<compile_context>
chip_gen: v6e
topology: v6e:2x2x1
jax: 0.10.0
libtpu: 0.0.40
codegen_flags: <defaults>
</compile_context>

<pallas_src>
import functools
import math

import jax
import jax.numpy as jnp
from jax.experimental import pallas as pl
from jax.experimental.pallas import tpu as pltpu

LN_EPS = 1e-5   # nn.LayerNorm default
BN_EPS = 1e-5   # nn.BatchNorm2d default


# ---------------------------------------------------------------------------
# Kernels
# ---------------------------------------------------------------------------
def _pos_enc_kernel(x_ref, hpe_ref, wpe_ref, w0_ref, b0_ref,
                    w1h_ref, b1h_ref, w1w_ref, b1w_ref, o_ref):
    """Adaptive 2D positional encoding for one batch item.

    x_ref: (1, HW, C).  hpe/wpe are the sinusoidal tables pre-expanded to
    (HW, C) rows (row s -> h_table[s // W] / w_table[s % W]).
    """
    x = x_ref[0]                                            # (HW, C) f32
    pooled = jnp.mean(x, axis=0, keepdims=True)             # global average pool (1, C)
    h = jnp.dot(pooled, w0_ref[...],
                preferred_element_type=jnp.float32) + b0_ref[...]
    h = jnp.maximum(h, 0.0)                                 # (1, C//2)
    zh = jnp.dot(h, w1h_ref[...],
                 preferred_element_type=jnp.float32) + b1h_ref[...]
    zw = jnp.dot(h, w1w_ref[...],
                 preferred_element_type=jnp.float32) + b1w_ref[...]
    alpha_h = 1.0 / (1.0 + jnp.exp(-zh))                    # sigmoid gates (1, C)
    alpha_w = 1.0 / (1.0 + jnp.exp(-zw))
    o_ref[0] = x + hpe_ref[...] * alpha_h + wpe_ref[...] * alpha_w


def _attn_ln_kernel(x_ref, gamma_ref, beta_ref,
                    wq_ref, bq_ref, wk_ref, bk_ref, wv_ref, bv_ref,
                    wo_ref, bo_ref, o_ref, *, head_num, inv_temperature):
    """Fused LN -> multi-head self-attention -> residual -> LN, one batch item.

    The SAME gamma/beta are used for both LayerNorms (the PyTorch EncoderLayer
    reuses one nn.LayerNorm instance).  Projection weights arrive pre-split per
    head along a leading dim, so there is no lane slicing, no transpose and no
    concatenation in the head loop; the output projection is accumulated.
    """
    x = x_ref[0]                                            # (T, C) f32
    T, C = x.shape
    gamma = gamma_ref[...]
    beta = beta_ref[...]

    # LayerNorm on the attention input (f32 elementwise).
    mu = jnp.mean(x, axis=-1, keepdims=True)
    var = jnp.mean((x - mu) ** 2, axis=-1, keepdims=True)
    xn = ((x - mu) * jax.lax.rsqrt(var + LN_EPS)) * gamma + beta
    xn_b = xn.astype(jnp.bfloat16)                          # bf16 MXU operand

    acc = jnp.zeros((T, C), jnp.float32)
    for h in range(head_num):                               # static unroll (small H)
        q = jnp.dot(xn_b, wq_ref[h], preferred_element_type=jnp.float32) + bq_ref[h]
        k = jnp.dot(xn_b, wk_ref[h], preferred_element_type=jnp.float32) + bk_ref[h]
        v = jnp.dot(xn_b, wv_ref[h], preferred_element_type=jnp.float32) + bv_ref[h]
        # scores: contract the last dims directly (no explicit K transpose).
        s = jax.lax.dot_general(q.astype(jnp.bfloat16), k.astype(jnp.bfloat16),
                                (((1,), (1,)), ((), ())),
                                preferred_element_type=jnp.float32)
        s = s * inv_temperature                             # multiply, not divide
        s = s - jnp.max(s, axis=-1, keepdims=True)          # stable softmax
        p = jnp.exp(s)
        denom = jnp.sum(p, axis=-1, keepdims=True)          # (T, 1)
        ctx = jnp.dot(p.astype(jnp.bfloat16), v.astype(jnp.bfloat16),
                      preferred_element_type=jnp.float32)   # (T, hd)
        # normalize the small (T,hd) context instead of the (T,T) probs; EUP recip.
        ctx = ctx * pl.reciprocal(denom, approx=True)
        acc = acc + jnp.dot(ctx.astype(jnp.bfloat16), wo_ref[h],
                            preferred_element_type=jnp.float32)   # (T, C)
    attn_out = acc + bo_ref[...]

    # residual with the PRE-norm input, then the shared LayerNorm again.
    res = attn_out + x
    mu2 = jnp.mean(res, axis=-1, keepdims=True)
    var2 = jnp.mean((res - mu2) ** 2, axis=-1, keepdims=True)
    o_ref[0] = ((res - mu2) * jax.lax.rsqrt(var2 + LN_EPS)) * gamma + beta


def _conv_ffn_kernel(x_ref, feat_ref,
                     w0_ref, bn0_s_ref, bn0_b_ref,
                     dw_ref, dwb_ref, bnd_s_ref, bnd_b_ref,
                     w1_ref, bn1_s_ref, bn1_b_ref,
                     o_ref, pad_ref, *, H, W):
    """Fused conv0(1x1)+BN+ReLU -> depthwise3x3+BN+ReLU -> conv1(1x1)+BN+ReLU
    -> +features, one batch item, channel-last (H, W, C) layout."""
    x = x_ref[0]                                            # (H, W, C) f32
    C = x.shape[-1]
    Fs = w0_ref.shape[-1]
    HW = H * W

    # conv0: 1x1 pointwise == channel matmul (bf16 operands, f32 accum).
    h0 = jnp.dot(x.reshape(HW, C).astype(jnp.bfloat16), w0_ref[...],
                 preferred_element_type=jnp.float32)
    h0 = jnp.maximum(h0 * bn0_s_ref[...] + bn0_b_ref[...], 0.0)   # (HW, Fs)
    h0 = h0.reshape(H, W, Fs)

    # depthwise 3x3, padding=1: zero-padded VMEM scratch + 9 shifted taps,
    # tap weights (1, Fs) broadcast along the lane (channel) dim.
    pad_ref[...] = jnp.zeros_like(pad_ref)
    pad_ref[1:H + 1, 1:W + 1, :] = h0
    acc = jnp.zeros((H, W, Fs), jnp.float32)
    for dy in range(3):
        for dx in range(3):
            acc = acc + pad_ref[dy:dy + H, dx:dx + W, :] * dw_ref[dy * 3 + dx]
    acc = acc + dwb_ref[...]                                 # depthwise bias
    hmid = jnp.maximum(acc * bnd_s_ref[...] + bnd_b_ref[...], 0.0)   # (H, W, Fs)

    # conv1: 1x1 pointwise back to C channels.
    y = jnp.dot(hmid.reshape(HW, Fs).astype(jnp.bfloat16), w1_ref[...],
                preferred_element_type=jnp.float32)
    y = jnp.maximum(y * bn1_s_ref[...] + bn1_b_ref[...], 0.0)        # (HW, C)

    o_ref[0] = y.reshape(H, W, C) + feat_ref[0]              # spatial residual


# ---------------------------------------------------------------------------
# pallas_call wrappers
# ---------------------------------------------------------------------------
def _full_spec(arr):
    """Whole-array weight block, resident across the batch grid."""
    if arr.ndim == 2:
        return pl.BlockSpec(arr.shape, lambda b: (0, 0))
    if arr.ndim == 3:
        return pl.BlockSpec(arr.shape, lambda b: (0, 0, 0))
    raise ValueError(f"unsupported weight rank: {arr.shape}")


def positional_encoding_block(x_seq, p):
    B, T, C = x_seq.shape
    weights = (p["h_table"], p["w_table"], p["w0"], p["b0"],
               p["w1h"], p["b1h"], p["w1w"], p["b1w"])
    return pl.pallas_call(
        _pos_enc_kernel,
        out_shape=jax.ShapeDtypeStruct((B, T, C), jnp.float32),
        grid_spec=pltpu.PrefetchScalarGridSpec(
            num_scalar_prefetch=0,
            grid=(B,),
            in_specs=[pl.BlockSpec((1, T, C), lambda b: (b, 0, 0))]
                     + [_full_spec(w) for w in weights],
            out_specs=pl.BlockSpec((1, T, C), lambda b: (b, 0, 0)),
        ),
        compiler_params=pltpu.CompilerParams(dimension_semantics=("parallel",)),
    )(x_seq, *weights)


def attention_block(x_seq, p, head_num):
    B, T, C = x_seq.shape
    head_dim = p["wq"].shape[-1]
    inv_temp = 1.0 / math.sqrt(head_num * head_dim)          # temperature = sqrt(H*hd)
    kernel = functools.partial(_attn_ln_kernel, head_num=head_num,
                               inv_temperature=inv_temp)
    weights = (p["ln_gamma"], p["ln_beta"],
               p["wq"], p["bq"], p["wk"], p["bk"], p["wv"], p["bv"],
               p["wo"], p["bo"])
    return pl.pallas_call(
        kernel,
        out_shape=jax.ShapeDtypeStruct((B, T, C), jnp.float32),
        grid_spec=pltpu.PrefetchScalarGridSpec(
            num_scalar_prefetch=0,
            grid=(B,),
            in_specs=[pl.BlockSpec((1, T, C), lambda b: (b, 0, 0))]
                     + [_full_spec(w) for w in weights],
            out_specs=pl.BlockSpec((1, T, C), lambda b: (b, 0, 0)),
        ),
        compiler_params=pltpu.CompilerParams(dimension_semantics=("parallel",)),
    )(x_seq, *weights)


def conv_ffn_block(x_cl, feat_cl, p):
    B, H, W, C = x_cl.shape
    Fs = p["w0"].shape[-1]
    kernel = functools.partial(_conv_ffn_kernel, H=H, W=W)
    weights = (p["w0"], p["bn0_s"], p["bn0_b"],
               p["dw"], p["dwb"], p["bnd_s"], p["bnd_b"],
               p["w1"], p["bn1_s"], p["bn1_b"])
    return pl.pallas_call(
        kernel,
        out_shape=jax.ShapeDtypeStruct((B, H, W, C), jnp.float32),
        grid_spec=pltpu.PrefetchScalarGridSpec(
            num_scalar_prefetch=0,
            grid=(B,),
            in_specs=[pl.BlockSpec((1, H, W, C), lambda b: (b, 0, 0, 0)),
                      pl.BlockSpec((1, H, W, C), lambda b: (b, 0, 0, 0))]
                     + [_full_spec(w) for w in weights],
            out_specs=pl.BlockSpec((1, H, W, C), lambda b: (b, 0, 0, 0)),
            scratch_shapes=[pltpu.VMEM((H + 2, W + 2, Fs), jnp.float32)],
        ),
        compiler_params=pltpu.CompilerParams(dimension_semantics=("parallel",)),
    )(x_cl, feat_cl, *weights)


def encoder_layer_forward(x_seq, p, head_num, H, W):
    """One EncoderLayer.  x_seq: (B, HW, C) sequence view of the feature map."""
    B, T, C = x_seq.shape
    attn_out = attention_block(x_seq, p, head_num)                  # (B, HW, C)
    # Faithful to the PyTorch module: `x.reshape(-1, c, h, w)` on a (B, HW, C)
    # tensor is a raw memory reinterpretation (NOT a transpose back); we then
    # move to channel-last for the conv kernel.
    conv_in = jnp.transpose(attn_out.reshape(B, C, H, W), (0, 2, 3, 1))
    feat_cl = x_seq.reshape(B, H, W, C)                             # original features
    out_cl = conv_ffn_block(conv_in, feat_cl, p)                    # (B, H, W, C)
    return out_cl.reshape(B, T, C)


def satrn_encoder_forward(features_cf, params, head_num):
    """features_cf: (B, hidden, H, W) CNN feature map (PyTorch channel-first)."""
    B, C, H, W = features_cf.shape
    # channel-last sequence view == x.view(b, c, h*w).transpose(1, 2)
    x = jnp.transpose(features_cf, (0, 2, 3, 1)).reshape(B, H * W, C)
    x = positional_encoding_block(x, params["pos_enc"])
    for layer_p in params["layers"]:
        x = encoder_layer_forward(x, layer_p, head_num, H, W)
    return x                                                        # (B, H*W, C)


# ---------------------------------------------------------------------------
# Deterministic parameter construction (PyTorch-equivalent shapes, eval mode)
# ---------------------------------------------------------------------------
def make_params(key, hidden, filter_size, head_num, layer_num, H, W):
    head_dim = hidden // head_num
    d_model = head_num * head_dim
    keys = iter(jax.random.split(key, 2 + 7 * layer_num))

    def xavier(k, fan_in, fan_out, shape=None):
        std = math.sqrt(2.0 / (fan_in + fan_out))
        return jax.random.normal(k, shape if shape is not None else (fan_in, fan_out),
                                 jnp.float32) * std

    def bn_fold(n):
        # eval-mode BatchNorm2d (gamma=1, beta=0, running_mean=0, running_var=1)
        scale = jnp.full((1, n), 1.0 / math.sqrt(1.0 + BN_EPS), jnp.float32)
        bias = jnp.zeros((1, n), jnp.float32)
        return scale, bias

    def sinusoid(length, hs):
        pos = jnp.arange(length, dtype=jnp.float32)[:, None]
        n_ts = hs // 2
        log_inc = math.log(10000.0) / (n_ts - 1)
        inv_ts = jnp.exp(jnp.arange(n_ts, dtype=jnp.float32) * -log_inc)[None, :]
        scaled = pos * inv_ts
        return jnp.concatenate([jnp.sin(scaled), jnp.cos(scaled)], axis=1)  # (length, hs)

    h_tab = sinusoid(H, hidden)                       # (H, hidden)
    w_tab = sinusoid(W, hidden)                       # (W, hidden)
    w1_full = xavier(next(keys), hidden // 2, hidden * 2)
    pos_enc = {
        "h_table": jnp.repeat(h_tab, W, axis=0),      # (HW, hidden): row s -> h_tab[s // W]
        "w_table": jnp.tile(w_tab, (H, 1)),           # (HW, hidden): row s -> w_tab[s % W]
        "w0": xavier(next(keys), hidden, hidden // 2),
        "b0": jnp.zeros((1, hidden // 2), jnp.float32),
        "w1h": w1_full[:, :hidden], "b1h": jnp.zeros((1, hidden), jnp.float32),
        "w1w": w1_full[:, hidden:], "b1w": jnp.zeros((1, hidden), jnp.float32),
    }

    def split_heads_in(w):   # (hidden, d_model) -> (head_num, hidden, head_dim) bf16
        return jnp.transpose(w.reshape(hidden, head_num, head_dim),
                             (1, 0, 2)).astype(jnp.bfloat16)

    layers = []
    for _ in range(layer_num):
        wq = xavier(next(keys), hidden, d_model)
        wk = xavier(next(keys), hidden, d_model)
        wv = xavier(next(keys), hidden, d_model)
        wo = xavier(next(keys), d_model, hidden)
        bn0_s, bn0_b = bn_fold(filter_size)
        bnd_s, bnd_b = bn_fold(filter_size)
        bn1_s, bn1_b = bn_fold(hidden)
        layers.append({
            "ln_gamma": jnp.ones((1, hidden), jnp.float32),
            "ln_beta": jnp.zeros((1, hidden), jnp.float32),
            "wq": split_heads_in(wq), "bq": jnp.zeros((head_num, 1, head_dim), jnp.float32),
            "wk": split_heads_in(wk), "bk": jnp.zeros((head_num, 1, head_dim), jnp.float32),
            "wv": split_heads_in(wv), "bv": jnp.zeros((head_num, 1, head_dim), jnp.float32),
            "wo": wo.reshape(head_num, head_dim, hidden).astype(jnp.bfloat16),
            "bo": jnp.zeros((1, hidden), jnp.float32),
            "w0": xavier(next(keys), hidden, filter_size).astype(jnp.bfloat16),
            "bn0_s": bn0_s, "bn0_b": bn0_b,
            "dw": xavier(next(keys), 9, 9, shape=(3, 3, filter_size)).reshape(9, 1, filter_size),
            "dwb": jnp.zeros((1, filter_size), jnp.float32),
            "bnd_s": bnd_s, "bnd_b": bnd_b,
            "w1": xavier(next(keys), filter_size, hidden).astype(jnp.bfloat16),
            "bn1_s": bn1_s, "bn1_b": bn1_b,
        })
    return {"pos_enc": pos_enc, "layers": layers}


# ---------------------------------------------------------------------------
if __name__ == "__main__":
    B, hidden, filter_size, head_num, layer_num = 2, 32, 64, 4, 2
    H, W = 8, 16        # feature-map size (e.g. 256x512 input image, /32)
    assert hidden % head_num == 0

    key = jax.random.PRNGKey(0)
    k_feat, k_par = jax.random.split(key)

    # TODO(synk): EfficientNet backbone (timm pretrained) is not translated;
    #             start from its (B, hidden, H, W) feature map.
    feats = jax.random.normal(k_feat, (B, hidden, H, W), jnp.float32)
    params = make_params(k_par, hidden, filter_size, head_num, layer_num, H, W)

    fwd = jax.jit(satrn_encoder_forward, static_argnums=(2,))
    out = fwd(feats, params, head_num)
    out = jax.block_until_ready(out)

    assert out.shape == (B, H * W, hidden)
    assert bool(jnp.all(jnp.isfinite(out)))
    print("KERNEL_OK")
</pallas_src>

<mosaic_0001>
module attributes {stable_mosaic.version = 11 : i64} {
  func.func @_pos_enc_kernel(%arg0: i32, %arg1: memref<1x128x32xf32, #tpu.memory_space<vmem>>, %arg2: memref<128x32xf32, #tpu.memory_space<vmem>>, %arg3: memref<128x32xf32, #tpu.memory_space<vmem>>, %arg4: memref<32x16xf32, #tpu.memory_space<vmem>>, %arg5: memref<1x16xf32, #tpu.memory_space<vmem>>, %arg6: memref<16x32xf32, #tpu.memory_space<vmem>>, %arg7: memref<1x32xf32, #tpu.memory_space<vmem>>, %arg8: memref<16x32xf32, #tpu.memory_space<vmem>>, %arg9: memref<1x32xf32, #tpu.memory_space<vmem>>, %arg10: memref<1x128x32xf32, #tpu.memory_space<vmem>>) attributes {dimension_semantics = [#tpu.dimension_semantics<parallel>], iteration_bounds = array<i64: 2>, scalar_prefetch = 0 : i64, scratch_operands = 0 : i64, tpu.core_type = #tpu.core_type<tc>, window_params = [{transform_indices = @transform_0, window_bounds = array<i64: 1, 128, 32>}, {pipeline_mode = #tpu.pipeline_mode<synchronous>, transform_indices = @transform_1, window_bounds = array<i64: 128, 32>}, {pipeline_mode = #tpu.pipeline_mode<synchronous>, transform_indices = @transform_2, window_bounds = array<i64: 128, 32>}, {pipeline_mode = #tpu.pipeline_mode<synchronous>, transform_indices = @transform_3, window_bounds = array<i64: 32, 16>}, {pipeline_mode = #tpu.pipeline_mode<synchronous>, transform_indices = @transform_4, window_bounds = array<i64: 1, 16>}, {pipeline_mode = #tpu.pipeline_mode<synchronous>, transform_indices = @transform_5, window_bounds = array<i64: 16, 32>}, {pipeline_mode = #tpu.pipeline_mode<synchronous>, transform_indices = @transform_6, window_bounds = array<i64: 1, 32>}, {pipeline_mode = #tpu.pipeline_mode<synchronous>, transform_indices = @transform_7, window_bounds = array<i64: 16, 32>}, {pipeline_mode = #tpu.pipeline_mode<synchronous>, transform_indices = @transform_8, window_bounds = array<i64: 1, 32>}, {transform_indices = @transform_9, window_bounds = array<i64: 1, 128, 32>}]} {
    %c0 = arith.constant 0 : index
    %c0_0 = arith.constant 0 : index
    %c0_1 = arith.constant 0 : index
    %0 = vector.load %arg1[%c0, %c0_0, %c0_1] : memref<1x128x32xf32, #tpu.memory_space<vmem>>, vector<1x128x32xf32>
    %1 = vector.shape_cast %0 : vector<1x128x32xf32> to vector<128x32xf32>
    %cst = arith.constant dense<0.000000e+00> : vector<32xf32>
    %2 = vector.multi_reduction <add>, %1, %cst [0] : vector<128x32xf32> to vector<32xf32>
    %3 = vector.shape_cast %2 : vector<32xf32> to vector<1x32xf32>
    %cst_2 = arith.constant 1.280000e+02 : f32
    %4 = vector.broadcast %cst_2 : f32 to vector<1x32xf32>
    %5 = arith.divf %3, %4 : vector<1x32xf32>
    %c0_3 = arith.constant 0 : index
    %c0_4 = arith.constant 0 : index
    %6 = vector.load %arg4[%c0_3, %c0_4] : memref<32x16xf32, #tpu.memory_space<vmem>>, vector<32x16xf32>
    %cst_5 = arith.constant dense<0.000000e+00> : vector<1x16xf32>
    %7 = tpu.matmul %5, %6, %cst_5 {dimension_numbers = #tpu.dot_dimension_numbers<[1], [0], [0], [1], [0, 0, 1, 1], [], []>} : vector<1x32xf32>, vector<32x16xf32>, vector<1x16xf32> -> vector<1x16xf32>
    %c0_6 = arith.constant 0 : index
    %c0_7 = arith.constant 0 : index
    %8 = vector.load %arg5[%c0_6, %c0_7] : memref<1x16xf32, #tpu.memory_space<vmem>>, vector<1x16xf32>
    %9 = arith.addf %7, %8 : vector<1x16xf32>
    %cst_8 = arith.constant 0.000000e+00 : f32
    %10 = vector.broadcast %cst_8 : f32 to vector<1x16xf32>
    %11 = arith.maximumf %9, %10 : vector<1x16xf32>
    %c0_9 = arith.constant 0 : index
    %c0_10 = arith.constant 0 : index
    %12 = vector.load %arg6[%c0_9, %c0_10] : memref<16x32xf32, #tpu.memory_space<vmem>>, vector<16x32xf32>
    %cst_11 = arith.constant dense<0.000000e+00> : vector<1x32xf32>
    %13 = tpu.matmul %11, %12, %cst_11 {dimension_numbers = #tpu.dot_dimension_numbers<[1], [0], [0], [1], [0, 0, 1, 1], [], []>} : vector<1x16xf32>, vector<16x32xf32>, vector<1x32xf32> -> vector<1x32xf32>
    %c0_12 = arith.constant 0 : index
    %c0_13 = arith.constant 0 : index
    %14 = vector.load %arg7[%c0_12, %c0_13] : memref<1x32xf32, #tpu.memory_space<vmem>>, vector<1x32xf32>
    %15 = arith.addf %13, %14 : vector<1x32xf32>
    %c0_14 = arith.constant 0 : index
    %c0_15 = arith.constant 0 : index
    %16 = vector.load %arg8[%c0_14, %c0_15] : memref<16x32xf32, #tpu.memory_space<vmem>>, vector<16x32xf32>
    %cst_16 = arith.constant dense<0.000000e+00> : vector<1x32xf32>
    %17 = tpu.matmul %11, %16, %cst_16 {dimension_numbers = #tpu.dot_dimension_numbers<[1], [0], [0], [1], [0, 0, 1, 1], [], []>} : vector<1x16xf32>, vector<16x32xf32>, vector<1x32xf32> -> vector<1x32xf32>
    %c0_17 = arith.constant 0 : index
    %c0_18 = arith.constant 0 : index
    %18 = vector.load %arg9[%c0_17, %c0_18] : memref<1x32xf32, #tpu.memory_space<vmem>>, vector<1x32xf32>
    %19 = arith.addf %17, %18 : vector<1x32xf32>
    %cst_19 = arith.constant 0.000000e+00 : f32
    %20 = vector.broadcast %cst_19 : f32 to vector<1x32xf32>
    %21 = arith.subf %20, %15 : vector<1x32xf32>
    %22 = math.exp %21 : vector<1x32xf32>
    %cst_20 = arith.constant 1.000000e+00 : f32
    %23 = vector.broadcast %cst_20 : f32 to vector<1x32xf32>
    %24 = arith.addf %23, %22 : vector<1x32xf32>
    %cst_21 = arith.constant 1.000000e+00 : f32
    %25 = vector.broadcast %cst_21 : f32 to vector<1x32xf32>
    %26 = arith.divf %25, %24 : vector<1x32xf32>
    %cst_22 = arith.constant 0.000000e+00 : f32
    %27 = vector.broadcast %cst_22 : f32 to vector<1x32xf32>
    %28 = arith.subf %27, %19 : vector<1x32xf32>
    %29 = math.exp %28 : vector<1x32xf32>
    %cst_23 = arith.constant 1.000000e+00 : f32
    %30 = vector.broadcast %cst_23 : f32 to vector<1x32xf32>
    %31 = arith.addf %30, %29 : vector<1x32xf32>
    %cst_24 = arith.constant 1.000000e+00 : f32
    %32 = vector.broadcast %cst_24 : f32 to vector<1x32xf32>
    %33 = arith.divf %32, %31 : vector<1x32xf32>
    %c0_25 = arith.constant 0 : index
    %c0_26 = arith.constant 0 : index
    %34 = vector.load %arg2[%c0_25, %c0_26] : memref<128x32xf32, #tpu.memory_space<vmem>>, vector<128x32xf32>
    %35 = vector.broadcast %26 : vector<1x32xf32> to vector<128x32xf32>
    %36 = arith.mulf %34, %35 : vector<128x32xf32>
    %37 = arith.addf %1, %36 : vector<128x32xf32>
    %c0_27 = arith.constant 0 : index
    %c0_28 = arith.constant 0 : index
    %38 = vector.load %arg3[%c0_27, %c0_28] : memref<128x32xf32, #tpu.memory_space<vmem>>, vector<128x32xf32>
    %39 = vector.broadcast %33 : vector<1x32xf32> to vector<128x32xf32>
    %40 = arith.mulf %38, %39 : vector<128x32xf32>
    %41 = arith.addf %37, %40 : vector<128x32xf32>
    %c0_29 = arith.constant 0 : index
    %c0_30 = arith.constant 0 : index
    %c0_31 = arith.constant 0 : index
    %42 = vector.load %arg10[%c0_29, %c0_30, %c0_31] : memref<1x128x32xf32, #tpu.memory_space<vmem>>, vector<1x128x32xf32>
    %43 = vector.shape_cast %42 : vector<1x128x32xf32> to vector<128x32xf32>
    %44 = vector.shape_cast %41 : vector<128x32xf32> to vector<1x128x32xf32>
    tpu.vector_store %arg10[%c0_29, %c0_30, %c0_31], %44 {strides = array<i32>} : memref<1x128x32xf32, #tpu.memory_space<vmem>>, vector<1x128x32xf32>,
    return
  }
  func.func @transform_0(%arg0: i32) -> (i32, i32, i32) {
    %c0_i32 = arith.constant 0 : i32
    %c0_i32_0 = arith.constant 0 : i32
    %c0_i32_1 = arith.constant 0 : i32
    return %arg0, %c0_i32, %c0_i32_0 : i32, i32, i32
  }
  func.func @transform_1(%arg0: i32) -> (i32, i32) {
    %c0_i32 = arith.constant 0 : i32
    %c0_i32_0 = arith.constant 0 : i32
    %c0_i32_1 = arith.constant 0 : i32
    return %c0_i32, %c0_i32_0 : i32, i32
  }
  func.func @transform_2(%arg0: i32) -> (i32, i32) {
    %c0_i32 = arith.constant 0 : i32
    %c0_i32_0 = arith.constant 0 : i32
    %c0_i32_1 = arith.constant 0 : i32
    return %c0_i32, %c0_i32_0 : i32, i32
  }
  func.func @transform_3(%arg0: i32) -> (i32, i32) {
    %c0_i32 = arith.constant 0 : i32
    %c0_i32_0 = arith.constant 0 : i32
    %c0_i32_1 = arith.constant 0 : i32
    return %c0_i32, %c0_i32_0 : i32, i32
  }
  func.func @transform_4(%arg0: i32) -> (i32, i32) {
    %c0_i32 = arith.constant 0 : i32
    %c0_i32_0 = arith.constant 0 : i32
    %c0_i32_1 = arith.constant 0 : i32
    return %c0_i32, %c0_i32_0 : i32, i32
  }
  func.func @transform_5(%arg0: i32) -> (i32, i32) {
    %c0_i32 = arith.constant 0 : i32
    %c0_i32_0 = arith.constant 0 : i32
    %c0_i32_1 = arith.constant 0 : i32
    return %c0_i32, %c0_i32_0 : i32, i32
  }
  func.func @transform_6(%arg0: i32) -> (i32, i32) {
    %c0_i32 = arith.constant 0 : i32
    %c0_i32_0 = arith.constant 0 : i32
    %c0_i32_1 = arith.constant 0 : i32
    return %c0_i32, %c0_i32_0 : i32, i32
  }
  func.func @transform_7(%arg0: i32) -> (i32, i32) {
    %c0_i32 = arith.constant 0 : i32
    %c0_i32_0 = arith.constant 0 : i32
    %c0_i32_1 = arith.constant 0 : i32
    return %c0_i32, %c0_i32_0 : i32, i32
  }
  func.func @transform_8(%arg0: i32) -> (i32, i32) {
    %c0_i32 = arith.constant 0 : i32
    %c0_i32_0 = arith.constant 0 : i32
    %c0_i32_1 = arith.constant 0 : i32
    return %c0_i32, %c0_i32_0 : i32, i32
  }
  func.func @transform_9(%arg0: i32) -> (i32, i32, i32) {
    %c0_i32 = arith.constant 0 : i32
    %c0_i32_0 = arith.constant 0 : i32
    %c0_i32_1 = arith.constant 0 : i32
    return %arg0, %c0_i32, %c0_i32_0 : i32, i32, i32
  }
}

module attributes {stable_mosaic.version = 11 : i64} {
  func.func @_attn_ln_kernel(%arg0: i32, %arg1: memref<1x128x32xf32, #tpu.memory_space<vmem>>, %arg2: memref<1x32xf32, #tpu.memory_space<vmem>>, %arg3: memref<1x32xf32, #tpu.memory_space<vmem>>, %arg4: memref<4x32x8xbf16, #tpu.memory_space<vmem>>, %arg5: memref<4x1x8xf32, #tpu.memory_space<vmem>>, %arg6: memref<4x32x8xbf16, #tpu.memory_space<vmem>>, %arg7: memref<4x1x8xf32, #tpu.memory_space<vmem>>, %arg8: memref<4x32x8xbf16, #tpu.memory_space<vmem>>, %arg9: memref<4x1x8xf32, #tpu.memory_space<vmem>>, %arg10: memref<4x8x32xbf16, #tpu.memory_space<vmem>>, %arg11: memref<1x32xf32, #tpu.memory_space<vmem>>, %arg12: memref<1x128x32xf32, #tpu.memory_space<vmem>>) attributes {dimension_semantics = [#tpu.dimension_semantics<parallel>], iteration_bounds = array<i64: 2>, scalar_prefetch = 0 : i64, scratch_operands = 0 : i64, tpu.core_type = #tpu.core_type<tc>, window_params = [{transform_indices = @transform_0, window_bounds = array<i64: 1, 128, 32>}, {pipeline_mode = #tpu.pipeline_mode<synchronous>, transform_indices = @transform_1, window_bounds = array<i64: 1, 32>}, {pipeline_mode = #tpu.pipeline_mode<synchronous>, transform_indices = @transform_2, window_bounds = array<i64: 1, 32>}, {pipeline_mode = #tpu.pipeline_mode<synchronous>, transform_indices = @transform_3, window_bounds = array<i64: 4, 32, 8>}, {pipeline_mode = #tpu.pipeline_mode<synchronous>, transform_indices = @transform_4, window_bounds = array<i64: 4, 1, 8>}, {pipeline_mode = #tpu.pipeline_mode<synchronous>, transform_indices = @transform_5, window_bounds = array<i64: 4, 32, 8>}, {pipeline_mode = #tpu.pipeline_mode<synchronous>, transform_indices = @transform_6, window_bounds = array<i64: 4, 1, 8>}, {pipeline_mode = #tpu.pipeline_mode<synchronous>, transform_indices = @transform_7, window_bounds = array<i64: 4, 32, 8>}, {pipeline_mode = #tpu.pipeline_mode<synchronous>, transform_indices = @transform_8, window_bounds = array<i64: 4, 1, 8>}, {pipeline_mode = #tpu.pipeline_mode<synchronous>, transform_indices = @transform_9, window_bounds = array<i64: 4, 8, 32>}, {pipeline_mode = #tpu.pipeline_mode<synchronous>, transform_indices = @transform_10, window_bounds = array<i64: 1, 32>}, {transform_indices = @transform_11, window_bounds = array<i64: 1, 128, 32>}]} {
    %c0 = arith.constant 0 : index
    %c0_0 = arith.constant 0 : index
    %c0_1 = arith.constant 0 : index
    %0 = vector.load %arg1[%c0, %c0_0, %c0_1] : memref<1x128x32xf32, #tpu.memory_space<vmem>>, vector<1x128x32xf32>
    %1 = vector.shape_cast %0 : vector<1x128x32xf32> to vector<128x32xf32>
    %c0_2 = arith.constant 0 : index
    %c0_3 = arith.constant 0 : index
    %2 = vector.load %arg2[%c0_2, %c0_3] : memref<1x32xf32, #tpu.memory_space<vmem>>, vector<1x32xf32>
    %c0_4 = arith.constant 0 : index
    %c0_5 = arith.constant 0 : index
    %3 = vector.load %arg3[%c0_4, %c0_5] : memref<1x32xf32, #tpu.memory_space<vmem>>, vector<1x32xf32>
    %cst = arith.constant dense<0.000000e+00> : vector<128xf32>
    %4 = vector.multi_reduction <add>, %1, %cst [1] : vector<128x32xf32> to vector<128xf32>
    %5 = vector.shape_cast %4 : vector<128xf32> to vector<128x1xf32>
    %cst_6 = arith.constant 3.200000e+01 : f32
    %6 = vector.broadcast %cst_6 : f32 to vector<128x1xf32>
    %7 = arith.divf %5, %6 : vector<128x1xf32>
    %8 = vector.broadcast %7 : vector<128x1xf32> to vector<128x32xf32>
    %9 = arith.subf %1, %8 : vector<128x32xf32>
    %10 = arith.mulf %9, %9 : vector<128x32xf32>
    %cst_7 = arith.constant dense<0.000000e+00> : vector<128xf32>
    %11 = vector.multi_reduction <add>, %10, %cst_7 [1] : vector<128x32xf32> to vector<128xf32>
    %12 = vector.shape_cast %11 : vector<128xf32> to vector<128x1xf32>
    %cst_8 = arith.constant 3.200000e+01 : f32
    %13 = vector.broadcast %cst_8 : f32 to vector<128x1xf32>
    %14 = arith.divf %12, %13 : vector<128x1xf32>
    %15 = vector.broadcast %7 : vector<128x1xf32> to vector<128x32xf32>
    %16 = arith.subf %1, %15 : vector<128x32xf32>
    %cst_9 = arith.constant 9.99999974E-6 : f32
    %17 = vector.broadcast %cst_9 : f32 to vector<128x1xf32>
    %18 = arith.addf %14, %17 : vector<128x1xf32>
    %19 = math.rsqrt %18 : vector<128x1xf32>
    %20 = vector.broadcast %19 : vector<128x1xf32> to vector<128x32xf32>
    %21 = arith.mulf %16, %20 : vector<128x32xf32>
    %22 = vector.broadcast %2 : vector<1x32xf32> to vector<128x32xf32>
    %23 = arith.mulf %21, %22 : vector<128x32xf32>
    %24 = vector.broadcast %3 : vector<1x32xf32> to vector<128x32xf32>
    %25 = arith.addf %23, %24 : vector<128x32xf32>
    %26 = arith.truncf %25 : vector<128x32xf32> to vector<128x32xbf16>
    %cst_10 = arith.constant 0.000000e+00 : f32
    %27 = vector.broadcast %cst_10 : f32 to vector<128x32xf32>
    %c0_11 = arith.constant 0 : index
    %c0_12 = arith.constant 0 : index
    %c0_13 = arith.constant 0 : index
    %28 = vector.load %arg4[%c0_11, %c0_12, %c0_13] : memref<4x32x8xbf16, #tpu.memory_space<vmem>>, vector<1x32x8xbf16>
    %29 = vector.shape_cast %28 : vector<1x32x8xbf16> to vector<32x8xbf16>
    %cst_14 = arith.constant dense<0.000000e+00> : vector<128x8xf32>
    %30 = tpu.matmul %26, %29, %cst_14 {dimension_numbers = #tpu.dot_dimension_numbers<[1], [0], [0], [1], [0, 0, 1, 1], [], []>} : vector<128x32xbf16>, vector<32x8xbf16>, vector<128x8xf32> -> vector<128x8xf32>
    %c0_15 = arith.constant 0 : index
    %c0_16 = arith.constant 0 : index
    %c0_17 = arith.constant 0 : index
    %31 = vector.load %arg5[%c0_15, %c0_16, %c0_17] : memref<4x1x8xf32, #tpu.memory_space<vmem>>, vector<1x1x8xf32>
    %32 = vector.shape_cast %31 : vector<1x1x8xf32> to vector<1x8xf32>
    %33 = vector.broadcast %32 : vector<1x8xf32> to vector<128x8xf32>
    %34 = arith.addf %30, %33 : vector<128x8xf32>
    %c0_18 = arith.constant 0 : index
    %c0_19 = arith.constant 0 : index
    %c0_20 = arith.constant 0 : index
    %35 = vector.load %arg6[%c0_18, %c0_19, %c0_20] : memref<4x32x8xbf16, #tpu.memory_space<vmem>>, vector<1x32x8xbf16>
    %36 = vector.shape_cast %35 : vector<1x32x8xbf16> to vector<32x8xbf16>
    %cst_21 = arith.constant dense<0.000000e+00> : vector<128x8xf32>
    %37 = tpu.matmul %26, %36, %cst_21 {dimension_numbers = #tpu.dot_dimension_numbers<[1], [0], [0], [1], [0, 0, 1, 1], [], []>} : vector<128x32xbf16>, vector<32x8xbf16>, vector<128x8xf32> -> vector<128x8xf32>
    %c0_22 = arith.constant 0 : index
    %c0_23 = arith.constant 0 : index
    %c0_24 = arith.constant 0 : index
    %38 = vector.load %arg7[%c0_22, %c0_23, %c0_24] : memref<4x1x8xf32, #tpu.memory_space<vmem>>, vector<1x1x8xf32>
    %39 = vector.shape_cast %38 : vector<1x1x8xf32> to vector<1x8xf32>
    %40 = vector.broadcast %39 : vector<1x8xf32> to vector<128x8xf32>
    %41 = arith.addf %37, %40 : vector<128x8xf32>
    %c0_25 = arith.constant 0 : index
    %c0_26 = arith.constant 0 : index
    %c0_27 = arith.constant 0 : index
    %42 = vector.load %arg8[%c0_25, %c0_26, %c0_27] : memref<4x32x8xbf16, #tpu.memory_space<vmem>>, vector<1x32x8xbf16>
    %43 = vector.shape_cast %42 : vector<1x32x8xbf16> to vector<32x8xbf16>
    %cst_28 = arith.constant dense<0.000000e+00> : vector<128x8xf32>
    %44 = tpu.matmul %26, %43, %cst_28 {dimension_numbers = #tpu.dot_dimension_numbers<[1], [0], [0], [1], [0, 0, 1, 1], [], []>} : vector<128x32xbf16>, vector<32x8xbf16>, vector<128x8xf32> -> vector<128x8xf32>
    %c0_29 = arith.constant 0 : index
    %c0_30 = arith.constant 0 : index
    %c0_31 = arith.constant 0 : index
    %45 = vector.load %arg9[%c0_29, %c0_30, %c0_31] : memref<4x1x8xf32, #tpu.memory_space<vmem>>, vector<1x1x8xf32>
    %46 = vector.shape_cast %45 : vector<1x1x8xf32> to vector<1x8xf32>
    %47 = vector.broadcast %46 : vector<1x8xf32> to vector<128x8xf32>
    %48 = arith.addf %44, %47 : vector<128x8xf32>
    %49 = arith.truncf %34 : vector<128x8xf32> to vector<128x8xbf16>
    %50 = arith.truncf %41 : vector<128x8xf32> to vector<128x8xbf16>
    %cst_32 = arith.constant dense<0.000000e+00> : vector<128x128xf32>
    %51 = tpu.matmul %49, %50, %cst_32 {dimension_numbers = #tpu.dot_dimension_numbers<[1], [1], [0], [0], [0, 0, 1, 0], [], []>} : vector<128x8xbf16>, vector<128x8xbf16>, vector<128x128xf32> -> vector<128x128xf32>
    %cst_33 = arith.constant 0.176776692 : f32
    %52 = vector.broadcast %cst_33 : f32 to vector<128x128xf32>
    %53 = arith.mulf %51, %52 : vector<128x128xf32>
    %cst_34 = arith.constant dense<0xFF800000> : vector<128xf32>
    %54 = vector.multi_reduction <maximumf>, %53, %cst_34 [1] : vector<128x128xf32> to vector<128xf32>
    %55 = vector.shape_cast %54 : vector<128xf32> to vector<128x1xf32>
    %56 = vector.broadcast %55 : vector<128x1xf32> to vector<128x128xf32>
    %57 = arith.subf %53, %56 : vector<128x128xf32>
    %58 = math.exp %57 : vector<128x128xf32>
    %cst_35 = arith.constant dense<0.000000e+00> : vector<128xf32>
    %59 = vector.multi_reduction <add>, %58, %cst_35 [1] : vector<128x128xf32> to vector<128xf32>
    %60 = vector.shape_cast %59 : vector<128xf32> to vector<128x1xf32>
    %61 = arith.truncf %58 : vector<128x128xf32> to vector<128x128xbf16>
    %62 = arith.truncf %48 : vector<128x8xf32> to vector<128x8xbf16>
    %cst_36 = arith.constant dense<0.000000e+00> : vector<128x8xf32>
    %63 = tpu.matmul %61, %62, %cst_36 {dimension_numbers = #tpu.dot_dimension_numbers<[1], [0], [0], [1], [0, 0, 1, 1], [], []>} : vector<128x128xbf16>, vector<128x8xbf16>, vector<128x8xf32> -> vector<128x8xf32>
    %64 = tpu.reciprocal %60 {approx = true} : vector<128x1xf32> -> vector<128x1xf32>
    %65 = vector.broadcast %64 : vector<128x1xf32> to vector<128x8xf32>
    %66 = arith.mulf %63, %65 : vector<128x8xf32>
    %67 = arith.truncf %66 : vector<128x8xf32> to vector<128x8xbf16>
    %c0_37 = arith.constant 0 : index
    %c0_38 = arith.constant 0 : index
    %c0_39 = arith.constant 0 : index
    %68 = vector.load %arg10[%c0_37, %c0_38, %c0_39] : memref<4x8x32xbf16, #tpu.memory_space<vmem>>, vector<1x8x32xbf16>
    %69 = vector.shape_cast %68 : vector<1x8x32xbf16> to vector<8x32xbf16>
    %cst_40 = arith.constant dense<0.000000e+00> : vector<128x32xf32>
    %70 = tpu.matmul %67, %69, %cst_40 {dimension_numbers = #tpu.dot_dimension_numbers<[1], [0], [0], [1], [0, 0, 1, 1], [], []>} : vector<128x8xbf16>, vector<8x32xbf16>, vector<128x32xf32> -> vector<128x32xf32>
    %71 = arith.addf %27, %70 : vector<128x32xf32>
    %c1 = arith.constant 1 : index
    %c0_41 = arith.constant 0 : index
    %c0_42 = arith.constant 0 : index
    %72 = vector.load %arg4[%c1, %c0_41, %c0_42] : memref<4x32x8xbf16, #tpu.memory_space<vmem>>, vector<1x32x8xbf16>
    %73 = vector.shape_cast %72 : vector<1x32x8xbf16> to vector<32x8xbf16>
    %cst_43 = arith.constant dense<0.000000e+00> : vector<128x8xf32>
    %74 = tpu.matmul %26, %73, %cst_43 {dimension_numbers = #tpu.dot_dimension_numbers<[1], [0], [0], [1], [0, 0, 1, 1], [], []>} : vector<128x32xbf16>, vector<32x8xbf16>, vector<128x8xf32> -> vector<128x8xf32>
    %c1_44 = arith.constant 1 : index
    %c0_45 = arith.constant 0 : index
    %c0_46 = arith.constant 0 : index
    %75 = vector.load %arg5[%c1_44, %c0_45, %c0_46] : memref<4x1x8xf32, #tpu.memory_space<vmem>>, vector<1x1x8xf32>
    %76 = vector.shape_cast %75 : vector<1x1x8xf32> to vector<1x8xf32>
    %77 = vector.broadcast %76 : vector<1x8xf32> to vector<128x8xf32>
    %78 = arith.addf %74, %77 : vector<128x8xf32>
    %c1_47 = arith.constant 1 : index
    %c0_48 = arith.constant 0 : index
    %c0_49 = arith.constant 0 : index
    %79 = vector.load %arg6[%c1_47, %c0_48, %c0_49] : memref<4x32x8xbf16, #tpu.memory_space<vmem>>, vector<1x32x8xbf16>
    %80 = vector.shape_cast %79 : vector<1x32x8xbf16> to vector<32x8xbf16>
    %cst_50 = arith.constant dense<0.000000e+00> : vector<128x8xf32>
    %81 = tpu.matmul %26, %80, %cst_50 {dimension_numbers = #tpu.dot_dimension_numbers<[1], [0], [0], [1], [0, 0, 1, 1], [], []>} : vector<128x32xbf16>, vector<32x8xbf16>, vector<128x8xf32> -> vector<128x8xf32>
    %c1_51 = arith.constant 1 : index
    %c0_52 = arith.constant 0 : index
    %c0_53 = arith.constant 0 : index
    %82 = vector.load %arg7[%c1_51, %c0_52, %c0_53] : memref<4x1x8xf32, #tpu.memory_space<vmem>>, vector<1x1x8xf32>
    %83 = vector.shape_cast %82 : vector<1x1x8xf32> to vector<1x8xf32>
    %84 = vector.broadcast %83 : vector<1x8xf32> to vector<128x8xf32>
    %85 = arith.addf %81, %84 : vector<128x8xf32>
    %c1_54 = arith.constant 1 : index
    %c0_55 = arith.constant 0 : index
    %c0_56 = arith.constant 0 : index
    %86 = vector.load %arg8[%c1_54, %c0_55, %c0_56] : memref<4x32x8xbf16, #tpu.memory_space<vmem>>, vector<1x32x8xbf16>
    %87 = vector.shape_cast %86 : vector<1x32x8xbf16> to vector<32x8xbf16>
    %cst_57 = arith.constant dense<0.000000e+00> : vector<128x8xf32>
    %88 = tpu.matmul %26, %87, %cst_57 {dimension_numbers = #tpu.dot_dimension_numbers<[1], [0], [0], [1], [0, 0, 1, 1], [], []>} : vector<128x32xbf16>, vector<32x8xbf16>, vector<128x8xf32> -> vector<128x8xf32>
    %c1_58 = arith.constant 1 : index
    %c0_59 = arith.constant 0 : index
    %c0_60 = arith.constant 0 : index
    %89 = vector.load %arg9[%c1_58, %c0_59, %c0_60] : memref<4x1x8xf32, #tpu.memory_space<vmem>>, vector<1x1x8xf32>
    %90 = vector.shape_cast %89 : vector<1x1x8xf32> to vector<1x8xf32>
    %91 = vector.broadcast %90 : vector<1x8xf32> to vector<128x8xf32>
    %92 = arith.addf %88, %91 : vector<128x8xf32>
    %93 = arith.truncf %78 : vector<128x8xf32> to vector<128x8xbf16>
    %94 = arith.truncf %85 : vector<128x8xf32> to vector<128x8xbf16>
    %cst_61 = arith.constant dense<0.000000e+00> : vector<128x128xf32>
    %95 = tpu.matmul %93, %94, %cst_61 {dimension_numbers = #tpu.dot_dimension_numbers<[1], [1], [0], [0], [0, 0, 1, 0], [], []>} : vector<128x8xbf16>, vector<128x8xbf16>, vector<128x128xf32> -> vector<128x128xf32>
    %cst_62 = arith.constant 0.176776692 : f32
    %96 = vector.broadcast %cst_62 : f32 to vector<128x128xf32>
    %97 = arith.mulf %95, %96 : vector<128x128xf32>
    %cst_63 = arith.constant dense<0xFF800000> : vector<128xf32>
    %98 = vector.multi_reduction <maximumf>, %97, %cst_63 [1] : vector<128x128xf32> to vector<128xf32>
    %99 = vector.shape_cast %98 : vector<128xf32> to vector<128x1xf32>
    %100 = vector.broadcast %99 : vector<128x1xf32> to vector<128x128xf32>
    %101 = arith.subf %97, %100 : vector<128x128xf32>
    %102 = math.exp %101 : vector<128x128xf32>
    %cst_64 = arith.constant dense<0.000000e+00> : vector<128xf32>
    %103 = vector.multi_reduction <add>, %102, %cst_64 [1] : vector<128x128xf32> to vector<128xf32>
    %104 = vector.shape_cast %103 : vector<128xf32> to vector<128x1xf32>
    %105 = arith.truncf %102 : vector<128x128xf32> to vector<128x128xbf16>
    %106 = arith.truncf %92 : vector<128x8xf32> to vector<128x8xbf16>
    %cst_65 = arith.constant dense<0.000000e+00> : vector<128x8xf32>
    %107 = tpu.matmul %105, %106, %cst_65 {dimension_numbers = #tpu.dot_dimension_numbers<[1], [0], [0], [1], [0, 0, 1, 1], [], []>} : vector<128x128xbf16>, vector<128x8xbf16>, vector<128x8xf32> -> vector<128x8xf32>
    %108 = tpu.reciprocal %104 {approx = true} : vector<128x1xf32> -> vector<128x1xf32>
    %109 = vector.broadcast %108 : vector<128x1xf32> to vector<128x8xf32>
    %110 = arith.mulf %107, %109 : vector<128x8xf32>
    %111 = arith.truncf %110 : vector<128x8xf32> to vector<128x8xbf16>
    %c1_66 = arith.constant 1 : index
    %c0_67 = arith.constant 0 : index
    %c0_68 = arith.constant 0 : index
    %112 = vector.load %arg10[%c1_66, %c0_67, %c0_68] : memref<4x8x32xbf16, #tpu.memory_space<vmem>>, vector<1x8x32xbf16>
    %113 = vector.shape_cast %112 : vector<1x8x32xbf16> to vector<8x32xbf16>
    %cst_69 = arith.constant dense<0.000000e+00> : vector<128x32xf32>
    %114 = tpu.matmul %111, %113, %cst_69 {dimension_numbers = #tpu.dot_dimension_numbers<[1], [0], [0], [1], [0, 0, 1, 1], [], []>} : vector<128x8xbf16>, vector<8x32xbf16>, vector<128x32xf32> -> vector<128x32xf32>
    %115 = arith.addf %71, %114 : vector<128x32xf32>
    %c2 = arith.constant 2 : index
    %c0_70 = arith.constant 0 : index
    %c0_71 = arith.constant 0 : index
    %116 = vector.load %arg4[%c2, %c0_70, %c0_71] : memref<4x32x8xbf16, #tpu.memory_space<vmem>>, vector<1x32x8xbf16>
    %117 = vector.shape_cast %116 : vector<1x32x8xbf16> to vector<32x8xbf16>
    %cst_72 = arith.constant dense<0.000000e+00> : vector<128x8xf32>
    %118 = tpu.matmul %26, %117, %cst_72 {dimension_numbers = #tpu.dot_dimension_numbers<[1], [0], [0], [1], [0, 0, 1, 1], [], []>} : vector<128x32xbf16>, vector<32x8xbf16>, vector<128x8xf32> -> vector<128x8xf32>
    %c2_73 = arith.constant 2 : index
    %c0_74 = arith.constant 0 : index
    %c0_75 = arith.constant 0 : index
    %119 = vector.load %arg5[%c2_73, %c0_74, %c0_75] : memref<4x1x8xf32, #tpu.memory_space<vmem>>, vector<1x1x8xf32>
    %120 = vector.shape_cast %119 : vector<1x1x8xf32> to vector<1x8xf32>
    %121 = vector.broadcast %120 : vector<1x8xf32> to vector<128x8xf32>
    %122 = arith.addf %118, %121 : vector<128x8xf32>
    %c2_76 = arith.constant 2 : index
    %c0_77 = arith.constant 0 : index
    %c0_78 = arith.constant 0 : index
    %123 = vector.load %arg6[%c2_76, %c0_77, %c0_78] : memref<4x32x8xbf16, #tpu.memory_space<vmem>>, vector<1x32x8xbf16>
    %124 = vector.shape_cast %123 : vector<1x32x8xbf16> to vector<32x8xbf16>
    %cst_79 = arith.constant dense<0.000000e+00> : vector<128x8xf32>
    %125 = tpu.matmul %26, %124, %cst_79 {dimension_numbers = #tpu.dot_dimension_numbers<[1], [0], [0], [1], [0, 0, 1, 1], [], []>} : vector<128x32xbf16>, vector<32x8xbf16>, vector<128x8xf32> -> vector<128x8xf32>
    %c2_80 = arith.constant 2 : index
    %c0_81 = arith.constant 0 : index
    %c0_82 = arith.constant 0 : index
    %126 = vector.load %arg7[%c2_80, %c0_81, %c0_82] : memref<4x1x8xf32, #tpu.memory_space<vmem>>, vector<1x1x8xf32>
    %127 = vector.shape_cast %126 : vector<1x1x8xf32> to vector<1x8xf32>
    %128 = vector.broadcast %127 : vector<1x8xf32> to vector<128x8xf32>
    %129 = arith.addf %125, %128 : vector<128x8xf32>
    %c2_83 = arith.constant 2 : index
    %c0_84 = arith.constant 0 : index
    %c0_85 = arith.constant 0 : index
    %130 = vector.load %arg8[%c2_83, %c0_84, %c0_85] : memref<4x32x8xbf16, #tpu.memory_space<vmem>>, vector<1x32x8xbf16>
    %131 = vector.shape_cast %130 : vector<1x32x8xbf16> to vector<32x8xbf16>
    %cst_86 = arith.constant dense<0.000000e+00> : vector<128x8xf32>
    %132 = tpu.matmul %26, %131, %cst_86 {dimension_numbers = #tpu.dot_dimension_numbers<[1], [0], [0], [1], [0, 0, 1, 1], [], []>} : vector<128x32xbf16>, vector<32x8xbf16>, vector<128x8xf32> -> vector<128x8xf32>
    %c2_87 = arith.constant 2 : index
    %c0_88 = arith.constant 0 : index
    %c0_89 = arith.constant 0 : index
    %133 = vector.load %arg9[%c2_87, %c0_88, %c0_89] : memref<4x1x8xf32, #tpu.memory_space<vmem>>, vector<1x1x8xf32>
    %134 = vector.shape_cast %133 : vector<1x1x8xf32> to vector<1x8xf32>
    %135 = vector.broadcast %134 : vector<1x8xf32> to vector<128x8xf32>
    %136 = arith.addf %132, %135 : vector<128x8xf32>
    %137 = arith.truncf %122 : vector<128x8xf32> to vector<128x8xbf16>
    %138 = arith.truncf %129 : vector<128x8xf32> to vector<128x8xbf16>
    %cst_90 = arith.constant dense<0.000000e+00> : vector<128x128xf32>
    %139 = tpu.matmul %137, %138, %cst_90 {dimension_numbers = #tpu.dot_dimension_numbers<[1], [1], [0], [0], [0, 0, 1, 0], [], []>} : vector<128x8xbf16>, vector<128x8xbf16>, vector<128x128xf32> -> vector<128x128xf32>
    %cst_91 = arith.constant 0.176776692 : f32
    %140 = vector.broadcast %cst_91 : f32 to vector<128x128xf32>
    %141 = arith.mulf %139, %140 : vector<128x128xf32>
    %cst_92 = arith.constant dense<0xFF800000> : vector<128xf32>
    %142 = vector.multi_reduction <maximumf>, %141, %cst_92 [1] : vector<128x128xf32> to vector<128xf32>
    %143 = vector.shape_cast %142 : vector<128xf32> to vector<128x1xf32>
    %144 = vector.broadcast %143 : vector<128x1xf32> to vector<128x128xf32>
    %145 = arith.subf %141, %144 : vector<128x128xf32>
    %146 = math.exp %145 : vector<128x128xf32>
    %cst_93 = arith.constant dense<0.000000e+00> : vector<128xf32>
    %147 = vector.multi_reduction <add>, %146, %cst_93 [1] : vector<128x128xf32> to vector<128xf32>
    %148 = vector.shape_cast %147 : vector<128xf32> to vector<128x1xf32>
    %149 = arith.truncf %146 : vector<128x128xf32> to vector<128x128xbf16>
    %150 = arith.truncf %136 : vector<128x8xf32> to vector<128x8xbf16>
    %cst_94 = arith.constant dense<0.000000e+00> : vector<128x8xf32>
    %151 = tpu.matmul %149, %150, %cst_94 {dimension_numbers = #tpu.dot_dimension_numbers<[1], [0], [0], [1], [0, 0, 1, 1], [], []>} : vector<128x128xbf16>, vector<128x8xbf16>, vector<128x8xf32> -> vector<128x8xf32>
    %152 = tpu.reciprocal %148 {approx = true} : vector<128x1xf32> -> vector<128x1xf32>
    %153 = vector.broadcast %152 : vector<128x1xf32> to vector<128x8xf32>
    %154 = arith.mulf %151, %153 : vector<128x8xf32>
    %155 = arith.truncf %154 : vector<128x8xf32> to vector<128x8xbf16>
    %c2_95 = arith.constant 2 : index
    %c0_96 = arith.constant 0 : index
    %c0_97 = arith.constant 0 : index
    %156 = vector.load %arg10[%c2_95, %c0_96, %c0_97] : memref<4x8x32xbf16, #tpu.memory_space<vmem>>, vector<1x8x32xbf16>
    %157 = vector.shape_cast %156 : vector<1x8x32xbf16> to vector<8x32xbf16>
    %cst_98 = arith.constant dense<0.000000e+00> : vector<128x32xf32>
    %158 = tpu.matmul %155, %157, %cst_98 {dimension_numbers = #tpu.dot_dimension_numbers<[1], [0], [0], [1], [0, 0, 1, 1], [], []>} : vector<128x8xbf16>, vector<8x32xbf16>, vector<128x32xf32> -> vector<128x32xf32>
    %159 = arith.addf %115, %158 : vector<128x32xf32>
    %c3 = arith.constant 3 : index
    %c0_99 = arith.constant 0 : index
    %c0_100 = arith.constant 0 : index
    %160 = vector.load %arg4[%c3, %c0_99, %c0_100] : memref<4x32x8xbf16, #tpu.memory_space<vmem>>, vector<1x32x8xbf16>
    %161 = vector.shape_cast %160 : vector<1x32x8xbf16> to vector<32x8xbf16>
    %cst_101 = arith.constant dense<0.000000e+00> : vector<128x8xf32>
    %162 = tpu.matmul %26, %161, %cst_101 {dimension_numbers = #tpu.dot_dimension_numbers<[1], [0], [0], [1], [0, 0, 1, 1], [], []>} : vector<128x32xbf16>, vector<32x8xbf16>, vector<128x8xf32> -> vector<128x8xf32>
    %c3_102 = arith.constant 3 : index
    %c0_103 = arith.constant 0 : index
    %c0_104 = arith.constant 0 : index
    %163 = vector.load %arg5[%c3_102, %c0_103, %c0_104] : memref<4x1x8xf32, #tpu.memory_space<vmem>>, vector<1x1x8xf32>
    %164 = vector.shape_cast %163 : vector<1x1x8xf32> to vector<1x8xf32>
    %165 = vector.broadcast %164 : vector<1x8xf32> to vector<128x8xf32>
    %166 = arith.addf %162, %165 : vector<128x8xf32>
    %c3_105 = arith.constant 3 : index
    %c0_106 = arith.constant 0 : index
    %c0_107 = arith.constant 0 : index
    %167 = vector.load %arg6[%c3_105, %c0_106, %c0_107] : memref<4x32x8xbf16, #tpu.memory_space<vmem>>, vector<1x32x8xbf16>
    %168 = vector.shape_cast %167 : vector<1x32x8xbf16> to vector<32x8xbf16>
    %cst_108 = arith.constant dense<0.000000e+00> : vector<128x8xf32>
    %169 = tpu.matmul %26, %168, %cst_108 {dimension_numbers = #tpu.dot_dimension_numbers<[1], [0], [0], [1], [0, 0, 1, 1], [], []>} : vector<128x32xbf16>, vector<32x8xbf16>, vector<128x8xf32> -> vector<128x8xf32>
    %c3_109 = arith.constant 3 : index
    %c0_110 = arith.constant 0 : index
    %c0_111 = arith.constant 0 : index
    %170 = vector.load %arg7[%c3_109, %c0_110, %c0_111] : memref<4x1x8xf32, #tpu.memory_space<vmem>>, vector<1x1x8xf32>
    %171 = vector.shape_cast %170 : vector<1x1x8xf32> to vector<1x8xf32>
    %172 = vector.broadcast %171 : vector<1x8xf32> to vector<128x8xf32>
    %173 = arith.addf %169, %172 : vector<128x8xf32>
    %c3_112 = arith.constant 3 : index
    %c0_113 = arith.constant 0 : index
    %c0_114 = arith.constant 0 : index
    %174 = vector.load %arg8[%c3_112, %c0_113, %c0_114] : memref<4x32x8xbf16, #tpu.memory_space<vmem>>, vector<1x32x8xbf16>
    %175 = vector.shape_cast %174 : vector<1x32x8xbf16> to vector<32x8xbf16>
    %cst_115 = arith.constant dense<0.000000e+00> : vector<128x8xf32>
    %176 = tpu.matmul %26, %175, %cst_115 {dimension_numbers = #tpu.dot_dimension_numbers<[1], [0], [0], [1], [0, 0, 1, 1], [], []>} : vector<128x32xbf16>, vector<32x8xbf16>, vector<128x8xf32> -> vector<128x8xf32>
    %c3_116 = arith.constant 3 : index
    %c0_117 = arith.constant 0 : index
    %c0_118 = arith.constant 0 : index
    %177 = vector.load %arg9[%c3_116, %c0_117, %c0_118] : memref<4x1x8xf32, #tpu.memory_space<vmem>>, vector<1x1x8xf32>
    %178 = vector.shape_cast %177 : vector<1x1x8xf32> to vector<1x8xf32>
    %179 = vector.broadcast %178 : vector<1x8xf32> to vector<128x8xf32>
    %180 = arith.addf %176, %179 : vector<128x8xf32>
    %181 = arith.truncf %166 : vector<128x8xf32> to vector<128x8xbf16>
    %182 = arith.truncf %173 : vector<128x8xf32> to vector<128x8xbf16>
    %cst_119 = arith.constant dense<0.000000e+00> : vector<128x128xf32>
    %183 = tpu.matmul %181, %182, %cst_119 {dimension_numbers = #tpu.dot_dimension_numbers<[1], [1], [0], [0], [0, 0, 1, 0], [], []>} : vector<128x8xbf16>, vector<128x8xbf16>, vector<128x128xf32> -> vector<128x128xf32>
    %cst_120 = arith.constant 0.176776692 : f32
    %184 = vector.broadcast %cst_120 : f32 to vector<128x128xf32>
    %185 = arith.mulf %183, %184 : vector<128x128xf32>
    %cst_121 = arith.constant dense<0xFF800000> : vector<128xf32>
    %186 = vector.multi_reduction <maximumf>, %185, %cst_121 [1] : vector<128x128xf32> to vector<128xf32>
    %187 = vector.shape_cast %186 : vector<128xf32> to vector<128x1xf32>
    %188 = vector.broadcast %187 : vector<128x1xf32> to vector<128x128xf32>
    %189 = arith.subf %185, %188 : vector<128x128xf32>
    %190 = math.exp %189 : vector<128x128xf32>
    %cst_122 = arith.constant dense<0.000000e+00> : vector<128xf32>
    %191 = vector.multi_reduction <add>, %190, %cst_122 [1] : vector<128x128xf32> to vector<128xf32>
    %192 = vector.shape_cast %191 : vector<128xf32> to vector<128x1xf32>
    %193 = arith.truncf %190 : vector<128x128xf32> to vector<128x128xbf16>
    %194 = arith.truncf %180 : vector<128x8xf32> to vector<128x8xbf16>
    %cst_123 = arith.constant dense<0.000000e+00> : vector<128x8xf32>
    %195 = tpu.matmul %193, %194, %cst_123 {dimension_numbers = #tpu.dot_dimension_numbers<[1], [0], [0], [1], [0, 0, 1, 1], [], []>} : vector<128x128xbf16>, vector<128x8xbf16>, vector<128x8xf32> -> vector<128x8xf32>
    %196 = tpu.reciprocal %192 {approx = true} : vector<128x1xf32> -> vector<128x1xf32>
    %197 = vector.broadcast %196 : vector<128x1xf32> to vector<128x8xf32>
    %198 = arith.mulf %195, %197 : vector<128x8xf32>
    %199 = arith.truncf %198 : vector<128x8xf32> to vector<128x8xbf16>
    %c3_124 = arith.constant 3 : index
    %c0_125 = arith.constant 0 : index
    %c0_126 = arith.constant 0 : index
    %200 = vector.load %arg10[%c3_124, %c0_125, %c0_126] : memref<4x8x32xbf16, #tpu.memory_space<vmem>>, vector<1x8x32xbf16>
    %201 = vector.shape_cast %200 : vector<1x8x32xbf16> to vector<8x32xbf16>
    %cst_127 = arith.constant dense<0.000000e+00> : vector<128x32xf32>
    %202 = tpu.matmul %199, %201, %cst_127 {dimension_numbers = #tpu.dot_dimension_numbers<[1], [0], [0], [1], [0, 0, 1, 1], [], []>} : vector<128x8xbf16>, vector<8x32xbf16>, vector<128x32xf32> -> vector<128x32xf32>
    %203 = arith.addf %159, %202 : vector<128x32xf32>
    %c0_128 = arith.constant 0 : index
    %c0_129 = arith.constant 0 : index
    %204 = vector.load %arg11[%c0_128, %c0_129] : memref<1x32xf32, #tpu.memory_space<vmem>>, vector<1x32xf32>
    %205 = vector.broadcast %204 : vector<1x32xf32> to vector<128x32xf32>
    %206 = arith.addf %203, %205 : vector<128x32xf32>
    %207 = arith.addf %206, %1 : vector<128x32xf32>
    %cst_130 = arith.constant dense<0.000000e+00> : vector<128xf32>
    %208 = vector.multi_reduction <add>, %207, %cst_130 [1] : vector<128x32xf32> to vector<128xf32>
    %209 = vector.shape_cast %208 : vector<128xf32> to vector<128x1xf32>
    %cst_131 = arith.constant 3.200000e+01 : f32
    %210 = vector.broadcast %cst_131 : f32 to vector<128x1xf32>
    %211 = arith.divf %209, %210 : vector<128x1xf32>
    %212 = vector.broadcast %211 : vector<128x1xf32> to vector<128x32xf32>
    %213 = arith.subf %207, %212 : vector<128x32xf32>
    %214 = arith.mulf %213, %213 : vector<128x32xf32>
    %cst_132 = arith.constant dense<0.000000e+00> : vector<128xf32>
    %215 = vector.multi_reduction <add>, %214, %cst_132 [1] : vector<128x32xf32> to vector<128xf32>
    %216 = vector.shape_cast %215 : vector<128xf32> to vector<128x1xf32>
    %cst_133 = arith.constant 3.200000e+01 : f32
    %217 = vector.broadcast %cst_133 : f32 to vector<128x1xf32>
    %218 = arith.divf %216, %217 : vector<128x1xf32>
    %219 = vector.broadcast %211 : vector<128x1xf32> to vector<128x32xf32>
    %220 = arith.subf %207, %219 : vector<128x32xf32>
    %cst_134 = arith.constant 9.99999974E-6 : f32
    %221 = vector.broadcast %cst_134 : f32 to vector<128x1xf32>
    %222 = arith.addf %218, %221 : vector<128x1xf32>
    %223 = math.rsqrt %222 : vector<128x1xf32>
    %224 = vector.broadcast %223 : vector<128x1xf32> to vector<128x32xf32>
    %225 = arith.mulf %220, %224 : vector<128x32xf32>
    %226 = vector.broadcast %2 : vector<1x32xf32> to vector<128x32xf32>
    %227 = arith.mulf %225, %226 : vector<128x32xf32>
    %228 = vector.broadcast %3 : vector<1x32xf32> to vector<128x32xf32>
    %229 = arith.addf %227, %228 : vector<128x32xf32>
    %c0_135 = arith.constant 0 : index
    %c0_136 = arith.constant 0 : index
    %c0_137 = arith.constant 0 : index
    %230 = vector.load %arg12[%c0_135, %c0_136, %c0_137] : memref<1x128x32xf32, #tpu.memory_space<vmem>>, vector<1x128x32xf32>
    %231 = vector.shape_cast %230 : vector<1x128x32xf32> to vector<128x32xf32>
    %232 = vector.shape_cast %229 : vector<128x32xf32> to vector<1x128x32xf32>
    tpu.vector_store %arg12[%c0_135, %c0_136, %c0_137], %232 {strides = array<i32>} : memref<1x128x32xf32, #tpu.memory_space<vmem>>, vector<1x128x32xf32>,
    return
  }
  func.func @transform_0(%arg0: i32) -> (i32, i32, i32) {
    %c0_i32 = arith.constant 0 : i32
    %c0_i32_0 = arith.constant 0 : i32
    %c0_i32_1 = arith.constant 0 : i32
    return %arg0, %c0_i32, %c0_i32_0 : i32, i32, i32
  }
  func.func @transform_1(%arg0: i32) -> (i32, i32) {
    %c0_i32 = arith.constant 0 : i32
    %c0_i32_0 = arith.constant 0 : i32
    %c0_i32_1 = arith.constant 0 : i32
    return %c0_i32, %c0_i32_0 : i32, i32
  }
  func.func @transform_2(%arg0: i32) -> (i32, i32) {
    %c0_i32 = arith.constant 0 : i32
    %c0_i32_0 = arith.constant 0 : i32
    %c0_i32_1 = arith.constant 0 : i32
    return %c0_i32, %c0_i32_0 : i32, i32
  }
  func.func @transform_3(%arg0: i32) -> (i32, i32, i32) {
    %c0_i32 = arith.constant 0 : i32
    %c0_i32_0 = arith.constant 0 : i32
    %c0_i32_1 = arith.constant 0 : i32
    %c0_i32_2 = arith.constant 0 : i32
    return %c0_i32, %c0_i32_0, %c0_i32_1 : i32, i32, i32
  }
  func.func @transform_4(%arg0: i32) -> (i32, i32, i32) {
    %c0_i32 = arith.constant 0 : i32
    %c0_i32_0 = arith.constant 0 : i32
    %c0_i32_1 = arith.constant 0 : i32
    %c0_i32_2 = arith.constant 0 : i32
    return %c0_i32, %c0_i32_0, %c0_i32_1 : i32, i32, i32
  }
  func.func @transform_5(%arg0: i32) -> (i32, i32, i32) {
    %c0_i32 = arith.constant 0 : i32
    %c0_i32_0 = arith.constant 0 : i32
    %c0_i32_1 = arith.constant 0 : i32
    %c0_i32_2 = arith.constant 0 : i32
    return %c0_i32, %c0_i32_0, %c0_i32_1 : i32, i32, i32
  }
  func.func @transform_6(%arg0: i32) -> (i32, i32, i32) {
    %c0_i32 = arith.constant 0 : i32
    %c0_i32_0 = arith.constant 0 : i32
    %c0_i32_1 = arith.constant 0 : i32
    %c0_i32_2 = arith.constant 0 : i32
    return %c0_i32, %c0_i32_0, %c0_i32_1 : i32, i32, i32
  }
  func.func @transform_7(%arg0: i32) -> (i32, i32, i32) {
    %c0_i32 = arith.constant 0 : i32
    %c0_i32_0 = arith.constant 0 : i32
    %c0_i32_1 = arith.constant 0 : i32
    %c0_i32_2 = arith.constant 0 : i32
    return %c0_i32, %c0_i32_0, %c0_i32_1 : i32, i32, i32
  }
  func.func @transform_8(%arg0: i32) -> (i32, i32, i32) {
    %c0_i32 = arith.constant 0 : i32
    %c0_i32_0 = arith.constant 0 : i32
    %c0_i32_1 = arith.constant 0 : i32
    %c0_i32_2 = arith.constant 0 : i32
    return %c0_i32, %c0_i32_0, %c0_i32_1 : i32, i32, i32
  }
  func.func @transform_9(%arg0: i32) -> (i32, i32, i32) {
    %c0_i32 = arith.constant 0 : i32
    %c0_i32_0 = arith.constant 0 : i32
    %c0_i32_1 = arith.constant 0 : i32
    %c0_i32_2 = arith.constant 0 : i32
    return %c0_i32, %c0_i32_0, %c0_i32_1 : i32, i32, i32
  }
  func.func @transform_10(%arg0: i32) -> (i32, i32) {
    %c0_i32 = arith.constant 0 : i32
    %c0_i32_0 = arith.constant 0 : i32
    %c0_i32_1 = arith.constant 0 : i32
    return %c0_i32, %c0_i32_0 : i32, i32
  }
  func.func @transform_11(%arg0: i32) -> (i32, i32, i32) {
    %c0_i32 = arith.constant 0 : i32
    %c0_i32_0 = arith.constant 0 : i32
    %c0_i32_1 = arith.constant 0 : i32
    return %arg0, %c0_i32, %c0_i32_0 : i32, i32, i32
  }
}

module attributes {stable_mosaic.version = 11 : i64} {
  func.func @_conv_ffn_kernel(%arg0: i32, %arg1: memref<1x8x16x32xf32, #tpu.memory_space<vmem>>, %arg2: memref<1x8x16x32xf32, #tpu.memory_space<vmem>>, %arg3: memref<32x64xbf16, #tpu.memory_space<vmem>>, %arg4: memref<1x64xf32, #tpu.memory_space<vmem>>, %arg5: memref<1x64xf32, #tpu.memory_space<vmem>>, %arg6: memref<9x1x64xf32, #tpu.memory_space<vmem>>, %arg7: memref<1x64xf32, #tpu.memory_space<vmem>>, %arg8: memref<1x64xf32, #tpu.memory_space<vmem>>, %arg9: memref<1x64xf32, #tpu.memory_space<vmem>>, %arg10: memref<64x32xbf16, #tpu.memory_space<vmem>>, %arg11: memref<1x32xf32, #tpu.memory_space<vmem>>, %arg12: memref<1x32xf32, #tpu.memory_space<vmem>>, %arg13: memref<1x8x16x32xf32, #tpu.memory_space<vmem>>, %arg14: memref<10x18x64xf32, #tpu.memory_space<vmem>>) attributes {dimension_semantics = [#tpu.dimension_semantics<parallel>], iteration_bounds = array<i64: 2>, scalar_prefetch = 0 : i64, scratch_operands = 1 : i64, tpu.core_type = #tpu.core_type<tc>, window_params = [{transform_indices = @transform_0, window_bounds = array<i64: 1, 8, 16, 32>}, {transform_indices = @transform_1, window_bounds = array<i64: 1, 8, 16, 32>}, {pipeline_mode = #tpu.pipeline_mode<synchronous>, transform_indices = @transform_2, window_bounds = array<i64: 32, 64>}, {pipeline_mode = #tpu.pipeline_mode<synchronous>, transform_indices = @transform_3, window_bounds = array<i64: 1, 64>}, {pipeline_mode = #tpu.pipeline_mode<synchronous>, transform_indices = @transform_4, window_bounds = array<i64: 1, 64>}, {pipeline_mode = #tpu.pipeline_mode<synchronous>, transform_indices = @transform_5, window_bounds = array<i64: 9, 1, 64>}, {pipeline_mode = #tpu.pipeline_mode<synchronous>, transform_indices = @transform_6, window_bounds = array<i64: 1, 64>}, {pipeline_mode = #tpu.pipeline_mode<synchronous>, transform_indices = @transform_7, window_bounds = array<i64: 1, 64>}, {pipeline_mode = #tpu.pipeline_mode<synchronous>, transform_indices = @transform_8, window_bounds = array<i64: 1, 64>}, {pipeline_mode = #tpu.pipeline_mode<synchronous>, transform_indices = @transform_9, window_bounds = array<i64: 64, 32>}, {pipeline_mode = #tpu.pipeline_mode<synchronous>, transform_indices = @transform_10, window_bounds = array<i64: 1, 32>}, {pipeline_mode = #tpu.pipeline_mode<synchronous>, transform_indices = @transform_11, window_bounds = array<i64: 1, 32>}, {transform_indices = @transform_12, window_bounds = array<i64: 1, 8, 16, 32>}]} {
    %c0 = arith.constant 0 : index
    %c0_0 = arith.constant 0 : index
    %c0_1 = arith.constant 0 : index
    %c0_2 = arith.constant 0 : index
    %0 = vector.load %arg1[%c0, %c0_0, %c0_1, %c0_2] : memref<1x8x16x32xf32, #tpu.memory_space<vmem>>, vector<1x8x16x32xf32>
    %1 = vector.shape_cast %0 : vector<1x8x16x32xf32> to vector<8x16x32xf32>
    %2 = vector.shape_cast %1 : vector<8x16x32xf32> to vector<128x32xf32>
    %3 = arith.truncf %2 : vector<128x32xf32> to vector<128x32xbf16>
    %c0_3 = arith.constant 0 : index
    %c0_4 = arith.constant 0 : index
    %4 = vector.load %arg3[%c0_3, %c0_4] : memref<32x64xbf16, #tpu.memory_space<vmem>>, vector<32x64xbf16>
    %cst = arith.constant dense<0.000000e+00> : vector<128x64xf32>
    %5 = tpu.matmul %3, %4, %cst {dimension_numbers = #tpu.dot_dimension_numbers<[1], [0], [0], [1], [0, 0, 1, 1], [], []>} : vector<128x32xbf16>, vector<32x64xbf16>, vector<128x64xf32> -> vector<128x64xf32>
    %c0_5 = arith.constant 0 : index
    %c0_6 = arith.constant 0 : index
    %6 = vector.load %arg4[%c0_5, %c0_6] : memref<1x64xf32, #tpu.memory_space<vmem>>, vector<1x64xf32>
    %7 = vector.broadcast %6 : vector<1x64xf32> to vector<128x64xf32>
    %8 = arith.mulf %5, %7 : vector<128x64xf32>
    %c0_7 = arith.constant 0 : index
    %c0_8 = arith.constant 0 : index
    %9 = vector.load %arg5[%c0_7, %c0_8] : memref<1x64xf32, #tpu.memory_space<vmem>>, vector<1x64xf32>
    %10 = vector.broadcast %9 : vector<1x64xf32> to vector<128x64xf32>
    %11 = arith.addf %8, %10 : vector<128x64xf32>
    %cst_9 = arith.constant 0.000000e+00 : f32
    %12 = vector.broadcast %cst_9 : f32 to vector<128x64xf32>
    %13 = arith.maximumf %11, %12 : vector<128x64xf32>
    %14 = vector.shape_cast %13 : vector<128x64xf32> to vector<8x16x64xf32>
    %cst_10 = arith.constant 0.000000e+00 : f32
    %15 = vector.broadcast %cst_10 : f32 to vector<10x18x64xf32>
    %c0_11 = arith.constant 0 : index
    %c0_12 = arith.constant 0 : index
    %c0_13 = arith.constant 0 : index
    %16 = vector.load %arg14[%c0_11, %c0_12, %c0_13] : memref<10x18x64xf32, #tpu.memory_space<vmem>>, vector<10x18x64xf32>
    tpu.vector_store %arg14[%c0_11, %c0_12, %c0_13], %15 {strides = array<i32>} : memref<10x18x64xf32, #tpu.memory_space<vmem>>, vector<10x18x64xf32>,
    %c1 = arith.constant 1 : index
    %c1_14 = arith.constant 1 : index
    %c0_15 = arith.constant 0 : index
    %17 = vector.load %arg14[%c1, %c1_14, %c0_15] : memref<10x18x64xf32, #tpu.memory_space<vmem>>, vector<8x16x64xf32>
    tpu.vector_store %arg14[%c1, %c1_14, %c0_15], %14 {strides = array<i32>} : memref<10x18x64xf32, #tpu.memory_space<vmem>>, vector<8x16x64xf32>,
    %cst_16 = arith.constant 0.000000e+00 : f32
    %18 = vector.broadcast %cst_16 : f32 to vector<8x16x64xf32>
    %c0_17 = arith.constant 0 : index
    %c0_18 = arith.constant 0 : index
    %c0_19 = arith.constant 0 : index
    %19 = vector.load %arg14[%c0_17, %c0_18, %c0_19] : memref<10x18x64xf32, #tpu.memory_space<vmem>>, vector<8x16x64xf32>
    %c0_20 = arith.constant 0 : index
    %c0_21 = arith.constant 0 : index
    %c0_22 = arith.constant 0 : index
    %20 = vector.load %arg6[%c0_20, %c0_21, %c0_22] : memref<9x1x64xf32, #tpu.memory_space<vmem>>, vector<1x1x64xf32>
    %21 = vector.shape_cast %20 : vector<1x1x64xf32> to vector<1x64xf32>
    %22 = vector.shape_cast %21 : vector<1x64xf32> to vector<1x1x64xf32>
    %23 = vector.broadcast %22 : vector<1x1x64xf32> to vector<8x16x64xf32>
    %24 = arith.mulf %19, %23 : vector<8x16x64xf32>
    %25 = arith.addf %18, %24 : vector<8x16x64xf32>
    %c0_23 = arith.constant 0 : index
    %c1_24 = arith.constant 1 : index
    %c0_25 = arith.constant 0 : index
    %26 = vector.load %arg14[%c0_23, %c1_24, %c0_25] : memref<10x18x64xf32, #tpu.memory_space<vmem>>, vector<8x16x64xf32>
    %c1_26 = arith.constant 1 : index
    %c0_27 = arith.constant 0 : index
    %c0_28 = arith.constant 0 : index
    %27 = vector.load %arg6[%c1_26, %c0_27, %c0_28] : memref<9x1x64xf32, #tpu.memory_space<vmem>>, vector<1x1x64xf32>
    %28 = vector.shape_cast %27 : vector<1x1x64xf32> to vector<1x64xf32>
    %29 = vector.shape_cast %28 : vector<1x64xf32> to vector<1x1x64xf32>
    %30 = vector.broadcast %29 : vector<1x1x64xf32> to vector<8x16x64xf32>
    %31 = arith.mulf %26, %30 : vector<8x16x64xf32>
    %32 = arith.addf %25, %31 : vector<8x16x64xf32>
    %c0_29 = arith.constant 0 : index
    %c2 = arith.constant 2 : index
    %c0_30 = arith.constant 0 : index
    %33 = vector.load %arg14[%c0_29, %c2, %c0_30] : memref<10x18x64xf32, #tpu.memory_space<vmem>>, vector<8x16x64xf32>
    %c2_31 = arith.constant 2 : index
    %c0_32 = arith.constant 0 : index
    %c0_33 = arith.constant 0 : index
    %34 = vector.load %arg6[%c2_31, %c0_32, %c0_33] : memref<9x1x64xf32, #tpu.memory_space<vmem>>, vector<1x1x64xf32>
    %35 = vector.shape_cast %34 : vector<1x1x64xf32> to vector<1x64xf32>
    %36 = vector.shape_cast %35 : vector<1x64xf32> to vector<1x1x64xf32>
    %37 = vector.broadcast %36 : vector<1x1x64xf32> to vector<8x16x64xf32>
    %38 = arith.mulf %33, %37 : vector<8x16x64xf32>
    %39 = arith.addf %32, %38 : vector<8x16x64xf32>
    %c1_34 = arith.constant 1 : index
    %c0_35 = arith.constant 0 : index
    %c0_36 = arith.constant 0 : index
    %40 = vector.load %arg14[%c1_34, %c0_35, %c0_36] : memref<10x18x64xf32, #tpu.memory_space<vmem>>, vector<8x16x64xf32>
    %c3 = arith.constant 3 : index
    %c0_37 = arith.constant 0 : index
    %c0_38 = arith.constant 0 : index
    %41 = vector.load %arg6[%c3, %c0_37, %c0_38] : memref<9x1x64xf32, #tpu.memory_space<vmem>>, vector<1x1x64xf32>
    %42 = vector.shape_cast %41 : vector<1x1x64xf32> to vector<1x64xf32>
    %43 = vector.shape_cast %42 : vector<1x64xf32> to vector<1x1x64xf32>
    %44 = vector.broadcast %43 : vector<1x1x64xf32> to vector<8x16x64xf32>
    %45 = arith.mulf %40, %44 : vector<8x16x64xf32>
    %46 = arith.addf %39, %45 : vector<8x16x64xf32>
    %c1_39 = arith.constant 1 : index
    %c1_40 = arith.constant 1 : index
    %c0_41 = arith.constant 0 : index
    %47 = vector.load %arg14[%c1_39, %c1_40, %c0_41] : memref<10x18x64xf32, #tpu.memory_space<vmem>>, vector<8x16x64xf32>
    %c4 = arith.constant 4 : index
    %c0_42 = arith.constant 0 : index
    %c0_43 = arith.constant 0 : index
    %48 = vector.load %arg6[%c4, %c0_42, %c0_43] : memref<9x1x64xf32, #tpu.memory_space<vmem>>, vector<1x1x64xf32>
    %49 = vector.shape_cast %48 : vector<1x1x64xf32> to vector<1x64xf32>
    %50 = vector.shape_cast %49 : vector<1x64xf32> to vector<1x1x64xf32>
    %51 = vector.broadcast %50 : vector<1x1x64xf32> to vector<8x16x64xf32>
    %52 = arith.mulf %47, %51 : vector<8x16x64xf32>
    %53 = arith.addf %46, %52 : vector<8x16x64xf32>
    %c1_44 = arith.constant 1 : index
    %c2_45 = arith.constant 2 : index
    %c0_46 = arith.constant 0 : index
    %54 = vector.load %arg14[%c1_44, %c2_45, %c0_46] : memref<10x18x64xf32, #tpu.memory_space<vmem>>, vector<8x16x64xf32>
    %c5 = arith.constant 5 : index
    %c0_47 = arith.constant 0 : index
    %c0_48 = arith.constant 0 : index
    %55 = vector.load %arg6[%c5, %c0_47, %c0_48] : memref<9x1x64xf32, #tpu.memory_space<vmem>>, vector<1x1x64xf32>
    %56 = vector.shape_cast %55 : vector<1x1x64xf32> to vector<1x64xf32>
    %57 = vector.shape_cast %56 : vector<1x64xf32> to vector<1x1x64xf32>
    %58 = vector.broadcast %57 : vector<1x1x64xf32> to vector<8x16x64xf32>
    %59 = arith.mulf %54, %58 : vector<8x16x64xf32>
    %60 = arith.addf %53, %59 : vector<8x16x64xf32>
    %c2_49 = arith.constant 2 : index
    %c0_50 = arith.constant 0 : index
    %c0_51 = arith.constant 0 : index
    %61 = vector.load %arg14[%c2_49, %c0_50, %c0_51] : memref<10x18x64xf32, #tpu.memory_space<vmem>>, vector<8x16x64xf32>
    %c6 = arith.constant 6 : index
    %c0_52 = arith.constant 0 : index
    %c0_53 = arith.constant 0 : index
    %62 = vector.load %arg6[%c6, %c0_52, %c0_53] : memref<9x1x64xf32, #tpu.memory_space<vmem>>, vector<1x1x64xf32>
    %63 = vector.shape_cast %62 : vector<1x1x64xf32> to vector<1x64xf32>
    %64 = vector.shape_cast %63 : vector<1x64xf32> to vector<1x1x64xf32>
    %65 = vector.broadcast %64 : vector<1x1x64xf32> to vector<8x16x64xf32>
    %66 = arith.mulf %61, %65 : vector<8x16x64xf32>
    %67 = arith.addf %60, %66 : vector<8x16x64xf32>
    %c2_54 = arith.constant 2 : index
    %c1_55 = arith.constant 1 : index
    %c0_56 = arith.constant 0 : index
    %68 = vector.load %arg14[%c2_54, %c1_55, %c0_56] : memref<10x18x64xf32, #tpu.memory_space<vmem>>, vector<8x16x64xf32>
    %c7 = arith.constant 7 : index
    %c0_57 = arith.constant 0 : index
    %c0_58 = arith.constant 0 : index
    %69 = vector.load %arg6[%c7, %c0_57, %c0_58] : memref<9x1x64xf32, #tpu.memory_space<vmem>>, vector<1x1x64xf32>
    %70 = vector.shape_cast %69 : vector<1x1x64xf32> to vector<1x64xf32>
    %71 = vector.shape_cast %70 : vector<1x64xf32> to vector<1x1x64xf32>
    %72 = vector.broadcast %71 : vector<1x1x64xf32> to vector<8x16x64xf32>
    %73 = arith.mulf %68, %72 : vector<8x16x64xf32>
    %74 = arith.addf %67, %73 : vector<8x16x64xf32>
    %c2_59 = arith.constant 2 : index
    %c2_60 = arith.constant 2 : index
    %c0_61 = arith.constant 0 : index
    %75 = vector.load %arg14[%c2_59, %c2_60, %c0_61] : memref<10x18x64xf32, #tpu.memory_space<vmem>>, vector<8x16x64xf32>
    %c8 = arith.constant 8 : index
    %c0_62 = arith.constant 0 : index
    %c0_63 = arith.constant 0 : index
    %76 = vector.load %arg6[%c8, %c0_62, %c0_63] : memref<9x1x64xf32, #tpu.memory_space<vmem>>, vector<1x1x64xf32>
    %77 = vector.shape_cast %76 : vector<1x1x64xf32> to vector<1x64xf32>
    %78 = vector.shape_cast %77 : vector<1x64xf32> to vector<1x1x64xf32>
    %79 = vector.broadcast %78 : vector<1x1x64xf32> to vector<8x16x64xf32>
    %80 = arith.mulf %75, %79 : vector<8x16x64xf32>
    %81 = arith.addf %74, %80 : vector<8x16x64xf32>
    %c0_64 = arith.constant 0 : index
    %c0_65 = arith.constant 0 : index
    %82 = vector.load %arg7[%c0_64, %c0_65] : memref<1x64xf32, #tpu.memory_space<vmem>>, vector<1x64xf32>
    %83 = vector.shape_cast %82 : vector<1x64xf32> to vector<1x1x64xf32>
    %84 = vector.broadcast %83 : vector<1x1x64xf32> to vector<8x16x64xf32>
    %85 = arith.addf %81, %84 : vector<8x16x64xf32>
    %c0_66 = arith.constant 0 : index
    %c0_67 = arith.constant 0 : index
    %86 = vector.load %arg8[%c0_66, %c0_67] : memref<1x64xf32, #tpu.memory_space<vmem>>, vector<1x64xf32>
    %87 = vector.shape_cast %86 : vector<1x64xf32> to vector<1x1x64xf32>
    %88 = vector.broadcast %87 : vector<1x1x64xf32> to vector<8x16x64xf32>
    %89 = arith.mulf %85, %88 : vector<8x16x64xf32>
    %c0_68 = arith.constant 0 : index
    %c0_69 = arith.constant 0 : index
    %90 = vector.load %arg9[%c0_68, %c0_69] : memref<1x64xf32, #tpu.memory_space<vmem>>, vector<1x64xf32>
    %91 = vector.shape_cast %90 : vector<1x64xf32> to vector<1x1x64xf32>
    %92 = vector.broadcast %91 : vector<1x1x64xf32> to vector<8x16x64xf32>
    %93 = arith.addf %89, %92 : vector<8x16x64xf32>
    %cst_70 = arith.constant 0.000000e+00 : f32
    %94 = vector.broadcast %cst_70 : f32 to vector<8x16x64xf32>
    %95 = arith.maximumf %93, %94 : vector<8x16x64xf32>
    %96 = vector.shape_cast %95 : vector<8x16x64xf32> to vector<128x64xf32>
    %97 = arith.truncf %96 : vector<128x64xf32> to vector<128x64xbf16>
    %c0_71 = arith.constant 0 : index
    %c0_72 = arith.constant 0 : index
    %98 = vector.load %arg10[%c0_71, %c0_72] : memref<64x32xbf16, #tpu.memory_space<vmem>>, vector<64x32xbf16>
    %cst_73 = arith.constant dense<0.000000e+00> : vector<128x32xf32>
    %99 = tpu.matmul %97, %98, %cst_73 {dimension_numbers = #tpu.dot_dimension_numbers<[1], [0], [0], [1], [0, 0, 1, 1], [], []>} : vector<128x64xbf16>, vector<64x32xbf16>, vector<128x32xf32> -> vector<128x32xf32>
    %c0_74 = arith.constant 0 : index
    %c0_75 = arith.constant 0 : index
    %100 = vector.load %arg11[%c0_74, %c0_75] : memref<1x32xf32, #tpu.memory_space<vmem>>, vector<1x32xf32>
    %101 = vector.broadcast %100 : vector<1x32xf32> to vector<128x32xf32>
    %102 = arith.mulf %99, %101 : vector<128x32xf32>
    %c0_76 = arith.constant 0 : index
    %c0_77 = arith.constant 0 : index
    %103 = vector.load %arg12[%c0_76, %c0_77] : memref<1x32xf32, #tpu.memory_space<vmem>>, vector<1x32xf32>
    %104 = vector.broadcast %103 : vector<1x32xf32> to vector<128x32xf32>
    %105 = arith.addf %102, %104 : vector<128x32xf32>
    %cst_78 = arith.constant 0.000000e+00 : f32
    %106 = vector.broadcast %cst_78 : f32 to vector<128x32xf32>
    %107 = arith.maximumf %105, %106 : vector<128x32xf32>
    %108 = vector.shape_cast %107 : vector<128x32xf32> to vector<8x16x32xf32>
    %c0_79 = arith.constant 0 : index
    %c0_80 = arith.constant 0 : index
    %c0_81 = arith.constant 0 : index
    %c0_82 = arith.constant 0 : index
    %109 = vector.load %arg2[%c0_79, %c0_80, %c0_81, %c0_82] : memref<1x8x16x32xf32, #tpu.memory_space<vmem>>, vector<1x8x16x32xf32>
    %110 = vector.shape_cast %109 : vector<1x8x16x32xf32> to vector<8x16x32xf32>
    %111 = arith.addf %108, %110 : vector<8x16x32xf32>
    %c0_83 = arith.constant 0 : index
    %c0_84 = arith.constant 0 : index
    %c0_85 = arith.constant 0 : index
    %c0_86 = arith.constant 0 : index
    %112 = vector.load %arg13[%c0_83, %c0_84, %c0_85, %c0_86] : memref<1x8x16x32xf32, #tpu.memory_space<vmem>>, vector<1x8x16x32xf32>
    %113 = vector.shape_cast %112 : vector<1x8x16x32xf32> to vector<8x16x32xf32>
    %114 = vector.shape_cast %111 : vector<8x16x32xf32> to vector<1x8x16x32xf32>
    tpu.vector_store %arg13[%c0_83, %c0_84, %c0_85, %c0_86], %114 {strides = array<i32>} : memref<1x8x16x32xf32, #tpu.memory_space<vmem>>, vector<1x8x16x32xf32>,
    return
  }
  func.func @transform_0(%arg0: i32) -> (i32, i32, i32, i32) {
    %c0_i32 = arith.constant 0 : i32
    %c0_i32_0 = arith.constant 0 : i32
    %c0_i32_1 = arith.constant 0 : i32
    %c0_i32_2 = arith.constant 0 : i32
    return %arg0, %c0_i32, %c0_i32_0, %c0_i32_1 : i32, i32, i32, i32
  }
  func.func @transform_1(%arg0: i32) -> (i32, i32, i32, i32) {
    %c0_i32 = arith.constant 0 : i32
    %c0_i32_0 = arith.constant 0 : i32
    %c0_i32_1 = arith.constant 0 : i32
    %c0_i32_2 = arith.constant 0 : i32
    return %arg0, %c0_i32, %c0_i32_0, %c0_i32_1 : i32, i32, i32, i32
  }
  func.func @transform_2(%arg0: i32) -> (i32, i32) {
    %c0_i32 = arith.constant 0 : i32
    %c0_i32_0 = arith.constant 0 : i32
    %c0_i32_1 = arith.constant 0 : i32
    return %c0_i32, %c0_i32_0 : i32, i32
  }
  func.func @transform_3(%arg0: i32) -> (i32, i32) {
    %c0_i32 = arith.constant 0 : i32
    %c0_i32_0 = arith.constant 0 : i32
    %c0_i32_1 = arith.constant 0 : i32
    return %c0_i32, %c0_i32_0 : i32, i32
  }
  func.func @transform_4(%arg0: i32) -> (i32, i32) {
    %c0_i32 = arith.constant 0 : i32
    %c0_i32_0 = arith.constant 0 : i32
    %c0_i32_1 = arith.constant 0 : i32
    return %c0_i32, %c0_i32_0 : i32, i32
  }
  func.func @transform_5(%arg0: i32) -> (i32, i32, i32) {
    %c0_i32 = arith.constant 0 : i32
    %c0_i32_0 = arith.constant 0 : i32
    %c0_i32_1 = arith.constant 0 : i32
    %c0_i32_2 = arith.constant 0 : i32
    return %c0_i32, %c0_i32_0, %c0_i32_1 : i32, i32, i32
  }
  func.func @transform_6(%arg0: i32) -> (i32, i32) {
    %c0_i32 = arith.constant 0 : i32
    %c0_i32_0 = arith.constant 0 : i32
    %c0_i32_1 = arith.constant 0 : i32
    return %c0_i32, %c0_i32_0 : i32, i32
  }
  func.func @transform_7(%arg0: i32) -> (i32, i32) {
    %c0_i32 = arith.constant 0 : i32
    %c0_i32_0 = arith.constant 0 : i32
    %c0_i32_1 = arith.constant 0 : i32
    return %c0_i32, %c0_i32_0 : i32, i32
  }
  func.func @transform_8(%arg0: i32) -> (i32, i32) {
    %c0_i32 = arith.constant 0 : i32
    %c0_i32_0 = arith.constant 0 : i32
    %c0_i32_1 = arith.constant 0 : i32
    return %c0_i32, %c0_i32_0 : i32, i32
  }
  func.func @transform_9(%arg0: i32) -> (i32, i32) {
    %c0_i32 = arith.constant 0 : i32
    %c0_i32_0 = arith.constant 0 : i32
    %c0_i32_1 = arith.constant 0 : i32
    return %c0_i32, %c0_i32_0 : i32, i32
  }
  func.func @transform_10(%arg0: i32) -> (i32, i32) {
    %c0_i32 = arith.constant 0 : i32
    %c0_i32_0 = arith.constant 0 : i32
    %c0_i32_1 = arith.constant 0 : i32
    return %c0_i32, %c0_i32_0 : i32, i32
  }
  func.func @transform_11(%arg0: i32) -> (i32, i32) {
    %c0_i32 = arith.constant 0 : i32
    %c0_i32_0 = arith.constant 0 : i32
    %c0_i32_1 = arith.constant 0 : i32
    return %c0_i32, %c0_i32_0 : i32, i32
  }
  func.func @transform_12(%arg0: i32) -> (i32, i32, i32, i32) {
    %c0_i32 = arith.constant 0 : i32
    %c0_i32_0 = arith.constant 0 : i32
    %c0_i32_1 = arith.constant 0 : i32
    %c0_i32_2 = arith.constant 0 : i32
    return %arg0, %c0_i32, %c0_i32_0, %c0_i32_1 : i32, i32, i32, i32
  }
}

</mosaic_0001>

<bundles_post_ra>
// kernel: satrn_encoder_forward.5
= control target key start
LH: loop header
LB: loop body
LE: loop exit
PB: predicated region body
PF: predicated region fallthrough
CT: control target
= control target key end

     0   :  { %s935_s30 = smov 0   ;;  %s1235_s0 = inlined_call_operand.vmem [shape: f32[2,128,32], index: 0, kind: input, shape index: {}]   ;;  %s1236_s1 = inlined_call_operand.vmem [shape: f32[128,32], index: 1, kind: input, shape index: {}]   ;;  %s1237_s2 = inlined_call_operand.vmem [shape: f32[128,32], index: 2, kind: input, shape index: {}]   ;;  %s1238_s3 = inlined_call_operand.vmem [shape: f32[32,16], index: 3, kind: input, shape index: {}]   ;;  %s1239_s4 = inlined_call_operand.vmem [shape: f32[1,16], index: 4, kind: input, shape index: {}]   ;;  %s1240_s5 = inlined_call_operand.vmem [shape: f32[16,32], index: 5, kind: input, shape index: {}]   ;;  %s1241_s6 = inlined_call_operand.vmem [shape: f32[1,32], index: 6, kind: input, shape index: {}]   ;;  %s1242_s7 = inlined_call_operand.vmem [shape: f32[16,32], index: 7, kind: input, shape index: {}]   ;;  %s1243_s8 = inlined_call_operand.vmem [shape: f32[1,32], index: 8, kind: input, shape index: {}]   ;;  %s1244_s9 = inlined_call_operand.vmem [shape: f32[2,128,32], index: 9, kind: output, shape index: {}]  }
   0x1 LB: > { %s805_s10 = sadd.s32 4294967295, %s881_s30   ;;  %p809_p0 = scmp.ge.s32.totalorder %s881_s30, 1  ;;  %s881_s30 = sphi %s935_s30, %s19_s30  }
   0x2   : > { %p287_p1 = scmp.lt.s32.totalorder %s881_s30, 3 }
   0x4   : > { %p288_p2 = pnand %p809_p0, %p287_p1 }
   0x5   : > { %p323_p3 = scmp.lt.s32.totalorder (!%p288_p2), %s805_s10, 1 }
   0x6   : > { %291 = sbr.rel (%p288_p2) target bundleno = 512 (0x200), region = 56 }
   0xb   : > { %v392_v0 = vld [vmem:[%s1238_s3 + $0x18] sm:$0xff]  ;;  %v883_v1 = vmov 0.0   ;;  %v391_v2 = vld [vmem:[%s1238_s3 + $0x10] sm:$0xff]  ;;  %vm884_vm0 = vmmov 0   ;;  %s1246_s10 = smov (!%p323_p3, %s805_s10), 1  ;;  %v390_v3 = vld [vmem:[%s1238_s3 + $0x8] sm:$0xff] }
   0xc   : > { %832 = vmatprep.subr.mxu0 %v883_v1  ;;  %840 = vmatprep.mubr.msk.f32.mxu0 %vm884_vm0, %v883_v1  ;;  %s819_s17 = sshll.u32 %s1246_s10, 7  ;;  %vm349_vm1 = vcmask 261120   ;;  %v389_v4 = vld [vmem:[%s1238_s3] sm:$0xff]  ;;  %v469_v59 = vld [vmem:[%s1240_s5 + $0x8] sm:$0xff]  ;;  %vm471_vm2 = vcmask 130048  }
   0xd   : > { %833 = vmatpush3.msra.mxu0 %v392_v0  ;;  %843 = vmatprep.subr.mxu1 %v883_v1  ;;  %s971_s22 = scalar_lea.vmem %s1235_s0, %s819_s17  ;;  %v468_v60 = vld [vmem:[%s1240_s5] sm:$0xff]  ;;  %s1198_s12 = scalar_lea.vmem %s1244_s9, %s819_s17 }
   0xe   : > { %834 = vmatprep.subr.mxu0 %v883_v1  ;;  %847 = vmatprep.mubr.msk.f32.mxu1 %vm884_vm0, %v883_v1  ;;  %v974_v5 = vld [vmem:[%s971_s22] sm:$0xff]  ;;  %v977_v6 = vld [vmem:[%s971_s22 + $0x8] sm:$0xff]  ;;  %v980_v7 = vld [vmem:[%s971_s22 + $0x10] sm:$0xff] }
   0xf   : > { %835 = vmatpush3.msra.mxu0 %v391_v2  ;;  %v984_v8 = vld [vmem:[%s971_s22 + $0x18] sm:$0xff]  ;;  %v350_v9 = vsel %vm349_vm1, %v974_v5, 0.0  ;;  %v351_v10 = vsel %vm349_vm1, %v977_v6, 0.0  ;;  %v353_v11 = vsel %vm349_vm1, %v980_v7, 0.0  ;;  %v993_v12 = vld [vmem:[%s971_s22 + $0x20] sm:$0xff]  ;;  %v998_v15 = vld [vmem:[%s971_s22 + $0x28] sm:$0xff]  ;;  %844 = vmatpush3.msra.mxu1 %v469_v59 }
  0x10   : > { %836 = vmatprep.subr.mxu0 %v883_v1  ;;  %v352_v13 = vadd.f32 %v351_v10, %v350_v9  ;;  %v355_v14 = vsel %vm349_vm1, %v984_v8, 0.0  ;;  %v357_v17 = vsel %vm349_vm1, %v993_v12, 0.0  ;;  %v1003_v18 = vld [vmem:[%s971_s22 + $0x30] sm:$0xff]  ;;  %v359_v20 = vsel %vm349_vm1, %v998_v15, 0.0  ;;  %v1008_v21 = vld [vmem:[%s971_s22 + $0x38] sm:$0xff]  ;;  %v1013_v24 = vld [vmem:[%s971_s22 + $0x40] sm:$0xff]  ;;  %845 = vmatprep.subr.mxu1 %v883_v1 }
  0x11   : > { %837 = vmatpush3.msra.mxu0 %v390_v3  ;;  %v361_v23 = vsel %vm349_vm1, %v1003_v18, 0.0  ;;  %v363_v26 = vsel %vm349_vm1, %v1008_v21, 0.0  ;;  %v1018_v27 = vld [vmem:[%s971_s22 + $0x48] sm:$0xff]  ;;  %v365_v29 = vsel %vm349_vm1, %v1013_v24, 0.0  ;;  %v1023_v30 = vld [vmem:[%s971_s22 + $0x50] sm:$0xff]  ;;  %v1028_v33 = vld [vmem:[%s971_s22 + $0x58] sm:$0xff]  ;;  %846 = vmatpush3.msra.mxu1 %v468_v60 }
  0x12   : > { %838 = vmatprep.subr.mxu0 %v883_v1  ;;  %v354_v16 = vadd.f32 %v353_v11, %v352_v13  ;;  %v367_v32 = vsel %vm349_vm1, %v1018_v27, 0.0  ;;  %v369_v35 = vsel %vm349_vm1, %v1023_v30, 0.0  ;;  %v1033_v36 = vld [vmem:[%s971_s22 + $0x60] sm:$0xff]  ;;  %v371_v38 = vsel %vm349_vm1, %v1028_v33, 0.0  ;;  %v1038_v39 = vld [vmem:[%s971_s22 + $0x68] sm:$0xff]  ;;  %v1043_v42 = vld [vmem:[%s971_s22 + $0x70] sm:$0xff]  ;;  %850 = vmatprep.subr.mxu1 %v883_v1 }
  0x13   : > { %839 = vmatpush3.msra.mxu0 %v389_v4  ;;  %v373_v41 = vsel %vm349_vm1, %v1033_v36, 0.0  ;;  %v375_v44 = vsel %vm349_vm1, %v1038_v39, 0.0  ;;  %v1048_v45 = vld [vmem:[%s971_s22 + $0x78] sm:$0xff]  ;;  %v377_v47 = vsel %vm349_vm1, %v1043_v42, 0.0  ;;  %v393_v61 = vld [vmem:[%s1239_s4] sm:$0x1] }
  0x14   : > { %v356_v19 = vadd.f32 %v355_v14, %v354_v16  ;;  %v379_v49 = vsel %vm349_vm1, %v1048_v45, 0.0  ;;  %v546_v3 = vld [vmem:[%s1242_s7 + $0x8] sm:$0xff]  ;;  %v545_v4 = vld [vmem:[%s1242_s7] sm:$0xff] }
  0x15   : > { %v470_v9 = vld [vmem:[%s1241_s6] sm:$0x1] }
  0x16   : > { %v358_v22 = vadd.f32 %v357_v17, %v356_v19  ;;  %v547_v14 = vld [vmem:[%s1243_s8] sm:$0x1] }
  0x18   : > { %v360_v25 = vadd.f32 %v359_v20, %v358_v22 }
  0x1a   : > { %v362_v28 = vadd.f32 %v361_v23, %v360_v25 }
  0x1c   : > { %v364_v31 = vadd.f32 %v363_v26, %v362_v28 }
  0x1e   : > { %v366_v34 = vadd.f32 %v365_v29, %v364_v31  ;;  %v646_v29 = vlaneseq }
  0x20   : > { %v368_v37 = vadd.f32 %v367_v32, %v366_v34  ;;  %v647_v32 = vshrl.u32 %v646_v29, 7  ;;  %v687_v29 = vld [vmem:[%s1237_s2 + $0x28] sm:$0xff] }
  0x22   : > { %v370_v40 = vadd.f32 %v369_v35, %v368_v37  ;;  %v648_v34 = vsub.s32 0, %v647_v32  ;;  %v630_v37 = vld [vmem:[%s1236_s1] sm:$0xff] }
  0x23   : > { %v690_v32 = vld [vmem:[%s1237_s2 + $0x40] sm:$0xff] }
  0x24   : > { %v372_v43 = vadd.f32 %v371_v38, %v370_v40  ;;  %v631_v38 = vld [vmem:[%s1236_s1 + $0x8] sm:$0xff]  ;;  %v632_v40 = vld [vmem:[%s1236_s1 + $0x10] sm:$0xff] }
  0x26   : > { %v374_v46 = vadd.f32 %v373_v41, %v372_v43  ;;  %v633_v41 = vld [vmem:[%s1236_s1 + $0x18] sm:$0xff] }
  0x28   : > { %v376_v48 = vadd.f32 %v375_v44, %v374_v46  ;;  %v634_v44 = vld [vmem:[%s1236_s1 + $0x20] sm:$0xff]  ;;  %v635_v46 = vld [vmem:[%s1236_s1 + $0x28] sm:$0xff] }
  0x2a   : > { %v378_v50 = vadd.f32 %v377_v47, %v376_v48  ;;  %v636_v47 = vld [vmem:[%s1236_s1 + $0x30] sm:$0xff]  ;;  %v637_v48 = vld [vmem:[%s1236_s1 + $0x38] sm:$0xff] }
  0x2c   : > { %v380_v51 = vadd.f32 %v379_v49, %v378_v50  ;;  %v638_v49 = vld [vmem:[%s1236_s1 + $0x40] sm:$0xff]  ;;  %v639_v50 = vld [vmem:[%s1236_s1 + $0x48] sm:$0xff] }
  0x2e   : > { %v381_v52 = vrot.slane %v380_v51, 4 }
  0x30   : > { %v382_v53 = vadd.f32 %v381_v52, %v380_v51  ;;  %v640_v51 = vld [vmem:[%s1236_s1 + $0x50] sm:$0xff]  ;;  %v641_v52 = vld [vmem:[%s1236_s1 + $0x58] sm:$0xff] }
  0x32   : > { %v383_v54 = vrot.slane %v382_v53, 2 }
  0x34   : > { %v384_v55 = vadd.f32 %v383_v54, %v382_v53  ;;  %v642_v53 = vld [vmem:[%s1236_s1 + $0x60] sm:$0xff] }
  0x36   : > { %v385_v56 = vrot.slane %v384_v55, 1 }
  0x38   : > { %v386_v57 = vadd.f32 %v385_v56, %v384_v55  ;;  %v643_v55 = vld [vmem:[%s1236_s1 + $0x68] sm:$0xff]  ;;  %v644_v56 = vld [vmem:[%s1236_s1 + $0x70] sm:$0xff] }
  0x3a   : > { %v388_v58 = vmul.f32 0.0078125, %v386_v57  ;;  %v645_v57 = vld [vmem:[%s1236_s1 + $0x78] sm:$0xff] }
  0x3c   : > { %841 = vmatmul.mubr.msk.f32.vlgmr.msra.gmra.mxu0 %vm349_vm1, %v388_v58 }
  0xfc   : > { %v463_v62 = vpop.f32.mrf.mxu0 }
  0xfd   : > { %v464_v63 = vadd.f32 %v463_v62, %v393_v61 }
  0xfe   : > { %v842_v0 = vpop.f32.mrf.mxu0 }
  0xff   : > { %v467_v2 = vmax.f32 %v464_v63, 0.0 }
 0x101   : > { %848 = vmatmul.mubr.msk.f32.vlgmr.msra.gmra.mxu1 %vm471_vm2, %v467_v2 }
 0x102   : > { %851 = vmatpush3.msra.mxu1 %v546_v3  ;;  %854 = vmatprep.mubr.msk.f32.mxu1 %vm884_vm0, %v883_v1 }
 0x103   : > { %852 = vmatprep.subr.mxu1 %v883_v1 }
 0x104   : > { %853 = vmatpush3.msra.mxu1 %v545_v4 }
 0x105   : > { %855 = vmatmul.mubr.msk.f32.vlgmr.msra.gmra.mxu1 %vm471_vm2, %v467_v2 }
 0x1c1   : > { %v541_v10 = vpop.f32.mrf.mxu1 }
 0x1c2   : > { %v542_v11 = vadd.f32 %v541_v10, %v470_v9 }
 0x1c3   : > { %v849_v13 = vpop.f32.mrf.mxu1 }
 0x1c4   : > { %v618_v16 = vsub.f32 0.0, %v542_v11 }
 0x1c5   : > { %v614_v17 = vpop.f32.mrf.mxu1 }
 0x1c6   : > { %v619_v19 = vmul.f32 1.442695, %v618_v16  ;;  %v615_v20 = vadd.f32 %v614_v17, %v547_v14 }
 0x1c7   : > { %v856_v22 = vpop.f32.mrf.mxu1 }
 0x1c8   : > { %867 = vpow2.f32 %v619_v19  ;;  %v624_v1 = vsub.f32 0.0, %v615_v20  ;;  %v682_v19 = vld [vmem:[%s1237_s2] sm:$0xff] }
 0x1ca   : > { %v625_v23 = vmul.f32 1.442695, %v624_v1 }
 0x1cc   : > { %869 = vpow2.f32 %v625_v23 }
 0x1d5   : > { %v868_v25 = vpop.eup %867 }
 0x1d6   : > { %v621_v26 = vadd.f32 1.0, %v868_v25  ;;  %v683_v25 = vld [vmem:[%s1237_s2 + $0x8] sm:$0xff] }
 0x1d8   : > { %871 = vrcp.f32 %v621_v26  ;;  %v685_v26 = vld [vmem:[%s1237_s2 + $0x18] sm:$0xff] }
 0x1d9   : > { %v870_v28 = vpop.eup %869 }
 0x1da   : > { %v627_v31 = vadd.f32 1.0, %v870_v28  ;;  %v686_v28 = vld [vmem:[%s1237_s2 + $0x20] sm:$0xff] }
 0x1dc   : > { %873 = vrcp.f32 %v627_v31  ;;  %v688_v31 = vld [vmem:[%s1237_s2 + $0x30] sm:$0xff] }
 0x1e5   : > { %v872_v35 = vpop.eup %871 }
 0x1e6   : > { %v649_v43 = vrot.slane %v872_v35, %v648_v34  ;;  %v691_v35 = vld [vmem:[%s1237_s2 + $0x48] sm:$0xff] }
 0x1e8   : > { %v650_v54 = vmul.f32 %v649_v43, %v630_v37  ;;  %v651_v58 = vmul.f32 %v649_v43, %v631_v38  ;;  %v652_v59 = vmul.f32 %v649_v43, %v632_v40  ;;  %v653_v60 = vmul.f32 %v649_v43, %v633_v41  ;;  %v692_v40 = vld [vmem:[%s1237_s2 + $0x50] sm:$0xff]  ;;  %v693_v41 = vld [vmem:[%s1237_s2 + $0x58] sm:$0xff] }
 0x1e9   : > { %v654_v61 = vmul.f32 %v649_v43, %v634_v44  ;;  %v655_v62 = vmul.f32 %v649_v43, %v635_v46  ;;  %v656_v63 = vmul.f32 %v649_v43, %v636_v47  ;;  %v657_v0 = vmul.f32 %v649_v43, %v637_v48  ;;  %v874_v11 = vpop.eup %873 }
 0x1ea   : > { %v658_v2 = vmul.f32 %v649_v43, %v638_v49  ;;  %v659_v3 = vmul.f32 %v649_v43, %v639_v50  ;;  %v660_v4 = vmul.f32 %v649_v43, %v640_v51  ;;  %v661_v9 = vmul.f32 %v649_v43, %v641_v52 }
 0x1eb   : > { %v662_v10 = vmul.f32 %v649_v43, %v642_v53  ;;  %v663_v13 = vmul.f32 %v649_v43, %v643_v55  ;;  %v664_v14 = vmul.f32 %v649_v43, %v644_v56  ;;  %v665_v16 = vmul.f32 %v649_v43, %v645_v57 }
 0x1ec   : > { %v666_v17 = vadd.f32 %v650_v54, %v974_v5  ;;  %v667_v20 = vadd.f32 %v651_v58, %v977_v6  ;;  %v668_v22 = vadd.f32 %v652_v59, %v980_v7  ;;  %v669_v1 = vadd.f32 %v653_v60, %v984_v8  ;;  %v684_v5 = vld [vmem:[%s1237_s2 + $0x10] sm:$0xff] }
 0x1ed   : > { %v670_v23 = vadd.f32 %v654_v61, %v993_v12  ;;  %v671_v6 = vadd.f32 %v655_v62, %v998_v15  ;;  %v672_v7 = vadd.f32 %v656_v63, %v1003_v18  ;;  %v673_v8 = vadd.f32 %v657_v0, %v1008_v21 }
 0x1ee   : > { %v674_v12 = vadd.f32 %v658_v2, %v1013_v24  ;;  %v675_v15 = vadd.f32 %v659_v3, %v1018_v27  ;;  %v676_v18 = vadd.f32 %v660_v4, %v1023_v30  ;;  %v677_v21 = vadd.f32 %v661_v9, %v1028_v33  ;;  %v689_v24 = vld [vmem:[%s1237_s2 + $0x38] sm:$0xff] }
 0x1ef   : > { %v701_v37 = vrot.slane %v874_v11, %v648_v34  ;;  %v678_v38 = vadd.f32 %v662_v10, %v1033_v36  ;;  %v679_v27 = vadd.f32 %v663_v13, %v1038_v39  ;;  %v680_v30 = vadd.f32 %v664_v14, %v1043_v42  ;;  %v694_v34 = vld [vmem:[%s1237_s2 + $0x60] sm:$0xff]  ;;  %v695_v36 = vld [vmem:[%s1237_s2 + $0x68] sm:$0xff]  ;;  %v696_v39 = vld [vmem:[%s1237_s2 + $0x70] sm:$0xff] }
 0x1f0   : > { %v681_v33 = vadd.f32 %v665_v16, %v1048_v45  ;;  %v697_v42 = vld [vmem:[%s1237_s2 + $0x78] sm:$0xff] }
 0x1f1   : > { %v702_v45 = vmul.f32 %v701_v37, %v682_v19  ;;  %v703_v43 = vmul.f32 %v701_v37, %v683_v25  ;;  %v704_v44 = vmul.f32 %v701_v37, %v684_v5  ;;  %v705_v46 = vmul.f32 %v701_v37, %v685_v26 }
 0x1f2   : > { %v706_v47 = vmul.f32 %v701_v37, %v686_v28  ;;  %v707_v48 = vmul.f32 %v701_v37, %v687_v29  ;;  %v708_v49 = vmul.f32 %v701_v37, %v688_v31  ;;  %v709_v50 = vmul.f32 %v701_v37, %v689_v24 }
 0x1f3   : > { %v710_v51 = vmul.f32 %v701_v37, %v690_v32  ;;  %v711_v52 = vmul.f32 %v701_v37, %v691_v35  ;;  %v712_v53 = vmul.f32 %v701_v37, %v692_v40  ;;  %v713_v54 = vmul.f32 %v701_v37, %v693_v41 }
 0x1f4   : > { %v714_v55 = vmul.f32 %v701_v37, %v694_v34  ;;  %v715_v56 = vmul.f32 %v701_v37, %v695_v36  ;;  %v716_v57 = vmul.f32 %v701_v37, %v696_v39  ;;  %v717_v58 = vmul.f32 %v701_v37, %v697_v42 }
 0x1f5   : > { %v718_v59 = vadd.f32 %v702_v45, %v666_v17  ;;  %v719_v60 = vadd.f32 %v703_v43, %v667_v20  ;;  %v720_v61 = vadd.f32 %v704_v44, %v668_v22  ;;  %v721_v62 = vadd.f32 %v705_v46, %v669_v1 }
 0x1f6   : > { %v722_v63 = vadd.f32 %v706_v47, %v670_v23  ;;  %v723_v0 = vadd.f32 %v707_v48, %v671_v6  ;;  %v724_v2 = vadd.f32 %v708_v49, %v672_v7  ;;  %v725_v3 = vadd.f32 %v709_v50, %v673_v8 }
 0x1f7   : > { %v726_v4 = vadd.f32 %v710_v51, %v674_v12  ;;  %v727_v9 = vadd.f32 %v711_v52, %v675_v15  ;;  %v728_v10 = vadd.f32 %v712_v53, %v676_v18  ;;  %v729_v11 = vadd.f32 %v713_v54, %v677_v21  ;;  %734 = vst.msk [vmem:[%s1198_s12] sm:$0xff] %vm349_vm1, %v718_v59 }
 0x1f8   : > { %735 = vst.msk [vmem:[%s1198_s12 + $0x8] sm:$0xff] %vm349_vm1, %v719_v60  ;;  %736 = vst.msk [vmem:[%s1198_s12 + $0x10] sm:$0xff] %vm349_vm1, %v720_v61  ;;  %v730_v13 = vadd.f32 %v714_v55, %v678_v38  ;;  %v731_v14 = vadd.f32 %v715_v56, %v679_v27  ;;  %v732_v16 = vadd.f32 %v716_v57, %v680_v30 }
 0x1f9   : > { %737 = vst.msk [vmem:[%s1198_s12 + $0x18] sm:$0xff] %vm349_vm1, %v721_v62  ;;  %v733_v17 = vadd.f32 %v717_v58, %v681_v33  ;;  %738 = vst.msk [vmem:[%s1198_s12 + $0x20] sm:$0xff] %vm349_vm1, %v722_v63 }
 0x1fa   : > { %739 = vst.msk [vmem:[%s1198_s12 + $0x28] sm:$0xff] %vm349_vm1, %v723_v0  ;;  %740 = vst.msk [vmem:[%s1198_s12 + $0x30] sm:$0xff] %vm349_vm1, %v724_v2 }
 0x1fb   : > { %741 = vst.msk [vmem:[%s1198_s12 + $0x38] sm:$0xff] %vm349_vm1, %v725_v3  ;;  %742 = vst.msk [vmem:[%s1198_s12 + $0x40] sm:$0xff] %vm349_vm1, %v726_v4 }
 0x1fc   : > { %743 = vst.msk [vmem:[%s1198_s12 + $0x48] sm:$0xff] %vm349_vm1, %v727_v9  ;;  %744 = vst.msk [vmem:[%s1198_s12 + $0x50] sm:$0xff] %vm349_vm1, %v728_v10 }
 0x1fd   : > { %745 = vst.msk [vmem:[%s1198_s12 + $0x58] sm:$0xff] %vm349_vm1, %v729_v11  ;;  %746 = vst.msk [vmem:[%s1198_s12 + $0x60] sm:$0xff] %vm349_vm1, %v730_v13 }
 0x1fe   : > { %747 = vst.msk [vmem:[%s1198_s12 + $0x68] sm:$0xff] %vm349_vm1, %v731_v14  ;;  %748 = vst.msk [vmem:[%s1198_s12 + $0x70] sm:$0xff] %vm349_vm1, %v732_v16 }
 0x1ff   : > { %749 = vst.msk [vmem:[%s1198_s12 + $0x78] sm:$0xff] %vm349_vm1, %v733_v17 }
 0x200 PF: > { %s19_s30 = sadd.s32 1, %s881_s30  }
 0x201   : > { %p16_p4 = scmp.ge.s32.totalorder %s19_s30, 4  }
 0x203   :  { %18 = sbr.rel (!%p16_p4) target bundleno = 1 (0x1), region = 86 }

// kernel: satrn_encoder_forward.7
= control target key start
LH: loop header
LB: loop body
LE: loop exit
PB: predicated region body
PF: predicated region fallthrough
CT: control target
= control target key end

     0   :  { %s1852_s21 = smov 0   ;;  %s2544_s0 = inlined_call_operand.vmem [shape: f32[2,8,16,32], index: 0, kind: input, shape index: {}]   ;;  %s2545_s1 = inlined_call_operand.vmem [shape: f32[2,8,16,32], index: 1, kind: input, shape index: {}]   ;;  %s2546_s2 = inlined_call_operand.vmem [shape: bf16[32,64], index: 2, kind: input, shape index: {}]   ;;  %s2547_s3 = inlined_call_operand.vmem [shape: f32[1,64], index: 3, kind: input, shape index: {}]   ;;  %s2548_s4 = inlined_call_operand.vmem [shape: f32[1,64], index: 4, kind: input, shape index: {}]   ;;  %s2549_s5 = inlined_call_operand.vmem [shape: f32[9,1,64], index: 5, kind: input, shape index: {}]   ;;  %s2550_s6 = inlined_call_operand.vmem [shape: f32[1,64], index: 6, kind: input, shape index: {}]   ;;  %s2551_s7 = inlined_call_operand.vmem [shape: f32[1,64], index: 7, kind: input, shape index: {}]   ;;  %s2552_s8 = inlined_call_operand.vmem [shape: f32[1,64], index: 8, kind: input, shape index: {}]   ;;  %s2553_s9 = inlined_call_operand.vmem [shape: bf16[64,32], index: 9, kind: input, shape index: {}]   ;;  %s2554_s10 = inlined_call_operand.vmem [shape: f32[1,32], index: 10, kind: input, shape index: {}]   ;;  %s2555_s11 = inlined_call_operand.vmem [shape: f32[1,32], index: 11, kind: input, shape index: {}]   ;;  %s2556_s12 = inlined_call_operand.vmem [shape: f32[2,8,16,32], index: 12, kind: output, shape index: {}]  }
   0x1 LB: > { %s1635_s22 = sadd.s32 4294967295, %s1784_s21   ;;  %p1639_p0 = scmp.ge.s32.totalorder %s1784_s21, 1  ;;  %s1784_s21 = sphi %s1852_s21, %s22_s21  }
   0x2   : > { %p372_p1 = scmp.lt.s32.totalorder %s1784_s21, 3 }
   0x4   : > { %p373_p2 = pnand %p1639_p0, %p372_p1 }
   0x5   : > { %p419_p3 = scmp.lt.s32.totalorder (!%p373_p2), %s1635_s22, 1 }
   0x6   : > { %376 = sbr.rel (%p373_p2) target bundleno = 539 (0x21b), region = 68 }
   0xb   : > { %v1772_v0 = vld [vmem:[%s2546_s2 + $0x8] sm:$0xff]   ;;  %v1773_v1 = vld [vmem:[%s2546_s2] sm:$0xff]   ;;  %s2558_s22 = smov (!%p419_p3, %s1635_s22), 1  ;;  %vm475_vm0 = vcmask 261120   ;;  %vm659_vm1 = vcmask 523264   ;;  %v1786_v26 = vmov 0.0  }
   0xc   : > { %1719 = vmatprep.subr.bf16.mxu0 %v1772_v0  ;;  %s1866_s27 = sshll.u32 %s2558_s22, 7  ;;  %667 = vst.msk [vmem:[#allocation2 + $0x30] sm:$0xff] %vm659_vm1, %v1786_v26  ;;  %668 = vst.msk [vmem:[#allocation2 + $0x38] sm:$0xff] %vm659_vm1, %v1786_v26  ;;  %vm662_vm2 = vcmask 517120   ;;  %v1774_v27 = vld [vmem:[%s2553_s9 + $0x18] sm:$0xff]   ;;  %v1775_v28 = vld [vmem:[%s2553_s9 + $0x10] sm:$0xff]  }
   0xd   : > { %1720 = vmatpush3.bf16.msra.mxu0 %v1772_v0  ;;  %s1872_s30 = scalar_lea.vmem %s2544_s0, %s1866_s27  ;;  %660 = vst.msk [vmem:[#allocation2] sm:$0xff] %vm659_vm1, %v1786_v26  ;;  %661 = vst.msk [vmem:[#allocation2 + $0x8] sm:$0xff] %vm659_vm1, %v1786_v26  ;;  %1739 = vmatprep.subr.bf16.mxu1 %v1774_v27  ;;  %v1776_v29 = vld [vmem:[%s2553_s9 + $0x8] sm:$0xff]   ;;  %v1777_v30 = vld [vmem:[%s2553_s9] sm:$0xff]   ;;  %s2453_s24 = scalar_lea.vmem %s2545_s1, %s1866_s27 }
   0xe   : > { %1721 = vmatprep.subr.bf16.mxu0 %v1773_v1  ;;  %v435_v2 = vld [vmem:[%s1872_s30] sm:$0xff]  ;;  %v436_v3 = vld [vmem:[%s1872_s30 + $0x8] sm:$0xff]  ;;  %v437_v4 = vld [vmem:[%s1872_s30 + $0x10] sm:$0xff]  ;;  %664 = vst.msk [vmem:[#allocation2 + $0x18] sm:$0xff] %vm659_vm1, %v1786_v26  ;;  %1740 = vmatpush3.bf16.msra.mxu1 %v1774_v27  ;;  %s2465_s28 = scalar_lea.vmem %s2556_s12, %s1866_s27 }
   0xf   : > { %v451_v5 = vpack.c.bf16 %v436_v3, %v435_v2  ;;  %v438_v6 = vld [vmem:[%s1872_s30 + $0x18] sm:$0xff]  ;;  %v439_v7 = vld [vmem:[%s1872_s30 + $0x20] sm:$0xff]  ;;  %v440_v8 = vld [vmem:[%s1872_s30 + $0x28] sm:$0xff]  ;;  %665 = vst.msk [vmem:[#allocation2 + $0x20] sm:$0xff] %vm659_vm1, %v1786_v26  ;;  %1741 = vmatprep.subr.bf16.mxu1 %v1775_v28 }
  0x10   : > { %v452_v9 = vpack.c.bf16 %v438_v6, %v437_v4  ;;  %v453_v10 = vpack.c.bf16 %v440_v8, %v439_v7  ;;  %v441_v11 = vld [vmem:[%s1872_s30 + $0x30] sm:$0xff]  ;;  %v442_v12 = vld [vmem:[%s1872_s30 + $0x38] sm:$0xff]  ;;  %v443_v13 = vld [vmem:[%s1872_s30 + $0x40] sm:$0xff]  ;;  %670 = vst.msk [vmem:[#allocation2 + $0x48] sm:$0xff] %vm659_vm1, %v1786_v26 }
  0x11   : > { %1722 = vmatpush3.bf16.msra.mxu0 %v1773_v1  ;;  %1723 = vmatprep.mubr.msk.bf16.mxu0 %vm475_vm0, %v451_v5  ;;  %v444_v14 = vld [vmem:[%s1872_s30 + $0x48] sm:$0xff]  ;;  %v454_v15 = vpack.c.bf16 %v442_v12, %v441_v11  ;;  %v445_v17 = vld [vmem:[%s1872_s30 + $0x50] sm:$0xff]  ;;  %v446_v18 = vld [vmem:[%s1872_s30 + $0x58] sm:$0xff]  ;;  %671 = vst.msk [vmem:[#allocation2 + $0x50] sm:$0xff] %vm659_vm1, %v1786_v26 }
  0x12   : > { %v455_v16 = vpack.c.bf16 %v444_v14, %v443_v13  ;;  %v447_v19 = vld [vmem:[%s1872_s30 + $0x60] sm:$0xff]  ;;  %v448_v20 = vld [vmem:[%s1872_s30 + $0x68] sm:$0xff]  ;;  %v456_v21 = vpack.c.bf16 %v446_v18, %v445_v17  ;;  %v449_v23 = vld [vmem:[%s1872_s30 + $0x70] sm:$0xff]  ;;  %673 = vst.msk [vmem:[#allocation2 + $0x60] sm:$0xff] %vm659_vm1, %v1786_v26  ;;  %1742 = vmatpush3.bf16.msra.mxu1 %v1775_v28 }
  0x13   : > { %v457_v22 = vpack.c.bf16 %v448_v20, %v447_v19  ;;  %v450_v24 = vld [vmem:[%s1872_s30 + $0x78] sm:$0xff]  ;;  %674 = vst.msk [vmem:[#allocation2 + $0x68] sm:$0xff] %vm659_vm1, %v1786_v26  ;;  %676 = vst.msk [vmem:[#allocation2 + $0x78] sm:$0xff] %vm659_vm1, %v1786_v26  ;;  %1743 = vmatprep.subr.bf16.mxu1 %v1776_v29  ;;  %v1933_v31 = vld [vmem:[%s2547_s3] ss:$0 sm:$0xff] }
  0x14   : > { %1724 = vmatmul.mubr.msk.bf16.vlgmr.msra.gmra.mxu0 %vm475_vm0, %v452_v9  ;;  %v458_v25 = vpack.c.bf16 %v450_v24, %v449_v23  ;;  %677 = vst.msk [vmem:[#allocation2 + $0x80] sm:$0xff] %vm659_vm1, %v1786_v26  ;;  %679 = vst.msk [vmem:[#allocation2 + $0x90] sm:$0xff] %vm659_vm1, %v1786_v26  ;;  %v1938_v33 = vld [vmem:[%s2548_s4] ss:$0 sm:$0xff]  ;;  %v763_v38 = vld [vmem:[#allocation2 + $0x1] sm:$0xff] }
  0x15   : > { %1727 = vmatprep.mubr.msk.bf16.mxu0 %vm475_vm0, %v453_v10  ;;  %680 = vst.msk [vmem:[#allocation2 + $0x98] sm:$0xff] %vm659_vm1, %v1786_v26  ;;  %682 = vst.msk [vmem:[#allocation2 + $0xa8] sm:$0xff] %vm659_vm1, %v1786_v26  ;;  %v708_v36 = vld [vmem:[#allocation2] sm:$0xff]  ;;  %v709_v41 = vld [vmem:[#allocation2 + $0x8] sm:$0xff] }
  0x16   : > { %683 = vst.msk [vmem:[#allocation2 + $0xb0] sm:$0xff] %vm659_vm1, %v1786_v26  ;;  %685 = vst.msk [vmem:[#allocation2 + $0xc0] sm:$0xff] %vm659_vm1, %v1786_v26  ;;  %1744 = vmatpush3.bf16.msra.mxu1 %v1776_v29  ;;  %v1944_v37 = vld [vmem:[%s2549_s5] ss:$0 sm:$0xff]  ;;  %v1951_v43 = vld [vmem:[%s2549_s5 + $0x1] ss:$0 sm:$0xff] }
  0x17   : > { %686 = vst.msk [vmem:[#allocation2 + $0xc8] sm:$0xff] %vm659_vm1, %v1786_v26  ;;  %688 = vst.msk [vmem:[#allocation2 + $0xd8] sm:$0xff] %vm659_vm1, %v1786_v26  ;;  %1745 = vmatprep.subr.bf16.mxu1 %v1777_v30  ;;  %v731_v49 = vmul.f32 %v1944_v37, %v708_v36  ;;  %v732_v50 = vmul.f32 %v1944_v37, %v709_v41  ;;  %v787_v51 = vmul.f32 %v1951_v43, %v763_v38  ;;  %v819_v56 = vld [vmem:[#allocation2 + $0x2] sm:$0xff] }
  0x18   : > { %689 = vst.msk [vmem:[#allocation2 + $0xe0] sm:$0xff] %vm659_vm1, %v1786_v26  ;;  %v1965_v58 = vld [vmem:[%s2549_s5 + $0x2] ss:$0 sm:$0xff]  ;;  %v1978_v8 = vld [vmem:[%s2549_s5 + $0x3] ss:$0 sm:$0xff] }
  0x19   : > { %669 = vst.msk [vmem:[#allocation2 + $0x40] sm:$0x3] %vm662_vm2, %v1786_v26  ;;  %663 = vst.msk [vmem:[#allocation2 + $0x10] sm:$0x3] %vm662_vm2, %v1786_v26  ;;  %v803_v0 = vadd.f32 %v787_v51, %v731_v49  ;;  %v843_v2 = vmul.f32 %v1965_v58, %v819_v56  ;;  %v1983_v9 = vld [vmem:[%s2549_s5 + $0x6] ss:$0 sm:$0xff] }
  0x1a   : > { %666 = vst.msk [vmem:[#allocation2 + $0x28] sm:$0x3] %vm662_vm2, %v1786_v26  ;;  %672 = vst.msk [vmem:[#allocation2 + $0x58] sm:$0x3] %vm662_vm2, %v1786_v26  ;;  %1746 = vmatpush3.bf16.msra.mxu1 %v1777_v30  ;;  %v1991_v13 = vld [vmem:[%s2549_s5 + $0x4] ss:$0 sm:$0xff] }
  0x1b   : > { %675 = vst.msk [vmem:[#allocation2 + $0x70] sm:$0x3] %vm662_vm2, %v1786_v26  ;;  %678 = vst.msk [vmem:[#allocation2 + $0x88] sm:$0x3] %vm662_vm2, %v1786_v26  ;;  %v1996_v14 = vld [vmem:[%s2549_s5 + $0x7] ss:$0 sm:$0xff] }
  0x1c   : > { %1728 = vmatmul.mubr.msk.bf16.gmra.mxu0 %vm475_vm0, %v454_v15  ;;  %681 = vst.msk [vmem:[#allocation2 + $0xa0] sm:$0x3] %vm662_vm2, %v1786_v26  ;;  %684 = vst.msk [vmem:[#allocation2 + $0xb8] sm:$0x3] %vm662_vm2, %v1786_v26  ;;  %v2023_v38 = vld [vmem:[%s2549_s5 + $0x8] ss:$0 sm:$0xff] }
  0x1d   : > { %1731 = vmatprep.mubr.msk.bf16.mxu0 %vm475_vm0, %v455_v16  ;;  %687 = vst.msk [vmem:[#allocation2 + $0xd0] sm:$0x3] %vm662_vm2, %v1786_v26  ;;  %690 = vst.msk [vmem:[#allocation2 + $0xe8] sm:$0x3] %vm662_vm2, %v1786_v26  ;;  %v859_v16 = vadd.f32 %v843_v2, %v803_v0 }
  0x20   : > { %v764_v42 = vld [vmem:[#allocation2 + $0x9] sm:$0xff] }
  0x21   : > { %v788_v52 = vmul.f32 %v1951_v43, %v764_v42  ;;  %v820_v57 = vld [vmem:[#allocation2 + $0xa] sm:$0xff] }
  0x22   : > { %v844_v3 = vmul.f32 %v1965_v58, %v820_v57 }
  0x23   : > { %v804_v1 = vadd.f32 %v788_v52, %v732_v50 }
  0x24   : > { %1732 = vmatmul.mubr.msk.bf16.gmra.mxu0 %vm475_vm0, %v456_v21 }
  0x25   : > { %1735 = vmatprep.mubr.msk.bf16.mxu0 %vm475_vm0, %v457_v22  ;;  %v860_v17 = vadd.f32 %v844_v3, %v804_v1  ;;  %v2059_v3 = vld [vmem:[%s2549_s5 + $0x5] ss:$0 sm:$0xff] }
  0x2c   : > { %1736 = vmatmul.mubr.msk.bf16.gmra.mxu0 %vm475_vm0, %v458_v25 }
  0xd4   : > { %v1725_v32 = vpop.f32.mrf.mxu0 }
  0xd5   : > { %v606_v34 = vmul.f32 %v1725_v32, %v1933_v31 }
  0xd6   : > { %v534_v35 = vpop.f32.mrf.mxu0 }
  0xd7   : > { %v629_v39 = vadd.f32 %v1938_v33, %v606_v34  ;;  %v604_v40 = vmul.f32 %v1933_v31, %v534_v35 }
  0xd8   : > { %v1726_v44 = vpop.f32.mrf.mxu0 }
  0xd9   : > { %v645_v45 = vmax.f32 %v629_v39, 0.0  ;;  %v627_v46 = vadd.f32 %v1938_v33, %v604_v40  ;;  %v607_v47 = vmul.f32 %v1726_v44, %v1933_v31 }
  0xda   : > { %v537_v48 = vpop.f32.mrf.mxu0 }
  0xdb   : > { %694 = vst.msk [vmem:[#allocation2 + $0x31] sm:$0xff] %vm659_vm1, %v645_v45  ;;  %v643_v53 = vmax.f32 %v627_v46, 0.0  ;;  %v630_v54 = vadd.f32 %v1938_v33, %v607_v47  ;;  %v605_v55 = vmul.f32 %v1933_v31, %v537_v48 }
  0xdc   : > { %v1729_v59 = vpop.f32.mrf.mxu0 }
  0xdd   : > { %692 = vst.msk [vmem:[#allocation2 + $0x19] sm:$0xff] %vm659_vm1, %v643_v53  ;;  %v646_v60 = vmax.f32 %v630_v54, 0.0  ;;  %v628_v61 = vadd.f32 %v1938_v33, %v605_v55  ;;  %v610_v62 = vmul.f32 %v1729_v59, %v1933_v31 }
  0xde   : > { %v550_v63 = vpop.f32.mrf.mxu0 }
  0xdf   : > { %695 = vst.msk [vmem:[#allocation2 + $0x39] sm:$0xff] %vm659_vm1, %v646_v60  ;;  %v644_v4 = vmax.f32 %v628_v61, 0.0  ;;  %v633_v5 = vadd.f32 %v1938_v33, %v610_v62  ;;  %v608_v6 = vmul.f32 %v1933_v31, %v550_v63 }
  0xe0   : > { %v1730_v7 = vpop.f32.mrf.mxu0 }
  0xe1   : > { %693 = vst.msk [vmem:[#allocation2 + $0x21] sm:$0xff] %vm659_vm1, %v644_v4  ;;  %v649_v10 = vmax.f32 %v633_v5, 0.0  ;;  %v631_v11 = vadd.f32 %v1938_v33, %v608_v6  ;;  %v611_v12 = vmul.f32 %v1730_v7, %v1933_v31 }
  0xe2   : > { %v553_v15 = vpop.f32.mrf.mxu0  ;;  %v1044_v18 = vld [vmem:[#allocation2 + $0x30] sm:$0xff] }
  0xe3   : > { %v1100_v19 = vld [vmem:[#allocation2 + $0x31] sm:$0xff]  ;;  %698 = vst.msk [vmem:[#allocation2 + $0x61] sm:$0xff] %vm659_vm1, %v649_v10  ;;  %v647_v20 = vmax.f32 %v631_v11, 0.0  ;;  %v634_v21 = vadd.f32 %v1938_v33, %v611_v12  ;;  %v609_v22 = vmul.f32 %v1933_v31, %v553_v15  ;;  %v2002_v23 = vmul.f32 %v1983_v9, %v1044_v18 }
  0xe4   : > { %v1733_v24 = vpop.f32.mrf.mxu0  ;;  %v875_v25 = vld [vmem:[#allocation2 + $0x18] sm:$0xff]  ;;  %v2005_v27 = vmul.f32 %v1996_v14, %v1100_v19  ;;  %v2008_v28 = vmul.f32 %v1978_v8, %v1044_v18  ;;  %v2011_v29 = vmul.f32 %v1991_v13, %v1100_v19  ;;  %v2014_v30 = vmul.f32 %v1944_v37, %v1044_v18 }
  0xe5   : > { %v931_v26 = vld [vmem:[#allocation2 + $0x19] sm:$0xff]  ;;  %696 = vst.msk [vmem:[#allocation2 + $0x49] sm:$0xff] %vm659_vm1, %v647_v20  ;;  %v650_v32 = vmax.f32 %v634_v21, 0.0  ;;  %v632_v34 = vadd.f32 %v1938_v33, %v609_v22  ;;  %v614_v35 = vmul.f32 %v1733_v24, %v1933_v31  ;;  %v899_v36 = vmul.f32 %v1978_v8, %v875_v25 }
  0xe6   : > { %v566_v39 = vpop.f32.mrf.mxu0  ;;  %v955_v40 = vmul.f32 %v1991_v13, %v931_v26  ;;  %v2026_v41 = vld [vmem:[#allocation2 + $0x38] sm:$0xff]  ;;  %v733_v45 = vmul.f32 %v1944_v37, %v875_v25  ;;  %v789_v46 = vmul.f32 %v1951_v43, %v931_v26  ;;  %v2035_v47 = vmul.f32 %v1951_v43, %v1100_v19 }
  0xe7   : > { %v2028_v42 = vld [vmem:[#allocation2 + $0x39] sm:$0xff]  ;;  %699 = vst.msk [vmem:[#allocation2 + $0x69] sm:$0xff] %vm659_vm1, %v650_v32  ;;  %v648_v48 = vmax.f32 %v632_v34, 0.0  ;;  %v637_v49 = vadd.f32 %v1938_v33, %v614_v35  ;;  %v612_v50 = vmul.f32 %v1933_v31, %v566_v39  ;;  %v915_v51 = vadd.f32 %v899_v36, %v859_v16 }
  0xe8   : > { %v2030_v44 = vld [vmem:[#allocation2 + $0x32] sm:$0xff]  ;;  %v2040_v52 = vld [vmem:[#allocation2 + $0x3a] sm:$0xff]  ;;  %v1734_v53 = vpop.f32.mrf.mxu0  ;;  %v1069_v57 = vmul.f32 %v1983_v9, %v2026_v41  ;;  %v1125_v59 = vmul.f32 %v1996_v14, %v2028_v42  ;;  %v988_v2 = vld [vmem:[#allocation2 + $0x22] sm:$0xff]  ;;  %v805_v22 = vadd.f32 %v789_v46, %v733_v45 }
  0xe9   : > { %v876_v54 = vld [vmem:[#allocation2 + $0x20] sm:$0xff]  ;;  %v1180_v60 = vmul.f32 %v2023_v38, %v2030_v44  ;;  %v2050_v61 = vmul.f32 %v2023_v38, %v2040_v52  ;;  %697 = vst.msk [vmem:[#allocation2 + $0x51] sm:$0xff] %vm659_vm1, %v648_v48  ;;  %v653_v62 = vmax.f32 %v637_v49, 0.0  ;;  %v635_v63 = vadd.f32 %v1938_v33, %v612_v50 }
  0xea   : > { %v932_v55 = vld [vmem:[#allocation2 + $0x21] sm:$0xff]  ;;  %v615_v0 = vmul.f32 %v1734_v53, %v1933_v31  ;;  %v900_v1 = vmul.f32 %v1978_v8, %v876_v54  ;;  %v569_v4 = vpop.f32.mrf.mxu0  ;;  %v971_v6 = vadd.f32 %v955_v40, %v915_v51  ;;  %v1012_v10 = vmul.f32 %v2059_v3, %v988_v2 }
  0xeb   : > { %v987_v56 = vld [vmem:[#allocation2 + $0x1a] sm:$0xff]  ;;  %v956_v5 = vmul.f32 %v1991_v13, %v932_v55  ;;  %702 = vst.msk [vmem:[#allocation2 + $0x91] sm:$0xff] %vm659_vm1, %v653_v62  ;;  %v651_v11 = vmax.f32 %v635_v63, 0.0  ;;  %v613_v15 = vmul.f32 %v1933_v31, %v569_v4  ;;  %v734_v20 = vmul.f32 %v1944_v37, %v876_v54 }
  0xec   : > { %v1011_v7 = vmul.f32 %v2059_v3, %v987_v56  ;;  %v638_v12 = vadd.f32 %v1938_v33, %v615_v0  ;;  %v916_v16 = vadd.f32 %v900_v1, %v860_v17  ;;  %v1737_v18 = vpop.f32.mrf.mxu0  ;;  %v790_v21 = vmul.f32 %v1951_v43, %v932_v55  ;;  %v2087_v63 = vld [vmem:[%s2550_s6] ss:$0 sm:$0xff] }
  0xed   : > { %700 = vst.msk [vmem:[#allocation2 + $0x79] sm:$0xff] %vm659_vm1, %v651_v11  ;;  %v636_v25 = vadd.f32 %v1938_v33, %v613_v15  ;;  %v618_v26 = vmul.f32 %v1737_v18, %v1933_v31  ;;  %v845_v17 = vmul.f32 %v1965_v58, %v987_v56  ;;  %v846_v39 = vmul.f32 %v1965_v58, %v988_v2  ;;  %v2108_v18 = vld [vmem:[#allocation2 + $0x49] sm:$0xff] }
  0xee   : > { %v1027_v19 = vadd.f32 %v1011_v7, %v971_v6  ;;  %v654_v24 = vmax.f32 %v638_v12, 0.0  ;;  %v972_v32 = vadd.f32 %v956_v5, %v916_v16  ;;  %v582_v34 = vpop.f32.mrf.mxu0  ;;  %v806_v36 = vadd.f32 %v790_v21, %v734_v20  ;;  %v2116_v20 = vld [vmem:[%s2552_s8] ss:$0 sm:$0xff] }
  0xef   : > { %v652_v40 = vmax.f32 %v636_v25, 0.0  ;;  %v641_v45 = vadd.f32 %v1938_v33, %v618_v26  ;;  %v616_v46 = vmul.f32 %v1933_v31, %v582_v34  ;;  %v861_v51 = vadd.f32 %v845_v17, %v805_v22 }
  0xf0   : > { %v1084_v35 = vadd.f32 %v2002_v23, %v1027_v19  ;;  %703 = vst.msk [vmem:[#allocation2 + $0x99] sm:$0xff] %vm659_vm1, %v654_v24  ;;  %v1028_v48 = vadd.f32 %v1012_v10, %v972_v32  ;;  %v1738_v49 = vpop.f32.mrf.mxu0  ;;  %v862_v53 = vadd.f32 %v846_v39, %v806_v36  ;;  %v902_v23 = vmul.f32 %v1978_v8, %v2026_v41  ;;  %v2098_v10 = vld [vmem:[%s2551_s7] ss:$0 sm:$0xff]  ;;  %v2120_v21 = vld [vmem:[#allocation2 + $0x51] sm:$0xff] }
  0xf1   : > { %701 = vst.msk [vmem:[#allocation2 + $0x81] sm:$0xff] %vm659_vm1, %v652_v40  ;;  %v657_v54 = vmax.f32 %v641_v45, 0.0  ;;  %v639_v55 = vadd.f32 %v1938_v33, %v616_v46  ;;  %v619_v56 = vmul.f32 %v1738_v49, %v1933_v31  ;;  %v917_v1 = vadd.f32 %v2008_v28, %v861_v51  ;;  %v2102_v28 = vld [vmem:[#allocation2 + $0x50] sm:$0xff] }
  0xf2   : > { %v1140_v50 = vadd.f32 %v2005_v27, %v1084_v35  ;;  %v1085_v62 = vadd.f32 %v1069_v57, %v1028_v48  ;;  %v585_v0 = vpop.f32.mrf.mxu0  ;;  %v918_v2 = vadd.f32 %v902_v23, %v862_v53  ;;  %v958_v4 = vmul.f32 %v1991_v13, %v2028_v42  ;;  %v2122_v22 = vld [vmem:[#allocation2 + $0x4a] sm:$0xff]  ;;  %v2129_v26 = vld [vmem:[#allocation2 + $0x52] sm:$0xff] }
  0xf3   : > { %706 = vst.msk [vmem:[#allocation2 + $0xc1] sm:$0xff] %vm659_vm1, %v657_v54  ;;  %v655_v5 = vmax.f32 %v639_v55, 0.0  ;;  %v642_v6 = vadd.f32 %v1938_v33, %v619_v56  ;;  %v617_v57 = vmul.f32 %v1933_v31, %v585_v0  ;;  %v973_v12 = vadd.f32 %v2011_v29, %v917_v1 }
  0xf4   : > { %v1196_v27 = vadd.f32 %v1180_v60, %v1140_v50  ;;  %v1141_v7 = vadd.f32 %v1125_v59, %v1085_v62  ;;  %v2100_v60 = vld [vmem:[#allocation2 + $0x48] sm:$0xff]  ;;  %v974_v15 = vadd.f32 %v958_v4, %v918_v2  ;;  %v1013_v16 = vmul.f32 %v2059_v3, %v2030_v44 }
  0xf5   : > { %704 = vst.msk [vmem:[#allocation2 + $0xa9] sm:$0xff] %vm659_vm1, %v655_v5  ;;  %v658_v31 = vmax.f32 %v642_v6, 0.0  ;;  %v640_v59 = vadd.f32 %v1938_v33, %v617_v57  ;;  %v1014_v29 = vmul.f32 %v2059_v3, %v2040_v52  ;;  %v1070_v33 = vmul.f32 %v1983_v9, %v2100_v60  ;;  %v2161_v5 = vld [vmem:[#allocation2 + $0x60] sm:$0xff] }
  0xf6   : > { %v1219_v11 = vadd.f32 %v2087_v63, %v1196_v27  ;;  %v1197_v19 = vadd.f32 %v2050_v61, %v1141_v7  ;;  %v1029_v25 = vadd.f32 %v1013_v16, %v973_v12  ;;  %v1071_v61 = vmul.f32 %v1983_v9, %v2102_v28  ;;  %v2172_v12 = vld [vmem:[#allocation2 + $0x69] sm:$0xff] }
  0xf7   : > { %707 = vst.msk [vmem:[#allocation2 + $0xc9] sm:$0xff] %vm659_vm1, %v658_v31  ;;  %v656_v32 = vmax.f32 %v640_v59, 0.0  ;;  %v1030_v35 = vadd.f32 %v1014_v29, %v974_v15  ;;  %v1126_v36 = vmul.f32 %v1996_v14, %v2108_v18  ;;  %v1127_v40 = vmul.f32 %v1996_v14, %v2120_v21  ;;  %v2179_v29 = vld [vmem:[#allocation2 + $0x6a] sm:$0xff] }
  0xf8   : > { %v1242_v24 = vmul.f32 %v2098_v10, %v1219_v11  ;;  %v1220_v34 = vadd.f32 %v2087_v63, %v1197_v19  ;;  %v1086_v39 = vadd.f32 %v1070_v33, %v1029_v25  ;;  %v1182_v45 = vmul.f32 %v2023_v38, %v2122_v22  ;;  %v2170_v11 = vld [vmem:[#allocation2 + $0x61] sm:$0xff] }
  0xf9   : > { %705 = vst.msk [vmem:[#allocation2 + $0xb1] sm:$0xff] %vm659_vm1, %v656_v32  ;;  %v1087_v48 = vadd.f32 %v1071_v61, %v1030_v35  ;;  %v1183_v49 = vmul.f32 %v2023_v38, %v2129_v26  ;;  %v736_v50 = vmul.f32 %v1944_v37, %v2026_v41  ;;  %v792_v23 = vmul.f32 %v1951_v43, %v2028_v42  ;;  %v2177_v19 = vld [vmem:[#allocation2 + $0x62] sm:$0xff] }
  0xfa   : > { %v1265_v17 = vadd.f32 %v2116_v20, %v1242_v24  ;;  %v1243_v46 = vmul.f32 %v2098_v10, %v1220_v34  ;;  %v1142_v53 = vadd.f32 %v1126_v36, %v1086_v39  ;;  %v807_v54 = vadd.f32 %v2035_v47, %v2014_v30 }
  0xfb   : > { %v1143_v56 = vadd.f32 %v1127_v40, %v1087_v48  ;;  %v847_v62 = vmul.f32 %v1965_v58, %v2030_v44  ;;  %v848_v0 = vmul.f32 %v1965_v58, %v2040_v52  ;;  %v808_v1 = vadd.f32 %v792_v23, %v736_v50  ;;  %v2163_v44 = vld [vmem:[#allocation2 + $0x68] sm:$0xff] }
  0xfc   : > { %v1281_v51 = vmax.f32 %v1265_v17, 0.0  ;;  %v1266_v55 = vadd.f32 %v2116_v20, %v1243_v46  ;;  %v1198_v27 = vadd.f32 %v1182_v45, %v1142_v53  ;;  %v903_v41 = vmul.f32 %v1978_v8, %v2100_v60 }
  0xfd   : > { %v904_v42 = vmul.f32 %v1978_v8, %v2102_v28  ;;  %v1199_v4 = vadd.f32 %v1183_v49, %v1143_v56  ;;  %v863_v30 = vadd.f32 %v847_v62, %v807_v54  ;;  %v959_v47 = vmul.f32 %v1991_v13, %v2108_v18 }
  0xfe   : > { %v1282_v2 = vmax.f32 %v1266_v55, 0.0  ;;  %v1221_v52 = vadd.f32 %v2087_v63, %v1198_v27  ;;  %v864_v6 = vadd.f32 %v848_v0, %v808_v1  ;;  %v960_v57 = vmul.f32 %v1991_v13, %v2120_v21 }
  0xff   : > { %v1015_v7 = vmul.f32 %v2059_v3, %v2122_v22  ;;  %v1222_v16 = vadd.f32 %v2087_v63, %v1199_v4  ;;  %v919_v31 = vadd.f32 %v903_v41, %v863_v30  ;;  %v1016_v59 = vmul.f32 %v2059_v3, %v2129_v26  ;;  %v2212_v41 = vld [vmem:[#allocation2 + $0x78] sm:$0xff] }
 0x100   : > { %v1297_v15 = vpack.c.bf16 %v1282_v2, %v1281_v51  ;;  %v1244_v24 = vmul.f32 %v2098_v10, %v1221_v52  ;;  %v920_v25 = vadd.f32 %v904_v42, %v864_v6  ;;  %v1072_v33 = vmul.f32 %v1983_v9, %v2161_v5  ;;  %v2222_v52 = vld [vmem:[#allocation2 + $0x79] sm:$0xff]  ;;  %v2224_v6 = vld [vmem:[#allocation2 + $0x81] sm:$0xff] }
 0x101   : > { %v1073_v61 = vmul.f32 %v1983_v9, %v2163_v44  ;;  %v1245_v32 = vmul.f32 %v2098_v10, %v1222_v16  ;;  %v975_v34 = vadd.f32 %v959_v47, %v919_v31  ;;  %v1128_v35 = vmul.f32 %v1996_v14, %v2170_v11 }
 0x102   : > { %1747 = vmatprep.mubr.msk.bf16.mxu1 %vm659_vm1, %v1297_v15  ;;  %v1129_v36 = vmul.f32 %v1996_v14, %v2172_v12  ;;  %v1267_v17 = vadd.f32 %v2116_v20, %v1244_v24  ;;  %v976_v39 = vadd.f32 %v960_v57, %v920_v25  ;;  %v1184_v40 = vmul.f32 %v2023_v38, %v2177_v19  ;;  %v2226_v57 = vld [vmem:[#allocation2 + $0x7a] sm:$0xff] }
 0x103   : > { %v1185_v45 = vmul.f32 %v2023_v38, %v2179_v29  ;;  %v1268_v46 = vadd.f32 %v2116_v20, %v1245_v32  ;;  %v1031_v48 = vadd.f32 %v1015_v7, %v975_v34  ;;  %v737_v49 = vmul.f32 %v1944_v37, %v2100_v60 }
 0x104   : > { %v738_v50 = vmul.f32 %v1944_v37, %v2102_v28  ;;  %v1283_v51 = vmax.f32 %v1267_v17, 0.0  ;;  %v1032_v53 = vadd.f32 %v1016_v59, %v976_v39  ;;  %v793_v23 = vmul.f32 %v1951_v43, %v2108_v18  ;;  %v2235_v59 = vld [vmem:[#allocation2 + $0x82] sm:$0xff] }
 0x105   : > { %v794_v54 = vmul.f32 %v1951_v43, %v2120_v21  ;;  %v1284_v55 = vmax.f32 %v1268_v46, 0.0  ;;  %v1088_v56 = vadd.f32 %v1072_v33, %v1031_v48  ;;  %v849_v62 = vmul.f32 %v1965_v58, %v2122_v22  ;;  %v2218_v22 = vld [vmem:[#allocation2 + $0x80] sm:$0xff] }
 0x106   : > { %v850_v0 = vmul.f32 %v1965_v58, %v2129_v26  ;;  %v1089_v60 = vadd.f32 %v1073_v61, %v1032_v53  ;;  %v809_v27 = vadd.f32 %v793_v23, %v737_v49  ;;  %v905_v28 = vmul.f32 %v1978_v8, %v2161_v5 }
 0x107   : > { %v810_v1 = vadd.f32 %v794_v54, %v738_v50  ;;  %v1298_v18 = vpack.c.bf16 %v1284_v55, %v1283_v51  ;;  %v1144_v42 = vadd.f32 %v1128_v35, %v1088_v56  ;;  %v906_v21 = vmul.f32 %v1978_v8, %v2163_v44 }
 0x108   : > { %v961_v2 = vmul.f32 %v1991_v13, %v2170_v11  ;;  %v1145_v4 = vadd.f32 %v1129_v36, %v1089_v60  ;;  %v865_v26 = vadd.f32 %v849_v62, %v809_v27  ;;  %v962_v47 = vmul.f32 %v1991_v13, %v2172_v12 }
 0x109   : > { %v866_v30 = vadd.f32 %v850_v0, %v810_v1  ;;  %1748 = vmatmul.mubr.msk.bf16.vlgmr.msra.gmra.mxu1 %vm659_vm1, %v1298_v18  ;;  %v1200_v7 = vadd.f32 %v1184_v40, %v1144_v42  ;;  %v1017_v15 = vmul.f32 %v2059_v3, %v2177_v19  ;;  %v1018_v16 = vmul.f32 %v2059_v3, %v2179_v29 }
 0x10a   : > { %v1074_v31 = vmul.f32 %v1983_v9, %v2212_v41  ;;  %v1201_v24 = vadd.f32 %v1185_v45, %v1145_v4  ;;  %v921_v25 = vadd.f32 %v905_v28, %v865_v26  ;;  %v1075_v61 = vmul.f32 %v1983_v9, %v2218_v22 }
 0x10b   : > { %v922_v33 = vadd.f32 %v906_v21, %v866_v30  ;;  %v1223_v32 = vadd.f32 %v2087_v63, %v1200_v7  ;;  %v1130_v34 = vmul.f32 %v1996_v14, %v2222_v52  ;;  %v1131_v35 = vmul.f32 %v1996_v14, %v2224_v6  ;;  %v2279_v7 = vld [vmem:[#allocation2 + $0x91] sm:$0xff] }
 0x10c   : > { %v1186_v36 = vmul.f32 %v2023_v38, %v2226_v57  ;;  %v1224_v17 = vadd.f32 %v2087_v63, %v1201_v24  ;;  %v977_v39 = vadd.f32 %v961_v2, %v921_v25  ;;  %v1187_v45 = vmul.f32 %v2023_v38, %v2235_v59  ;;  %v2269_v2 = vld [vmem:[#allocation2 + $0x90] sm:$0xff]  ;;  %v2281_v25 = vld [vmem:[#allocation2 + $0x99] sm:$0xff] }
 0x10d   : > { %v978_v40 = vadd.f32 %v962_v47, %v922_v33  ;;  %v1246_v46 = vmul.f32 %v2098_v10, %v1223_v32  ;;  %v739_v48 = vmul.f32 %v1944_v37, %v2161_v5  ;;  %v740_v49 = vmul.f32 %v1944_v37, %v2163_v44  ;;  %v2283_v33 = vld [vmem:[#allocation2 + $0x92] sm:$0xff] }
 0x10e   : > { %v795_v50 = vmul.f32 %v1951_v43, %v2170_v11  ;;  %v1247_v51 = vmul.f32 %v2098_v10, %v1224_v17  ;;  %v1033_v53 = vadd.f32 %v1017_v15, %v977_v39  ;;  %v796_v54 = vmul.f32 %v1951_v43, %v2172_v12 }
 0x10f   : > { %v1034_v23 = vadd.f32 %v1018_v16, %v978_v40  ;;  %v1269_v55 = vadd.f32 %v2116_v20, %v1246_v46  ;;  %v851_v62 = vmul.f32 %v1965_v58, %v2177_v19  ;;  %v852_v5 = vmul.f32 %v1965_v58, %v2179_v29  ;;  %v2271_v29 = vld [vmem:[#allocation2 + $0x98] sm:$0xff] }
 0x110   : > { %v811_v56 = vadd.f32 %v795_v50, %v739_v48  ;;  %v1270_v44 = vadd.f32 %v2116_v20, %v1247_v51  ;;  %v1090_v0 = vadd.f32 %v1074_v31, %v1033_v53  ;;  %v812_v60 = vadd.f32 %v796_v54, %v740_v49 }
 0x111   : > { %v1091_v11 = vadd.f32 %v1075_v61, %v1034_v23  ;;  %v1285_v27 = vmax.f32 %v1269_v55, 0.0  ;;  %v907_v28 = vmul.f32 %v1978_v8, %v2212_v41  ;;  %v908_v12 = vmul.f32 %v1978_v8, %v2218_v22  ;;  %v2285_v61 = vld [vmem:[#allocation2 + $0x9a] sm:$0xff] }
 0x112   : > { %v867_v1 = vadd.f32 %v851_v62, %v811_v56  ;;  %v1286_v18 = vmax.f32 %v1270_v44, 0.0  ;;  %v1146_v42 = vadd.f32 %v1130_v34, %v1090_v0  ;;  %v868_v19 = vadd.f32 %v852_v5, %v812_v60 }
 0x113   : > { %v1147_v21 = vadd.f32 %v1131_v35, %v1091_v11  ;;  %v963_v26 = vmul.f32 %v1991_v13, %v2222_v52  ;;  %v964_v30 = vmul.f32 %v1991_v13, %v2224_v6  ;;  %v1019_v47 = vmul.f32 %v2059_v3, %v2226_v57 }
 0x114   : > { %v923_v4 = vadd.f32 %v907_v28, %v867_v1  ;;  %v1299_v15 = vpack.c.bf16 %v1286_v18, %v1285_v27  ;;  %v1202_v16 = vadd.f32 %v1186_v36, %v1146_v42  ;;  %v924_v24 = vadd.f32 %v908_v12, %v868_v19 }
 0x115   : > { %v1203_v31 = vadd.f32 %v1187_v45, %v1147_v21  ;;  %v1020_v34 = vmul.f32 %v2059_v3, %v2235_v59  ;;  %v1076_v35 = vmul.f32 %v1983_v9, %v2269_v2  ;;  %v1077_v17 = vmul.f32 %v1983_v9, %v2271_v29 }
 0x116   : > { %v979_v32 = vadd.f32 %v963_v26, %v923_v4  ;;  %1751 = vmatprep.mubr.msk.bf16.mxu1 %vm659_vm1, %v1299_v15  ;;  %v1225_v36 = vadd.f32 %v2087_v63, %v1202_v16  ;;  %v980_v40 = vadd.f32 %v964_v30, %v924_v24  ;;  %v1132_v45 = vmul.f32 %v1996_v14, %v2279_v7  ;;  %v2324_v4 = vld [vmem:[#allocation2 + $0xa8] sm:$0xff] }
 0x117   : > { %v1226_v39 = vadd.f32 %v2087_v63, %v1203_v31  ;;  %v1133_v48 = vmul.f32 %v1996_v14, %v2281_v25  ;;  %v1188_v49 = vmul.f32 %v2023_v38, %v2283_v33  ;;  %v1189_v50 = vmul.f32 %v2023_v38, %v2285_v61  ;;  %v2332_v15 = vld [vmem:[#allocation2 + $0xa9] sm:$0xff] }
 0x118   : > { %v1035_v46 = vadd.f32 %v1019_v47, %v979_v32  ;;  %v1248_v51 = vmul.f32 %v2098_v10, %v1225_v36  ;;  %v1036_v23 = vadd.f32 %v1020_v34, %v980_v40  ;;  %v741_v54 = vmul.f32 %v1944_v37, %v2212_v41  ;;  %v2337_v34 = vld [vmem:[#allocation2 + $0xb1] sm:$0xff] }
 0x119   : > { %v1249_v53 = vmul.f32 %v2098_v10, %v1226_v39  ;;  %v742_v56 = vmul.f32 %v1944_v37, %v2218_v22  ;;  %v797_v62 = vmul.f32 %v1951_v43, %v2222_v52  ;;  %v798_v5 = vmul.f32 %v1951_v43, %v2224_v6 }
 0x11a   : > { %v1092_v55 = vadd.f32 %v1076_v35, %v1035_v46  ;;  %v1271_v44 = vadd.f32 %v2116_v20, %v1248_v51  ;;  %v1093_v11 = vadd.f32 %v1077_v17, %v1036_v23  ;;  %v853_v60 = vmul.f32 %v1965_v58, %v2226_v57  ;;  %v2326_v57 = vld [vmem:[#allocation2 + $0xb0] sm:$0xff] }
 0x11b   : > { %v1272_v0 = vadd.f32 %v2116_v20, %v1249_v53  ;;  %v813_v41 = vadd.f32 %v797_v62, %v741_v54  ;;  %v814_v1 = vadd.f32 %v798_v5, %v742_v56  ;;  %v854_v22 = vmul.f32 %v1965_v58, %v2235_v59  ;;  %v2339_v35 = vld [vmem:[#allocation2 + $0xaa] sm:$0xff]  ;;  %v2341_v17 = vld [vmem:[#allocation2 + $0xb2] sm:$0xff] }
 0x11c   : > { %v1148_v27 = vadd.f32 %v1132_v45, %v1092_v55  ;;  %v1287_v28 = vmax.f32 %v1271_v44, 0.0  ;;  %v1149_v52 = vadd.f32 %v1133_v48, %v1093_v11  ;;  %v909_v6 = vmul.f32 %v1978_v8, %v2269_v2 }
 0x11d   : > { %v1288_v12 = vmax.f32 %v1272_v0, 0.0  ;;  %v869_v42 = vadd.f32 %v853_v60, %v813_v41  ;;  %v870_v21 = vadd.f32 %v854_v22, %v814_v1  ;;  %v910_v19 = vmul.f32 %v1978_v8, %v2271_v29 }
 0x11e   : > { %v1204_v18 = vadd.f32 %v1188_v49, %v1148_v27  ;;  %v1205_v30 = vadd.f32 %v1189_v50, %v1149_v52  ;;  %v965_v59 = vmul.f32 %v1991_v13, %v2279_v7  ;;  %v966_v47 = vmul.f32 %v1991_v13, %v2281_v25 }
 0x11f   : > { %v1300_v26 = vpack.c.bf16 %v1288_v12, %v1287_v28  ;;  %v925_v31 = vadd.f32 %v909_v6, %v869_v42  ;;  %v926_v24 = vadd.f32 %v910_v19, %v870_v21  ;;  %v1021_v32 = vmul.f32 %v2059_v3, %v2283_v33  ;;  %v1056_v19 = vld [vmem:[#allocation2 + $0xc0] sm:$0xff] }
 0x120   : > { %v1227_v16 = vadd.f32 %v2087_v63, %v1204_v18  ;;  %v1228_v36 = vadd.f32 %v2087_v63, %v1205_v30  ;;  %v1022_v39 = vmul.f32 %v2059_v3, %v2285_v61  ;;  %v1078_v40 = vmul.f32 %v1983_v9, %v2324_v4 }
 0x121   : > { %1752 = vmatmul.mubr.msk.bf16.gmra.mxu1 %vm659_vm1, %v1300_v26  ;;  %v1079_v45 = vmul.f32 %v1983_v9, %v2326_v57  ;;  %v981_v48 = vadd.f32 %v965_v59, %v925_v31  ;;  %v982_v49 = vadd.f32 %v966_v47, %v926_v24  ;;  %v1134_v50 = vmul.f32 %v1996_v14, %v2332_v15  ;;  %v1057_v26 = vld [vmem:[#allocation2 + $0xc8] sm:$0xff] }
 0x122   : > { %v1250_v46 = vmul.f32 %v2098_v10, %v1227_v16  ;;  %v1251_v51 = vmul.f32 %v2098_v10, %v1228_v36  ;;  %v1135_v53 = vmul.f32 %v1996_v14, %v2337_v34  ;;  %v1190_v23 = vmul.f32 %v2023_v38, %v2339_v35  ;;  %v1112_v47 = vld [vmem:[#allocation2 + $0xc1] sm:$0xff]  ;;  %v1113_v16 = vld [vmem:[#allocation2 + $0xc9] sm:$0xff] }
 0x123   : > { %v1191_v54 = vmul.f32 %v2023_v38, %v2341_v17  ;;  %v1037_v56 = vadd.f32 %v1021_v32, %v981_v48  ;;  %v1038_v62 = vadd.f32 %v1022_v39, %v982_v49  ;;  %v743_v5 = vmul.f32 %v1944_v37, %v2269_v2  ;;  %v1168_v39 = vld [vmem:[#allocation2 + $0xc2] sm:$0xff] }
 0x124   : > { %v1273_v55 = vadd.f32 %v2116_v20, %v1250_v46  ;;  %v1274_v44 = vadd.f32 %v2116_v20, %v1251_v51  ;;  %v744_v0 = vmul.f32 %v1944_v37, %v2271_v29  ;;  %v799_v11 = vmul.f32 %v1951_v43, %v2279_v7 }
 0x125   : > { %v800_v60 = vmul.f32 %v1951_v43, %v2281_v25  ;;  %v1094_v41 = vadd.f32 %v1078_v40, %v1037_v56  ;;  %v1095_v1 = vadd.f32 %v1079_v45, %v1038_v62  ;;  %v855_v22 = vmul.f32 %v1965_v58, %v2283_v33 }
 0x126   : > { %v1289_v27 = vmax.f32 %v1273_v55, 0.0  ;;  %v1290_v28 = vmax.f32 %v1274_v44, 0.0  ;;  %v815_v12 = vadd.f32 %v799_v11, %v743_v5  ;;  %v856_v52 = vmul.f32 %v1965_v58, %v2285_v61  ;;  %v1169_v55 = vld [vmem:[#allocation2 + $0xca] sm:$0xff] }
 0x127   : > { %v816_v2 = vadd.f32 %v800_v60, %v744_v0  ;;  %v1150_v6 = vadd.f32 %v1134_v50, %v1094_v41  ;;  %v1151_v29 = vadd.f32 %v1135_v53, %v1095_v1  ;;  %v911_v7 = vmul.f32 %v1978_v8, %v2324_v4 }
 0x128   : > { %v912_v25 = vmul.f32 %v1978_v8, %v2326_v57  ;;  %v1301_v18 = vpack.c.bf16 %v1290_v28, %v1289_v27  ;;  %v871_v42 = vadd.f32 %v855_v22, %v815_v12  ;;  %v967_v59 = vmul.f32 %v1991_v13, %v2332_v15 }
 0x129   : > { %v872_v21 = vadd.f32 %v856_v52, %v816_v2  ;;  %v1206_v33 = vadd.f32 %v1190_v23, %v1150_v6  ;;  %v1207_v30 = vadd.f32 %v1191_v54, %v1151_v29  ;;  %v968_v61 = vmul.f32 %v1991_v13, %v2337_v34 }
 0x12a   : > { %1755 = vmatprep.mubr.msk.bf16.mxu1 %vm659_vm1, %v1301_v18  ;;  %v927_v31 = vadd.f32 %v911_v7, %v871_v42  ;;  %v1023_v32 = vmul.f32 %v2059_v3, %v2339_v35  ;;  %v1024_v36 = vmul.f32 %v2059_v3, %v2341_v17  ;;  %v1080_v46 = vmul.f32 %v1983_v9, %v1056_v19 }
 0x12b   : > { %v928_v24 = vadd.f32 %v912_v25, %v872_v21  ;;  %v1229_v40 = vadd.f32 %v2087_v63, %v1206_v33  ;;  %v1230_v45 = vadd.f32 %v2087_v63, %v1207_v30  ;;  %v1081_v48 = vmul.f32 %v1983_v9, %v1057_v26  ;;  %v1059_v30 = vld [vmem:[#allocation2 + $0xe0] sm:$0xff] }
 0x12c   : > { %v983_v49 = vadd.f32 %v967_v59, %v927_v31  ;;  %v1136_v51 = vmul.f32 %v1996_v14, %v1112_v47  ;;  %v1137_v53 = vmul.f32 %v1996_v14, %v1113_v16  ;;  %v1192_v56 = vmul.f32 %v2023_v38, %v1168_v39 }
 0x12d   : > { %v984_v50 = vadd.f32 %v968_v61, %v928_v24  ;;  %v1252_v23 = vmul.f32 %v2098_v10, %v1229_v40  ;;  %v1253_v54 = vmul.f32 %v2098_v10, %v1230_v45  ;;  %v745_v62 = vmul.f32 %v1944_v37, %v2324_v4  ;;  %v1114_v61 = vld [vmem:[#allocation2 + $0xd9] sm:$0xff] }
 0x12e   : > { %v1039_v5 = vadd.f32 %v1023_v32, %v983_v49  ;;  %v746_v0 = vmul.f32 %v1944_v37, %v2326_v57  ;;  %v801_v11 = vmul.f32 %v1951_v43, %v2332_v15  ;;  %v802_v41 = vmul.f32 %v1951_v43, %v2337_v34  ;;  %v1058_v43 = vld [vmem:[#allocation2 + $0xd8] sm:$0xff] }
 0x12f   : > { %v1040_v44 = vadd.f32 %v1024_v36, %v984_v50  ;;  %v1275_v60 = vadd.f32 %v2116_v20, %v1252_v23  ;;  %v1276_v27 = vadd.f32 %v2116_v20, %v1253_v54  ;;  %v857_v1 = vmul.f32 %v1965_v58, %v2339_v35  ;;  %v1170_v40 = vld [vmem:[#allocation2 + $0xda] sm:$0xff] }
 0x130   : > { %v1096_v22 = vadd.f32 %v1080_v46, %v1039_v5  ;;  %v1193_v28 = vmul.f32 %v2023_v38, %v1169_v55  ;;  %v817_v12 = vadd.f32 %v801_v11, %v745_v62  ;;  %v818_v57 = vadd.f32 %v802_v41, %v746_v0 }
 0x131   : > { %v1097_v4 = vadd.f32 %v1081_v48, %v1040_v44  ;;  %v1291_v2 = vmax.f32 %v1275_v60, 0.0  ;;  %v1292_v37 = vmax.f32 %v1276_v27, 0.0  ;;  %v858_v15 = vmul.f32 %v1965_v58, %v2341_v17  ;;  %v1171_v48 = vld [vmem:[#allocation2 + $0xe2] sm:$0xff] }
 0x132   : > { %v1152_v52 = vadd.f32 %v1136_v51, %v1096_v22  ;;  %v873_v29 = vadd.f32 %v857_v1, %v817_v12  ;;  %v913_v7 = vmul.f32 %v1978_v8, %v1056_v19  ;;  %v914_v35 = vmul.f32 %v1978_v8, %v1057_v26  ;;  %v1115_v26 = vld [vmem:[#allocation2 + $0xe1] sm:$0xff] }
 0x133   : > { %v1153_v6 = vadd.f32 %v1137_v53, %v1097_v4  ;;  %v1302_v34 = vpack.c.bf16 %v1292_v37, %v1291_v2  ;;  %v874_v25 = vadd.f32 %v858_v15, %v818_v57  ;;  %v969_v33 = vmul.f32 %v1991_v13, %v1112_v47  ;;  %v1522_v57 = vld [vmem:[%s2453_s24 + $0x10] sm:$0xff] }
 0x134   : > { %v1208_v18 = vadd.f32 %v1192_v56, %v1152_v52  ;;  %v929_v21 = vadd.f32 %v913_v7, %v873_v29  ;;  %v970_v58 = vmul.f32 %v1991_v13, %v1113_v16  ;;  %v1082_v17 = vmul.f32 %v1983_v9, %v1058_v43  ;;  %v1520_v7 = vld [vmem:[%s2453_s24] sm:$0xff] }
 0x135   : > { %v1209_v42 = vadd.f32 %v1193_v28, %v1153_v6  ;;  %1756 = vmatmul.mubr.msk.bf16.gmra.mxu1 %vm659_vm1, %v1302_v34  ;;  %v930_v59 = vadd.f32 %v914_v35, %v874_v25  ;;  %v1025_v8 = vmul.f32 %v2059_v3, %v1168_v39  ;;  %v1026_v47 = vmul.f32 %v2059_v3, %v1169_v55  ;;  %v2442_v28 = vld [vmem:[%s2554_s10] ss:$0 sm:$0xff] }
 0x136   : > { %v1231_v19 = vadd.f32 %v2087_v63, %v1208_v18  ;;  %v985_v24 = vadd.f32 %v969_v33, %v929_v21  ;;  %v1083_v36 = vmul.f32 %v1983_v9, %v1059_v30  ;;  %v1138_v46 = vmul.f32 %v1996_v14, %v1114_v61 }
 0x137   : > { %v1232_v31 = vadd.f32 %v2087_v63, %v1209_v42  ;;  %v986_v32 = vadd.f32 %v970_v58, %v930_v59  ;;  %v1139_v50 = vmul.f32 %v1996_v14, %v1115_v26  ;;  %v1194_v3 = vmul.f32 %v2023_v38, %v1170_v40  ;;  %v1523_v42 = vld [vmem:[%s2453_s24 + $0x18] sm:$0xff]  ;;  %v1521_v59 = vld [vmem:[%s2453_s24 + $0x8] sm:$0xff] }
 0x138   : > { %v1254_v45 = vmul.f32 %v2098_v10, %v1231_v19  ;;  %v1041_v16 = vadd.f32 %v1025_v8, %v985_v24  ;;  %v1195_v23 = vmul.f32 %v2023_v38, %v1171_v48 }
 0x139   : > { %v1255_v13 = vmul.f32 %v2098_v10, %v1232_v31  ;;  %v1042_v49 = vadd.f32 %v1026_v47, %v986_v32  ;;  %v1526_v32 = vld [vmem:[%s2453_s24 + $0x30] sm:$0xff] }
 0x13a   : > { %v1277_v39 = vadd.f32 %v2116_v20, %v1254_v45  ;;  %v1098_v53 = vadd.f32 %v1082_v17, %v1041_v16 }
 0x13b   : > { %v1278_v51 = vadd.f32 %v2116_v20, %v1255_v13  ;;  %v1099_v9 = vadd.f32 %v1083_v36, %v1042_v49  ;;  %v1524_v13 = vld [vmem:[%s2453_s24 + $0x20] sm:$0xff] }
 0x13c   : > { %v1293_v54 = vmax.f32 %v1277_v39, 0.0  ;;  %v1154_v56 = vadd.f32 %v1138_v46, %v1098_v53  ;;  %v1527_v39 = vld [vmem:[%s2453_s24 + $0x38] sm:$0xff] }
 0x13d   : > { %v1294_v55 = vmax.f32 %v1278_v51, 0.0  ;;  %v1155_v62 = vadd.f32 %v1139_v50, %v1099_v9  ;;  %v1525_v9 = vld [vmem:[%s2453_s24 + $0x28] sm:$0xff] }
 0x13e   : > { %v1210_v44 = vadd.f32 %v1194_v3, %v1154_v56 }
 0x13f   : > { %v1303_v5 = vpack.c.bf16 %v1294_v55, %v1293_v54  ;;  %v1211_v0 = vadd.f32 %v1195_v23, %v1155_v62 }
 0x140   : > { %v1233_v14 = vadd.f32 %v2087_v63, %v1210_v44 }
 0x141   : > { %1759 = vmatprep.mubr.msk.bf16.mxu1 %vm659_vm1, %v1303_v5  ;;  %v1234_v11 = vadd.f32 %v2087_v63, %v1211_v0 }
 0x142   : > { %v1256_v60 = vmul.f32 %v2098_v10, %v1233_v14  ;;  %v1530_v14 = vld [vmem:[%s2453_s24 + $0x50] sm:$0xff] }
 0x143   : > { %v1257_v27 = vmul.f32 %v2098_v10, %v1234_v11  ;;  %v2447_v10 = vld [vmem:[%s2555_s11] ss:$0 sm:$0xff] }
 0x144   : > { %v1279_v38 = vadd.f32 %v2116_v20, %v1256_v60 }
 0x145   : > { %v1280_v41 = vadd.f32 %v2116_v20, %v1257_v27 }
 0x146   : > { %v1295_v1 = vmax.f32 %v1279_v38, 0.0 }
 0x147   : > { %v1296_v22 = vmax.f32 %v1280_v41, 0.0  ;;  %v1528_v41 = vld [vmem:[%s2453_s24 + $0x40] sm:$0xff] }
 0x149   : > { %v1304_v4 = vpack.c.bf16 %v1296_v22, %v1295_v1 }
 0x14b   : > { %1760 = vmatmul.mubr.msk.bf16.gmra.mxu1 %vm659_vm1, %v1304_v4 }
 0x1c9   : > { %v1749_v63 = vpop.f32.mrf.mxu1 }
 0x1ca   : > { %v1467_v20 = vmul.f32 %v1749_v63, %v2442_v28 }
 0x1cb   : > { %v1395_v12 = vpop.f32.mrf.mxu1 }
 0x1cc   : > { %v1490_v2 = vadd.f32 %v2447_v10, %v1467_v20  ;;  %v1465_v37 = vmul.f32 %v2442_v28, %v1395_v12  ;;  %v1531_v12 = vld [vmem:[%s2453_s24 + $0x58] sm:$0xff] }
 0x1cd   : > { %v1750_v15 = vpop.f32.mrf.mxu1 }
 0x1ce   : > { %v1506_v52 = vmax.f32 %v1490_v2, 0.0  ;;  %v1488_v6 = vadd.f32 %v2447_v10, %v1465_v37  ;;  %v1468_v29 = vmul.f32 %v1750_v15, %v2442_v28  ;;  %v1529_v15 = vld [vmem:[%s2453_s24 + $0x48] sm:$0xff] }
 0x1cf   : > { %v1398_v43 = vpop.f32.mrf.mxu1 }
 0x1d0   : > { %v1538_v34 = vadd.f32 %v1522_v57, %v1506_v52  ;;  %v1504_v25 = vmax.f32 %v1488_v6, 0.0  ;;  %v1491_v35 = vadd.f32 %v2447_v10, %v1468_v29  ;;  %v1466_v18 = vmul.f32 %v2442_v28, %v1398_v43 }
 0x1d2   : > { %1554 = vst.msk [vmem:[%s2465_s28 + $0x10] sm:$0xff] %vm475_vm0, %v1538_v34  ;;  %v1536_v21 = vadd.f32 %v1520_v7, %v1504_v25  ;;  %v1507_v33 = vmax.f32 %v1491_v35, 0.0  ;;  %v1489_v30 = vadd.f32 %v2447_v10, %v1466_v18  ;;  %v1534_v18 = vld [vmem:[%s2453_s24 + $0x70] sm:$0xff] }
 0x1d4   : > { %1552 = vst.msk [vmem:[%s2465_s28] sm:$0xff] %vm475_vm0, %v1536_v21  ;;  %v1539_v58 = vadd.f32 %v1523_v42, %v1507_v33  ;;  %v1505_v17 = vmax.f32 %v1489_v30, 0.0 }
 0x1d6   : > { %1555 = vst.msk [vmem:[%s2465_s28 + $0x18] sm:$0xff] %vm475_vm0, %v1539_v58  ;;  %v1537_v61 = vadd.f32 %v1521_v59, %v1505_v17  ;;  %v1532_v59 = vld [vmem:[%s2453_s24 + $0x60] sm:$0xff] }
 0x1d8   : > { %1553 = vst.msk [vmem:[%s2465_s28 + $0x8] sm:$0xff] %vm475_vm0, %v1537_v61 }
 0x1e1   : > { %v1753_v19 = vpop.f32.mrf.mxu1 }
 0x1e2   : > { %v1471_v31 = vmul.f32 %v1753_v19, %v2442_v28 }
 0x1e3   : > { %v1411_v24 = vpop.f32.mrf.mxu1 }
 0x1e4   : > { %v1494_v8 = vadd.f32 %v2447_v10, %v1471_v31  ;;  %v1469_v26 = vmul.f32 %v2442_v28, %v1411_v24  ;;  %v1535_v24 = vld [vmem:[%s2453_s24 + $0x78] sm:$0xff] }
 0x1e5   : > { %v1754_v47 = vpop.f32.mrf.mxu1 }
 0x1e6   : > { %v1510_v36 = vmax.f32 %v1494_v8, 0.0  ;;  %v1492_v40 = vadd.f32 %v2447_v10, %v1469_v26  ;;  %v1472_v45 = vmul.f32 %v1754_v47, %v2442_v28  ;;  %v1533_v47 = vld [vmem:[%s2453_s24 + $0x68] sm:$0xff] }
 0x1e7   : > { %v1414_v16 = vpop.f32.mrf.mxu1 }
 0x1e8   : > { %v1542_v46 = vadd.f32 %v1526_v32, %v1510_v36  ;;  %v1508_v48 = vmax.f32 %v1492_v40, 0.0  ;;  %v1495_v49 = vadd.f32 %v2447_v10, %v1472_v45  ;;  %v1470_v50 = vmul.f32 %v2442_v28, %v1414_v16 }
 0x1ea   : > { %1558 = vst.msk [vmem:[%s2465_s28 + $0x30] sm:$0xff] %vm475_vm0, %v1542_v46  ;;  %v1540_v51 = vadd.f32 %v1524_v13, %v1508_v48  ;;  %v1511_v53 = vmax.f32 %v1495_v49, 0.0  ;;  %v1493_v3 = vadd.f32 %v2447_v10, %v1470_v50 }
 0x1ec   : > { %1556 = vst.msk [vmem:[%s2465_s28 + $0x20] sm:$0xff] %vm475_vm0, %v1540_v51  ;;  %v1543_v23 = vadd.f32 %v1527_v39, %v1511_v53  ;;  %v1509_v54 = vmax.f32 %v1493_v3, 0.0 }
 0x1ee   : > { %1559 = vst.msk [vmem:[%s2465_s28 + $0x38] sm:$0xff] %vm475_vm0, %v1543_v23  ;;  %v1541_v55 = vadd.f32 %v1525_v9, %v1509_v54 }
 0x1f0   : > { %1557 = vst.msk [vmem:[%s2465_s28 + $0x28] sm:$0xff] %vm475_vm0, %v1541_v55 }
 0x1f5   : > { %v1757_v56 = vpop.f32.mrf.mxu1 }
 0x1f6   : > { %v1475_v62 = vmul.f32 %v1757_v56, %v2442_v28 }
 0x1f7   : > { %v1427_v5 = vpop.f32.mrf.mxu1 }
 0x1f8   : > { %v1498_v44 = vadd.f32 %v2447_v10, %v1475_v62  ;;  %v1473_v0 = vmul.f32 %v2442_v28, %v1427_v5 }
 0x1f9   : > { %v1758_v11 = vpop.f32.mrf.mxu1 }
 0x1fa   : > { %v1514_v60 = vmax.f32 %v1498_v44, 0.0  ;;  %v1496_v27 = vadd.f32 %v2447_v10, %v1473_v0  ;;  %v1476_v38 = vmul.f32 %v1758_v11, %v2442_v28 }
 0x1fb   : > { %v1430_v1 = vpop.f32.mrf.mxu1 }
 0x1fc   : > { %v1546_v22 = vadd.f32 %v1530_v14, %v1514_v60  ;;  %v1512_v4 = vmax.f32 %v1496_v27, 0.0  ;;  %v1499_v63 = vadd.f32 %v2447_v10, %v1476_v38  ;;  %v1474_v20 = vmul.f32 %v2442_v28, %v1430_v1 }
 0x1fe   : > { %1562 = vst.msk [vmem:[%s2465_s28 + $0x50] sm:$0xff] %vm475_vm0, %v1546_v22  ;;  %v1544_v2 = vadd.f32 %v1528_v41, %v1512_v4  ;;  %v1515_v37 = vmax.f32 %v1499_v63, 0.0  ;;  %v1497_v57 = vadd.f32 %v2447_v10, %v1474_v20 }
 0x200   : > { %1560 = vst.msk [vmem:[%s2465_s28 + $0x40] sm:$0xff] %vm475_vm0, %v1544_v2  ;;  %v1547_v52 = vadd.f32 %v1531_v12, %v1515_v37  ;;  %v1513_v6 = vmax.f32 %v1497_v57, 0.0 }
 0x202   : > { %1563 = vst.msk [vmem:[%s2465_s28 + $0x58] sm:$0xff] %vm475_vm0, %v1547_v52  ;;  %v1545_v29 = vadd.f32 %v1529_v15, %v1513_v6 }
 0x204   : > { %1561 = vst.msk [vmem:[%s2465_s28 + $0x48] sm:$0xff] %vm475_vm0, %v1545_v29 }
 0x20b   : > { %v1761_v7 = vpop.f32.mrf.mxu1 }
 0x20c   : > { %v1479_v43 = vmul.f32 %v1761_v7, %v2442_v28 }
 0x20d   : > { %v1443_v34 = vpop.f32.mrf.mxu1 }
 0x20e   : > { %v1502_v25 = vadd.f32 %v2447_v10, %v1479_v43  ;;  %v1477_v35 = vmul.f32 %v2442_v28, %v1443_v34 }
 0x20f   : > { %v1762_v42 = vpop.f32.mrf.mxu1 }
 0x210   : > { %v1518_v21 = vmax.f32 %v1502_v25, 0.0  ;;  %v1500_v33 = vadd.f32 %v2447_v10, %v1477_v35  ;;  %v1480_v30 = vmul.f32 %v1762_v42, %v2442_v28 }
 0x211   : > { %v1446_v58 = vpop.f32.mrf.mxu1 }
 0x212   : > { %v1550_v17 = vadd.f32 %v1534_v18, %v1518_v21  ;;  %v1516_v61 = vmax.f32 %v1500_v33, 0.0  ;;  %v1503_v19 = vadd.f32 %v2447_v10, %v1480_v30  ;;  %v1478_v31 = vmul.f32 %v2442_v28, %v1446_v58 }
 0x214   : > { %1566 = vst.msk [vmem:[%s2465_s28 + $0x70] sm:$0xff] %vm475_vm0, %v1550_v17  ;;  %v1548_v8 = vadd.f32 %v1532_v59, %v1516_v61  ;;  %v1519_v26 = vmax.f32 %v1503_v19, 0.0  ;;  %v1501_v32 = vadd.f32 %v2447_v10, %v1478_v31 }
 0x216   : > { %1564 = vst.msk [vmem:[%s2465_s28 + $0x60] sm:$0xff] %vm475_vm0, %v1548_v8  ;;  %v1551_v36 = vadd.f32 %v1535_v24, %v1519_v26  ;;  %v1517_v40 = vmax.f32 %v1501_v32, 0.0 }
 0x218   : > { %1567 = vst.msk [vmem:[%s2465_s28 + $0x78] sm:$0xff] %vm475_vm0, %v1551_v36  ;;  %v1549_v45 = vadd.f32 %v1533_v47, %v1517_v40 }
 0x21a   : > { %1565 = vst.msk [vmem:[%s2465_s28 + $0x68] sm:$0xff] %vm475_vm0, %v1549_v45 }
 0x21b PF: > { %s22_s21 = sadd.s32 1, %s1784_s21  }
 0x21c   : > { %p19_p4 = scmp.ge.s32.totalorder %s22_s21, 4  }
 0x21e   :  { %21 = sbr.rel (!%p19_p4) target bundleno = 1 (0x1), region = 111 }

// kernel: satrn_encoder_forward.6
= control target key start
LH: loop header
LB: loop body
LE: loop exit
PB: predicated region body
PF: predicated region fallthrough
CT: control target
= control target key end

     0   :  { %s6391_s17 = smov 0   ;;  %s8079_s0 = inlined_call_operand.vmem [shape: f32[2,128,32], index: 0, kind: input, shape index: {}]   ;;  %s8080_s1 = inlined_call_operand.vmem [shape: f32[1,32], index: 1, kind: input, shape index: {}]   ;;  %s8081_s2 = inlined_call_operand.vmem [shape: f32[1,32], index: 2, kind: input, shape index: {}]   ;;  %s8082_s3 = inlined_call_operand.vmem [shape: bf16[4,32,8], index: 3, kind: input, shape index: {}]   ;;  %s8083_s4 = inlined_call_operand.vmem [shape: f32[4,1,8], index: 4, kind: input, shape index: {}]   ;;  %s8084_s5 = inlined_call_operand.vmem [shape: bf16[4,32,8], index: 5, kind: input, shape index: {}]   ;;  %s8085_s6 = inlined_call_operand.vmem [shape: f32[4,1,8], index: 6, kind: input, shape index: {}]   ;;  %s8086_s7 = inlined_call_operand.vmem [shape: bf16[4,32,8], index: 7, kind: input, shape index: {}]   ;;  %s8087_s8 = inlined_call_operand.vmem [shape: f32[4,1,8], index: 8, kind: input, shape index: {}]   ;;  %s8088_s9 = inlined_call_operand.vmem [shape: bf16[4,8,32], index: 9, kind: input, shape index: {}]   ;;  %s8089_s10 = inlined_call_operand.vmem [shape: f32[1,32], index: 10, kind: input, shape index: {}]   ;;  %s8090_s11 = inlined_call_operand.vmem [shape: f32[2,128,32], index: 11, kind: output, shape index: {}]  }
   0x1 LB: > { %s4805_s18 = sadd.s32 4294967295, %s6329_s17   ;;  %p4809_p0 = scmp.ge.s32.totalorder %s6329_s17, 1  ;;  %s6329_s17 = sphi %s6391_s17, %s21_s17  }
   0x2   : > { %p337_p1 = scmp.lt.s32.totalorder %s6329_s17, 3 }
   0x4   : > { %p338_p2 = pnand %p4809_p0, %p337_p1 }
   0x6   : > { %341 = sbr.rel (%p338_p2) target bundleno = 4024 (0xfb8), region = 64 }
   0xb   : > { %p377_p3 = scmp.lt.s32.totalorder %s4805_s18, 1  ;;  %vm406_vm0 = vcmask 261120   ;;  %vm1068_vm1 = vcmask 64512   ;;  %vm2330_vm2 = vcmask 1043456  }
   0xd   : > { %s8215_s18 = smov (!%p377_p3, %s4805_s18), 1 }
   0xe   : > { %s5063_s19 = sshll.u32 %s8215_s18, 7 }
   0xf   : > { %s6407_s22 = scalar_lea.vmem %s8079_s0, %s5063_s19  ;;  %s7991_s21 = scalar_lea.vmem %s8090_s11, %s5063_s19 }
  0x10   : > { %v388_v0 = vld [vmem:[%s6407_s22] sm:$0xff]  ;;  %v390_v1 = vld [vmem:[%s6407_s22 + $0x10] sm:$0xff]  ;;  %v389_v2 = vld [vmem:[%s6407_s22 + $0x8] sm:$0xff] }
  0x11   : > { %v407_v3 = vsel %vm406_vm0, %v388_v0, 0.0  ;;  %v413_v4 = vsel %vm406_vm0, %v390_v1, 0.0  ;;  %v391_v5 = vld [vmem:[%s6407_s22 + $0x18] sm:$0xff]  ;;  %v6416_v6 = vld [vmem:[%s6407_s22 + $0x20] sm:$0xff]  ;;  %v6419_v7 = vld [vmem:[%s6407_s22 + $0x28] sm:$0xff]  ;;  %v410_v10 = vsel %vm406_vm0, %v389_v2, 0.0 }
  0x12   : > { %408 = vadd.xlane.f32.xlu0 %v407_v3  ;;  %414 = vadd.xlane.f32.xlu1 %v413_v4  ;;  %v6422_v8 = vld [vmem:[%s6407_s22 + $0x30] sm:$0xff]  ;;  %v6425_v9 = vld [vmem:[%s6407_s22 + $0x38] sm:$0xff]  ;;  %v416_v11 = vsel %vm406_vm0, %v391_v5, 0.0  ;;  %v6430_v12 = vld [vmem:[%s6407_s22 + $0x40] sm:$0xff]  ;;  %v419_v14 = vsel %vm406_vm0, %v6416_v6, 0.0  ;;  %v422_v15 = vsel %vm406_vm0, %v6419_v7, 0.0 }
  0x13   : > { %v6433_v13 = vld [vmem:[%s6407_s22 + $0x48] sm:$0xff]  ;;  %v425_v16 = vsel %vm406_vm0, %v6422_v8, 0.0  ;;  %v428_v17 = vsel %vm406_vm0, %v6425_v9, 0.0  ;;  %v431_v18 = vsel %vm406_vm0, %v6430_v12, 0.0  ;;  %v6448_v20 = vld [vmem:[%s6407_s22 + $0x50] sm:$0xff]  ;;  %v6451_v21 = vld [vmem:[%s6407_s22 + $0x58] sm:$0xff] }
  0x14   : > { %v434_v19 = vsel %vm406_vm0, %v6433_v13, 0.0  ;;  %v437_v22 = vsel %vm406_vm0, %v6448_v20, 0.0  ;;  %v440_v23 = vsel %vm406_vm0, %v6451_v21, 0.0  ;;  %v6458_v24 = vld [vmem:[%s6407_s22 + $0x60] sm:$0xff]  ;;  %v6461_v25 = vld [vmem:[%s6407_s22 + $0x68] sm:$0xff]  ;;  %v6468_v28 = vld [vmem:[%s6407_s22 + $0x70] sm:$0xff] }
  0x15   : > { %v443_v26 = vsel %vm406_vm0, %v6458_v24, 0.0  ;;  %v446_v27 = vsel %vm406_vm0, %v6461_v25, 0.0  ;;  %v6471_v29 = vld [vmem:[%s6407_s22 + $0x78] sm:$0xff]  ;;  %v449_v30 = vsel %vm406_vm0, %v6468_v28, 0.0 }
  0x16   : > { %411 = vadd.xlane.f32.xlu0 %v410_v10  ;;  %417 = vadd.xlane.f32.xlu1 %v416_v11  ;;  %v452_v31 = vsel %vm406_vm0, %v6471_v29, 0.0 }
  0x1a   : > { %420 = vadd.xlane.f32.xlu0 %v419_v14  ;;  %423 = vadd.xlane.f32.xlu1 %v422_v15 }
  0x1e   : > { %426 = vadd.xlane.f32.xlu0 %v425_v16  ;;  %429 = vadd.xlane.f32.xlu1 %v428_v17 }
  0x22   : > { %432 = vadd.xlane.f32.xlu0 %v431_v18  ;;  %435 = vadd.xlane.f32.xlu1 %v434_v19 }
  0x26   : > { %438 = vadd.xlane.f32.xlu0 %v437_v22  ;;  %441 = vadd.xlane.f32.xlu1 %v440_v23 }
  0x2a   : > { %444 = vadd.xlane.f32.xlu0 %v443_v26  ;;  %447 = vadd.xlane.f32.xlu1 %v446_v27 }
  0x2e   : > { %450 = vadd.xlane.f32.xlu0 %v449_v30  ;;  %453 = vadd.xlane.f32.xlu1 %v452_v31 }
  0x9b   : > { %v409_v32 = vpop.xlane.xlu0 %408  ;;  %v415_v33 = vpop.xlane.xlu1 %414 }
  0x9c   : > { %v456_v34 = vmul.f32 0.03125, %v409_v32  ;;  %v458_v35 = vmul.f32 0.03125, %v415_v33 }
  0x9e   : > { %v6477_v36 = vsub.f32 %v388_v0, %v456_v34  ;;  %v6479_v37 = vsub.f32 %v390_v1, %v458_v35 }
  0x9f   : > { %v412_v38 = vpop.xlane.xlu0 %411  ;;  %v418_v39 = vpop.xlane.xlu1 %417 }
  0xa0   : > { %v457_v40 = vmul.f32 0.03125, %v412_v38  ;;  %v459_v41 = vmul.f32 0.03125, %v418_v39  ;;  %v488_v42 = vmul.f32 %v6477_v36, %v6477_v36  ;;  %v490_v43 = vmul.f32 %v6479_v37, %v6479_v37 }
  0xa2   : > { %v6485_v44 = vsub.f32 %v389_v2, %v457_v40  ;;  %v6487_v45 = vsub.f32 %v391_v5, %v459_v41  ;;  %v504_v46 = vsel %vm406_vm0, %v488_v42, 0.0  ;;  %v510_v49 = vsel %vm406_vm0, %v490_v43, 0.0 }
  0xa3   : > { %505 = vadd.xlane.f32.xlu0 %v504_v46  ;;  %v421_v47 = vpop.xlane.xlu0 %420  ;;  %v424_v48 = vpop.xlane.xlu1 %423 }
  0xa4   : > { %v460_v50 = vmul.f32 0.03125, %v421_v47  ;;  %v461_v51 = vmul.f32 0.03125, %v424_v48  ;;  %v489_v52 = vmul.f32 %v6485_v44, %v6485_v44  ;;  %v491_v53 = vmul.f32 %v6487_v45, %v6487_v45 }
  0xa6   : > { %v6496_v54 = vsub.f32 %v6416_v6, %v460_v50  ;;  %v6499_v55 = vsub.f32 %v6419_v7, %v461_v51  ;;  %v507_v56 = vsel %vm406_vm0, %v489_v52, 0.0  ;;  %v513_v59 = vsel %vm406_vm0, %v491_v53, 0.0  ;;  %v5962_v53 = vld [vmem:[%s8084_s5 + $0x8] sm:$0xff]  }
  0xa7   : > { %511 = vadd.xlane.f32.xlu0 %v510_v49  ;;  %508 = vadd.xlane.f32.xlu1 %v507_v56  ;;  %v427_v57 = vpop.xlane.xlu0 %426  ;;  %v430_v58 = vpop.xlane.xlu1 %429  ;;  %v5963_v56 = vld [vmem:[%s8082_s3] sm:$0xff]  }
  0xa8   : > { %v462_v60 = vmul.f32 0.03125, %v427_v57  ;;  %v463_v61 = vmul.f32 0.03125, %v430_v58  ;;  %v492_v62 = vmul.f32 %v6496_v54, %v6496_v54  ;;  %v493_v63 = vmul.f32 %v6499_v55, %v6499_v55  ;;  %5369 = vmatprep.subr.bf16.mxu1 %v5962_v53  ;;  %v5964_v57 = vld [vmem:[%s8084_s5] sm:$0xff]   ;;  %v6584_v58 = vld [vmem:[%s8086_s7 + $0x8] sm:$0xff]  }
  0xa9   : > { %5370 = vmatpush3.bf16.msra.mxu1 %v5962_v53 }
  0xaa   : > { %v6508_v0 = vsub.f32 %v6422_v8, %v462_v60  ;;  %v6511_v1 = vsub.f32 %v6425_v9, %v463_v61  ;;  %v516_v2 = vsel %vm406_vm0, %v492_v62, 0.0  ;;  %v519_v5 = vsel %vm406_vm0, %v493_v63, 0.0  ;;  %5371 = vmatprep.subr.bf16.mxu1 %v5964_v57 }
  0xab   : > { %514 = vadd.xlane.f32.xlu1 %v513_v59  ;;  %517 = vadd.xlane.f32.xlu0 %v516_v2  ;;  %v433_v3 = vpop.xlane.xlu0 %432  ;;  %v436_v4 = vpop.xlane.xlu1 %435 }
  0xac   : > { %v464_v6 = vmul.f32 0.03125, %v433_v3  ;;  %v465_v7 = vmul.f32 0.03125, %v436_v4  ;;  %v494_v10 = vmul.f32 %v6508_v0, %v6508_v0  ;;  %v495_v8 = vmul.f32 %v6511_v1, %v6511_v1 }
  0xad   : > { %5372 = vmatpush3.bf16.msra.mxu1 %v5964_v57 }
  0xae   : > { %v6520_v11 = vsub.f32 %v6430_v12, %v464_v6  ;;  %v6523_v9 = vsub.f32 %v6433_v13, %v465_v7  ;;  %v522_v14 = vsel %vm406_vm0, %v494_v10, 0.0  ;;  %v525_v17 = vsel %vm406_vm0, %v495_v8, 0.0 }
  0xaf   : > { %520 = vadd.xlane.f32.xlu1 %v519_v5  ;;  %523 = vadd.xlane.f32.xlu0 %v522_v14  ;;  %v439_v15 = vpop.xlane.xlu0 %438  ;;  %v442_v16 = vpop.xlane.xlu1 %441 }
  0xb0   : > { %v466_v18 = vmul.f32 0.03125, %v439_v15  ;;  %v467_v19 = vmul.f32 0.03125, %v442_v16  ;;  %v496_v22 = vmul.f32 %v6520_v11, %v6520_v11  ;;  %v497_v12 = vmul.f32 %v6523_v9, %v6523_v9 }
  0xb2   : > { %v6532_v23 = vsub.f32 %v6448_v20, %v466_v18  ;;  %v6535_v13 = vsub.f32 %v6451_v21, %v467_v19  ;;  %v528_v26 = vsel %vm406_vm0, %v496_v22, 0.0  ;;  %v531_v31 = vsel %vm406_vm0, %v497_v12, 0.0 }
  0xb3   : > { %526 = vadd.xlane.f32.xlu1 %v525_v17  ;;  %529 = vadd.xlane.f32.xlu0 %v528_v26  ;;  %v445_v27 = vpop.xlane.xlu0 %444  ;;  %v448_v30 = vpop.xlane.xlu1 %447 }
  0xb4   : > { %v468_v32 = vmul.f32 0.03125, %v445_v27  ;;  %v469_v33 = vmul.f32 0.03125, %v448_v30  ;;  %v498_v34 = vmul.f32 %v6532_v23, %v6532_v23  ;;  %v499_v20 = vmul.f32 %v6535_v13, %v6535_v13 }
  0xb6   : > { %v6544_v35 = vsub.f32 %v6458_v24, %v468_v32  ;;  %v6547_v21 = vsub.f32 %v6461_v25, %v469_v33  ;;  %v534_v38 = vsel %vm406_vm0, %v498_v34, 0.0  ;;  %v537_v41 = vsel %vm406_vm0, %v499_v20, 0.0  ;;  %v6590_v33 = vld [vmem:[%s8080_s1] ss:$0 sm:$0xff] }
  0xb7   : > { %532 = vadd.xlane.f32.xlu1 %v531_v31  ;;  %535 = vadd.xlane.f32.xlu0 %v534_v38  ;;  %v451_v39 = vpop.xlane.xlu0 %450  ;;  %v454_v40 = vpop.xlane.xlu1 %453 }
  0xb8   : > { %v470_v42 = vmul.f32 0.03125, %v451_v39  ;;  %v471_v43 = vmul.f32 0.03125, %v454_v40  ;;  %v500_v46 = vmul.f32 %v6544_v35, %v6544_v35  ;;  %v501_v24 = vmul.f32 %v6547_v21, %v6547_v21 }
  0xba   : > { %v6556_v47 = vsub.f32 %v6468_v28, %v470_v42  ;;  %v6559_v25 = vsub.f32 %v6471_v29, %v471_v43  ;;  %v540_v48 = vsel %vm406_vm0, %v500_v46, 0.0  ;;  %v543_v49 = vsel %vm406_vm0, %v501_v24, 0.0  ;;  %v5961_v29 = vld [vmem:[%s8082_s3 + $0x8] sm:$0xff]  }
  0xbb   : > { %538 = vadd.xlane.f32.xlu1 %v537_v41  ;;  %541 = vadd.xlane.f32.xlu0 %v540_v48  ;;  %v6597_v48 = vld [vmem:[%s8081_s2] ss:$0 sm:$0xff] }
  0xbc   : > { %v502_v50 = vmul.f32 %v6556_v47, %v6556_v47  ;;  %v503_v51 = vmul.f32 %v6559_v25, %v6559_v25  ;;  %5349 = vmatprep.subr.bf16.mxu0 %v5961_v29 }
  0xbd   : > { %5350 = vmatpush3.bf16.msra.mxu0 %v5961_v29 }
  0xbe   : > { %v546_v52 = vsel %vm406_vm0, %v502_v50, 0.0  ;;  %v549_v28 = vsel %vm406_vm0, %v503_v51, 0.0  ;;  %5351 = vmatprep.subr.bf16.mxu0 %v5963_v56 }
  0xbf   : > { %544 = vadd.xlane.f32.xlu1 %v543_v49  ;;  %547 = vadd.xlane.f32.xlu0 %v546_v52 }
  0xc1   : > { %5352 = vmatpush3.bf16.msra.mxu0 %v5963_v56 }
  0xc2   : > { %5389 = vmatprep.subr.bf16.mxu0 %v6584_v58 }
  0xc3   : > { %550 = vadd.xlane.f32.xlu1 %v549_v28 }
 0x12c   : > { %v506_v59 = vpop.xlane.xlu0 %505 }
 0x12d   : > { %v552_v60 = vmul.f32 0.03125, %v506_v59 }
 0x12f   : > { %v568_v61 = vadd.f32 1e-05, %v552_v60 }
 0x130   : > { %v509_v62 = vpop.xlane.xlu1 %508  ;;  %v512_v63 = vpop.xlane.xlu0 %511 }
 0x131   : > { %5985 = vrsqrt.f32 %v568_v61  ;;  %v553_v2 = vmul.f32 0.03125, %v509_v62  ;;  %v554_v3 = vmul.f32 0.03125, %v512_v63 }
 0x133   : > { %v569_v4 = vadd.f32 1e-05, %v553_v2  ;;  %v570_v5 = vadd.f32 1e-05, %v554_v3 }
 0x134   : > { %v515_v6 = vpop.xlane.xlu1 %514  ;;  %v518_v7 = vpop.xlane.xlu0 %517 }
 0x135   : > { %5987 = vrsqrt.f32 %v569_v4  ;;  %v555_v10 = vmul.f32 0.03125, %v515_v6  ;;  %v556_v8 = vmul.f32 0.03125, %v518_v7 }
 0x136   : > { %5989 = vrsqrt.f32 %v570_v5 }
 0x137   : > { %v571_v14 = vadd.f32 1e-05, %v555_v10  ;;  %v572_v15 = vadd.f32 1e-05, %v556_v8 }
 0x138   : > { %v521_v16 = vpop.xlane.xlu1 %520  ;;  %v524_v17 = vpop.xlane.xlu0 %523 }
 0x139   : > { %5991 = vrsqrt.f32 %v571_v14  ;;  %v557_v18 = vmul.f32 0.03125, %v521_v16  ;;  %v558_v19 = vmul.f32 0.03125, %v524_v17 }
 0x13a   : > { %5993 = vrsqrt.f32 %v572_v15 }
 0x13b   : > { %v573_v22 = vadd.f32 1e-05, %v557_v18  ;;  %v574_v12 = vadd.f32 1e-05, %v558_v19 }
 0x13c   : > { %v527_v26 = vpop.xlane.xlu1 %526  ;;  %v530_v27 = vpop.xlane.xlu0 %529 }
 0x13d   : > { %5995 = vrsqrt.f32 %v573_v22  ;;  %v559_v30 = vmul.f32 0.03125, %v527_v26  ;;  %v560_v31 = vmul.f32 0.03125, %v530_v27 }
 0x13e   : > { %v5986_v32 = vpop.eup %5985  ;;  %5997 = vrsqrt.f32 %v574_v12 }
 0x13f   : > { %v600_v34 = vmul.f32 %v5986_v32, %v6477_v36  ;;  %v575_v20 = vadd.f32 1e-05, %v559_v30  ;;  %v576_v38 = vadd.f32 1e-05, %v560_v31 }
 0x140   : > { %v533_v39 = vpop.xlane.xlu1 %532  ;;  %v536_v40 = vpop.xlane.xlu0 %535 }
 0x141   : > { %5999 = vrsqrt.f32 %v575_v20  ;;  %v561_v41 = vmul.f32 0.03125, %v533_v39  ;;  %v562_v42 = vmul.f32 0.03125, %v536_v40  ;;  %v622_v46 = vmul.f32 %v6590_v33, %v600_v34 }
 0x142   : > { %v5988_v43 = vpop.eup %5987  ;;  %6001 = vrsqrt.f32 %v576_v38 }
 0x143   : > { %v5990_v24 = vpop.eup %5989  ;;  %v601_v49 = vmul.f32 %v5988_v43, %v6485_v44  ;;  %v577_v36 = vadd.f32 1e-05, %v561_v41  ;;  %v578_v50 = vadd.f32 1e-05, %v562_v42  ;;  %v644_v59 = vadd.f32 %v6597_v48, %v622_v46 }
 0x144   : > { %v602_v51 = vmul.f32 %v5990_v24, %v6479_v37  ;;  %v539_v52 = vpop.xlane.xlu1 %538  ;;  %v542_v28 = vpop.xlane.xlu0 %541 }
 0x145   : > { %v623_v29 = vmul.f32 %v6590_v33, %v601_v49  ;;  %6003 = vrsqrt.f32 %v577_v36  ;;  %v563_v53 = vmul.f32 0.03125, %v539_v52  ;;  %v564_v56 = vmul.f32 0.03125, %v542_v28 }
 0x146   : > { %v5992_v57 = vpop.eup %5991  ;;  %v624_v60 = vmul.f32 %v6590_v33, %v602_v51  ;;  %6005 = vrsqrt.f32 %v578_v50 }
 0x147   : > { %v5994_v61 = vpop.eup %5993  ;;  %v645_v44 = vadd.f32 %v6597_v48, %v623_v29  ;;  %v603_v62 = vmul.f32 %v5992_v57, %v6487_v45  ;;  %v579_v63 = vadd.f32 1e-05, %v563_v53  ;;  %v580_v37 = vadd.f32 1e-05, %v564_v56 }
 0x148   : > { %v604_v2 = vmul.f32 %v5994_v61, %v6496_v54  ;;  %v545_v3 = vpop.xlane.xlu1 %544  ;;  %v548_v4 = vpop.xlane.xlu0 %547  ;;  %v646_v45 = vadd.f32 %v6597_v48, %v624_v60 }
 0x149   : > { %v6607_v5 = vpack.c.bf16 %v645_v44, %v644_v59  ;;  %v625_v6 = vmul.f32 %v6590_v33, %v603_v62  ;;  %6007 = vrsqrt.f32 %v579_v63  ;;  %v565_v7 = vmul.f32 0.03125, %v545_v3 }
 0x14a   : > { %v5996_v10 = vpop.eup %5995  ;;  %v626_v8 = vmul.f32 %v6590_v33, %v604_v2  ;;  %6009 = vrsqrt.f32 %v580_v37  ;;  %v566_v14 = vmul.f32 0.03125, %v548_v4 }
 0x14b   : > { %v5998_v15 = vpop.eup %5997  ;;  %v647_v16 = vadd.f32 %v6597_v48, %v625_v6  ;;  %v605_v54 = vmul.f32 %v5996_v10, %v6499_v55  ;;  %v581_v17 = vadd.f32 1e-05, %v565_v7  ;;  %5353 = vmatprep.mubr.msk.bf16.mxu0 %vm406_vm0, %v6607_v5  ;;  %5373 = vmatprep.mubr.msk.bf16.mxu1 %vm406_vm0, %v6607_v5  ;;  %v5966_v55 = vld [vmem:[%s8086_s7] sm:$0xff]  }
 0x14c   : > { %v606_v18 = vmul.f32 %v5998_v15, %v6508_v0  ;;  %v582_v19 = vadd.f32 1e-05, %v566_v14  ;;  %v551_v22 = vpop.xlane.xlu1 %550  ;;  %v648_v31 = vadd.f32 %v6597_v48, %v626_v8  ;;  %v6724_v15 = vld [vmem:[%s8085_s6] ss:$0 sm:$0xff] }
 0x14d   : > { %v6619_v12 = vpack.c.bf16 %v647_v16, %v646_v45  ;;  %v627_v26 = vmul.f32 %v6590_v33, %v605_v54  ;;  %6011 = vrsqrt.f32 %v581_v17  ;;  %v567_v27 = vmul.f32 0.03125, %v551_v22 }
 0x14e   : > { %v6000_v30 = vpop.eup %5999  ;;  %6013 = vrsqrt.f32 %v582_v19  ;;  %v628_v0 = vmul.f32 %v6590_v33, %v606_v18 }
 0x14f   : > { %v6002_v32 = vpop.eup %6001  ;;  %v649_v34 = vadd.f32 %v6597_v48, %v627_v26  ;;  %v607_v20 = vmul.f32 %v6000_v30, %v6511_v1  ;;  %v583_v38 = vadd.f32 1e-05, %v567_v27  ;;  %5354 = vmatmul.mubr.msk.bf16.vlgmr.msra.gmra.mxu0 %vm406_vm0, %v6619_v12  ;;  %5374 = vmatmul.mubr.msk.bf16.vlgmr.msra.gmra.mxu1 %vm406_vm0, %v6619_v12 }
 0x150   : > { %v608_v39 = vmul.f32 %v6002_v32, %v6520_v11  ;;  %5390 = vmatpush3.bf16.msra.mxu0 %v6584_v58  ;;  %v650_v46 = vadd.f32 %v6597_v48, %v628_v0 }
 0x151   : > { %v6635_v40 = vpack.c.bf16 %v649_v34, %v648_v31  ;;  %v629_v41 = vmul.f32 %v6590_v33, %v607_v20  ;;  %6015 = vrsqrt.f32 %v583_v38  ;;  %5391 = vmatprep.subr.bf16.mxu0 %v5966_v55 }
 0x152   : > { %v6004_v42 = vpop.eup %6003  ;;  %v630_v1 = vmul.f32 %v6590_v33, %v608_v39 }
 0x153   : > { %8117 = vst [vmem:[#allocation2_spill] sm:$0xff] %v6635_v40  ;;  %v6006_v43 = vpop.eup %6005  ;;  %v651_v24 = vadd.f32 %v6597_v48, %v629_v41  ;;  %v609_v49 = vmul.f32 %v6004_v42, %v6523_v9  ;;  %5357 = vmatprep.mubr.msk.bf16.mxu0 %vm406_vm0, %v6635_v40  ;;  %5377 = vmatprep.mubr.msk.bf16.mxu1 %vm406_vm0, %v6635_v40 }
 0x154   : > { %v610_v11 = vmul.f32 %v6006_v43, %v6532_v23  ;;  %5392 = vmatpush3.bf16.msra.mxu0 %v5966_v55  ;;  %v652_v51 = vadd.f32 %v6597_v48, %v630_v1 }
 0x155   : > { %v6647_v58 = vpack.c.bf16 %v651_v24, %v650_v46  ;;  %v631_v36 = vmul.f32 %v6590_v33, %v609_v49 }
 0x156   : > { %v6008_v50 = vpop.eup %6007  ;;  %v632_v9 = vmul.f32 %v6590_v33, %v610_v11 }
 0x157   : > { %8118 = vst [vmem:[#allocation3_spill] sm:$0xff] %v6647_v58  ;;  %v6010_v52 = vpop.eup %6009  ;;  %v653_v28 = vadd.f32 %v6597_v48, %v631_v36  ;;  %v611_v29 = vmul.f32 %v6008_v50, %v6535_v13  ;;  %5358 = vmatmul.mubr.msk.bf16.gmra.mxu0 %vm406_vm0, %v6647_v58  ;;  %5378 = vmatmul.mubr.msk.bf16.gmra.mxu1 %vm406_vm0, %v6647_v58 }
 0x158   : > { %v612_v23 = vmul.f32 %v6010_v52, %v6544_v35  ;;  %v654_v61 = vadd.f32 %v6597_v48, %v632_v9 }
 0x159   : > { %v6659_v53 = vpack.c.bf16 %v653_v28, %v652_v51  ;;  %v633_v56 = vmul.f32 %v6590_v33, %v611_v29 }
 0x15a   : > { %v6012_v57 = vpop.eup %6011  ;;  %v634_v59 = vmul.f32 %v6590_v33, %v612_v23 }
 0x15b   : > { %8119 = vst [vmem:[#allocation4_spill] sm:$0xff] %v6659_v53  ;;  %v6014_v60 = vpop.eup %6013  ;;  %v655_v13 = vadd.f32 %v6597_v48, %v633_v56  ;;  %v613_v44 = vmul.f32 %v6012_v57, %v6547_v21  ;;  %5361 = vmatprep.mubr.msk.bf16.mxu0 %vm406_vm0, %v6659_v53  ;;  %5381 = vmatprep.mubr.msk.bf16.mxu1 %vm406_vm0, %v6659_v53 }
 0x15c   : > { %v614_v35 = vmul.f32 %v6014_v60, %v6556_v47  ;;  %v656_v2 = vadd.f32 %v6597_v48, %v634_v59 }
 0x15d   : > { %v6671_v62 = vpack.c.bf16 %v655_v13, %v654_v61  ;;  %v635_v63 = vmul.f32 %v6590_v33, %v613_v44 }
 0x15e   : > { %v6016_v37 = vpop.eup %6015  ;;  %v636_v4 = vmul.f32 %v6590_v33, %v614_v35 }
 0x15f   : > { %8120 = vst [vmem:[#allocation5_spill] sm:$0xff] %v6671_v62  ;;  %v657_v3 = vadd.f32 %v6597_v48, %v635_v63  ;;  %v615_v21 = vmul.f32 %v6016_v37, %v6559_v25  ;;  %5362 = vmatmul.mubr.msk.bf16.gmra.mxu0 %vm406_vm0, %v6671_v62  ;;  %5382 = vmatmul.mubr.msk.bf16.gmra.mxu1 %vm406_vm0, %v6671_v62 }
 0x160   : > { %v658_v7 = vadd.f32 %v6597_v48, %v636_v4 }
 0x161   : > { %v6682_v47 = vpack.c.bf16 %v657_v3, %v656_v2  ;;  %v637_v6 = vmul.f32 %v6590_v33, %v615_v21  ;;  %v6716_v33 = vld [vmem:[%s8083_s4] ss:$0 sm:$0xff] }
 0x163   : > { %8121 = vst [vmem:[#allocation6_spill] sm:$0xff] %v6682_v47  ;;  %v659_v10 = vadd.f32 %v6597_v48, %v637_v6  ;;  %5365 = vmatprep.mubr.msk.bf16.mxu0 %vm406_vm0, %v6682_v47  ;;  %5385 = vmatprep.mubr.msk.bf16.mxu1 %vm406_vm0, %v6682_v47 }
 0x165   : > { %v6691_v25 = vpack.c.bf16 %v659_v10, %v658_v7 }
 0x167   : > { %8122 = vst [vmem:[#allocation7_spill] sm:$0xff] %v6691_v25  ;;  %5366 = vmatmul.mubr.msk.bf16.gmra.mxu0 %vm406_vm0, %v6691_v25  ;;  %5386 = vmatmul.mubr.msk.bf16.gmra.mxu1 %vm406_vm0, %v6691_v25 }
 0x168   : > { %5393 = vmatprep.mubr.msk.bf16.mxu0 %vm406_vm0, %v6607_v5 }
 0x16f   : > { %5394 = vmatmul.mubr.msk.bf16.vlgmr.msra.gmra.mxu0 %vm406_vm0, %v6619_v12 }
 0x170   : > { %5397 = vmatprep.mubr.msk.bf16.mxu0 %vm406_vm0, %v6635_v40 }
 0x177   : > { %5398 = vmatmul.mubr.msk.bf16.gmra.mxu0 %vm406_vm0, %v6647_v58 }
 0x178   : > { %5401 = vmatprep.mubr.msk.bf16.mxu0 %vm406_vm0, %v6659_v53 }
 0x17f   : > { %5402 = vmatmul.mubr.msk.bf16.gmra.mxu0 %vm406_vm0, %v6671_v62 }
 0x180   : > { %5405 = vmatprep.mubr.msk.bf16.mxu0 %vm406_vm0, %v6682_v47 }
 0x187   : > { %5406 = vmatmul.mubr.msk.bf16.gmra.mxu0 %vm406_vm0, %v6691_v25 }
 0x20f   : > { %v5355_v48 = vpop.f32.mrf.mxu0  ;;  %v5375_v8 = vpop.f32.mrf.mxu1 }
 0x210   : > { %v6719_v14 = vadd.f32 %v5355_v48, %v6716_v33  ;;  %v878_v18 = vadd.f32 %v5375_v8, %v6724_v15 }
 0x211   : > { %v749_v45 = vpop.f32.mrf.mxu0  ;;  %v6726_v16 = vpop.f32.mrf.mxu1 }
 0x212   : > { %v750_v55 = vadd.f32 %v6716_v33, %v749_v45 }
 0x213   : > { %v5356_v54 = vpop.f32.mrf.mxu0  ;;  %v5376_v17 = vpop.f32.mrf.mxu1 }
 0x214   : > { %v6730_v19 = vadd.f32 %v5356_v54, %v6716_v33  ;;  %v881_v22 = vadd.f32 %v5376_v17, %v6724_v15 }
 0x215   : > { %v752_v26 = vpop.f32.mrf.mxu0  ;;  %v6733_v27 = vpop.f32.mrf.mxu1 }
 0x216   : > { %v1053_v30 = vpack.c.bf16 %v6730_v19, %v6719_v14  ;;  %v6738_v31 = vpack.c.bf16 %v881_v22, %v878_v18  ;;  %v753_v32 = vadd.f32 %v6716_v33, %v752_v26 }
 0x217   : > { %v5359_v34 = vpop.f32.mrf.mxu0  ;;  %v6741_v0 = vpop.f32.mrf.mxu1 }
 0x218   : > { %v1052_v20 = vpack.c.bf16 %v753_v32, %v750_v55  ;;  %v6744_v38 = vadd.f32 %v5359_v34, %v6716_v33 }
 0x219   : > { %v765_v39 = vpop.f32.mrf.mxu0  ;;  %v6746_v41 = vpop.f32.mrf.mxu1 }
 0x21a   : > { %v6749_v42 = vadd.f32 %v6716_v33, %v765_v39  ;;  %5425 = vmatprep.mubr.msk.bf16.mxu1 %vm1068_vm1, %v1052_v20 }
 0x21b   : > { %v5360_v1 = vpop.f32.mrf.mxu0  ;;  %v6752_v43 = vpop.f32.mrf.mxu1 }
 0x21c   : > { %v6755_v46 = vadd.f32 %v5360_v1, %v6716_v33 }
 0x21d   : > { %v768_v24 = vpop.f32.mrf.mxu0  ;;  %v6757_v49 = vpop.f32.mrf.mxu1 }
 0x21e   : > { %v1055_v11 = vpack.c.bf16 %v6755_v46, %v6744_v38  ;;  %v6762_v36 = vadd.f32 %v6716_v33, %v768_v24 }
 0x21f   : > { %v5363_v50 = vpop.f32.mrf.mxu0  ;;  %v5383_v51 = vpop.f32.mrf.mxu1 }
 0x220   : > { %v1054_v52 = vpack.c.bf16 %v6762_v36, %v6749_v42  ;;  %v6767_v28 = vadd.f32 %v5363_v50, %v6716_v33 }
 0x221   : > { %v781_v9 = vpop.f32.mrf.mxu0  ;;  %v901_v29 = vpop.f32.mrf.mxu1 }
 0x222   : > { %v6770_v23 = vadd.f32 %v6716_v33, %v781_v9  ;;  %v910_v9 = vadd.f32 %v5383_v51, %v6724_v15 }
 0x223   : > { %v5364_v56 = vpop.f32.mrf.mxu0  ;;  %v5384_v57 = vpop.f32.mrf.mxu1 }
 0x224   : > { %v6773_v59 = vadd.f32 %v5364_v56, %v6716_v33 }
 0x225   : > { %v784_v60 = vpop.f32.mrf.mxu0  ;;  %v904_v61 = vpop.f32.mrf.mxu1 }
 0x226   : > { %v1057_v13 = vpack.c.bf16 %v6773_v59, %v6767_v28  ;;  %v6778_v44 = vadd.f32 %v6716_v33, %v784_v60 }
 0x227   : > { %v5367_v35 = vpop.f32.mrf.mxu0  ;;  %v5387_v63 = vpop.f32.mrf.mxu1 }
 0x228   : > { %v1056_v37 = vpack.c.bf16 %v6778_v44, %v6770_v23  ;;  %v6783_v2 = vadd.f32 %v5367_v35, %v6716_v33  ;;  %v926_v10 = vadd.f32 %v5387_v63, %v6724_v15 }
 0x229   : > { %v797_v3 = vpop.f32.mrf.mxu0  ;;  %v917_v4 = vpop.f32.mrf.mxu1 }
 0x22a   : > { %v6786_v21 = vadd.f32 %v6716_v33, %v797_v3  ;;  %v918_v45 = vadd.f32 %v6724_v15, %v917_v4  ;;  %v905_v4 = vadd.f32 %v6724_v15, %v904_v61 }
 0x22b   : > { %v5368_v6 = vpop.f32.mrf.mxu0  ;;  %v5388_v7 = vpop.f32.mrf.mxu1 }
 0x22c   : > { %v6790_v48 = vadd.f32 %v5368_v6, %v6716_v33  ;;  %v929_v8 = vadd.f32 %v5388_v7, %v6724_v15  ;;  %v902_v7 = vadd.f32 %v6724_v15, %v901_v29 }
 0x22d   : > { %v800_v54 = vpop.f32.mrf.mxu0  ;;  %v920_v17 = vpop.f32.mrf.mxu1 }
 0x22e   : > { %v1067_v22 = vpack.c.bf16 %v929_v8, %v926_v10  ;;  %v6797_v26 = vadd.f32 %v6716_v33, %v800_v54  ;;  %v921_v55 = vadd.f32 %v6724_v15, %v920_v17  ;;  %v913_v33 = vadd.f32 %v5384_v57, %v6724_v15 }
 0x22f   : > { %v6800_v32 = vpop.f32.mrf.mxu0  ;;  %v1064_v57 = vpack.c.bf16 %v905_v4, %v902_v7  ;;  %v897_v54 = vadd.f32 %v6752_v43, %v6724_v15  ;;  %v889_v43 = vadd.f32 %v6724_v15, %v6757_v49  ;;  %v8123_v14 = vpack.c.bf16 %v6790_v48, %v6783_v2 }
 0x230   : > { %v1058_v34 = vpack.c.bf16 %v6797_v26, %v6786_v21  ;;  %v1066_v20 = vpack.c.bf16 %v921_v55, %v918_v45  ;;  %5917 = vmatprep.subr.msk.bf16.mxu1 %vm1068_vm1, %v1067_v22  ;;  %v1115_v39 = vsel %vm1068_vm1, %v1067_v22, 0  ;;  %v1065_v60 = vpack.c.bf16 %v913_v33, %v910_v9 }
 0x231   : > { %v6806_v1 = vpop.f32.mrf.mxu0  ;;  %5410 = vmatpush3.bf16.xpose.msra.mxu1 %v1115_v39  ;;  %v894_v22 = vadd.f32 %v6741_v0, %v6724_v15  ;;  %v1106_v29 = vsel %vm1068_vm1, %v1064_v57, 0  ;;  %v4838_v39 = vld [vmem:[%s8087_s8] ss:$0 sm:$0xff]  ;;  %v886_v0 = vadd.f32 %v6724_v15, %v6746_v41 }
 0x232   : > { %5918 = vmatprep.subr.msk.bf16.mxu1 %vm1068_vm1, %v1066_v20  ;;  %v1112_v35 = vsel %vm1068_vm1, %v1066_v20, 0  ;;  %v1109_v8 = vsel %vm1068_vm1, %v1065_v60, 0 }
 0x233   : > { %v6809_v24 = vpop.f32.mrf.mxu0  ;;  %v1063_v55 = vpack.c.bf16 %v897_v54, %v894_v22 }
 0x235   : > { %v6812_v50 = vpop.f32.mrf.mxu0 }
 0x237   : > { %v5399_v56 = vpop.f32.mrf.mxu0 }
 0x239   : > { %v1005_v63 = vpop.f32.mrf.mxu0  ;;  %5412 = vmatpush3.bf16.xpose.msra.mxu1 %v1112_v35 }
 0x23a   : > { %5919 = vmatprep.subr.msk.bf16.mxu1 %vm1068_vm1, %v1065_v60 }
 0x23b   : > { %v5400_v3 = vpop.f32.mrf.mxu0 }
 0x23c   : > { %v1017_v41 = vadd.f32 %v5400_v3, %v4838_v39  ;;  %v1006_v3 = vadd.f32 %v4838_v39, %v1005_v63 }
 0x23d   : > { %v1008_v6 = vpop.f32.mrf.mxu0 }
 0x23f   : > { %v5403_v10 = vpop.f32.mrf.mxu0 }
 0x240   : > { %v1030_v18 = vadd.f32 %v5403_v10, %v4838_v39  ;;  %v873_v10 = vadd.f32 %v6724_v15, %v6733_v27 }
 0x241   : > { %v1021_v45 = vpop.f32.mrf.mxu0  ;;  %5414 = vmatpush3.bf16.xpose.msra.mxu1 %v1109_v8  ;;  %v1062_v8 = vpack.c.bf16 %v889_v43, %v886_v0 }
 0x242   : > { %5920 = vmatprep.subr.msk.bf16.mxu1 %vm1068_vm1, %v1064_v57 }
 0x243   : > { %v5404_v51 = vpop.f32.mrf.mxu0  ;;  %v1100_v43 = vsel %vm1068_vm1, %v1062_v8, 0 }
 0x244   : > { %v1033_v54 = vadd.f32 %v5404_v51, %v4838_v39  ;;  %v1014_v51 = vadd.f32 %v5399_v56, %v4838_v39  ;;  %v1097_v56 = vsel %vm1068_vm1, %v6738_v31, 0 }
 0x245   : > { %v1024_v17 = vpop.f32.mrf.mxu0 }
 0x246   : > { %v1355_v49 = vpack.c.bf16 %v1033_v54, %v1030_v18  ;;  %v1009_v18 = vadd.f32 %v4838_v39, %v1008_v6  ;;  %v993_v6 = vadd.f32 %v4838_v39, %v6812_v50 }
 0x247   : > { %v5407_v61 = vpop.f32.mrf.mxu0 }
 0x248   : > { %v1046_v9 = vadd.f32 %v5407_v61, %v4838_v39  ;;  %v1025_v61 = vadd.f32 %v4838_v39, %v1024_v17 }
 0x249   : > { %v1037_v20 = vpop.f32.mrf.mxu0  ;;  %5416 = vmatpush3.bf16.xpose.msra.mxu1 %v1106_v29  ;;  %v1103_v29 = vsel %vm1068_vm1, %v1063_v55, 0 }
 0x24a   : > { %5921 = vmatprep.subr.msk.bf16.mxu1 %vm1068_vm1, %v1063_v55  ;;  %v1038_v4 = vadd.f32 %v4838_v39, %v1037_v20  ;;  %v1353_v55 = vpack.c.bf16 %v1017_v41, %v1014_v51 }
 0x24b   : > { %v5408_v33 = vpop.f32.mrf.mxu0 }
 0x24c   : > { %v1049_v60 = vadd.f32 %v5408_v33, %v4838_v39  ;;  %v1022_v33 = vadd.f32 %v4838_v39, %v1021_v45  ;;  %v870_v45 = vadd.f32 %v6724_v15, %v6726_v16  ;;  %v990_v15 = vadd.f32 %v4838_v39, %v6806_v1  ;;  %v5967_v16 = vld [vmem:[%s8084_s5 + $0x18] sm:$0xff]  }
 0x24d   : > { %v1040_v35 = vpop.f32.mrf.mxu0 }
 0x24e   : > { %v1357_v7 = vpack.c.bf16 %v1049_v60, %v1046_v9  ;;  %v1041_v57 = vadd.f32 %v4838_v39, %v1040_v35  ;;  %v1354_v20 = vpack.c.bf16 %v1025_v61, %v1022_v33  ;;  %v1060_v17 = vpack.c.bf16 %v873_v10, %v870_v45  ;;  %v4878_v61 = vld [vmem:[%s8085_s6 + $0x1] ss:$0 sm:$0xff] }
 0x24f   : > { %v1001_v9 = vadd.f32 %v6809_v24, %v4838_v39  ;;  %v1352_v60 = vpack.c.bf16 %v1009_v18, %v1006_v3  ;;  %v998_v35 = vadd.f32 %v6800_v32, %v4838_v39  ;;  %v1350_v24 = vpack.c.bf16 %v993_v6, %v990_v15  ;;  %v5968_v32 = vld [vmem:[%s8084_s5 + $0x10] sm:$0xff]  }
 0x250   : > { %v1356_v22 = vpack.c.bf16 %v1041_v57, %v1038_v4  ;;  %5441 = vmatprep.subr.bf16.mxu0 %v1357_v7 }
 0x251   : > { %5418 = vmatpush3.bf16.xpose.msra.mxu1 %v1103_v29  ;;  %5442 = vmatpush3.bf16.msra.mxu0 %v1357_v7  ;;  %v1351_v27 = vpack.c.bf16 %v1001_v9, %v998_v35 }
 0x252   : > { %5922 = vmatprep.subr.msk.bf16.mxu1 %vm1068_vm1, %v1062_v8  ;;  %5443 = vmatprep.subr.bf16.mxu0 %v1356_v22 }
 0x255   : > { %5444 = vmatpush3.bf16.msra.mxu0 %v1356_v22 }
 0x256   : > { %5445 = vmatprep.subr.bf16.mxu0 %v1355_v49 }
 0x259   : > { %5420 = vmatpush3.bf16.xpose.msra.mxu1 %v1100_v43  ;;  %5446 = vmatpush3.bf16.msra.mxu0 %v1355_v49 }
 0x25a   : > { %5923 = vmatprep.subr.msk.bf16.mxu1 %vm1068_vm1, %v6738_v31  ;;  %5447 = vmatprep.subr.bf16.mxu0 %v1354_v20  ;;  %v1094_v31 = vsel %vm1068_vm1, %v1060_v17, 0 }
 0x25d   : > { %5448 = vmatpush3.bf16.msra.mxu0 %v1354_v20 }
 0x25e   : > { %5449 = vmatprep.subr.bf16.mxu0 %v1353_v55 }
 0x261   : > { %5422 = vmatpush3.bf16.xpose.msra.mxu1 %v1097_v56  ;;  %5450 = vmatpush3.bf16.msra.mxu0 %v1353_v55 }
 0x262   : > { %5924 = vmatprep.subr.msk.bf16.mxu1 %vm1068_vm1, %v1060_v17  ;;  %5451 = vmatprep.subr.bf16.mxu0 %v1352_v60  ;;  %v6955_v17 = vld [vmem:[%s8082_s3 + $0x18] sm:$0xff]  }
 0x265   : > { %5452 = vmatpush3.bf16.msra.mxu0 %v1352_v60 }
 0x266   : > { %5453 = vmatprep.subr.bf16.mxu0 %v1351_v27 }
 0x269   : > { %5424 = vmatpush3.bf16.xpose.msra.mxu1 %v1094_v31  ;;  %5454 = vmatpush3.bf16.msra.mxu0 %v1351_v27 }
 0x26a   : > { %5455 = vmatprep.subr.bf16.mxu0 %v1350_v24  ;;  %5493 = vmatprep.subr.bf16.mxu1 %v5967_v16 }
 0x26d   : > { %5456 = vmatpush3.bf16.msra.mxu0 %v1350_v24 }
 0x26e   : > { %5473 = vmatprep.subr.bf16.mxu0 %v6955_v17 }
 0x270   : > { %5426 = vmatmul.mubr.msk.bf16.vlgmr.msra.gmra.mxu1 %vm1068_vm1, %v1053_v30 }
 0x271   : > { %5429 = vmatprep.mubr.msk.bf16.mxu1 %vm1068_vm1, %v1054_v52  ;;  %5494 = vmatpush3.bf16.msra.mxu1 %v5967_v16 }
 0x272   : > { %5495 = vmatprep.subr.bf16.mxu1 %v5968_v32 }
 0x275   : > { %5496 = vmatpush3.bf16.msra.mxu1 %v5968_v32 }
 0x278   : > { %5430 = vmatmul.mubr.msk.bf16.gmra.mxu1 %vm1068_vm1, %v1055_v11 }
 0x279   : > { %5433 = vmatprep.mubr.msk.bf16.mxu1 %vm1068_vm1, %v1056_v37 }
 0x280   : > { %5434 = vmatmul.mubr.msk.bf16.gmra.mxu1 %vm1068_vm1, %v1057_v13 }
 0x281   : > { %5437 = vmatprep.mubr.msk.bf16.mxu1 %vm1068_vm1, %v1058_v34 }
 0x288   : > { %5438 = vmatmul.mubr.msk.bf16.gmra.mxu1 %vm1068_vm1, %v8123_v14 }
 0x289   : > { %5497 = vmatprep.mubr.msk.bf16.mxu1 %vm406_vm0, %v6607_v5 }
 0x290   : > { %5498 = vmatmul.mubr.msk.bf16.vlgmr.msra.gmra.mxu1 %vm406_vm0, %v6619_v12 }
 0x291   : > { %5501 = vmatprep.mubr.msk.bf16.mxu1 %vm406_vm0, %v6635_v40 }
 0x298   : > { %5502 = vmatmul.mubr.msk.bf16.gmra.mxu1 %vm406_vm0, %v6647_v58 }
 0x299   : > { %5505 = vmatprep.mubr.msk.bf16.mxu1 %vm406_vm0, %v6659_v53 }
 0x2a0   : > { %5506 = vmatmul.mubr.msk.bf16.gmra.mxu1 %vm406_vm0, %v6671_v62 }
 0x2a1   : > { %5509 = vmatprep.mubr.msk.bf16.mxu1 %vm406_vm0, %v6682_v47 }
 0x2a8   : > { %5510 = vmatmul.mubr.msk.bf16.gmra.mxu1 %vm406_vm0, %v6691_v25 }
 0x330   : > { %v5427_v19 = vpop.f32.mrf.mxu1 }
 0x331   : > { %v6904_v11 = vmul.f32 0.17677669, %v5427_v19 }
 0x332   : > { %v1151_v30 = vpop.f32.mrf.mxu1 }
 0x333   : > { %v6901_v38 = vmul.f32 0.17677669, %v1151_v30 }
 0x334   : > { %v5428_v42 = vpop.f32.mrf.mxu1 }
 0x335   : > { %1230 = vmax.xlane.f32.xlu0 %v6901_v38  ;;  %v6910_v23 = vmul.f32 0.17677669, %v5428_v42 }
 0x336   : > { %v1154_v46 = vpop.f32.mrf.mxu1 }
 0x337   : > { %v6906_v36 = vmul.f32 0.17677669, %v1154_v46 }
 0x338   : > { %v5431_v52 = vpop.f32.mrf.mxu1 }
 0x339   : > { %1234 = vmax.xlane.f32.xlu0 %v6904_v11  ;;  %1232 = vmax.xlane.f32.xlu1 %v6906_v36  ;;  %v6916_v37 = vmul.f32 0.17677669, %v5431_v52 }
 0x33a   : > { %v1167_v28 = vpop.f32.mrf.mxu1 }
 0x33b   : > { %v6912_v59 = vmul.f32 0.17677669, %v1167_v28 }
 0x33c   : > { %v5432_v13 = vpop.f32.mrf.mxu1 }
 0x33d   : > { %1236 = vmax.xlane.f32.xlu1 %v6910_v23  ;;  %1238 = vmax.xlane.f32.xlu0 %v6912_v59  ;;  %v6922_v26 = vmul.f32 0.17677669, %v5432_v13 }
 0x33e   : > { %v1170_v44 = vpop.f32.mrf.mxu1 }
 0x33f   : > { %v6918_v2 = vmul.f32 0.17677669, %v1170_v44 }
 0x340   : > { %v5435_v21 = vpop.f32.mrf.mxu1 }
 0x341   : > { %1242 = vmax.xlane.f32.xlu0 %v6916_v37  ;;  %1240 = vmax.xlane.f32.xlu1 %v6918_v2  ;;  %v6928_v63 = vmul.f32 0.17677669, %v5435_v21 }
 0x342   : > { %v1183_v48 = vpop.f32.mrf.mxu1 }
 0x343   : > { %v6924_v34 = vmul.f32 0.17677669, %v1183_v48 }
 0x344   : > { %v5436_v1 = vpop.f32.mrf.mxu1 }
 0x345   : > { %1244 = vmax.xlane.f32.xlu1 %v6922_v26  ;;  %1246 = vmax.xlane.f32.xlu0 %v6924_v34  ;;  %v6934_v7 = vmul.f32 0.17677669, %v5436_v1 }
 0x346   : > { %v1186_v50 = vpop.f32.mrf.mxu1 }
 0x347   : > { %v6930_v39 = vmul.f32 0.17677669, %v1186_v50 }
 0x348   : > { %v5439_v0 = vpop.f32.mrf.mxu1 }
 0x349   : > { %1250 = vmax.xlane.f32.xlu0 %v6928_v63  ;;  %1248 = vmax.xlane.f32.xlu1 %v6930_v39  ;;  %v6940_v22 = vmul.f32 0.17677669, %v5439_v0 }
 0x34a   : > { %v1199_v4 = vpop.f32.mrf.mxu1 }
 0x34b   : > { %v6936_v57 = vmul.f32 0.17677669, %v1199_v4 }
 0x34c   : > { %v5440_v8 = vpop.f32.mrf.mxu1 }
 0x34d   : > { %1252 = vmax.xlane.f32.xlu1 %v6934_v7  ;;  %1254 = vmax.xlane.f32.xlu0 %v6936_v57  ;;  %v6949_v41 = vmul.f32 0.17677669, %v5440_v8 }
 0x34e   : > { %v1202_v54 = vpop.f32.mrf.mxu1 }
 0x34f   : > { %v6942_v29 = vmul.f32 0.17677669, %v1202_v54 }
 0x350   : > { %v5499_v49 = vpop.f32.mrf.mxu1 }
 0x351   : > { %1258 = vmax.xlane.f32.xlu0 %v6940_v22  ;;  %1256 = vmax.xlane.f32.xlu1 %v6942_v29  ;;  %v1686_v43 = vadd.f32 %v5499_v49, %v4878_v61 }
 0x352   : > { %v1677_v33 = vpop.f32.mrf.mxu1 }
 0x354   : > { %v5500_v20 = vpop.f32.mrf.mxu1 }
 0x355   : > { %v1689_v51 = vadd.f32 %v5500_v20, %v4878_v61  ;;  %1260 = vmax.xlane.f32.xlu1 %v6949_v41 }
 0x356   : > { %v1680_v10 = vpop.f32.mrf.mxu1 }
 0x357   : > { %v1871_v55 = vpack.c.bf16 %v1689_v51, %v1686_v43 }
 0x358   : > { %v5503_v18 = vpop.f32.mrf.mxu1 }
 0x359   : > { %v1702_v4 = vadd.f32 %v5503_v18, %v4878_v61  ;;  %v1681_v18 = vadd.f32 %v4878_v61, %v1680_v10 }
 0x35a   : > { %v1693_v45 = vpop.f32.mrf.mxu1 }
 0x35b   : > { %v1694_v20 = vadd.f32 %v4878_v61, %v1693_v45 }
 0x35c   : > { %v5504_v3 = vpop.f32.mrf.mxu1 }
 0x35d   : > { %v1705_v0 = vadd.f32 %v5504_v3, %v4878_v61  ;;  %v1678_v3 = vadd.f32 %v4878_v61, %v1677_v33 }
 0x35e   : > { %v1696_v9 = vpop.f32.mrf.mxu1 }
 0x35f   : > { %v1873_v8 = vpack.c.bf16 %v1705_v0, %v1702_v4  ;;  %v1697_v49 = vadd.f32 %v4878_v61, %v1696_v9 }
 0x360   : > { %v5507_v60 = vpop.f32.mrf.mxu1 }
 0x361   : > { %v1718_v28 = vadd.f32 %v5507_v60, %v4878_v61  ;;  %v1872_v43 = vpack.c.bf16 %v1697_v49, %v1694_v20  ;;  %v1912_v51 = vsel %vm1068_vm1, %v1873_v8, 0 }
 0x362   : > { %v1709_v56 = vpop.f32.mrf.mxu1 }
 0x363   : > { %v1710_v48 = vadd.f32 %v4878_v61, %v1709_v56  ;;  %v1909_v60 = vsel %vm1068_vm1, %v1872_v43, 0  ;;  %v1870_v56 = vpack.c.bf16 %v1681_v18, %v1678_v3 }
 0x364   : > { %v5508_v35 = vpop.f32.mrf.mxu1 }
 0x365   : > { %v1721_v52 = vadd.f32 %v5508_v35, %v4878_v61  ;;  %v1906_v35 = vsel %vm1068_vm1, %v1871_v55, 0  ;;  %v1903_v45 = vsel %vm1068_vm1, %v1870_v56, 0 }
 0x366   : > { %v1712_v27 = vpop.f32.mrf.mxu1 }
 0x367   : > { %v1875_v13 = vpack.c.bf16 %v1721_v52, %v1718_v28  ;;  %v1713_v21 = vadd.f32 %v4878_v61, %v1712_v27 }
 0x368   : > { %v5511_v6 = vpop.f32.mrf.mxu1 }
 0x369   : > { %v1734_v24 = vadd.f32 %v5511_v6, %v4878_v61  ;;  %v1874_v1 = vpack.c.bf16 %v1713_v21, %v1710_v48  ;;  %v1918_v50 = vsel %vm1068_vm1, %v1875_v13, 0 }
 0x36a   : > { %v1725_v15 = vpop.f32.mrf.mxu1 }
 0x36b   : > { %v1726_v14 = vadd.f32 %v4878_v61, %v1725_v15  ;;  %v1915_v54 = vsel %vm1068_vm1, %v1874_v1, 0 }
 0x36c   : > { %v5512_v16 = vpop.f32.mrf.mxu1 }
 0x36d   : > { %v1737_v31 = vadd.f32 %v5512_v16, %v4878_v61 }
 0x36e   : > { %v1728_v32 = vpop.f32.mrf.mxu1 }
 0x36f   : > { %v1877_v19 = vpack.c.bf16 %v1737_v31, %v1734_v24  ;;  %v1729_v30 = vadd.f32 %v4878_v61, %v1728_v32 }
 0x371   : > { %v1876_v42 = vpack.c.bf16 %v1729_v30, %v1726_v14  ;;  %5925 = vmatprep.subr.msk.bf16.mxu1 %vm1068_vm1, %v1877_v19  ;;  %v1924_v46 = vsel %vm1068_vm1, %v1877_v19, 0 }
 0x372   : > { %5534 = vmatpush3.bf16.xpose.msra.mxu1 %v1924_v46 }
 0x373   : > { %5926 = vmatprep.subr.msk.bf16.mxu1 %vm1068_vm1, %v1876_v42  ;;  %v1921_v44 = vsel %vm1068_vm1, %v1876_v42, 0 }
 0x37a   : > { %5536 = vmatpush3.bf16.xpose.msra.mxu1 %v1921_v44 }
 0x37b   : > { %5927 = vmatprep.subr.msk.bf16.mxu1 %vm1068_vm1, %v1875_v13 }
 0x382   : > { %5538 = vmatpush3.bf16.xpose.msra.mxu1 %v1918_v50 }
 0x383   : > { %5928 = vmatprep.subr.msk.bf16.mxu1 %vm1068_vm1, %v1874_v1 }
 0x38a   : > { %5540 = vmatpush3.bf16.xpose.msra.mxu1 %v1915_v54 }
 0x38b   : > { %5929 = vmatprep.subr.msk.bf16.mxu1 %vm1068_vm1, %v1873_v8 }
 0x392   : > { %5542 = vmatpush3.bf16.xpose.msra.mxu1 %v1912_v51 }
 0x393   : > { %5930 = vmatprep.subr.msk.bf16.mxu1 %vm1068_vm1, %v1872_v43 }
 0x39a   : > { %5544 = vmatpush3.bf16.xpose.msra.mxu1 %v1909_v60  ;;  %v5970_v60 = vld [vmem:[%s8082_s3 + $0x10] sm:$0xff]  }
 0x39b   : > { %5931 = vmatprep.subr.msk.bf16.mxu1 %vm1068_vm1, %v1871_v55 }
 0x3a2   : > { %5546 = vmatpush3.bf16.xpose.msra.mxu1 %v1906_v35 }
 0x3a3   : > { %5932 = vmatprep.subr.msk.bf16.mxu1 %vm1068_vm1, %v1870_v56 }
 0x3aa   : > { %5548 = vmatpush3.bf16.xpose.msra.mxu1 %v1903_v45 }
 0x3be   : > { %v1231_v9 = vpop.xlane.xlu0 %1230 }
 0x3bf   : > { %v1262_v27 = vsub.f32 %v6901_v38, %v1231_v9 }
 0x3c1   : > { %v1278_v16 = vmul.f32 1.442695, %v1262_v27  ;;  %v5971_v27 = vld [vmem:[%s8086_s7 + $0x18] sm:$0xff]  }
 0x3c2   : > { %v1235_v6 = vpop.xlane.xlu0 %1234  ;;  %v1233_v15 = vpop.xlane.xlu1 %1232 }
 0x3c3   : > { %v1264_v24 = vsub.f32 %v6904_v11, %v1235_v6  ;;  %v1263_v10 = vsub.f32 %v6906_v36, %v1233_v15  ;;  %6017 = vpow2.f32 %v1278_v16 }
 0x3c5   : > { %v1280_v61 = vmul.f32 1.442695, %v1263_v10  ;;  %v1282_v33 = vmul.f32 1.442695, %v1264_v24 }
 0x3c6   : > { %v1237_v31 = vpop.xlane.xlu1 %1236  ;;  %v1239_v55 = vpop.xlane.xlu0 %1238 }
 0x3c7   : > { %v1265_v32 = vsub.f32 %v6910_v23, %v1237_v31  ;;  %v1266_v14 = vsub.f32 %v6912_v59, %v1239_v55  ;;  %6019 = vpow2.f32 %v1280_v61 }
 0x3c8   : > { %6021 = vpow2.f32 %v1282_v33 }
 0x3c9   : > { %v1284_v19 = vmul.f32 1.442695, %v1265_v32  ;;  %v1286_v42 = vmul.f32 1.442695, %v1266_v14 }
 0x3ca   : > { %v1243_v38 = vpop.xlane.xlu0 %1242  ;;  %v1241_v30 = vpop.xlane.xlu1 %1240 }
 0x3cb   : > { %6023 = vpow2.f32 %v1284_v19  ;;  %v1268_v11 = vsub.f32 %v6916_v37, %v1243_v38  ;;  %v1267_v36 = vsub.f32 %v6918_v2, %v1241_v30 }
 0x3cc   : > { %6025 = vpow2.f32 %v1286_v42 }
 0x3cd   : > { %v1288_v46 = vmul.f32 1.442695, %v1267_v36  ;;  %v1290_v52 = vmul.f32 1.442695, %v1268_v11  ;;  %v5972_v36 = vld [vmem:[%s8086_s7 + $0x10] sm:$0xff]  }
 0x3ce   : > { %v1245_v28 = vpop.xlane.xlu1 %1244  ;;  %v1247_v13 = vpop.xlane.xlu0 %1246 }
 0x3cf   : > { %v1269_v23 = vsub.f32 %v6922_v26, %v1245_v28  ;;  %v1270_v59 = vsub.f32 %v6924_v34, %v1247_v13  ;;  %6027 = vpow2.f32 %v1288_v46 }
 0x3d0   : > { %6029 = vpow2.f32 %v1290_v52  ;;  %v6985_v50 = vpop.eup %6017 }
 0x3d1   : > { %v1292_v44 = vmul.f32 1.442695, %v1269_v23  ;;  %v1294_v1 = vmul.f32 1.442695, %v1270_v59 }
 0x3d2   : > { %v1251_v21 = vpop.xlane.xlu0 %1250  ;;  %v1249_v48 = vpop.xlane.xlu1 %1248 }
 0x3d3   : > { %6031 = vpow2.f32 %v1292_v44  ;;  %v1272_v37 = vsub.f32 %v6928_v63, %v1251_v21  ;;  %v1271_v2 = vsub.f32 %v6930_v39, %v1249_v48 }
 0x3d4   : > { %v6987_v0 = vpop.eup %6019  ;;  %6033 = vpow2.f32 %v1294_v1 }
 0x3d5   : > { %v1296_v4 = vmul.f32 1.442695, %v1271_v2  ;;  %v1298_v8 = vmul.f32 1.442695, %v1272_v37  ;;  %v1342_v34 = vpack.c.bf16 %v6987_v0, %v6985_v50  ;;  %v6991_v49 = vpop.eup %6021 }
 0x3d6   : > { %v1253_v26 = vpop.xlane.xlu1 %1252  ;;  %v1255_v54 = vpop.xlane.xlu0 %1254 }
 0x3d7   : > { %v1273_v20 = vsub.f32 %v6934_v7, %v1253_v26  ;;  %v1274_v63 = vsub.f32 %v6936_v57, %v1255_v54  ;;  %6035 = vpow2.f32 %v1296_v4  ;;  %5457 = vmatprep.mubr.bf16.mxu0 %v1342_v34 }
 0x3d8   : > { %v6995_v43 = vpop.eup %6023  ;;  %6037 = vpow2.f32 %v1298_v8 }
 0x3d9   : > { %v1300_v39 = vmul.f32 1.442695, %v1273_v20  ;;  %v1343_v51 = vpack.c.bf16 %v6995_v43, %v6991_v49  ;;  %v1302_v56 = vmul.f32 1.442695, %v1274_v63  ;;  %v7004_v35 = vpop.eup %6025 }
 0x3da   : > { %v1259_v18 = vpop.xlane.xlu0 %1258  ;;  %v1257_v3 = vpop.xlane.xlu1 %1256 }
 0x3db   : > { %6039 = vpow2.f32 %v1300_v39  ;;  %v1276_v7 = vsub.f32 %v6940_v22, %v1259_v18  ;;  %v1275_v57 = vsub.f32 %v6942_v29, %v1257_v3  ;;  %5458 = vmatmul.mubr.bf16.vlgmr.msra.gmra.mxu0 %v1343_v51  ;;  %v4862_v39 = vld [vmem:[%s8083_s4 + $0x1] ss:$0 sm:$0xff] }
 0x3dc   : > { %5474 = vmatpush3.bf16.msra.mxu0 %v6955_v17  ;;  %v7007_v45 = vpop.eup %6027  ;;  %6041 = vpow2.f32 %v1302_v56 }
 0x3dd   : > { %v1304_v9 = vmul.f32 1.442695, %v1275_v57  ;;  %5475 = vmatprep.subr.bf16.mxu0 %v5970_v60  ;;  %v1306_v6 = vmul.f32 1.442695, %v1276_v7  ;;  %v1344_v22 = vpack.c.bf16 %v7007_v45, %v7004_v35  ;;  %v7014_v16 = vpop.eup %6029 }
 0x3de   : > { %v1261_v15 = vpop.xlane.xlu1 %1260 }
 0x3df   : > { %v1277_v29 = vsub.f32 %v6949_v41, %v1261_v15  ;;  %6043 = vpow2.f32 %v1304_v9  ;;  %5461 = vmatprep.mubr.bf16.mxu0 %v1344_v22 }
 0x3e0   : > { %v7017_v24 = vpop.eup %6031  ;;  %5476 = vmatpush3.bf16.msra.mxu0 %v5970_v60  ;;  %6045 = vpow2.f32 %v1306_v6 }
 0x3e1   : > { %v1308_v17 = vmul.f32 1.442695, %v1277_v29  ;;  %v1345_v10 = vpack.c.bf16 %v7017_v24, %v7014_v16  ;;  %5513 = vmatprep.subr.bf16.mxu0 %v5971_v27  ;;  %v7021_v61 = vpop.eup %6033 }
 0x3e3   : > { %6047 = vpow2.f32 %v1308_v17  ;;  %5462 = vmatmul.mubr.bf16.gmra.mxu0 %v1345_v10 }
 0x3e4   : > { %v7023_v33 = vpop.eup %6035 }
 0x3e5   : > { %v1346_v41 = vpack.c.bf16 %v7023_v33, %v7021_v61  ;;  %v7027_v31 = vpop.eup %6037 }
 0x3e7   : > { %5465 = vmatprep.mubr.bf16.mxu0 %v1346_v41 }
 0x3e8   : > { %v7029_v55 = vpop.eup %6039 }
 0x3e9   : > { %v1347_v32 = vpack.c.bf16 %v7029_v55, %v7027_v31  ;;  %v7033_v14 = vpop.eup %6041 }
 0x3eb   : > { %5466 = vmatmul.mubr.bf16.gmra.mxu0 %v1347_v32 }
 0x3ec   : > { %v7035_v19 = vpop.eup %6043 }
 0x3ed   : > { %v1348_v38 = vpack.c.bf16 %v7035_v19, %v7033_v14  ;;  %v7039_v30 = vpop.eup %6045 }
 0x3ef   : > { %5469 = vmatprep.mubr.bf16.mxu0 %v1348_v38 }
 0x3f0   : > { %v7041_v42 = vpop.eup %6047 }
 0x3f1   : > { %v1349_v11 = vpack.c.bf16 %v7041_v42, %v7039_v30 }
 0x3f3   : > { %5470 = vmatmul.mubr.bf16.gmra.mxu0 %v1349_v11 }
 0x3f4   : > { %5477 = vmatprep.mubr.msk.bf16.mxu0 %vm406_vm0, %v6607_v5 }
 0x3fb   : > { %5478 = vmatmul.mubr.msk.bf16.vlgmr.msra.gmra.mxu0 %vm406_vm0, %v6619_v12 }
 0x3fc   : > { %5481 = vmatprep.mubr.msk.bf16.mxu0 %vm406_vm0, %v6635_v40  ;;  %5514 = vmatpush3.bf16.msra.mxu0 %v5971_v27 }
 0x3fd   : > { %5515 = vmatprep.subr.bf16.mxu0 %v5972_v36 }
 0x400   : > { %5516 = vmatpush3.bf16.msra.mxu0 %v5972_v36 }
 0x403   : > { %5482 = vmatmul.mubr.msk.bf16.gmra.mxu0 %vm406_vm0, %v6647_v58 }
 0x404   : > { %5485 = vmatprep.mubr.msk.bf16.mxu0 %vm406_vm0, %v6659_v53 }
 0x40b   : > { %5486 = vmatmul.mubr.msk.bf16.gmra.mxu0 %vm406_vm0, %v6671_v62 }
 0x40c   : > { %5489 = vmatprep.mubr.msk.bf16.mxu0 %vm406_vm0, %v6682_v47 }
 0x413   : > { %5490 = vmatmul.mubr.msk.bf16.gmra.mxu0 %vm406_vm0, %v6691_v25 }
 0x414   : > { %5517 = vmatprep.mubr.msk.bf16.mxu0 %vm406_vm0, %v6607_v5 }
 0x41b   : > { %5518 = vmatmul.mubr.msk.bf16.vlgmr.msra.gmra.mxu0 %vm406_vm0, %v6619_v12 }
 0x41c   : > { %5521 = vmatprep.mubr.msk.bf16.mxu0 %vm406_vm0, %v6635_v40 }
 0x423   : > { %5522 = vmatmul.mubr.msk.bf16.gmra.mxu0 %vm406_vm0, %v6647_v58 }
 0x424   : > { %5525 = vmatprep.mubr.msk.bf16.mxu0 %vm406_vm0, %v6659_v53 }
 0x42b   : > { %5526 = vmatmul.mubr.msk.bf16.gmra.mxu0 %vm406_vm0, %v6671_v62 }
 0x42c   : > { %5529 = vmatprep.mubr.msk.bf16.mxu0 %vm406_vm0, %v6682_v47 }
 0x433   : > { %5530 = vmatmul.mubr.msk.bf16.gmra.mxu0 %vm406_vm0, %v6691_v25 }
 0x49b   : > { %v7080_v46 = vpop.f32.mrf.mxu0 }
 0x49d   : > { %v7082_v52 = vpop.f32.mrf.mxu0 }
 0x49f   : > { %v7084_v28 = vpop.f32.mrf.mxu0 }
 0x4a1   : > { %v7086_v13 = vpop.f32.mrf.mxu0 }
 0x4a3   : > { %v7088_v23 = vpop.f32.mrf.mxu0 }
 0x4a5   : > { %v7090_v59 = vpop.f32.mrf.mxu0 }
 0x4a7   : > { %v7092_v44 = vpop.f32.mrf.mxu0 }
 0x4a9   : > { %v7094_v21 = vpop.f32.mrf.mxu0 }
 0x4ab   : > { %v7096_v48 = vpop.f32.mrf.mxu0 }
 0x4ad   : > { %v7098_v1 = vpop.f32.mrf.mxu0 }
 0x4af   : > { %v7100_v37 = vpop.f32.mrf.mxu0 }
 0x4b1   : > { %v7102_v2 = vpop.f32.mrf.mxu0 }
 0x4b3   : > { %v7104_v4 = vpop.f32.mrf.mxu0 }
 0x4b5   : > { %v7106_v8 = vpop.f32.mrf.mxu0 }
 0x4b7   : > { %v7108_v26 = vpop.f32.mrf.mxu0 }
 0x4b9   : > { %v7110_v54 = vpop.f32.mrf.mxu0 }
 0x4bb   : > { %v5479_v34 = vpop.f32.mrf.mxu0 }
 0x4bc   : > { %v1564_v56 = vadd.f32 %v5479_v34, %v4862_v39 }
 0x4bd   : > { %v1555_v20 = vpop.f32.mrf.mxu0 }
 0x4be   : > { %v1556_v18 = vadd.f32 %v4862_v39, %v1555_v20 }
 0x4bf   : > { %v5480_v63 = vpop.f32.mrf.mxu0 }
 0x4c0   : > { %v1567_v51 = vadd.f32 %v5480_v63, %v4862_v39 }
 0x4c1   : > { %v1558_v60 = vpop.f32.mrf.mxu0 }
 0x4c2   : > { %v1559_v3 = vadd.f32 %v4862_v39, %v1558_v60  ;;  %v1863_v9 = vpack.c.bf16 %v1567_v51, %v1564_v56 }
 0x4c3   : > { %v5483_v7 = vpop.f32.mrf.mxu0 }
 0x4c4   : > { %v1862_v57 = vpack.c.bf16 %v1559_v3, %v1556_v18  ;;  %v1580_v10 = vadd.f32 %v5483_v7, %v4862_v39 }
 0x4c5   : > { %v1571_v27 = vpop.f32.mrf.mxu0 }
 0x4c6   : > { %5549 = vmatprep.mubr.msk.bf16.mxu1 %vm1068_vm1, %v1862_v57  ;;  %v1572_v29 = vadd.f32 %v4862_v39, %v1571_v27 }
 0x4c7   : > { %v5484_v6 = vpop.f32.mrf.mxu0  ;;  %5550 = vmatmul.mubr.msk.bf16.vlgmr.msra.gmra.mxu1 %vm1068_vm1, %v1863_v9 }
 0x4c8   : > { %v1583_v15 = vadd.f32 %v5484_v6, %v4862_v39 }
 0x4c9   : > { %v1574_v22 = vpop.f32.mrf.mxu0 }
 0x4ca   : > { %v1575_v17 = vadd.f32 %v4862_v39, %v1574_v22  ;;  %v1865_v38 = vpack.c.bf16 %v1583_v15, %v1580_v10 }
 0x4cb   : > { %v5487_v41 = vpop.f32.mrf.mxu0 }
 0x4cc   : > { %v1864_v32 = vpack.c.bf16 %v1575_v17, %v1572_v29  ;;  %v1596_v60 = vadd.f32 %v5487_v41, %v4862_v39 }
 0x4cd   : > { %v1587_v11 = vpop.f32.mrf.mxu0 }
 0x4ce   : > { %5553 = vmatprep.mubr.msk.bf16.mxu1 %vm1068_vm1, %v1864_v32  ;;  %v1588_v63 = vadd.f32 %v4862_v39, %v1587_v11 }
 0x4cf   : > { %v5488_v36 = vpop.f32.mrf.mxu0  ;;  %5554 = vmatmul.mubr.msk.bf16.gmra.mxu1 %vm1068_vm1, %v1865_v38 }
 0x4d0   : > { %v1599_v34 = vadd.f32 %v5488_v36, %v4862_v39 }
 0x4d1   : > { %v1590_v20 = vpop.f32.mrf.mxu0 }
 0x4d2   : > { %v1591_v51 = vadd.f32 %v4862_v39, %v1590_v20  ;;  %v1867_v56 = vpack.c.bf16 %v1599_v34, %v1596_v60 }
 0x4d3   : > { %v5491_v18 = vpop.f32.mrf.mxu0 }
 0x4d4   : > { %v1866_v3 = vpack.c.bf16 %v1591_v51, %v1588_v63  ;;  %v1612_v22 = vadd.f32 %v5491_v18, %v4862_v39  ;;  %v4894_v18 = vld [vmem:[%s8087_s8 + $0x1] ss:$0 sm:$0xff] }
 0x4d5   : > { %v1603_v57 = vpop.f32.mrf.mxu0 }
 0x4d6   : > { %5557 = vmatprep.mubr.msk.bf16.mxu1 %vm1068_vm1, %v1866_v3  ;;  %v1604_v6 = vadd.f32 %v4862_v39, %v1603_v57 }
 0x4d7   : > { %v5492_v7 = vpop.f32.mrf.mxu0  ;;  %5558 = vmatmul.mubr.msk.bf16.gmra.mxu1 %vm1068_vm1, %v1867_v56 }
 0x4d8   : > { %v1615_v9 = vadd.f32 %v5492_v7, %v4862_v39 }
 0x4d9   : > { %v1606_v27 = vpop.f32.mrf.mxu0 }
 0x4da   : > { %v1607_v15 = vadd.f32 %v4862_v39, %v1606_v27  ;;  %v1869_v10 = vpack.c.bf16 %v1615_v9, %v1612_v22 }
 0x4db   : > { %v5519_v29 = vpop.f32.mrf.mxu0 }
 0x4dc   : > { %v1868_v17 = vpack.c.bf16 %v1607_v15, %v1604_v6 }
 0x4dd   : > { %v1799_v32 = vpop.f32.mrf.mxu0 }
 0x4de   : > { %5561 = vmatprep.mubr.msk.bf16.mxu1 %vm1068_vm1, %v1868_v17 }
 0x4df   : > { %v5520_v41 = vpop.f32.mrf.mxu0  ;;  %5562 = vmatmul.mubr.msk.bf16.gmra.mxu1 %vm1068_vm1, %v1869_v10 }
 0x4e1   : > { %v1802_v38 = vpop.f32.mrf.mxu0 }
 0x4e3   : > { %v5523_v11 = vpop.f32.mrf.mxu0 }
 0x4e5   : > { %v1815_v36 = vpop.f32.mrf.mxu0 }
 0x4e7   : > { %v5524_v34 = vpop.f32.mrf.mxu0 }
 0x4e8   : > { %v1827_v58 = vadd.f32 %v5524_v34, %v4894_v18 }
 0x4e9   : > { %v1818_v20 = vpop.f32.mrf.mxu0 }
 0x4eb   : > { %v5527_v63 = vpop.f32.mrf.mxu0 }
 0x4ec   : > { %v1840_v25 = vadd.f32 %v5527_v63, %v4894_v18  ;;  %v1808_v63 = vadd.f32 %v5519_v29, %v4894_v18 }
 0x4ed   : > { %v1831_v51 = vpop.f32.mrf.mxu0 }
 0x4ee   : > { %v1832_v53 = vadd.f32 %v4894_v18, %v1831_v51  ;;  %v1800_v51 = vadd.f32 %v4894_v18, %v1799_v32 }
 0x4ef   : > { %v5528_v60 = vpop.f32.mrf.mxu0 }
 0x4f0   : > { %v1843_v17 = vadd.f32 %v5528_v60, %v4894_v18  ;;  %v1811_v60 = vadd.f32 %v5520_v41, %v4894_v18 }
 0x4f1   : > { %v1834_v3 = vpop.f32.mrf.mxu0 }
 0x4f2   : > { %v2164_v47 = vpack.c.bf16 %v1843_v17, %v1840_v25  ;;  %v1835_v62 = vadd.f32 %v4894_v18, %v1834_v3  ;;  %v2160_v25 = vpack.c.bf16 %v1811_v60, %v1808_v63  ;;  %v1803_v3 = vadd.f32 %v4894_v18, %v1802_v38 }
 0x4f3   : > { %v5531_v56 = vpop.f32.mrf.mxu0 }
 0x4f4   : > { %v1856_v7 = vadd.f32 %v5531_v56, %v4894_v18  ;;  %v2163_v40 = vpack.c.bf16 %v1835_v62, %v1832_v53  ;;  %v1824_v56 = vadd.f32 %v5523_v11, %v4894_v18  ;;  %v2159_v34 = vpack.c.bf16 %v1803_v3, %v1800_v51 }
 0x4f5   : > { %v1847_v39 = vpop.f32.mrf.mxu0 }
 0x4f6   : > { %v1848_v6 = vadd.f32 %v4894_v18, %v1847_v39  ;;  %v1819_v39 = vadd.f32 %v4894_v18, %v1818_v20 }
 0x4f7   : > { %v5532_v57 = vpop.f32.mrf.mxu0 }
 0x4f8   : > { %v1859_v9 = vadd.f32 %v5532_v57, %v4894_v18  ;;  %v2162_v57 = vpack.c.bf16 %v1827_v58, %v1824_v56 }
 0x4f9   : > { %v1850_v27 = vpop.f32.mrf.mxu0 }
 0x4fa   : > { %v2166_v15 = vpack.c.bf16 %v1859_v9, %v1856_v7  ;;  %v1851_v22 = vadd.f32 %v4894_v18, %v1850_v27  ;;  %v1816_v7 = vadd.f32 %v4894_v18, %v1815_v36 }
 0x4fc   : > { %v2165_v10 = vpack.c.bf16 %v1851_v22, %v1848_v6  ;;  %5565 = vmatprep.subr.bf16.mxu0 %v2166_v15  ;;  %v2161_v9 = vpack.c.bf16 %v1819_v39, %v1816_v7 }
 0x4fd   : > { %5566 = vmatpush3.bf16.msra.mxu0 %v2166_v15 }
 0x4fe   : > { %5567 = vmatprep.subr.bf16.mxu0 %v2165_v10 }
 0x501   : > { %5568 = vmatpush3.bf16.msra.mxu0 %v2165_v10 }
 0x502   : > { %5569 = vmatprep.subr.bf16.mxu0 %v2164_v47 }
 0x505   : > { %5570 = vmatpush3.bf16.msra.mxu0 %v2164_v47 }
 0x506   : > { %5571 = vmatprep.subr.bf16.mxu0 %v2163_v40 }
 0x509   : > { %5572 = vmatpush3.bf16.msra.mxu0 %v2163_v40 }
 0x50a   : > { %5573 = vmatprep.subr.bf16.mxu0 %v2162_v57 }
 0x50d   : > { %5574 = vmatpush3.bf16.msra.mxu0 %v2162_v57 }
 0x50e   : > { %5575 = vmatprep.subr.bf16.mxu0 %v2161_v9 }
 0x511   : > { %5576 = vmatpush3.bf16.msra.mxu0 %v2161_v9 }
 0x512   : > { %5577 = vmatprep.subr.bf16.mxu0 %v2160_v25 }
 0x515   : > { %5578 = vmatpush3.bf16.msra.mxu0 %v2160_v25 }
 0x516   : > { %5579 = vmatprep.subr.bf16.mxu0 %v2159_v34 }
 0x519   : > { %5580 = vmatpush3.bf16.msra.mxu0 %v2159_v34 }
 0x587   : > { %v5551_v53 = vpop.f32.mrf.mxu1 }
 0x588   : > { %v7129_v41 = vmul.f32 0.17677669, %v5551_v53 }
 0x589   : > { %v1960_v58 = vpop.f32.mrf.mxu1 }
 0x58a   : > { %v7126_v62 = vmul.f32 0.17677669, %v1960_v58 }
 0x58b   : > { %v5552_v40 = vpop.f32.mrf.mxu1 }
 0x58c   : > { %2039 = vmax.xlane.f32.xlu0 %v7126_v62  ;;  %v7135_v11 = vmul.f32 0.17677669, %v5552_v40 }
 0x58d   : > { %v1963_v47 = vpop.f32.mrf.mxu1 }
 0x58e   : > { %v7131_v29 = vmul.f32 0.17677669, %v1963_v47 }
 0x58f   : > { %v5555_v38 = vpop.f32.mrf.mxu1 }
 0x590   : > { %2043 = vmax.xlane.f32.xlu0 %v7129_v41  ;;  %2041 = vmax.xlane.f32.xlu1 %v7131_v29  ;;  %v7141_v27 = vmul.f32 0.17677669, %v5555_v38 }
 0x591   : > { %v1976_v32 = vpop.f32.mrf.mxu1 }
 0x592   : > { %v7137_v36 = vmul.f32 0.17677669, %v1976_v32 }
 0x593   : > { %v5556_v20 = vpop.f32.mrf.mxu1 }
 0x594   : > { %2045 = vmax.xlane.f32.xlu1 %v7135_v11  ;;  %2047 = vmax.xlane.f32.xlu0 %v7137_v36  ;;  %v7147_v17 = vmul.f32 0.17677669, %v5556_v20 }
 0x595   : > { %v1979_v18 = vpop.f32.mrf.mxu1 }
 0x596   : > { %v7143_v6 = vmul.f32 0.17677669, %v1979_v18 }
 0x597   : > { %v5559_v15 = vpop.f32.mrf.mxu1 }
 0x598   : > { %2051 = vmax.xlane.f32.xlu0 %v7141_v27  ;;  %2049 = vmax.xlane.f32.xlu1 %v7143_v6  ;;  %v7153_v39 = vmul.f32 0.17677669, %v5559_v15 }
 0x599   : > { %v1992_v22 = vpop.f32.mrf.mxu1 }
 0x59a   : > { %v7149_v10 = vmul.f32 0.17677669, %v1992_v22 }
 0x59b   : > { %v5560_v56 = vpop.f32.mrf.mxu1 }
 0x59c   : > { %2053 = vmax.xlane.f32.xlu1 %v7147_v17  ;;  %2055 = vmax.xlane.f32.xlu0 %v7149_v10  ;;  %v7159_v63 = vmul.f32 0.17677669, %v5560_v56 }
 0x59d   : > { %v1995_v57 = vpop.f32.mrf.mxu1 }
 0x59e   : > { %v7155_v7 = vmul.f32 0.17677669, %v1995_v57 }
 0x59f   : > { %v5563_v60 = vpop.f32.mrf.mxu1 }
 0x5a0   : > { %2059 = vmax.xlane.f32.xlu0 %v7153_v39  ;;  %2057 = vmax.xlane.f32.xlu1 %v7155_v7  ;;  %v7165_v34 = vmul.f32 0.17677669, %v5563_v60 }
 0x5a1   : > { %v2008_v9 = vpop.f32.mrf.mxu1 }
 0x5a2   : > { %v7161_v25 = vmul.f32 0.17677669, %v2008_v9 }
 0x5a3   : > { %v5564_v3 = vpop.f32.mrf.mxu1 }
 0x5a4   : > { %2061 = vmax.xlane.f32.xlu1 %v7159_v63  ;;  %2063 = vmax.xlane.f32.xlu0 %v7161_v25  ;;  %v7171_v58 = vmul.f32 0.17677669, %v5564_v3 }
 0x5a5   : > { %v2011_v51 = vpop.f32.mrf.mxu1 }
 0x5a6   : > { %v7167_v53 = vmul.f32 0.17677669, %v2011_v51 }
 0x5a8   : > { %2067 = vmax.xlane.f32.xlu0 %v7165_v34  ;;  %2065 = vmax.xlane.f32.xlu1 %v7167_v53 }
 0x5ac   : > { %1310 = vadd.xlane.f32.xlu0 %v6985_v50  ;;  %2069 = vmax.xlane.f32.xlu1 %v7171_v58  ;;  %v1495_v50 = vld [vmem:[%s8088_s9] sm:$0xf] }
 0x5ad   : > { %5934 = vmatprep.subr.msk.bf16.mxu1 %vm2330_vm2, %v1495_v50 }
 0x5b0   : > { %1314 = vadd.xlane.f32.xlu0 %v6991_v49  ;;  %1312 = vadd.xlane.f32.xlu1 %v6987_v0  ;;  %v2456_v0 = vsel %vm2330_vm2, %v1495_v50, 0  ;;  %v7198_v49 = vld [vmem:[%s8084_s5 + $0x28] sm:$0xff]  }
 0x5b1   : > { %5616 = vmatpush3.bf16.msra.mxu1 %v2456_v0 }
 0x5b2   : > { %5653 = vmatprep.subr.bf16.mxu1 %v7198_v49 }
 0x5b4   : > { %1318 = vadd.xlane.f32.xlu0 %v7004_v35  ;;  %1316 = vadd.xlane.f32.xlu1 %v6995_v43 }
 0x5b8   : > { %1322 = vadd.xlane.f32.xlu0 %v7014_v16  ;;  %1320 = vadd.xlane.f32.xlu1 %v7007_v45 }
 0x5bc   : > { %1326 = vadd.xlane.f32.xlu0 %v7021_v61  ;;  %1324 = vadd.xlane.f32.xlu1 %v7017_v24 }
 0x5c0   : > { %1330 = vadd.xlane.f32.xlu0 %v7027_v31  ;;  %1328 = vadd.xlane.f32.xlu1 %v7023_v33 }
 0x5c4   : > { %1334 = vadd.xlane.f32.xlu0 %v7033_v14  ;;  %1332 = vadd.xlane.f32.xlu1 %v7029_v55 }
 0x5c8   : > { %1338 = vadd.xlane.f32.xlu0 %v7039_v30  ;;  %1336 = vadd.xlane.f32.xlu1 %v7035_v19 }
 0x5cc   : > { %1340 = vadd.xlane.f32.xlu1 %v7041_v42 }
 0x615   : > { %v2040_v43 = vpop.xlane.xlu0 %2039 }
 0x616   : > { %v2071_v35 = vsub.f32 %v7126_v62, %v2040_v43 }
 0x618   : > { %v2087_v45 = vmul.f32 1.442695, %v2071_v35 }
 0x619   : > { %v2044_v16 = vpop.xlane.xlu0 %2043  ;;  %v2042_v24 = vpop.xlane.xlu1 %2041 }
 0x61a   : > { %6049 = vpow2.f32 %v2087_v45  ;;  %v2073_v61 = vsub.f32 %v7129_v41, %v2044_v16  ;;  %v2072_v33 = vsub.f32 %v7131_v29, %v2042_v24 }
 0x61c   : > { %v2091_v31 = vmul.f32 1.442695, %v2073_v61  ;;  %v2089_v55 = vmul.f32 1.442695, %v2072_v33 }
 0x61d   : > { %v2046_v14 = vpop.xlane.xlu1 %2045  ;;  %v2048_v19 = vpop.xlane.xlu0 %2047 }
 0x61e   : > { %6051 = vpow2.f32 %v2091_v31  ;;  %v2074_v30 = vsub.f32 %v7135_v11, %v2046_v14  ;;  %v2075_v42 = vsub.f32 %v7137_v36, %v2048_v19 }
 0x61f   : > { %6053 = vpow2.f32 %v2089_v55 }
 0x620   : > { %v2093_v40 = vmul.f32 1.442695, %v2074_v30  ;;  %v2095_v62 = vmul.f32 1.442695, %v2075_v42 }
 0x621   : > { %v2052_v47 = vpop.xlane.xlu0 %2051  ;;  %v2050_v38 = vpop.xlane.xlu1 %2049 }
 0x622   : > { %6055 = vpow2.f32 %v2093_v40  ;;  %v2077_v32 = vsub.f32 %v7141_v27, %v2052_v47  ;;  %v2076_v41 = vsub.f32 %v7143_v6, %v2050_v38 }
 0x623   : > { %6057 = vpow2.f32 %v2095_v62 }
 0x624   : > { %v2099_v29 = vmul.f32 1.442695, %v2077_v32  ;;  %v2097_v20 = vmul.f32 1.442695, %v2076_v41 }
 0x625   : > { %v2054_v18 = vpop.xlane.xlu1 %2053  ;;  %v2056_v15 = vpop.xlane.xlu0 %2055 }
 0x626   : > { %6059 = vpow2.f32 %v2099_v29  ;;  %v2078_v11 = vsub.f32 %v7147_v17, %v2054_v18  ;;  %v2079_v36 = vsub.f32 %v7149_v10, %v2056_v15 }
 0x627   : > { %v6050_v22 = vpop.eup %6049  ;;  %6061 = vpow2.f32 %v2097_v20 }
 0x628   : > { %v2101_v56 = vmul.f32 1.442695, %v2078_v11  ;;  %v2103_v57 = vmul.f32 1.442695, %v2079_v36  ;;  %2119 = vadd.xlane.f32.xlu0 %v6050_v22 }
 0x629   : > { %v2060_v60 = vpop.xlane.xlu0 %2059  ;;  %v2058_v9 = vpop.xlane.xlu1 %2057 }
 0x62a   : > { %6063 = vpow2.f32 %v2101_v56  ;;  %v2081_v27 = vsub.f32 %v7153_v39, %v2060_v60  ;;  %v2080_v6 = vsub.f32 %v7155_v7, %v2058_v9 }
 0x62b   : > { %v6052_v3 = vpop.eup %6051  ;;  %6065 = vpow2.f32 %v2103_v57 }
 0x62c   : > { %v6054_v51 = vpop.eup %6053  ;;  %v2107_v50 = vmul.f32 1.442695, %v2081_v27  ;;  %v2105_v0 = vmul.f32 1.442695, %v2080_v6  ;;  %2123 = vadd.xlane.f32.xlu0 %v6052_v3 }
 0x62d   : > { %2121 = vadd.xlane.f32.xlu1 %v6054_v51  ;;  %v2062_v17 = vpop.xlane.xlu1 %2061  ;;  %v2064_v10 = vpop.xlane.xlu0 %2063  ;;  %v2151_v43 = vpack.c.bf16 %v6054_v51, %v6050_v22 }
 0x62e   : > { %6067 = vpow2.f32 %v2107_v50  ;;  %v2082_v35 = vsub.f32 %v7159_v63, %v2062_v17  ;;  %v2083_v45 = vsub.f32 %v7161_v25, %v2064_v10 }
 0x62f   : > { %v6056_v16 = vpop.eup %6055  ;;  %6069 = vpow2.f32 %v2105_v0  ;;  %5581 = vmatprep.mubr.bf16.mxu0 %v2151_v43 }
 0x630   : > { %v6058_v39 = vpop.eup %6057  ;;  %v2109_v7 = vmul.f32 1.442695, %v2082_v35  ;;  %v2111_v24 = vmul.f32 1.442695, %v2083_v45  ;;  %v2152_v61 = vpack.c.bf16 %v6056_v16, %v6052_v3 }
 0x631   : > { %2127 = vadd.xlane.f32.xlu0 %v6058_v39  ;;  %2125 = vadd.xlane.f32.xlu1 %v6056_v16  ;;  %v2068_v33 = vpop.xlane.xlu0 %2067  ;;  %v2066_v31 = vpop.xlane.xlu1 %2065 }
 0x632   : > { %6071 = vpow2.f32 %v2109_v7  ;;  %v2085_v55 = vsub.f32 %v7165_v34, %v2068_v33  ;;  %v2084_v14 = vsub.f32 %v7167_v53, %v2066_v31  ;;  %5582 = vmatmul.mubr.bf16.vlgmr.msra.gmra.mxu0 %v2152_v61 }
 0x633   : > { %v6060_v63 = vpop.eup %6059  ;;  %6073 = vpow2.f32 %v2111_v24 }
 0x634   : > { %v6062_v25 = vpop.eup %6061  ;;  %v2115_v19 = vmul.f32 1.442695, %v2085_v55  ;;  %v2113_v30 = vmul.f32 1.442695, %v2084_v14 }
 0x635   : > { %2131 = vadd.xlane.f32.xlu0 %v6060_v63  ;;  %2129 = vadd.xlane.f32.xlu1 %v6062_v25  ;;  %v1311_v42 = vpop.xlane.xlu0 %1310  ;;  %v2070_v40 = vpop.xlane.xlu1 %2069  ;;  %v2153_v62 = vpack.c.bf16 %v6062_v25, %v6058_v39 }
 0x636   : > { %6075 = vpow2.f32 %v2115_v19  ;;  %v2086_v47 = vsub.f32 %v7171_v58, %v2070_v40  ;;  %v4913_v40 = vld [vmem:[%s8088_s9 + $0x4] sm:$0xf] }
 0x637   : > { %v6064_v38 = vpop.eup %6063  ;;  %6077 = vpow2.f32 %v2113_v30  ;;  %5585 = vmatprep.mubr.bf16.mxu0 %v2153_v62  ;;  %5933 = vmatprep.subr.msk.bf16.mxu0 %vm2330_vm2, %v4913_v40 }
 0x638   : > { %v6066_v34 = vpop.eup %6065  ;;  %v2117_v32 = vmul.f32 1.442695, %v2086_v47  ;;  %v2154_v53 = vpack.c.bf16 %v6064_v38, %v6060_v63  ;;  %6079 = vrcp.f32 %v1311_v42  ;;  %v2332_v47 = vsel %vm2330_vm2, %v4913_v40, 0 }
 0x639   : > { %2135 = vadd.xlane.f32.xlu0 %v6066_v34  ;;  %2133 = vadd.xlane.f32.xlu1 %v6064_v38  ;;  %v1315_v41 = vpop.xlane.xlu0 %1314  ;;  %v1313_v29 = vpop.xlane.xlu1 %1312 }
 0x63a   : > { %6081 = vpow2.f32 %v2117_v32  ;;  %5586 = vmatmul.mubr.bf16.gmra.mxu0 %v2154_v53 }
 0x63b   : > { %v6068_v20 = vpop.eup %6067  ;;  %6083 = vrcp.f32 %v1313_v29  ;;  %5598 = vmatpush3.bf16.msra.mxu0 %v2332_v47  ;;  %v5976_v47 = vld [vmem:[%s8082_s3 + $0x20] sm:$0xff]  }
 0x63c   : > { %v6070_v18 = vpop.eup %6069  ;;  %6085 = vrcp.f32 %v1315_v41 }
 0x63d   : > { %2139 = vadd.xlane.f32.xlu0 %v6068_v20  ;;  %2137 = vadd.xlane.f32.xlu1 %v6070_v18  ;;  %v1319_v58 = vpop.xlane.xlu0 %1318  ;;  %v1317_v15 = vpop.xlane.xlu1 %1316  ;;  %v2155_v11 = vpack.c.bf16 %v6070_v18, %v6066_v34 }
 0x63e   : > { %6087 = vrcp.f32 %v1317_v15 }
 0x63f   : > { %v6072_v36 = vpop.eup %6071  ;;  %5589 = vmatprep.mubr.bf16.mxu0 %v2155_v11  ;;  %6089 = vrcp.f32 %v1319_v58 }
 0x640   : > { %v6074_v22 = vpop.eup %6073  ;;  %v2156_v56 = vpack.c.bf16 %v6072_v36, %v6068_v20 }
 0x641   : > { %2143 = vadd.xlane.f32.xlu0 %v6074_v22  ;;  %2141 = vadd.xlane.f32.xlu1 %v6072_v36  ;;  %v1323_v57 = vpop.xlane.xlu0 %1322  ;;  %v1321_v60 = vpop.xlane.xlu1 %1320 }
 0x642   : > { %5590 = vmatmul.mubr.bf16.gmra.mxu0 %v2156_v56  ;;  %6091 = vrcp.f32 %v1321_v60 }
 0x643   : > { %v6076_v9 = vpop.eup %6075  ;;  %6093 = vrcp.f32 %v1323_v57 }
 0x644   : > { %v6078_v27 = vpop.eup %6077 }
 0x645   : > { %2147 = vadd.xlane.f32.xlu0 %v6076_v9  ;;  %2145 = vadd.xlane.f32.xlu1 %v6078_v27  ;;  %v1327_v6 = vpop.xlane.xlu0 %1326  ;;  %v1325_v3 = vpop.xlane.xlu1 %1324  ;;  %v2157_v51 = vpack.c.bf16 %v6078_v27, %v6074_v22  ;;  %v8129_v27 = vld [vmem:[#allocation7_spill] sm:$0xff] }
 0x646   : > { %v6080_v50 = vpop.eup %6079  ;;  %6095 = vrcp.f32 %v1325_v3 }
 0x647   : > { %v6082_v0 = vpop.eup %6081  ;;  %5593 = vmatprep.mubr.bf16.mxu0 %v2157_v51  ;;  %6097 = vrcp.f32 %v1327_v6  ;;  %v1471_v16 = vmul.f32 %v6080_v50, %v7082_v52  ;;  %v5974_v52 = vld [vmem:[%s8084_s5 + $0x20] sm:$0xff]  }
 0x648   : > { %v2158_v17 = vpack.c.bf16 %v6082_v0, %v6076_v9  ;;  %v6084_v10 = vpop.eup %6083  ;;  %v8128_v9 = vld [vmem:[#allocation6_spill] sm:$0xff] }
 0x649   : > { %2149 = vadd.xlane.f32.xlu1 %v6082_v0  ;;  %v1331_v43 = vpop.xlane.xlu0 %1330  ;;  %v1329_v35 = vpop.xlane.xlu1 %1328  ;;  %v1472_v39 = vmul.f32 %v6084_v10, %v7086_v13 }
 0x64a   : > { %v6086_v45 = vpop.eup %6085  ;;  %5594 = vmatmul.mubr.bf16.gmra.mxu0 %v2158_v17  ;;  %6099 = vrcp.f32 %v1329_v35 }
 0x64b   : > { %v6088_v7 = vpop.eup %6087  ;;  %v1487_v24 = vpack.c.bf16 %v1472_v39, %v1471_v16  ;;  %v1473_v61 = vmul.f32 %v6086_v45, %v7080_v46  ;;  %6101 = vrcp.f32 %v1331_v43 }
 0x64c   : > { %v1474_v33 = vmul.f32 %v6088_v7, %v7084_v28  ;;  %v6090_v14 = vpop.eup %6089 }
 0x64d   : > { %v1335_v31 = vpop.xlane.xlu0 %1334  ;;  %v1333_v55 = vpop.xlane.xlu1 %1332  ;;  %5617 = vmatprep.mubr.msk.bf16.mxu1 %vm1068_vm1, %v1487_v24  ;;  %v1475_v28 = vmul.f32 %v6090_v14, %v7090_v59 }
 0x64e   : > { %6103 = vrcp.f32 %v1333_v55  ;;  %v1488_v63 = vpack.c.bf16 %v1474_v33, %v1473_v61 }
 0x64f   : > { %v6092_v13 = vpop.eup %6091  ;;  %6105 = vrcp.f32 %v1335_v31 }
 0x650   : > { %5618 = vmatmul.mubr.msk.bf16.vlgmr.msra.gmra.mxu1 %vm1068_vm1, %v1488_v63  ;;  %v1476_v19 = vmul.f32 %v6092_v13, %v7094_v21  ;;  %v6094_v30 = vpop.eup %6093 }
 0x651   : > { %v1339_v25 = vpop.xlane.xlu0 %1338  ;;  %v1337_v46 = vpop.xlane.xlu1 %1336  ;;  %5654 = vmatpush3.bf16.msra.mxu1 %v7198_v49  ;;  %v1477_v21 = vmul.f32 %v6094_v30, %v7088_v23 }
 0x652   : > { %6107 = vrcp.f32 %v1337_v46  ;;  %v1489_v42 = vpack.c.bf16 %v1476_v19, %v1475_v28  ;;  %5655 = vmatprep.subr.bf16.mxu1 %v5974_v52 }
 0x653   : > { %v6096_v62 = vpop.eup %6095  ;;  %6109 = vrcp.f32 %v1339_v25 }
 0x654   : > { %5621 = vmatprep.mubr.msk.bf16.mxu1 %vm1068_vm1, %v1489_v42  ;;  %v1478_v49 = vmul.f32 %v6096_v62, %v7092_v44  ;;  %v6098_v38 = vpop.eup %6097 }
 0x655   : > { %v1341_v59 = vpop.xlane.xlu1 %1340  ;;  %5656 = vmatpush3.bf16.msra.mxu1 %v5974_v52  ;;  %v1479_v53 = vmul.f32 %v6098_v38, %v7098_v1 }
 0x656   : > { %6111 = vrcp.f32 %v1341_v59  ;;  %v1490_v34 = vpack.c.bf16 %v1478_v49, %v1477_v21 }
 0x657   : > { %v6100_v32 = vpop.eup %6099 }
 0x658   : > { %5622 = vmatmul.mubr.msk.bf16.gmra.mxu1 %vm1068_vm1, %v1490_v34  ;;  %v1480_v41 = vmul.f32 %v6100_v32, %v7102_v2  ;;  %v6102_v29 = vpop.eup %6101 }
 0x659   : > { %v1481_v23 = vmul.f32 %v6102_v29, %v7096_v48 }
 0x65a   : > { %v1491_v20 = vpack.c.bf16 %v1480_v41, %v1479_v53  ;;  %v5977_v41 = vld [vmem:[%s8086_s7 + $0x28] sm:$0xff]  }
 0x65b   : > { %v6104_v18 = vpop.eup %6103 }
 0x65c   : > { %5625 = vmatprep.mubr.msk.bf16.mxu1 %vm1068_vm1, %v1491_v20  ;;  %v1482_v44 = vmul.f32 %v6104_v18, %v7100_v37  ;;  %v6106_v58 = vpop.eup %6105  ;;  %v8124_v37 = vld [vmem:[#allocation2_spill] sm:$0xff] }
 0x65d   : > { %v1483_v22 = vmul.f32 %v6106_v58, %v7106_v8  ;;  %v8125_v8 = vld [vmem:[#allocation3_spill] sm:$0xff] }
 0x65e   : > { %v1492_v15 = vpack.c.bf16 %v1482_v44, %v1481_v23 }
 0x65f   : > { %v6108_v11 = vpop.eup %6107 }
 0x660   : > { %v6110_v36 = vpop.eup %6109  ;;  %5626 = vmatmul.mubr.msk.bf16.gmra.mxu1 %vm1068_vm1, %v1492_v15  ;;  %v1484_v1 = vmul.f32 %v6108_v11, %v7110_v54  ;;  %v8127_v54 = vld [vmem:[#allocation5_spill] sm:$0xff] }
 0x661   : > { %v1485_v57 = vmul.f32 %v6110_v36, %v7104_v4  ;;  %v8126_v4 = vld [vmem:[#allocation4_spill] sm:$0xff] }
 0x662   : > { %v1493_v56 = vpack.c.bf16 %v1484_v1, %v1483_v22 }
 0x663   : > { %v6112_v2 = vpop.eup %6111 }
 0x664   : > { %v1486_v60 = vmul.f32 %v6112_v2, %v7108_v26  ;;  %5629 = vmatprep.mubr.msk.bf16.mxu1 %vm1068_vm1, %v1493_v56  ;;  %v5975_v26 = vld [vmem:[%s8082_s3 + $0x28] sm:$0xff]  }
 0x665   : > { %5633 = vmatprep.subr.bf16.mxu0 %v5975_v26 }
 0x666   : > { %v1494_v48 = vpack.c.bf16 %v1486_v60, %v1485_v57 }
 0x668   : > { %5630 = vmatmul.mubr.msk.bf16.gmra.mxu1 %vm1068_vm1, %v1494_v48 }
 0x669   : > { %5657 = vmatprep.mubr.msk.bf16.mxu1 %vm406_vm0, %v6607_v5 }
 0x670   : > { %5658 = vmatmul.mubr.msk.bf16.vlgmr.msra.gmra.mxu1 %vm406_vm0, %v6619_v12 }
 0x671   : > { %5661 = vmatprep.mubr.msk.bf16.mxu1 %vm406_vm0, %v8124_v37 }
 0x678   : > { %5662 = vmatmul.mubr.msk.bf16.gmra.mxu1 %vm406_vm0, %v8125_v8 }
 0x679   : > { %5665 = vmatprep.mubr.msk.bf16.mxu1 %vm406_vm0, %v8126_v4 }
 0x680   : > { %5666 = vmatmul.mubr.msk.bf16.gmra.mxu1 %vm406_vm0, %v8127_v54 }
 0x681   : > { %5669 = vmatprep.mubr.msk.bf16.mxu1 %vm406_vm0, %v8128_v9 }
 0x688   : > { %5670 = vmatmul.mubr.msk.bf16.gmra.mxu1 %vm406_vm0, %v8129_v27 }
 0x6b1   : > { %v2120_v3 = vpop.xlane.xlu0 %2119 }
 0x6b2   : > { %6113 = vrcp.f32 %v2120_v3 }
 0x6b5   : > { %v2124_v50 = vpop.xlane.xlu0 %2123 }
 0x6b6   : > { %v2122_v6 = vpop.xlane.xlu1 %2121 }
 0x6ba   : > { %v2126_v51 = vpop.xlane.xlu1 %2125  ;;  %v2128_v17 = vpop.xlane.xlu0 %2127 }
 0x6bb   : > { %6115 = vrcp.f32 %v2126_v51 }
 0x6bc   : > { %6117 = vrcp.f32 %v2122_v6 }
 0x6bd   : > { %6119 = vrcp.f32 %v2124_v50 }
 0x6be   : > { %v2130_v0 = vpop.xlane.xlu1 %2129  ;;  %v2132_v43 = vpop.xlane.xlu0 %2131  ;;  %6121 = vrcp.f32 %v2128_v17 }
 0x6bf   : > { %v6114_v61 = vpop.eup %6113 }
 0x6c2   : > { %v2134_v10 = vpop.xlane.xlu1 %2133  ;;  %v2136_v45 = vpop.xlane.xlu0 %2135 }
 0x6c3   : > { %6123 = vrcp.f32 %v2134_v10 }
 0x6c4   : > { %6125 = vrcp.f32 %v2130_v0 }
 0x6c5   : > { %6127 = vrcp.f32 %v2132_v43 }
 0x6c6   : > { %v2138_v35 = vpop.xlane.xlu1 %2137  ;;  %v2140_v24 = vpop.xlane.xlu0 %2139  ;;  %6129 = vrcp.f32 %v2136_v45 }
 0x6c8   : > { %v6116_v31 = vpop.eup %6115 }
 0x6c9   : > { %v6118_v55 = vpop.eup %6117 }
 0x6ca   : > { %v2142_v39 = vpop.xlane.xlu1 %2141  ;;  %v6120_v52 = vpop.eup %6119 }
 0x6cb   : > { %6131 = vrcp.f32 %v2142_v39  ;;  %v2144_v30 = vpop.xlane.xlu0 %2143  ;;  %v6122_v59 = vpop.eup %6121 }
 0x6cc   : > { %6133 = vrcp.f32 %v2138_v35 }
 0x6cd   : > { %6135 = vrcp.f32 %v2140_v24 }
 0x6ce   : > { %v2146_v13 = vpop.xlane.xlu1 %2145  ;;  %6137 = vrcp.f32 %v2144_v30 }
 0x6cf   : > { %v2148_v20 = vpop.xlane.xlu0 %2147 }
 0x6d0   : > { %v6124_v49 = vpop.eup %6123 }
 0x6d1   : > { %v6126_v34 = vpop.eup %6125 }
 0x6d2   : > { %v2150_v38 = vpop.xlane.xlu1 %2149  ;;  %v6128_v29 = vpop.eup %6127 }
 0x6d3   : > { %6139 = vrcp.f32 %v2150_v38  ;;  %v6130_v22 = vpop.eup %6129 }
 0x6d4   : > { %6141 = vrcp.f32 %v2146_v13 }
 0x6d5   : > { %6143 = vrcp.f32 %v2148_v20 }
 0x6d8   : > { %v6132_v2 = vpop.eup %6131 }
 0x6d9   : > { %v6134_v56 = vpop.eup %6133 }
 0x6da   : > { %v6136_v48 = vpop.eup %6135 }
 0x6db   : > { %v6138_v10 = vpop.eup %6137 }
 0x6e0   : > { %v6140_v35 = vpop.eup %6139 }
 0x6e1   : > { %v6142_v45 = vpop.eup %6141 }
 0x6f2   : > { %v5583_v16 = vpop.f32.mrf.mxu0 }
 0x6f3   : > { %v2282_v28 = vmul.f32 %v6120_v52, %v5583_v16 }
 0x6f4   : > { %v2201_v7 = vpop.f32.mrf.mxu0 }
 0x6f5   : > { %v2280_v25 = vmul.f32 %v6114_v61, %v2201_v7  ;;  %v6144_v7 = vpop.eup %6143 }
 0x6f6   : > { %v5584_v33 = vpop.f32.mrf.mxu0 }
 0x6f7   : > { %v2283_v14 = vmul.f32 %v6116_v31, %v5584_v33 }
 0x6f8   : > { %v2204_v63 = vpop.f32.mrf.mxu0 }
 0x6f9   : > { %v2281_v46 = vmul.f32 %v6118_v55, %v2204_v63  ;;  %v2297_v40 = vpack.c.bf16 %v2283_v14, %v2282_v28  ;;  %v5978_v28 = vld [vmem:[%s8086_s7 + $0x20] sm:$0xff]  }
 0x6fa   : > { %v5587_v19 = vpop.f32.mrf.mxu0 }
 0x6fb   : > { %v2296_v42 = vpack.c.bf16 %v2281_v46, %v2280_v25  ;;  %v2286_v44 = vmul.f32 %v6128_v29, %v5587_v19 }
 0x6fc   : > { %v2217_v62 = vpop.f32.mrf.mxu0 }
 0x6fd   : > { %5599 = vmatprep.mubr.msk.bf16.mxu0 %vm1068_vm1, %v2296_v42  ;;  %v2284_v18 = vmul.f32 %v6122_v59, %v2217_v62 }
 0x6fe   : > { %v5588_v21 = vpop.f32.mrf.mxu0  ;;  %5600 = vmatmul.mubr.msk.bf16.vlgmr.msra.gmra.mxu0 %vm1068_vm1, %v2297_v40 }
 0x6ff   : > { %5634 = vmatpush3.bf16.msra.mxu0 %v5975_v26  ;;  %v2287_v32 = vmul.f32 %v6124_v49, %v5588_v21 }
 0x700   : > { %v2220_v53 = vpop.f32.mrf.mxu0  ;;  %5635 = vmatprep.subr.bf16.mxu0 %v5976_v47 }
 0x701   : > { %v2285_v23 = vmul.f32 %v6126_v34, %v2220_v53  ;;  %v2299_v11 = vpack.c.bf16 %v2287_v32, %v2286_v44  ;;  %v4951_v32 = vld [vmem:[%s8085_s6 + $0x2] ss:$0 sm:$0xff] }
 0x702   : > { %v5591_v58 = vpop.f32.mrf.mxu0 }
 0x703   : > { %v2298_v15 = vpack.c.bf16 %v2285_v23, %v2284_v18  ;;  %5636 = vmatpush3.bf16.msra.mxu0 %v5976_v47  ;;  %v2290_v3 = vmul.f32 %v6136_v48, %v5591_v58 }
 0x704   : > { %v2233_v36 = vpop.f32.mrf.mxu0  ;;  %5673 = vmatprep.subr.bf16.mxu0 %v5977_v41 }
 0x705   : > { %5603 = vmatprep.mubr.msk.bf16.mxu0 %vm1068_vm1, %v2298_v15  ;;  %v2288_v26 = vmul.f32 %v6130_v22, %v2233_v36 }
 0x706   : > { %v5592_v1 = vpop.f32.mrf.mxu0  ;;  %5604 = vmatmul.mubr.msk.bf16.gmra.mxu0 %vm1068_vm1, %v2299_v11 }
 0x707   : > { %v2291_v57 = vmul.f32 %v6132_v2, %v5592_v1 }
 0x708   : > { %v2236_v60 = vpop.f32.mrf.mxu0 }
 0x709   : > { %v2289_v6 = vmul.f32 %v6134_v56, %v2236_v60  ;;  %v2301_v0 = vpack.c.bf16 %v2291_v57, %v2290_v3 }
 0x70a   : > { %v5595_v51 = vpop.f32.mrf.mxu0 }
 0x70b   : > { %v2300_v50 = vpack.c.bf16 %v2289_v6, %v2288_v26  ;;  %v2294_v31 = vmul.f32 %v6144_v7, %v5595_v51 }
 0x70c   : > { %v2249_v17 = vpop.f32.mrf.mxu0 }
 0x70d   : > { %5607 = vmatprep.mubr.msk.bf16.mxu0 %vm1068_vm1, %v2300_v50  ;;  %v2292_v24 = vmul.f32 %v6138_v10, %v2249_v17 }
 0x70e   : > { %v5596_v43 = vpop.f32.mrf.mxu0  ;;  %5608 = vmatmul.mubr.msk.bf16.gmra.mxu0 %vm1068_vm1, %v2301_v0 }
 0x70f   : > { %v2295_v16 = vmul.f32 %v6140_v35, %v5596_v43 }
 0x710   : > { %v2252_v39 = vpop.f32.mrf.mxu0  ;;  %v7281_v33 = vpop.f32.mrf.mxu1 }
 0x711   : > { %v2293_v61 = vmul.f32 %v6142_v45, %v2252_v39  ;;  %v2303_v63 = vpack.c.bf16 %v2295_v16, %v2294_v31 }
 0x712   : > { %v7283_v14 = vpop.f32.mrf.mxu1 }
 0x713   : > { %v2302_v55 = vpack.c.bf16 %v2293_v61, %v2292_v24 }
 0x714   : > { %v7285_v52 = vpop.f32.mrf.mxu1 }
 0x715   : > { %5611 = vmatprep.mubr.msk.bf16.mxu0 %vm1068_vm1, %v2302_v55 }
 0x716   : > { %5612 = vmatmul.mubr.msk.bf16.gmra.mxu0 %vm1068_vm1, %v2303_v63  ;;  %v7289_v13 = vpop.f32.mrf.mxu1 }
 0x717   : > { %5637 = vmatprep.mubr.msk.bf16.mxu0 %vm406_vm0, %v6607_v5 }
 0x718   : > { %v7293_v25 = vpop.f32.mrf.mxu1 }
 0x719   : > { %8130 = vst [vmem:[#allocation2_spill] sm:$0xff] %v7293_v25 }
 0x71a   : > { %v7295_v46 = vpop.f32.mrf.mxu1 }
 0x71b   : > { %8131 = vst [vmem:[#allocation3_spill] sm:$0xff] %v7295_v46 }
 0x71c   : > { %v7300_v19 = vpop.f32.mrf.mxu1 }
 0x71d   : > { %8132 = vst [vmem:[#allocation4_spill] sm:$0xff] %v7300_v19 }
 0x71e   : > { %5638 = vmatmul.mubr.msk.bf16.vlgmr.msra.gmra.mxu0 %vm406_vm0, %v6619_v12  ;;  %v7304_v30 = vpop.f32.mrf.mxu1 }
 0x71f   : > { %8133 = vst [vmem:[#allocation5_spill] sm:$0xff] %v7304_v30  ;;  %5641 = vmatprep.mubr.msk.bf16.mxu0 %vm406_vm0, %v8124_v37  ;;  %5674 = vmatpush3.bf16.msra.mxu0 %v5977_v41 }
 0x720   : > { %5675 = vmatprep.subr.bf16.mxu0 %v5978_v28  ;;  %v7308_v42 = vpop.f32.mrf.mxu1 }
 0x721   : > { %8134 = vst [vmem:[#allocation6_spill] sm:$0xff] %v7308_v42 }
 0x722   : > { %v7310_v40 = vpop.f32.mrf.mxu1 }
 0x723   : > { %8135 = vst [vmem:[#allocation7_spill] sm:$0xff] %v7310_v40  ;;  %5676 = vmatpush3.bf16.msra.mxu0 %v5978_v28 }
 0x724   : > { %v7312_v62 = vpop.f32.mrf.mxu1 }
 0x725   : > { %8136 = vst [vmem:[#allocation8_spill] sm:$0xff] %v7312_v62 }
 0x726   : > { %5642 = vmatmul.mubr.msk.bf16.gmra.mxu0 %vm406_vm0, %v8125_v8  ;;  %v7316_v47 = vpop.f32.mrf.mxu1 }
 0x727   : > { %8137 = vst [vmem:[#allocation9_spill] sm:$0xff] %v7316_v47  ;;  %5645 = vmatprep.mubr.msk.bf16.mxu0 %vm406_vm0, %v8126_v4 }
 0x728   : > { %v7320_v59 = vpop.f32.mrf.mxu1 }
 0x729   : > { %8138 = vst [vmem:[#allocation10_spill] sm:$0xff] %v7320_v59 }
 0x72a   : > { %v7322_v21 = vpop.f32.mrf.mxu1 }
 0x72b   : > { %8139 = vst [vmem:[#allocation11_spill] sm:$0xff] %v7322_v21 }
 0x72c   : > { %v7324_v49 = vpop.f32.mrf.mxu1 }
 0x72d   : > { %8140 = vst [vmem:[#allocation12_spill] sm:$0xff] %v7324_v49 }
 0x72e   : > { %5646 = vmatmul.mubr.msk.bf16.gmra.mxu0 %vm406_vm0, %v8127_v54  ;;  %v7328_v38 = vpop.f32.mrf.mxu1 }
 0x72f   : > { %8141 = vst [vmem:[#allocation13_spill] sm:$0xff] %v7328_v38  ;;  %5649 = vmatprep.mubr.msk.bf16.mxu0 %vm406_vm0, %v8128_v9 }
 0x730   : > { %v5659_v34 = vpop.f32.mrf.mxu1 }
 0x731   : > { %v2745_v29 = vadd.f32 %v5659_v34, %v4951_v32 }
 0x732   : > { %v2736_v53 = vpop.f32.mrf.mxu1 }
 0x733   : > { %v2737_v23 = vadd.f32 %v4951_v32, %v2736_v53 }
 0x734   : > { %v5660_v41 = vpop.f32.mrf.mxu1 }
 0x735   : > { %v2748_v20 = vadd.f32 %v5660_v41, %v4951_v32 }
 0x736   : > { %5650 = vmatmul.mubr.msk.bf16.gmra.mxu0 %vm406_vm0, %v8129_v27  ;;  %v2739_v18 = vpop.f32.mrf.mxu1 }
 0x737   : > { %5677 = vmatprep.mubr.msk.bf16.mxu0 %vm406_vm0, %v6607_v5  ;;  %v2930_v44 = vpack.c.bf16 %v2748_v20, %v2745_v29  ;;  %v2740_v58 = vadd.f32 %v4951_v32, %v2739_v18 }
 0x738   : > { %v5663_v15 = vpop.f32.mrf.mxu1 }
 0x739   : > { %v2929_v11 = vpack.c.bf16 %v2740_v58, %v2737_v23  ;;  %v2761_v28 = vadd.f32 %v5663_v15, %v4951_v32  ;;  %v2965_v58 = vsel %vm1068_vm1, %v2930_v44, 0 }
 0x73a   : > { %v2752_v36 = vpop.f32.mrf.mxu1 }
 0x73b   : > { %v2753_v29 = vadd.f32 %v4951_v32, %v2752_v36  ;;  %v2962_v15 = vsel %vm1068_vm1, %v2929_v11, 0 }
 0x73c   : > { %v5664_v22 = vpop.f32.mrf.mxu1 }
 0x73d   : > { %v2764_v63 = vadd.f32 %v5664_v22, %v4951_v32 }
 0x73e   : > { %5678 = vmatmul.mubr.msk.bf16.vlgmr.msra.gmra.mxu0 %vm406_vm0, %v6619_v12  ;;  %v2755_v1 = vpop.f32.mrf.mxu1 }
 0x73f   : > { %5681 = vmatprep.mubr.msk.bf16.mxu0 %vm406_vm0, %v8124_v37  ;;  %v2932_v34 = vpack.c.bf16 %v2764_v63, %v2761_v28  ;;  %v2756_v41 = vadd.f32 %v4951_v32, %v2755_v1  ;;  %v5980_v28 = vld [vmem:[%s8082_s3 + $0x30] sm:$0xff]  }
 0x740   : > { %v5667_v2 = vpop.f32.mrf.mxu1 }
 0x741   : > { %v2777_v16 = vadd.f32 %v5667_v2, %v4951_v32  ;;  %v2931_v20 = vpack.c.bf16 %v2756_v41, %v2753_v29  ;;  %v2971_v18 = vsel %vm1068_vm1, %v2932_v34, 0  ;;  %v5981_v29 = vld [vmem:[%s8086_s7 + $0x38] sm:$0xff]  }
 0x742   : > { %v2768_v56 = vpop.f32.mrf.mxu1 }
 0x743   : > { %v2769_v61 = vadd.f32 %v4951_v32, %v2768_v56  ;;  %v2968_v23 = vsel %vm1068_vm1, %v2931_v20, 0 }
 0x744   : > { %v5668_v57 = vpop.f32.mrf.mxu1 }
 0x745   : > { %v2780_v45 = vadd.f32 %v5668_v57, %v4951_v32 }
 0x746   : > { %5682 = vmatmul.mubr.msk.bf16.gmra.mxu0 %vm406_vm0, %v8125_v8  ;;  %v2771_v60 = vpop.f32.mrf.mxu1 }
 0x747   : > { %5685 = vmatprep.mubr.msk.bf16.mxu0 %vm406_vm0, %v8126_v4  ;;  %v2934_v39 = vpack.c.bf16 %v2780_v45, %v2777_v16  ;;  %v2772_v24 = vadd.f32 %v4951_v32, %v2771_v60 }
 0x748   : > { %v5671_v48 = vpop.f32.mrf.mxu1 }
 0x749   : > { %v2793_v3 = vadd.f32 %v5671_v48, %v4951_v32  ;;  %v2933_v31 = vpack.c.bf16 %v2772_v24, %v2769_v61  ;;  %v2977_v55 = vsel %vm1068_vm1, %v2934_v39, 0 }
 0x74a   : > { %v2784_v26 = vpop.f32.mrf.mxu1 }
 0x74b   : > { %v2785_v0 = vadd.f32 %v4951_v32, %v2784_v26  ;;  %v2974_v53 = vsel %vm1068_vm1, %v2933_v31, 0 }
 0x74c   : > { %v5672_v6 = vpop.f32.mrf.mxu1 }
 0x74d   : > { %v2796_v51 = vadd.f32 %v5672_v6, %v4951_v32 }
 0x74e   : > { %5686 = vmatmul.mubr.msk.bf16.gmra.mxu0 %vm406_vm0, %v8127_v54  ;;  %v2787_v50 = vpop.f32.mrf.mxu1 }
 0x74f   : > { %5689 = vmatprep.mubr.msk.bf16.mxu0 %vm406_vm0, %v8128_v9  ;;  %v2936_v17 = vpack.c.bf16 %v2796_v51, %v2793_v3  ;;  %v2788_v10 = vadd.f32 %v4951_v32, %v2787_v50  ;;  %v5979_v32 = vld [vmem:[%s8082_s3 + $0x38] sm:$0xff]  }
 0x751   : > { %v2935_v43 = vpack.c.bf16 %v2788_v10, %v2785_v0  ;;  %5935 = vmatprep.subr.msk.bf16.mxu1 %vm1068_vm1, %v2936_v17  ;;  %v2983_v35 = vsel %vm1068_vm1, %v2936_v17, 0 }
 0x752   : > { %5694 = vmatpush3.bf16.xpose.msra.mxu1 %v2983_v35  ;;  %v4935_v35 = vld [vmem:[%s8083_s4 + $0x2] ss:$0 sm:$0xff] }
 0x753   : > { %5936 = vmatprep.subr.msk.bf16.mxu1 %vm1068_vm1, %v2935_v43  ;;  %v2980_v7 = vsel %vm1068_vm1, %v2935_v43, 0 }
 0x756   : > { %5690 = vmatmul.mubr.msk.bf16.gmra.mxu0 %vm406_vm0, %v8129_v27 }
 0x75a   : > { %5696 = vmatpush3.bf16.xpose.msra.mxu1 %v2980_v7 }
 0x75b   : > { %5937 = vmatprep.subr.msk.bf16.mxu1 %vm1068_vm1, %v2934_v39 }
 0x762   : > { %5698 = vmatpush3.bf16.xpose.msra.mxu1 %v2977_v55 }
 0x763   : > { %5938 = vmatprep.subr.msk.bf16.mxu1 %vm1068_vm1, %v2933_v31 }
 0x76a   : > { %5700 = vmatpush3.bf16.xpose.msra.mxu1 %v2974_v53 }
 0x76b   : > { %5939 = vmatprep.subr.msk.bf16.mxu1 %vm1068_vm1, %v2932_v34 }
 0x772   : > { %5702 = vmatpush3.bf16.xpose.msra.mxu1 %v2971_v18 }
 0x773   : > { %5940 = vmatprep.subr.msk.bf16.mxu1 %vm1068_vm1, %v2931_v20 }
 0x77a   : > { %5704 = vmatpush3.bf16.xpose.msra.mxu1 %v2968_v23 }
 0x77b   : > { %5941 = vmatprep.subr.msk.bf16.mxu1 %vm1068_vm1, %v2930_v44 }
 0x782   : > { %5706 = vmatpush3.bf16.xpose.msra.mxu1 %v2965_v58 }
 0x783   : > { %5942 = vmatprep.subr.msk.bf16.mxu1 %vm1068_vm1, %v2929_v11 }
 0x78a   : > { %5708 = vmatpush3.bf16.xpose.msra.mxu1 %v2962_v15 }
 0x78b   : > { %5775 = vmatprep.subr.bf16.mxu1 %v5979_v32 }
 0x7be   : > { %v7372_v36 = vpop.f32.mrf.mxu0 }
 0x7c0   : > { %v7374_v22 = vpop.f32.mrf.mxu0 }
 0x7c2   : > { %v7376_v1 = vpop.f32.mrf.mxu0 }
 0x7c4   : > { %v7378_v2 = vpop.f32.mrf.mxu0 }
 0x7c6   : > { %v7380_v44 = vpop.f32.mrf.mxu0 }
 0x7c7   : > { %8142 = vst [vmem:[#allocation14_spill] sm:$0xff] %v7380_v44 }
 0x7c8   : > { %v7382_v56 = vpop.f32.mrf.mxu0 }
 0x7c9   : > { %8143 = vst [vmem:[#allocation15_spill] sm:$0xff] %v7382_v56 }
 0x7ca   : > { %v7384_v57 = vpop.f32.mrf.mxu0 }
 0x7cb   : > { %8144 = vst [vmem:[#allocation16_spill] sm:$0xff] %v7384_v57 }
 0x7cc   : > { %v7386_v60 = vpop.f32.mrf.mxu0 }
 0x7cd   : > { %8145 = vst [vmem:[#allocation17_spill] sm:$0xff] %v7386_v60 }
 0x7ce   : > { %v7388_v48 = vpop.f32.mrf.mxu0 }
 0x7cf   : > { %8146 = vst [vmem:[#allocation18_spill] sm:$0xff] %v7388_v48 }
 0x7d0   : > { %v7390_v11 = vpop.f32.mrf.mxu0 }
 0x7d1   : > { %8147 = vst [vmem:[#allocation19_spill] sm:$0xff] %v7390_v11 }
 0x7d2   : > { %v7392_v26 = vpop.f32.mrf.mxu0 }
 0x7d3   : > { %8148 = vst [vmem:[#allocation20_spill] sm:$0xff] %v7392_v26 }
 0x7d4   : > { %v7394_v6 = vpop.f32.mrf.mxu0 }
 0x7d5   : > { %8149 = vst [vmem:[#allocation21_spill] sm:$0xff] %v7394_v6 }
 0x7d6   : > { %v7396_v3 = vpop.f32.mrf.mxu0 }
 0x7d7   : > { %8150 = vst [vmem:[#allocation22_spill] sm:$0xff] %v7396_v3 }
 0x7d8   : > { %v7398_v51 = vpop.f32.mrf.mxu0 }
 0x7d9   : > { %8151 = vst [vmem:[#allocation23_spill] sm:$0xff] %v7398_v51 }
 0x7da   : > { %v7400_v50 = vpop.f32.mrf.mxu0 }
 0x7db   : > { %8152 = vst [vmem:[#allocation24_spill] sm:$0xff] %v7400_v50 }
 0x7dc   : > { %v7402_v0 = vpop.f32.mrf.mxu0 }
 0x7dd   : > { %8153 = vst [vmem:[#allocation25_spill] sm:$0xff] %v7402_v0 }
 0x7de   : > { %v5639_v17 = vpop.f32.mrf.mxu0 }
 0x7df   : > { %v2623_v24 = vadd.f32 %v5639_v17, %v4935_v35 }
 0x7e0   : > { %v2614_v10 = vpop.f32.mrf.mxu0 }
 0x7e1   : > { %v2615_v39 = vadd.f32 %v4935_v35, %v2614_v10 }
 0x7e2   : > { %v5640_v43 = vpop.f32.mrf.mxu0 }
 0x7e3   : > { %v2626_v45 = vadd.f32 %v5640_v43, %v4935_v35 }
 0x7e4   : > { %v2617_v16 = vpop.f32.mrf.mxu0 }
 0x7e5   : > { %v2618_v7 = vadd.f32 %v4935_v35, %v2617_v16  ;;  %v2922_v55 = vpack.c.bf16 %v2626_v45, %v2623_v24 }
 0x7e6   : > { %v5643_v61 = vpop.f32.mrf.mxu0 }
 0x7e7   : > { %v2921_v31 = vpack.c.bf16 %v2618_v7, %v2615_v39  ;;  %v2639_v23 = vadd.f32 %v5643_v61, %v4935_v35 }
 0x7e8   : > { %v2630_v63 = vpop.f32.mrf.mxu0 }
 0x7e9   : > { %5709 = vmatprep.mubr.msk.bf16.mxu1 %vm1068_vm1, %v2921_v31  ;;  %v2631_v20 = vadd.f32 %v4935_v35, %v2630_v63 }
 0x7ea   : > { %v5644_v34 = vpop.f32.mrf.mxu0  ;;  %5710 = vmatmul.mubr.msk.bf16.vlgmr.msra.gmra.mxu1 %vm1068_vm1, %v2922_v55 }
 0x7eb   : > { %5776 = vmatpush3.bf16.msra.mxu1 %v5979_v32  ;;  %v2642_v53 = vadd.f32 %v5644_v34, %v4935_v35 }
 0x7ec   : > { %v2633_v41 = vpop.f32.mrf.mxu0  ;;  %5777 = vmatprep.subr.bf16.mxu1 %v5980_v28 }
 0x7ed   : > { %v2634_v18 = vadd.f32 %v4935_v35, %v2633_v41  ;;  %v2924_v17 = vpack.c.bf16 %v2642_v53, %v2639_v23 }
 0x7ee   : > { %v5647_v58 = vpop.f32.mrf.mxu0 }
 0x7ef   : > { %v2923_v15 = vpack.c.bf16 %v2634_v18, %v2631_v20  ;;  %5778 = vmatpush3.bf16.msra.mxu1 %v5980_v28  ;;  %v2655_v7 = vadd.f32 %v5647_v58, %v4935_v35 }
 0x7f0   : > { %v2646_v10 = vpop.f32.mrf.mxu0  ;;  %5815 = vmatprep.subr.bf16.mxu1 %v5981_v29 }
 0x7f1   : > { %5713 = vmatprep.mubr.msk.bf16.mxu1 %vm1068_vm1, %v2923_v15  ;;  %v2647_v16 = vadd.f32 %v4935_v35, %v2646_v10 }
 0x7f2   : > { %v5648_v43 = vpop.f32.mrf.mxu0  ;;  %5714 = vmatmul.mubr.msk.bf16.gmra.mxu1 %vm1068_vm1, %v2924_v17 }
 0x7f3   : > { %v2658_v32 = vadd.f32 %v5648_v43, %v4935_v35 }
 0x7f4   : > { %v2649_v45 = vpop.f32.mrf.mxu0 }
 0x7f5   : > { %v2650_v39 = vadd.f32 %v4935_v35, %v2649_v45  ;;  %v2926_v55 = vpack.c.bf16 %v2658_v32, %v2655_v7 }
 0x7f6   : > { %v5651_v24 = vpop.f32.mrf.mxu0 }
 0x7f7   : > { %v2925_v31 = vpack.c.bf16 %v2650_v39, %v2647_v16  ;;  %v2671_v20 = vadd.f32 %v5651_v24, %v4935_v35 }
 0x7f8   : > { %v2662_v61 = vpop.f32.mrf.mxu0 }
 0x7f9   : > { %5717 = vmatprep.mubr.msk.bf16.mxu1 %vm1068_vm1, %v2925_v31  ;;  %v2663_v53 = vadd.f32 %v4935_v35, %v2662_v61 }
 0x7fa   : > { %v5652_v63 = vpop.f32.mrf.mxu0  ;;  %5718 = vmatmul.mubr.msk.bf16.gmra.mxu1 %vm1068_vm1, %v2926_v55 }
 0x7fb   : > { %v2674_v28 = vadd.f32 %v5652_v63, %v4935_v35  ;;  %v4967_v63 = vld [vmem:[%s8087_s8 + $0x2] ss:$0 sm:$0xff] }
 0x7fc   : > { %v2665_v34 = vpop.f32.mrf.mxu0 }
 0x7fd   : > { %v2666_v41 = vadd.f32 %v4935_v35, %v2665_v34  ;;  %v2928_v15 = vpack.c.bf16 %v2674_v28, %v2671_v20  ;;  %v5982_v35 = vld [vmem:[%s8086_s7 + $0x30] sm:$0xff]  }
 0x7fe   : > { %v7419_v18 = vpop.f32.mrf.mxu0 }
 0x7ff   : > { %v2927_v23 = vpack.c.bf16 %v2666_v41, %v2663_v53 }
 0x800   : > { %v7421_v17 = vpop.f32.mrf.mxu0 }
 0x801   : > { %5721 = vmatprep.mubr.msk.bf16.mxu1 %vm1068_vm1, %v2927_v23 }
 0x802   : > { %v5680_v58 = vpop.f32.mrf.mxu0  ;;  %5722 = vmatmul.mubr.msk.bf16.gmra.mxu1 %vm1068_vm1, %v2928_v15 }
 0x803   : > { %5779 = vmatprep.mubr.msk.bf16.mxu1 %vm406_vm0, %v6607_v5 }
 0x804   : > { %v2861_v10 = vpop.f32.mrf.mxu0 }
 0x806   : > { %v5683_v43 = vpop.f32.mrf.mxu0 }
 0x808   : > { %v2874_v32 = vpop.f32.mrf.mxu0 }
 0x80a   : > { %v5684_v45 = vpop.f32.mrf.mxu0  ;;  %5780 = vmatmul.mubr.msk.bf16.vlgmr.msra.gmra.mxu1 %vm406_vm0, %v6619_v12 }
 0x80b   : > { %5783 = vmatprep.mubr.msk.bf16.mxu1 %vm406_vm0, %v8124_v37  ;;  %5816 = vmatpush3.bf16.msra.mxu1 %v5981_v29 }
 0x80c   : > { %v2877_v16 = vpop.f32.mrf.mxu0  ;;  %5817 = vmatprep.subr.bf16.mxu1 %v5982_v35 }
 0x80e   : > { %v5687_v39 = vpop.f32.mrf.mxu0 }
 0x80f   : > { %5818 = vmatpush3.bf16.msra.mxu1 %v5982_v35  ;;  %v2899_v38 = vadd.f32 %v5687_v39, %v4967_v63 }
 0x810   : > { %v2890_v7 = vpop.f32.mrf.mxu0 }
 0x812   : > { %v5688_v24 = vpop.f32.mrf.mxu0  ;;  %5784 = vmatmul.mubr.msk.bf16.gmra.mxu1 %vm406_vm0, %v8125_v8 }
 0x813   : > { %5787 = vmatprep.mubr.msk.bf16.mxu1 %vm406_vm0, %v8126_v4  ;;  %v2902_v15 = vadd.f32 %v5688_v24, %v4967_v63  ;;  %v2883_v24 = vadd.f32 %v5683_v43, %v4967_v63  ;;  %v2859_v43 = vadd.f32 %v4967_v63, %v7421_v17 }
 0x814   : > { %v2893_v31 = vpop.f32.mrf.mxu0 }
 0x815   : > { %v3223_v0 = vpack.c.bf16 %v2902_v15, %v2899_v38  ;;  %v2894_v49 = vadd.f32 %v4967_v63, %v2893_v31  ;;  %v2875_v38 = vadd.f32 %v4967_v63, %v2874_v32  ;;  %v2870_v31 = vadd.f32 %v5680_v58, %v4967_v63 }
 0x816   : > { %v5691_v55 = vpop.f32.mrf.mxu0 }
 0x817   : > { %v2915_v28 = vadd.f32 %v5691_v55, %v4967_v63  ;;  %v2891_v55 = vadd.f32 %v4967_v63, %v2890_v7 }
 0x818   : > { %v2906_v61 = vpop.f32.mrf.mxu0 }
 0x819   : > { %v2907_v41 = vadd.f32 %v4967_v63, %v2906_v61  ;;  %v2886_v61 = vadd.f32 %v5684_v45, %v4967_v63  ;;  %v2867_v45 = vadd.f32 %v7419_v18, %v4967_v63 }
 0x81a   : > { %v5692_v29 = vpop.f32.mrf.mxu0  ;;  %5788 = vmatmul.mubr.msk.bf16.gmra.mxu1 %vm406_vm0, %v8127_v54 }
 0x81b   : > { %v2918_v34 = vadd.f32 %v5692_v29, %v4967_v63  ;;  %5791 = vmatprep.mubr.msk.bf16.mxu1 %vm406_vm0, %v8128_v9  ;;  %v3222_v29 = vpack.c.bf16 %v2894_v49, %v2891_v55  ;;  %v3221_v39 = vpack.c.bf16 %v2886_v61, %v2883_v24  ;;  %v3219_v49 = vpack.c.bf16 %v2870_v31, %v2867_v45 }
 0x81c   : > { %v2909_v53 = vpop.f32.mrf.mxu0 }
 0x81d   : > { %v3225_v20 = vpack.c.bf16 %v2918_v34, %v2915_v28  ;;  %v2910_v23 = vadd.f32 %v4967_v63, %v2909_v53  ;;  %v2878_v28 = vadd.f32 %v4967_v63, %v2877_v16 }
 0x81f   : > { %v3224_v35 = vpack.c.bf16 %v2910_v23, %v2907_v41  ;;  %5725 = vmatprep.subr.bf16.mxu0 %v3225_v20  ;;  %v3220_v34 = vpack.c.bf16 %v2878_v28, %v2875_v38 }
 0x820   : > { %5726 = vmatpush3.bf16.msra.mxu0 %v3225_v20 }
 0x821   : > { %5727 = vmatprep.subr.bf16.mxu0 %v3224_v35 }
 0x822   : > { %5792 = vmatmul.mubr.msk.bf16.gmra.mxu1 %vm406_vm0, %v8129_v27 }
 0x823   : > { %5819 = vmatprep.mubr.msk.bf16.mxu1 %vm406_vm0, %v6607_v5 }
 0x824   : > { %5728 = vmatpush3.bf16.msra.mxu0 %v3224_v35 }
 0x825   : > { %5729 = vmatprep.subr.bf16.mxu0 %v3223_v0 }
 0x828   : > { %5730 = vmatpush3.bf16.msra.mxu0 %v3223_v0  ;;  %v2862_v0 = vadd.f32 %v4967_v63, %v2861_v10 }
 0x829   : > { %5731 = vmatprep.subr.bf16.mxu0 %v3222_v29 }
 0x82a   : > { %5820 = vmatmul.mubr.msk.bf16.vlgmr.msra.gmra.mxu1 %vm406_vm0, %v6619_v12  ;;  %v3218_v32 = vpack.c.bf16 %v2862_v0, %v2859_v43 }
 0x82b   : > { %5823 = vmatprep.mubr.msk.bf16.mxu1 %vm406_vm0, %v8124_v37 }
 0x82c   : > { %5732 = vmatpush3.bf16.msra.mxu0 %v3222_v29 }
 0x82d   : > { %5733 = vmatprep.subr.bf16.mxu0 %v3221_v39 }
 0x830   : > { %5734 = vmatpush3.bf16.msra.mxu0 %v3221_v39 }
 0x831   : > { %5735 = vmatprep.subr.bf16.mxu0 %v3220_v34 }
 0x832   : > { %5824 = vmatmul.mubr.msk.bf16.gmra.mxu1 %vm406_vm0, %v8125_v8 }
 0x833   : > { %5827 = vmatprep.mubr.msk.bf16.mxu1 %vm406_vm0, %v8126_v4 }
 0x834   : > { %5736 = vmatpush3.bf16.msra.mxu0 %v3220_v34 }
 0x835   : > { %5737 = vmatprep.subr.bf16.mxu0 %v3219_v49 }
 0x838   : > { %5738 = vmatpush3.bf16.msra.mxu0 %v3219_v49 }
 0x839   : > { %5739 = vmatprep.subr.bf16.mxu0 %v3218_v32 }
 0x83a   : > { %5828 = vmatmul.mubr.msk.bf16.gmra.mxu1 %vm406_vm0, %v8127_v54 }
 0x83b   : > { %5831 = vmatprep.mubr.msk.bf16.mxu1 %vm406_vm0, %v8128_v9 }
 0x83c   : > { %5740 = vmatpush3.bf16.msra.mxu0 %v3218_v32 }
 0x842   : > { %5832 = vmatmul.mubr.msk.bf16.gmra.mxu1 %vm406_vm0, %v8129_v27 }
 0x8aa   : > { %v5711_v18 = vpop.f32.mrf.mxu1 }
 0x8ab   : > { %v7468_v7 = vmul.f32 0.17677669, %v5711_v18 }
 0x8ac   : > { %v3019_v58 = vpop.f32.mrf.mxu1 }
 0x8ad   : > { %v7465_v10 = vmul.f32 0.17677669, %v3019_v58 }
 0x8ae   : > { %v5712_v16 = vpop.f32.mrf.mxu1 }
 0x8af   : > { %3098 = vmax.xlane.f32.xlu0 %v7465_v10  ;;  %v7474_v20 = vmul.f32 0.17677669, %v5712_v16  ;;  %v5000_v16 = vld [vmem:[%s8083_s4 + $0x3] ss:$0 sm:$0xff] }
 0x8b0   : > { %v3022_v17 = vpop.f32.mrf.mxu1 }
 0x8b1   : > { %v7470_v63 = vmul.f32 0.17677669, %v3022_v17 }
 0x8b2   : > { %v5715_v53 = vpop.f32.mrf.mxu1 }
 0x8b3   : > { %3102 = vmax.xlane.f32.xlu0 %v7468_v7  ;;  %3100 = vmax.xlane.f32.xlu1 %v7470_v63  ;;  %v7480_v55 = vmul.f32 0.17677669, %v5715_v53 }
 0x8b4   : > { %v3035_v41 = vpop.f32.mrf.mxu1 }
 0x8b5   : > { %v7476_v23 = vmul.f32 0.17677669, %v3035_v41 }
 0x8b6   : > { %v5716_v15 = vpop.f32.mrf.mxu1 }
 0x8b7   : > { %3104 = vmax.xlane.f32.xlu1 %v7474_v20  ;;  %3106 = vmax.xlane.f32.xlu0 %v7476_v23  ;;  %v7486_v39 = vmul.f32 0.17677669, %v5716_v15 }
 0x8b8   : > { %v3038_v35 = vpop.f32.mrf.mxu1 }
 0x8b9   : > { %v7482_v61 = vmul.f32 0.17677669, %v3038_v35 }
 0x8ba   : > { %v5719_v29 = vpop.f32.mrf.mxu1 }
 0x8bb   : > { %3110 = vmax.xlane.f32.xlu0 %v7480_v55  ;;  %3108 = vmax.xlane.f32.xlu1 %v7482_v61  ;;  %v7492_v34 = vmul.f32 0.17677669, %v5719_v29 }
 0x8bc   : > { %v3051_v24 = vpop.f32.mrf.mxu1 }
 0x8bd   : > { %v7488_v28 = vmul.f32 0.17677669, %v3051_v24 }
 0x8be   : > { %v5720_v38 = vpop.f32.mrf.mxu1 }
 0x8bf   : > { %3112 = vmax.xlane.f32.xlu1 %v7486_v39  ;;  %3114 = vmax.xlane.f32.xlu0 %v7488_v28  ;;  %v7498_v43 = vmul.f32 0.17677669, %v5720_v38 }
 0x8c0   : > { %v3054_v31 = vpop.f32.mrf.mxu1 }
 0x8c1   : > { %v7494_v45 = vmul.f32 0.17677669, %v3054_v31 }
 0x8c2   : > { %v5723_v49 = vpop.f32.mrf.mxu1 }
 0x8c3   : > { %3118 = vmax.xlane.f32.xlu0 %v7492_v34  ;;  %3116 = vmax.xlane.f32.xlu1 %v7494_v45  ;;  %v7507_v17 = vmul.f32 0.17677669, %v5723_v49 }
 0x8c4   : > { %v3067_v0 = vpop.f32.mrf.mxu1 }
 0x8c5   : > { %v7500_v32 = vmul.f32 0.17677669, %v3067_v0 }
 0x8c6   : > { %v5724_v18 = vpop.f32.mrf.mxu1 }
 0x8c7   : > { %3120 = vmax.xlane.f32.xlu1 %v7498_v43  ;;  %3122 = vmax.xlane.f32.xlu0 %v7500_v32  ;;  %v7515_v29 = vmul.f32 0.17677669, %v5724_v18 }
 0x8c8   : > { %v3070_v58 = vpop.f32.mrf.mxu1 }
 0x8c9   : > { %v7509_v53 = vmul.f32 0.17677669, %v3070_v58 }
 0x8ca   : > { %v5781_v41 = vpop.f32.mrf.mxu1 }
 0x8cb   : > { %v7511_v15 = vadd.f32 %v5781_v41, %v5000_v16  ;;  %3126 = vmax.xlane.f32.xlu0 %v7507_v17  ;;  %3124 = vmax.xlane.f32.xlu1 %v7509_v53 }
 0x8cc   : > { %v3564_v35 = vpop.f32.mrf.mxu1 }
 0x8cd   : > { %8154 = vst [vmem:[#allocation26_spill] sm:$0xff] %v7511_v15  ;;  %v7520_v49 = vadd.f32 %v5000_v16, %v3564_v35 }
 0x8ce   : > { %v5782_v24 = vpop.f32.mrf.mxu1 }
 0x8cf   : > { %v7517_v38 = vadd.f32 %v5782_v24, %v5000_v16  ;;  %3128 = vmax.xlane.f32.xlu1 %v7515_v29 }
 0x8d0   : > { %v3567_v31 = vpop.f32.mrf.mxu1 }
 0x8d1   : > { %8155 = vst [vmem:[#allocation27_spill] sm:$0xff] %v7517_v38  ;;  %v7524_v58 = vadd.f32 %v5000_v16, %v3567_v31 }
 0x8d2   : > { %v5785_v41 = vpop.f32.mrf.mxu1 }
 0x8d3   : > { %v7528_v21 = vadd.f32 %v5785_v41, %v5000_v16 }
 0x8d4   : > { %v3580_v18 = vpop.f32.mrf.mxu1 }
 0x8d5   : > { %8156 = vst [vmem:[#allocation28_spill] sm:$0xff] %v7528_v21  ;;  %v7530_v51 = vadd.f32 %v5000_v16, %v3580_v18 }
 0x8d6   : > { %v5786_v24 = vpop.f32.mrf.mxu1 }
 0x8d7   : > { %8157 = vst [vmem:[#allocation29_spill] sm:$0xff] %v7530_v51  ;;  %v7532_v59 = vadd.f32 %v5786_v24, %v5000_v16 }
 0x8d8   : > { %v3583_v3 = vpop.f32.mrf.mxu1 }
 0x8d9   : > { %8158 = vst [vmem:[#allocation30_spill] sm:$0xff] %v7532_v59  ;;  %v7536_v47 = vadd.f32 %v5000_v16, %v3583_v3 }
 0x8da   : > { %v5789_v31 = vpop.f32.mrf.mxu1 }
 0x8db   : > { %8159 = vst [vmem:[#allocation31_spill] sm:$0xff] %v7536_v47  ;;  %v7540_v15 = vadd.f32 %v5789_v31, %v5000_v16 }
 0x8dc   : > { %v3596_v41 = vpop.f32.mrf.mxu1 }
 0x8dd   : > { %8160 = vst [vmem:[#allocation32_spill] sm:$0xff] %v7540_v15  ;;  %v7542_v50 = vadd.f32 %v5000_v16, %v3596_v41 }
 0x8de   : > { %v5790_v18 = vpop.f32.mrf.mxu1 }
 0x8df   : > { %8161 = vst [vmem:[#allocation33_spill] sm:$0xff] %v7542_v50  ;;  %v7544_v38 = vadd.f32 %v5790_v18, %v5000_v16 }
 0x8e0   : > { %v3599_v24 = vpop.f32.mrf.mxu1 }
 0x8e1   : > { %8162 = vst [vmem:[#allocation34_spill] sm:$0xff] %v7544_v38  ;;  %v7548_v62 = vadd.f32 %v5000_v16, %v3599_v24 }
 0x8e2   : > { %v5793_v3 = vpop.f32.mrf.mxu1 }
 0x8e3   : > { %8163 = vst [vmem:[#allocation35_spill] sm:$0xff] %v7548_v62  ;;  %v7552_v21 = vadd.f32 %v5793_v3, %v5000_v16 }
 0x8e4   : > { %v3612_v31 = vpop.f32.mrf.mxu1 }
 0x8e5   : > { %8164 = vst [vmem:[#allocation36_spill] sm:$0xff] %v7552_v21  ;;  %v7554_v0 = vadd.f32 %v5000_v16, %v3612_v31 }
 0x8e6   : > { %v5794_v41 = vpop.f32.mrf.mxu1 }
 0x8e7   : > { %8165 = vst [vmem:[#allocation37_spill] sm:$0xff] %v7554_v0  ;;  %v7556_v59 = vadd.f32 %v5794_v41, %v5000_v16 }
 0x8e8   : > { %v3615_v18 = vpop.f32.mrf.mxu1 }
 0x8e9   : > { %8166 = vst [vmem:[#allocation38_spill] sm:$0xff] %v7556_v59  ;;  %v7560_v47 = vadd.f32 %v5000_v16, %v3615_v18  ;;  %v5032_v16 = vld [vmem:[%s8087_s8 + $0x3] ss:$0 sm:$0xff] }
 0x8ea   : > { %v5821_v24 = vpop.f32.mrf.mxu1 }
 0x8eb   : > { %8167 = vst [vmem:[#allocation39_spill] sm:$0xff] %v7560_v47 }
 0x8ec   : > { %v3808_v15 = vpop.f32.mrf.mxu1 }
 0x8ee   : > { %v5822_v35 = vpop.f32.mrf.mxu1 }
 0x8f0   : > { %v3811_v3 = vpop.f32.mrf.mxu1 }
 0x8f2   : > { %v5825_v38 = vpop.f32.mrf.mxu1 }
 0x8f4   : > { %v3824_v50 = vpop.f32.mrf.mxu1 }
 0x8f6   : > { %v5826_v31 = vpop.f32.mrf.mxu1 }
 0x8f7   : > { %v3836_v25 = vadd.f32 %v5826_v31, %v5032_v16 }
 0x8f8   : > { %v3827_v62 = vpop.f32.mrf.mxu1 }
 0x8fa   : > { %v5829_v26 = vpop.f32.mrf.mxu1 }
 0x8fb   : > { %v3849_v19 = vadd.f32 %v5829_v26, %v5032_v16 }
 0x8fc   : > { %v3840_v41 = vpop.f32.mrf.mxu1 }
 0x8fd   : > { %v3841_v56 = vadd.f32 %v5032_v16, %v3840_v41 }
 0x8fe   : > { %v5830_v40 = vpop.f32.mrf.mxu1 }
 0x8ff   : > { %v3852_v30 = vadd.f32 %v5830_v40, %v5032_v16  ;;  %v3820_v40 = vadd.f32 %v5822_v35, %v5032_v16 }
 0x900   : > { %v3843_v11 = vpop.f32.mrf.mxu1 }
 0x901   : > { %v4173_v57 = vpack.c.bf16 %v3852_v30, %v3849_v19  ;;  %v3844_v46 = vadd.f32 %v5032_v16, %v3843_v11  ;;  %v3812_v30 = vadd.f32 %v5032_v16, %v3811_v3 }
 0x902   : > { %v5833_v42 = vpop.f32.mrf.mxu1 }
 0x903   : > { %v3865_v51 = vadd.f32 %v5833_v42, %v5032_v16  ;;  %v4172_v44 = vpack.c.bf16 %v3844_v46, %v3841_v56  ;;  %v3833_v42 = vadd.f32 %v5825_v38, %v5032_v16 }
 0x904   : > { %v3856_v48 = vpop.f32.mrf.mxu1 }
 0x905   : > { %v3857_v59 = vadd.f32 %v5032_v16, %v3856_v48  ;;  %v3828_v48 = vadd.f32 %v5032_v16, %v3827_v62 }
 0x906   : > { %v5834_v18 = vpop.f32.mrf.mxu1 }
 0x907   : > { %v3868_v6 = vadd.f32 %v5834_v18, %v5032_v16  ;;  %v4171_v18 = vpack.c.bf16 %v3836_v25, %v3833_v42 }
 0x908   : > { %v3859_v21 = vpop.f32.mrf.mxu1 }
 0x909   : > { %v4175_v0 = vpack.c.bf16 %v3868_v6, %v3865_v51  ;;  %v3860_v47 = vadd.f32 %v5032_v16, %v3859_v21  ;;  %v3825_v21 = vadd.f32 %v5032_v16, %v3824_v50 }
 0x90b   : > { %v4174_v60 = vpack.c.bf16 %v3860_v47, %v3857_v59  ;;  %5867 = vmatprep.subr.bf16.mxu1 %v4175_v0  ;;  %v4170_v47 = vpack.c.bf16 %v3828_v48, %v3825_v21  ;;  %v3817_v59 = vadd.f32 %v5821_v24, %v5032_v16 }
 0x90c   : > { %5868 = vmatpush3.bf16.msra.mxu1 %v4175_v0 }
 0x90d   : > { %5869 = vmatprep.subr.bf16.mxu1 %v4174_v60  ;;  %v4169_v19 = vpack.c.bf16 %v3820_v40, %v3817_v59 }
 0x910   : > { %5870 = vmatpush3.bf16.msra.mxu1 %v4174_v60  ;;  %v3809_v60 = vadd.f32 %v5032_v16, %v3808_v15 }
 0x911   : > { %5871 = vmatprep.subr.bf16.mxu1 %v4173_v57 }
 0x912   : > { %v4168_v11 = vpack.c.bf16 %v3812_v30, %v3809_v60 }
 0x914   : > { %5872 = vmatpush3.bf16.msra.mxu1 %v4173_v57 }
 0x915   : > { %5873 = vmatprep.subr.bf16.mxu1 %v4172_v44 }
 0x918   : > { %5874 = vmatpush3.bf16.msra.mxu1 %v4172_v44 }
 0x919   : > { %5875 = vmatprep.subr.bf16.mxu1 %v4171_v18 }
 0x91c   : > { %5876 = vmatpush3.bf16.msra.mxu1 %v4171_v18 }
 0x91d   : > { %5877 = vmatprep.subr.bf16.mxu1 %v4170_v47 }
 0x920   : > { %5878 = vmatpush3.bf16.msra.mxu1 %v4170_v47 }
 0x921   : > { %5879 = vmatprep.subr.bf16.mxu1 %v4169_v19 }
 0x924   : > { %5880 = vmatpush3.bf16.msra.mxu1 %v4169_v19 }
 0x925   : > { %5881 = vmatprep.subr.bf16.mxu1 %v4168_v11 }
 0x928   : > { %5882 = vmatpush3.bf16.msra.mxu1 %v4168_v11 }
 0x938   : > { %v3099_v46 = vpop.xlane.xlu0 %3098 }
 0x939   : > { %v3130_v25 = vsub.f32 %v7465_v10, %v3099_v46 }
 0x93b   : > { %v3146_v62 = vmul.f32 1.442695, %v3130_v25 }
 0x93c   : > { %v3103_v44 = vpop.xlane.xlu0 %3102  ;;  %v3101_v56 = vpop.xlane.xlu1 %3100 }
 0x93d   : > { %6145 = vpow2.f32 %v3146_v62  ;;  %v3132_v57 = vsub.f32 %v7468_v7, %v3103_v44  ;;  %v3131_v26 = vsub.f32 %v7470_v63, %v3101_v56 }
 0x93f   : > { %v3150_v6 = vmul.f32 1.442695, %v3132_v57  ;;  %v3148_v51 = vmul.f32 1.442695, %v3131_v26 }
 0x940   : > { %v3105_v50 = vpop.xlane.xlu1 %3104  ;;  %v3107_v15 = vpop.xlane.xlu0 %3106 }
 0x941   : > { %6147 = vpow2.f32 %v3150_v6  ;;  %v3133_v38 = vsub.f32 %v7474_v20, %v3105_v50  ;;  %v3134_v0 = vsub.f32 %v7476_v23, %v3107_v15 }
 0x942   : > { %6149 = vpow2.f32 %v3148_v51 }
 0x943   : > { %v3152_v35 = vmul.f32 1.442695, %v3133_v38  ;;  %v3154_v10 = vmul.f32 1.442695, %v3134_v0 }
 0x944   : > { %v3111_v24 = vpop.xlane.xlu0 %3110  ;;  %v3109_v3 = vpop.xlane.xlu1 %3108 }
 0x945   : > { %6151 = vpow2.f32 %v3152_v35  ;;  %v3136_v31 = vsub.f32 %v7480_v55, %v3111_v24  ;;  %v3135_v7 = vsub.f32 %v7482_v61, %v3109_v3 }
 0x946   : > { %6153 = vpow2.f32 %v3154_v10 }
 0x947   : > { %v3158_v63 = vmul.f32 1.442695, %v3136_v31  ;;  %v3156_v41 = vmul.f32 1.442695, %v3135_v7 }
 0x948   : > { %v3113_v16 = vpop.xlane.xlu1 %3112  ;;  %v3115_v42 = vpop.xlane.xlu0 %3114 }
 0x949   : > { %6155 = vpow2.f32 %v3158_v63  ;;  %v3137_v20 = vsub.f32 %v7486_v39, %v3113_v16  ;;  %v3138_v23 = vsub.f32 %v7488_v28, %v3115_v42 }
 0x94a   : > { %v6146_v18 = vpop.eup %6145  ;;  %6157 = vpow2.f32 %v3156_v41 }
 0x94b   : > { %v3160_v48 = vmul.f32 1.442695, %v3137_v20  ;;  %v3162_v21 = vmul.f32 1.442695, %v3138_v23  ;;  %3178 = vadd.xlane.f32.xlu0 %v6146_v18 }
 0x94c   : > { %v3119_v40 = vpop.xlane.xlu0 %3118  ;;  %v3117_v47 = vpop.xlane.xlu1 %3116 }
 0x94d   : > { %6159 = vpow2.f32 %v3160_v48  ;;  %v3140_v55 = vsub.f32 %v7492_v34, %v3119_v40  ;;  %v3139_v61 = vsub.f32 %v7494_v45, %v3117_v47  ;;  %v4986_v48 = vld [vmem:[%s8088_s9 + $0x8] sm:$0xf]  ;;  %v5983_v40 = vld [vmem:[%s8084_s5 + $0x38] sm:$0xff]  }
 0x94e   : > { %v6148_v59 = vpop.eup %6147  ;;  %6161 = vpow2.f32 %v3162_v21  ;;  %5943 = vmatprep.subr.msk.bf16.mxu0 %vm2330_vm2, %v4986_v48  ;;  %v3390_v21 = vsel %vm2330_vm2, %v4986_v48, 0 }
 0x94f   : > { %v6150_v19 = vpop.eup %6149  ;;  %v3166_v30 = vmul.f32 1.442695, %v3140_v55  ;;  %v3164_v60 = vmul.f32 1.442695, %v3139_v61  ;;  %3182 = vadd.xlane.f32.xlu0 %v6148_v59 }
 0x950   : > { %3180 = vadd.xlane.f32.xlu1 %v6150_v19  ;;  %v3121_v39 = vpop.xlane.xlu1 %3120  ;;  %v3123_v28 = vpop.xlane.xlu0 %3122  ;;  %v3210_v11 = vpack.c.bf16 %v6150_v19, %v6146_v18 }
 0x951   : > { %6163 = vpow2.f32 %v3166_v30  ;;  %v3141_v46 = vsub.f32 %v7498_v43, %v3121_v39  ;;  %v3142_v25 = vsub.f32 %v7500_v32, %v3123_v28 }
 0x952   : > { %v6152_v62 = vpop.eup %6151  ;;  %6165 = vpow2.f32 %v3164_v60  ;;  %5741 = vmatprep.mubr.bf16.mxu0 %v3210_v11 }
 0x953   : > { %v6154_v34 = vpop.eup %6153  ;;  %v3211_v45 = vpack.c.bf16 %v6152_v62, %v6148_v59  ;;  %v3168_v44 = vmul.f32 1.442695, %v3141_v46  ;;  %v3170_v56 = vmul.f32 1.442695, %v3142_v25 }
 0x954   : > { %3186 = vadd.xlane.f32.xlu0 %v6154_v34  ;;  %3184 = vadd.xlane.f32.xlu1 %v6152_v62  ;;  %v3127_v57 = vpop.xlane.xlu0 %3126  ;;  %v3125_v26 = vpop.xlane.xlu1 %3124 }
 0x955   : > { %6167 = vpow2.f32 %v3168_v44  ;;  %v3144_v6 = vsub.f32 %v7507_v17, %v3127_v57  ;;  %v3143_v51 = vsub.f32 %v7509_v53, %v3125_v26  ;;  %5742 = vmatmul.mubr.bf16.vlgmr.msra.gmra.mxu0 %v3211_v45 }
 0x956   : > { %v6156_v43 = vpop.eup %6155  ;;  %6169 = vpow2.f32 %v3170_v56  ;;  %5758 = vmatpush3.bf16.msra.mxu0 %v3390_v21 }
 0x957   : > { %v6158_v32 = vpop.eup %6157  ;;  %v3174_v50 = vmul.f32 1.442695, %v3144_v6  ;;  %v3172_v15 = vmul.f32 1.442695, %v3143_v51  ;;  %5795 = vmatprep.subr.bf16.mxu0 %v5983_v40 }
 0x958   : > { %3190 = vadd.xlane.f32.xlu0 %v6156_v43  ;;  %3188 = vadd.xlane.f32.xlu1 %v6158_v32  ;;  %v3129_v38 = vpop.xlane.xlu1 %3128  ;;  %v3212_v0 = vpack.c.bf16 %v6158_v32, %v6154_v34 }
 0x959   : > { %6171 = vpow2.f32 %v3174_v50  ;;  %v3145_v35 = vsub.f32 %v7515_v29, %v3129_v38 }
 0x95a   : > { %v6160_v10 = vpop.eup %6159  ;;  %6173 = vpow2.f32 %v3172_v15  ;;  %5745 = vmatprep.mubr.bf16.mxu0 %v3212_v0 }
 0x95b   : > { %v6162_v24 = vpop.eup %6161  ;;  %v3176_v17 = vmul.f32 1.442695, %v3145_v35  ;;  %v3213_v3 = vpack.c.bf16 %v6160_v10, %v6156_v43 }
 0x95c   : > { %3194 = vadd.xlane.f32.xlu0 %v6162_v24  ;;  %3192 = vadd.xlane.f32.xlu1 %v6160_v10 }
 0x95d   : > { %6175 = vpow2.f32 %v3176_v17  ;;  %5746 = vmatmul.mubr.bf16.gmra.mxu0 %v3213_v3  ;;  %v5984_v17 = vld [vmem:[%s8084_s5 + $0x30] sm:$0xff]  }
 0x95e   : > { %v6164_v53 = vpop.eup %6163 }
 0x95f   : > { %v6166_v31 = vpop.eup %6165 }
 0x960   : > { %3198 = vadd.xlane.f32.xlu0 %v6164_v53  ;;  %3196 = vadd.xlane.f32.xlu1 %v6166_v31  ;;  %v3214_v7 = vpack.c.bf16 %v6166_v31, %v6162_v24 }
 0x962   : > { %v6168_v63 = vpop.eup %6167  ;;  %5749 = vmatprep.mubr.bf16.mxu0 %v3214_v7 }
 0x963   : > { %v6170_v41 = vpop.eup %6169  ;;  %v3215_v16 = vpack.c.bf16 %v6168_v63, %v6164_v53 }
 0x964   : > { %3202 = vadd.xlane.f32.xlu0 %v6170_v41  ;;  %3200 = vadd.xlane.f32.xlu1 %v6168_v63 }
 0x965   : > { %5750 = vmatmul.mubr.bf16.gmra.mxu0 %v3215_v16 }
 0x966   : > { %v6172_v29 = vpop.eup %6171 }
 0x967   : > { %v6174_v42 = vpop.eup %6173 }
 0x968   : > { %3206 = vadd.xlane.f32.xlu0 %v6172_v29  ;;  %3204 = vadd.xlane.f32.xlu1 %v6174_v42  ;;  %v3216_v20 = vpack.c.bf16 %v6174_v42, %v6170_v41 }
 0x96a   : > { %v6176_v23 = vpop.eup %6175  ;;  %5753 = vmatprep.mubr.bf16.mxu0 %v3216_v20 }
 0x96b   : > { %v3217_v18 = vpack.c.bf16 %v6176_v23, %v6172_v29 }
 0x96c   : > { %3208 = vadd.xlane.f32.xlu1 %v6176_v23 }
 0x96d   : > { %5754 = vmatmul.mubr.bf16.gmra.mxu0 %v3217_v18 }
 0x9d4   : > { %v3179_v55 = vpop.xlane.xlu0 %3178 }
 0x9d5   : > { %6177 = vrcp.f32 %v3179_v55 }
 0x9d8   : > { %v3183_v59 = vpop.xlane.xlu0 %3182 }
 0x9d9   : > { %v3181_v47 = vpop.xlane.xlu1 %3180 }
 0x9dd   : > { %v3185_v61 = vpop.xlane.xlu1 %3184  ;;  %v3187_v30 = vpop.xlane.xlu0 %3186 }
 0x9de   : > { %6179 = vrcp.f32 %v3185_v61 }
 0x9df   : > { %6181 = vrcp.f32 %v3181_v47 }
 0x9e0   : > { %6183 = vrcp.f32 %v3183_v59 }
 0x9e1   : > { %v3189_v19 = vpop.xlane.xlu1 %3188  ;;  %v3191_v39 = vpop.xlane.xlu0 %3190  ;;  %6185 = vrcp.f32 %v3187_v30 }
 0x9e2   : > { %v6178_v45 = vpop.eup %6177 }
 0x9e5   : > { %v3193_v60 = vpop.xlane.xlu1 %3192  ;;  %v3195_v11 = vpop.xlane.xlu0 %3194 }
 0x9e6   : > { %6187 = vrcp.f32 %v3193_v60 }
 0x9e7   : > { %6189 = vrcp.f32 %v3189_v19 }
 0x9e8   : > { %6191 = vrcp.f32 %v3191_v39 }
 0x9e9   : > { %v3197_v28 = vpop.xlane.xlu1 %3196  ;;  %v3199_v34 = vpop.xlane.xlu0 %3198  ;;  %6193 = vrcp.f32 %v3195_v11 }
 0x9eb   : > { %v6180_v56 = vpop.eup %6179 }
 0x9ec   : > { %v6182_v57 = vpop.eup %6181 }
 0x9ed   : > { %v3201_v25 = vpop.xlane.xlu1 %3200  ;;  %v6184_v51 = vpop.eup %6183 }
 0x9ee   : > { %6195 = vrcp.f32 %v3201_v25  ;;  %v3203_v0 = vpop.xlane.xlu0 %3202  ;;  %v6186_v3 = vpop.eup %6185 }
 0x9ef   : > { %6197 = vrcp.f32 %v3197_v28 }
 0x9f0   : > { %6199 = vrcp.f32 %v3199_v34 }
 0x9f1   : > { %v3205_v43 = vpop.xlane.xlu1 %3204  ;;  %6201 = vrcp.f32 %v3203_v0 }
 0x9f2   : > { %v3207_v42 = vpop.xlane.xlu0 %3206 }
 0x9f3   : > { %v6188_v31 = vpop.eup %6187 }
 0x9f4   : > { %v6190_v63 = vpop.eup %6189 }
 0x9f5   : > { %v3209_v7 = vpop.xlane.xlu1 %3208  ;;  %v6192_v29 = vpop.eup %6191 }
 0x9f6   : > { %6203 = vrcp.f32 %v3209_v7  ;;  %v8174_v7 = vld [vmem:[#allocation4_spill] sm:$0xff] }
 0x9f7   : > { %6205 = vrcp.f32 %v3205_v43 }
 0x9f8   : > { %6207 = vrcp.f32 %v3207_v42 }
 0xa15   : > { %v5743_v46 = vpop.f32.mrf.mxu0 }
 0xa16   : > { %v3341_v15 = vmul.f32 %v6184_v51, %v5743_v46 }
 0xa17   : > { %v3260_v62 = vpop.f32.mrf.mxu0 }
 0xa18   : > { %v3339_v32 = vmul.f32 %v6178_v45, %v3260_v62 }
 0xa19   : > { %v5744_v44 = vpop.f32.mrf.mxu0 }
 0xa1a   : > { %v3342_v26 = vmul.f32 %v6180_v56, %v5744_v44 }
 0xa1b   : > { %v3263_v6 = vpop.f32.mrf.mxu0 }
 0xa1c   : > { %v3340_v50 = vmul.f32 %v6182_v57, %v3263_v6  ;;  %v3356_v10 = vpack.c.bf16 %v3342_v26, %v3341_v15 }
 0xa1d   : > { %v5747_v38 = vpop.f32.mrf.mxu0 }
 0xa1e   : > { %v3355_v35 = vpack.c.bf16 %v3340_v50, %v3339_v32  ;;  %v3345_v18 = vmul.f32 %v6192_v29, %v5747_v38 }
 0xa1f   : > { %v3276_v24 = vpop.f32.mrf.mxu0 }
 0xa20   : > { %5759 = vmatprep.mubr.msk.bf16.mxu0 %vm1068_vm1, %v3355_v35  ;;  %v3343_v20 = vmul.f32 %v6186_v3, %v3276_v24  ;;  %v8172_v3 = vld [vmem:[#allocation3_spill] sm:$0xff] }
 0xa21   : > { %v5748_v53 = vpop.f32.mrf.mxu0  ;;  %5760 = vmatmul.mubr.msk.bf16.vlgmr.msra.gmra.mxu0 %vm1068_vm1, %v3356_v10 }
 0xa22   : > { %5796 = vmatpush3.bf16.msra.mxu0 %v5983_v40  ;;  %v3346_v41 = vmul.f32 %v6188_v31, %v5748_v53  ;;  %v6194_v40 = vpop.eup %6193 }
 0xa23   : > { %v3279_v16 = vpop.f32.mrf.mxu0  ;;  %5797 = vmatprep.subr.bf16.mxu0 %v5984_v17  ;;  %v6196_v59 = vpop.eup %6195 }
 0xa24   : > { %v3344_v23 = vmul.f32 %v6190_v63, %v3279_v16  ;;  %v3358_v47 = vpack.c.bf16 %v3346_v41, %v3345_v18  ;;  %v6198_v19 = vpop.eup %6197  ;;  %v8176_v16 = vld [vmem:[#allocation5_spill] sm:$0xff]  ;;  %v8178_v18 = vld [vmem:[#allocation6_spill] sm:$0xff] }
 0xa25   : > { %v5751_v48 = vpop.f32.mrf.mxu0  ;;  %v6200_v39 = vpop.eup %6199 }
 0xa26   : > { %v3357_v21 = vpack.c.bf16 %v3344_v23, %v3343_v20  ;;  %5798 = vmatpush3.bf16.msra.mxu0 %v5984_v17  ;;  %v3349_v46 = vmul.f32 %v6200_v39, %v5751_v48  ;;  %v6202_v44 = vpop.eup %6201  ;;  %v8177_v23 = vld [vmem:[#allocation18_spill] sm:$0xff] }
 0xa27   : > { %v3292_v55 = vpop.f32.mrf.mxu0  ;;  %v6204_v57 = vpop.eup %6203  ;;  %v2533_v48 = vadd.f32 %v8178_v18, %v8177_v23 }
 0xa28   : > { %5763 = vmatprep.mubr.msk.bf16.mxu0 %vm1068_vm1, %v3357_v21  ;;  %v3347_v28 = vmul.f32 %v6194_v40, %v3292_v55  ;;  %v6206_v26 = vpop.eup %6205  ;;  %v8179_v55 = vld [vmem:[#allocation19_spill] sm:$0xff] }
 0xa29   : > { %v5752_v61 = vpop.f32.mrf.mxu0  ;;  %5764 = vmatmul.mubr.msk.bf16.gmra.mxu0 %vm1068_vm1, %v3358_v47  ;;  %v6208_v43 = vpop.eup %6207  ;;  %v8180_v40 = vld [vmem:[#allocation7_spill] sm:$0xff] }
 0xa2a   : > { %v3350_v30 = vmul.f32 %v6196_v59, %v5752_v61  ;;  %v2525_v61 = vadd.f32 %v8180_v40, %v8179_v55 }
 0xa2b   : > { %v3295_v60 = vpop.f32.mrf.mxu0 }
 0xa2c   : > { %v3348_v11 = vmul.f32 %v6198_v19, %v3295_v60  ;;  %v3360_v34 = vpack.c.bf16 %v3350_v30, %v3349_v46  ;;  %v8181_v30 = vld [vmem:[#allocation20_spill] sm:$0xff]  ;;  %v8183_v46 = vld [vmem:[#allocation21_spill] sm:$0xff] }
 0xa2d   : > { %v5755_v25 = vpop.f32.mrf.mxu0  ;;  %v8182_v60 = vld [vmem:[#allocation8_spill] sm:$0xff] }
 0xa2e   : > { %v3359_v62 = vpack.c.bf16 %v3348_v11, %v3347_v28  ;;  %v3353_v15 = vmul.f32 %v6208_v43, %v5755_v25  ;;  %v2536_v39 = vadd.f32 %v8182_v60, %v8181_v30  ;;  %v8184_v25 = vld [vmem:[#allocation9_spill] sm:$0xff]  ;;  %v8188_v43 = vld [vmem:[#allocation11_spill] sm:$0xff] }
 0xa2f   : > { %v3308_v45 = vpop.f32.mrf.mxu0 }
 0xa30   : > { %5767 = vmatprep.mubr.msk.bf16.mxu0 %vm1068_vm1, %v3359_v62  ;;  %v3351_v32 = vmul.f32 %v6202_v44, %v3308_v45  ;;  %v2528_v62 = vadd.f32 %v8184_v25, %v8183_v46  ;;  %v8185_v44 = vld [vmem:[#allocation22_spill] sm:$0xff] }
 0xa31   : > { %v5756_v56 = vpop.f32.mrf.mxu0  ;;  %5768 = vmatmul.mubr.msk.bf16.gmra.mxu0 %vm1068_vm1, %v3360_v34 }
 0xa32   : > { %v3354_v6 = vmul.f32 %v6204_v57, %v5756_v56  ;;  %v8186_v56 = vld [vmem:[#allocation10_spill] sm:$0xff] }
 0xa33   : > { %v3311_v51 = vpop.f32.mrf.mxu0  ;;  %v2549_v57 = vadd.f32 %v8186_v56, %v8185_v44 }
 0xa34   : > { %v3352_v50 = vmul.f32 %v6206_v26, %v3311_v51  ;;  %v3362_v0 = vpack.c.bf16 %v3354_v6, %v3353_v15  ;;  %v8187_v51 = vld [vmem:[#allocation23_spill] sm:$0xff] }
 0xa36   : > { %v3361_v38 = vpack.c.bf16 %v3352_v50, %v3351_v32  ;;  %v2541_v32 = vadd.f32 %v8188_v43, %v8187_v51 }
 0xa38   : > { %5771 = vmatprep.mubr.msk.bf16.mxu0 %vm1068_vm1, %v3361_v38  ;;  %v8189_v38 = vld [vmem:[#allocation24_spill] sm:$0xff] }
 0xa39   : > { %5772 = vmatmul.mubr.msk.bf16.gmra.mxu0 %vm1068_vm1, %v3362_v0  ;;  %v8190_v0 = vld [vmem:[#allocation12_spill] sm:$0xff] }
 0xa3a   : > { %5799 = vmatprep.mubr.msk.bf16.mxu0 %vm406_vm0, %v6607_v5  ;;  %v8168_v5 = vpack.c.bf16 %v7524_v58, %v7520_v49  ;;  %v2496_v49 = vadd.f32 %v7289_v13, %v7378_v2  ;;  %v8175_v2 = vld [vmem:[#allocation17_spill] sm:$0xff] }
 0xa3b   : > { %v2512_v29 = vadd.f32 %v8176_v16, %v8175_v2 }
 0xa41   : > { %5800 = vmatmul.mubr.msk.bf16.vlgmr.msra.gmra.mxu0 %vm406_vm0, %v6619_v12  ;;  %v2501_v12 = vadd.f32 %v7281_v33, %v7372_v36  ;;  %v8169_v33 = vld [vmem:[#allocation14_spill] sm:$0xff] }
 0xa42   : > { %5803 = vmatprep.mubr.msk.bf16.mxu0 %vm406_vm0, %v8124_v37  ;;  %v8170_v36 = vld [vmem:[#allocation2_spill] sm:$0xff] }
 0xa43   : > { %v2517_v24 = vadd.f32 %v8170_v36, %v8169_v33  ;;  %v5016_v36 = vld [vmem:[%s8085_s6 + $0x3] ss:$0 sm:$0xff] }
 0xa49   : > { %5804 = vmatmul.mubr.msk.bf16.gmra.mxu0 %vm406_vm0, %v8125_v8  ;;  %v2493_v8 = vadd.f32 %v7283_v14, %v7374_v22  ;;  %v8171_v22 = vld [vmem:[#allocation15_spill] sm:$0xff] }
 0xa4a   : > { %5807 = vmatprep.mubr.msk.bf16.mxu0 %vm406_vm0, %v8126_v4  ;;  %v2509_v53 = vadd.f32 %v8172_v3, %v8171_v22 }
 0xa51   : > { %5808 = vmatmul.mubr.msk.bf16.gmra.mxu0 %vm406_vm0, %v8127_v54 }
 0xa52   : > { %5811 = vmatprep.mubr.msk.bf16.mxu0 %vm406_vm0, %v8128_v9  ;;  %v2504_v9 = vadd.f32 %v7285_v52, %v7376_v1  ;;  %v8173_v1 = vld [vmem:[#allocation16_spill] sm:$0xff] }
 0xa53   : > { %v2520_v63 = vadd.f32 %v8174_v7, %v8173_v1 }
 0xa59   : > { %5812 = vmatmul.mubr.msk.bf16.gmra.mxu0 %vm406_vm0, %v8129_v27 }
 0xa5a   : > { %5851 = vmatprep.mubr.msk.bf16.mxu0 %vm1068_vm1, %v8168_v5  ;;  %v2552_v5 = vadd.f32 %v8190_v0, %v8189_v38 }
 0xae1   : > { %v5761_v37 = vpop.f32.mrf.mxu0 }
 0xae2   : > { %v7626_v4 = vadd.f32 %v5761_v37, %v2501_v12 }
 0xae3   : > { %v3426_v54 = vpop.f32.mrf.mxu0 }
 0xae4   : > { %v7630_v35 = vadd.f32 %v3426_v54, %v2493_v8  ;;  %v8191_v8 = vld [vmem:[#allocation25_spill] sm:$0xff] }
 0xae5   : > { %v5762_v27 = vpop.f32.mrf.mxu0  ;;  %v8192_v54 = vld [vmem:[#allocation13_spill] sm:$0xff] }
 0xae6   : > { %v7634_v58 = vadd.f32 %v5762_v27, %v2504_v9  ;;  %v2544_v9 = vadd.f32 %v8192_v54, %v8191_v8 }
 0xae7   : > { %v3429_v10 = vpop.f32.mrf.mxu0 }
 0xae8   : > { %v7638_v17 = vadd.f32 %v3429_v10, %v2496_v49 }
 0xae9   : > { %v5765_v14 = vpop.f32.mrf.mxu0 }
 0xaea   : > { %v7642_v31 = vadd.f32 %v5765_v14, %v2517_v24 }
 0xaeb   : > { %v3442_v52 = vpop.f32.mrf.mxu0 }
 0xaec   : > { %v7646_v41 = vadd.f32 %v3442_v52, %v2509_v53 }
 0xaed   : > { %v5766_v13 = vpop.f32.mrf.mxu0 }
 0xaee   : > { %v7650_v42 = vadd.f32 %v5766_v13, %v2520_v63 }
 0xaef   : > { %v3445_v20 = vpop.f32.mrf.mxu0 }
 0xaf0   : > { %v7654_v21 = vadd.f32 %v3445_v20, %v2512_v29 }
 0xaf1   : > { %v5769_v47 = vpop.f32.mrf.mxu0 }
 0xaf2   : > { %v7658_v59 = vadd.f32 %v5769_v47, %v2533_v48 }
 0xaf3   : > { %v3458_v19 = vpop.f32.mrf.mxu0 }
 0xaf4   : > { %v7662_v28 = vadd.f32 %v3458_v19, %v2525_v61 }
 0xaf5   : > { %v5770_v11 = vpop.f32.mrf.mxu0 }
 0xaf6   : > { %v7666_v34 = vadd.f32 %v5770_v11, %v2536_v39 }
 0xaf7   : > { %v3461_v45 = vpop.f32.mrf.mxu0 }
 0xaf8   : > { %v7670_v26 = vadd.f32 %v3461_v45, %v2528_v62 }
 0xaf9   : > { %v5773_v6 = vpop.f32.mrf.mxu0 }
 0xafa   : > { %v7674_v50 = vadd.f32 %v5773_v6, %v2549_v57 }
 0xafb   : > { %v3474_v15 = vpop.f32.mrf.mxu0 }
 0xafc   : > { %v7678_v12 = vadd.f32 %v3474_v15, %v2541_v32 }
 0xafd   : > { %v5774_v37 = vpop.f32.mrf.mxu0 }
 0xafe   : > { %v7682_v27 = vadd.f32 %v5774_v37, %v2552_v5 }
 0xaff   : > { %v3477_v49 = vpop.f32.mrf.mxu0 }
 0xb00   : > { %v7684_v10 = vadd.f32 %v3477_v49, %v2544_v9 }
 0xb01   : > { %v5801_v33 = vpop.f32.mrf.mxu0 }
 0xb02   : > { %v3695_v22 = vadd.f32 %v5801_v33, %v5016_v36 }
 0xb03   : > { %v3686_v24 = vpop.f32.mrf.mxu0 }
 0xb04   : > { %v3687_v52 = vadd.f32 %v5016_v36, %v3686_v24  ;;  %v8194_v24 = vld [vmem:[#allocation26_spill] sm:$0xff] }
 0xb05   : > { %v5802_v14 = vpop.f32.mrf.mxu0 }
 0xb06   : > { %v3698_v3 = vadd.f32 %v5802_v14, %v5016_v36 }
 0xb07   : > { %v3689_v53 = vpop.f32.mrf.mxu0 }
 0xb08   : > { %v3880_v1 = vpack.c.bf16 %v3698_v3, %v3695_v22  ;;  %v3690_v7 = vadd.f32 %v5016_v36, %v3689_v53  ;;  %v8196_v22 = vld [vmem:[#allocation31_spill] sm:$0xff]  ;;  %v8197_v3 = vld [vmem:[#allocation29_spill] sm:$0xff] }
 0xb09   : > { %v5805_v63 = vpop.f32.mrf.mxu0  ;;  %v8198_v53 = vpack.c.bf16 %v8196_v22, %v8197_v3 }
 0xb0a   : > { %v3879_v13 = vpack.c.bf16 %v3690_v7, %v3687_v52  ;;  %v3711_v15 = vadd.f32 %v5805_v63, %v5016_v36  ;;  %v3915_v49 = vsel %vm1068_vm1, %v3880_v1, 0  ;;  %v8199_v52 = vld [vmem:[#allocation30_spill] sm:$0xff]  ;;  %v8200_v7 = vld [vmem:[#allocation28_spill] sm:$0xff] }
 0xb0b   : > { %v3702_v2 = vpop.f32.mrf.mxu0  ;;  %v8201_v63 = vpack.c.bf16 %v8199_v52, %v8200_v7 }
 0xb0c   : > { %v3703_v37 = vadd.f32 %v5016_v36, %v3702_v2  ;;  %v3912_v33 = vsel %vm1068_vm1, %v3879_v13, 0  ;;  %v8203_v2 = vld [vmem:[#allocation33_spill] sm:$0xff] }
 0xb0d   : > { %v5806_v16 = vpop.f32.mrf.mxu0 }
 0xb0e   : > { %v3714_v32 = vadd.f32 %v5806_v16, %v5016_v36 }
 0xb0f   : > { %v3705_v29 = vpop.f32.mrf.mxu0 }
 0xb10   : > { %v3882_v38 = vpack.c.bf16 %v3714_v32, %v3711_v15  ;;  %v3706_v5 = vadd.f32 %v5016_v36, %v3705_v29  ;;  %v8206_v29 = vld [vmem:[#allocation32_spill] sm:$0xff] }
 0xb11   : > { %v5809_v20 = vpop.f32.mrf.mxu0 }
 0xb12   : > { %v3727_v45 = vadd.f32 %v5809_v20, %v5016_v36  ;;  %v3881_v8 = vpack.c.bf16 %v3706_v5, %v3703_v37  ;;  %v3921_v54 = vsel %vm1068_vm1, %v3882_v38, 0 }
 0xb13   : > { %v3718_v23 = vpop.f32.mrf.mxu0 }
 0xb14   : > { %v3719_v6 = vadd.f32 %v5016_v36, %v3718_v23  ;;  %v3918_v9 = vsel %vm1068_vm1, %v3881_v8, 0  ;;  %v8208_v23 = vld [vmem:[#allocation39_spill] sm:$0xff] }
 0xb15   : > { %v5810_v18 = vpop.f32.mrf.mxu0 }
 0xb16   : > { %v3730_v62 = vadd.f32 %v5810_v18, %v5016_v36  ;;  %v8209_v18 = vld [vmem:[#allocation37_spill] sm:$0xff] }
 0xb17   : > { %v3721_v48 = vpop.f32.mrf.mxu0 }
 0xb18   : > { %v3884_v44 = vpack.c.bf16 %v3730_v62, %v3727_v45  ;;  %v3722_v57 = vadd.f32 %v5016_v36, %v3721_v48  ;;  %v8210_v48 = vpack.c.bf16 %v8208_v23, %v8209_v18 }
 0xb19   : > { %v5813_v47 = vpop.f32.mrf.mxu0 }
 0xb1a   : > { %v3743_v61 = vadd.f32 %v5813_v47, %v5016_v36  ;;  %v3883_v51 = vpack.c.bf16 %v3722_v57, %v3719_v6  ;;  %v3927_v43 = vsel %vm1068_vm1, %v3884_v44, 0  ;;  %v8211_v47 = vld [vmem:[#allocation38_spill] sm:$0xff] }
 0xb1b   : > { %v3734_v55 = vpop.f32.mrf.mxu0 }
 0xb1c   : > { %v3735_v60 = vadd.f32 %v5016_v36, %v3734_v55  ;;  %v3924_v0 = vsel %vm1068_vm1, %v3883_v51, 0  ;;  %v8212_v55 = vld [vmem:[#allocation36_spill] sm:$0xff] }
 0xb1d   : > { %v5814_v40 = vpop.f32.mrf.mxu0 }
 0xb1e   : > { %v3746_v19 = vadd.f32 %v5814_v40, %v5016_v36  ;;  %v8213_v40 = vpack.c.bf16 %v8211_v47, %v8212_v55 }
 0xb1f   : > { %v3737_v30 = vpop.f32.mrf.mxu0 }
 0xb20   : > { %v3886_v39 = vpack.c.bf16 %v3746_v19, %v3743_v61  ;;  %v3738_v11 = vadd.f32 %v5016_v36, %v3737_v30  ;;  %v8193_v36 = vld [vmem:[#allocation27_spill] sm:$0xff] }
 0xb21   : > { %v8195_v14 = vpack.c.bf16 %v8193_v36, %v8194_v24 }
 0xb22   : > { %v3885_v46 = vpack.c.bf16 %v3738_v11, %v3735_v60  ;;  %5944 = vmatprep.subr.msk.bf16.mxu0 %vm1068_vm1, %v3886_v39  ;;  %v3933_v25 = vsel %vm1068_vm1, %v3886_v39, 0 }
 0xb23   : > { %5836 = vmatpush3.bf16.xpose.msra.mxu0 %v3933_v25 }
 0xb24   : > { %5945 = vmatprep.subr.msk.bf16.mxu0 %vm1068_vm1, %v3885_v46  ;;  %v3930_v56 = vsel %vm1068_vm1, %v3885_v46, 0 }
 0xb2b   : > { %5838 = vmatpush3.bf16.xpose.msra.mxu0 %v3930_v56 }
 0xb2c   : > { %5946 = vmatprep.subr.msk.bf16.mxu0 %vm1068_vm1, %v3884_v44 }
 0xb33   : > { %5840 = vmatpush3.bf16.xpose.msra.mxu0 %v3927_v43 }
 0xb34   : > { %5947 = vmatprep.subr.msk.bf16.mxu0 %vm1068_vm1, %v3883_v51 }
 0xb3b   : > { %5842 = vmatpush3.bf16.xpose.msra.mxu0 %v3924_v0 }
 0xb3c   : > { %5948 = vmatprep.subr.msk.bf16.mxu0 %vm1068_vm1, %v3882_v38 }
 0xb43   : > { %5844 = vmatpush3.bf16.xpose.msra.mxu0 %v3921_v54 }
 0xb44   : > { %5949 = vmatprep.subr.msk.bf16.mxu0 %vm1068_vm1, %v3881_v8 }
 0xb4b   : > { %5846 = vmatpush3.bf16.xpose.msra.mxu0 %v3918_v9 }
 0xb4c   : > { %5950 = vmatprep.subr.msk.bf16.mxu0 %vm1068_vm1, %v3880_v1  ;;  %v8202_v1 = vld [vmem:[#allocation35_spill] sm:$0xff] }
 0xb4d   : > { %v8204_v16 = vpack.c.bf16 %v8202_v1, %v8203_v2 }
 0xb53   : > { %5848 = vmatpush3.bf16.xpose.msra.mxu0 %v3915_v49 }
 0xb54   : > { %5951 = vmatprep.subr.msk.bf16.mxu0 %vm1068_vm1, %v3879_v13  ;;  %v8205_v13 = vld [vmem:[#allocation34_spill] sm:$0xff] }
 0xb55   : > { %v8207_v20 = vpack.c.bf16 %v8205_v13, %v8206_v29 }
 0xb5b   : > { %5850 = vmatpush3.bf16.xpose.msra.mxu0 %v3912_v33 }
 0xb62   : > { %5852 = vmatmul.mubr.msk.bf16.vlgmr.msra.gmra.mxu0 %vm1068_vm1, %v8195_v14 }
 0xb63   : > { %5855 = vmatprep.mubr.msk.bf16.mxu0 %vm1068_vm1, %v8198_v53 }
 0xb6a   : > { %5856 = vmatmul.mubr.msk.bf16.gmra.mxu0 %vm1068_vm1, %v8201_v63 }
 0xb6b   : > { %5859 = vmatprep.mubr.msk.bf16.mxu0 %vm1068_vm1, %v8204_v16 }
 0xb72   : > { %5860 = vmatmul.mubr.msk.bf16.gmra.mxu0 %vm1068_vm1, %v8207_v20 }
 0xb73   : > { %5863 = vmatprep.mubr.msk.bf16.mxu0 %vm1068_vm1, %v8210_v48 }
 0xb7a   : > { %5864 = vmatmul.mubr.msk.bf16.gmra.mxu0 %vm1068_vm1, %v8213_v40 }
 0xc22   : > { %v5853_v61 = vpop.f32.mrf.mxu0 }
 0xc23   : > { %v4034_v11 = vmul.f32 0.17677669, %v5853_v61 }
 0xc24   : > { %v3969_v19 = vpop.f32.mrf.mxu0 }
 0xc25   : > { %v4032_v30 = vmul.f32 0.17677669, %v3969_v19 }
 0xc26   : > { %v5854_v60 = vpop.f32.mrf.mxu0 }
 0xc27   : > { %4048 = vmax.xlane.f32.xlu0 %v4032_v30  ;;  %v4035_v45 = vmul.f32 0.17677669, %v5854_v60 }
 0xc28   : > { %v3972_v39 = vpop.f32.mrf.mxu0 }
 0xc29   : > { %v4033_v46 = vmul.f32 0.17677669, %v3972_v39 }
 0xc2a   : > { %v5857_v25 = vpop.f32.mrf.mxu0 }
 0xc2b   : > { %4052 = vmax.xlane.f32.xlu0 %v4034_v11  ;;  %4050 = vmax.xlane.f32.xlu1 %v4033_v46  ;;  %v4038_v6 = vmul.f32 0.17677669, %v5857_v25 }
 0xc2c   : > { %v3985_v62 = vpop.f32.mrf.mxu0 }
 0xc2d   : > { %v4036_v44 = vmul.f32 0.17677669, %v3985_v62 }
 0xc2e   : > { %v5858_v56 = vpop.f32.mrf.mxu0 }
 0xc2f   : > { %4054 = vmax.xlane.f32.xlu1 %v4035_v45  ;;  %4056 = vmax.xlane.f32.xlu0 %v4036_v44  ;;  %v4039_v15 = vmul.f32 0.17677669, %v5858_v56 }
 0xc30   : > { %v3988_v57 = vpop.f32.mrf.mxu0 }
 0xc31   : > { %v4037_v51 = vmul.f32 0.17677669, %v3988_v57 }
 0xc32   : > { %v5861_v43 = vpop.f32.mrf.mxu0 }
 0xc33   : > { %4060 = vmax.xlane.f32.xlu0 %v4038_v6  ;;  %4058 = vmax.xlane.f32.xlu1 %v4037_v51  ;;  %v4042_v37 = vmul.f32 0.17677669, %v5861_v43 }
 0xc34   : > { %v4001_v32 = vpop.f32.mrf.mxu0 }
 0xc35   : > { %v4040_v38 = vmul.f32 0.17677669, %v4001_v32 }
 0xc36   : > { %v5862_v0 = vpop.f32.mrf.mxu0 }
 0xc37   : > { %4062 = vmax.xlane.f32.xlu1 %v4039_v15  ;;  %4064 = vmax.xlane.f32.xlu0 %v4040_v38  ;;  %v7733_v49 = vmul.f32 0.17677669, %v5862_v0 }
 0xc38   : > { %v4004_v5 = vpop.f32.mrf.mxu0 }
 0xc39   : > { %v4041_v8 = vmul.f32 0.17677669, %v4004_v5 }
 0xc3a   : > { %v5865_v54 = vpop.f32.mrf.mxu0 }
 0xc3b   : > { %4068 = vmax.xlane.f32.xlu0 %v4042_v37  ;;  %4066 = vmax.xlane.f32.xlu1 %v4041_v8  ;;  %v7739_v14 = vmul.f32 0.17677669, %v5865_v54 }
 0xc3c   : > { %v4017_v9 = vpop.f32.mrf.mxu0 }
 0xc3d   : > { %v7735_v33 = vmul.f32 0.17677669, %v4017_v9 }
 0xc3e   : > { %v5866_v36 = vpop.f32.mrf.mxu0 }
 0xc3f   : > { %4070 = vmax.xlane.f32.xlu1 %v7733_v49  ;;  %4072 = vmax.xlane.f32.xlu0 %v7735_v33  ;;  %v7745_v3 = vmul.f32 0.17677669, %v5866_v36 }
 0xc40   : > { %v4020_v24 = vpop.f32.mrf.mxu0 }
 0xc41   : > { %v7741_v22 = vmul.f32 0.17677669, %v4020_v24 }
 0xc43   : > { %4076 = vmax.xlane.f32.xlu0 %v7739_v14  ;;  %4074 = vmax.xlane.f32.xlu1 %v7741_v22 }
 0xc47   : > { %4078 = vmax.xlane.f32.xlu1 %v7745_v3 }
 0xcb0   : > { %v4049_v53 = vpop.xlane.xlu0 %4048 }
 0xcb1   : > { %v4080_v52 = vsub.f32 %v4032_v30, %v4049_v53 }
 0xcb3   : > { %v4096_v7 = vmul.f32 1.442695, %v4080_v52 }
 0xcb4   : > { %v4053_v63 = vpop.xlane.xlu0 %4052  ;;  %v4051_v1 = vpop.xlane.xlu1 %4050 }
 0xcb5   : > { %6209 = vpow2.f32 %v4096_v7  ;;  %v4082_v2 = vsub.f32 %v4034_v11, %v4053_v63  ;;  %v4081_v16 = vsub.f32 %v4033_v46, %v4051_v1 }
 0xcb7   : > { %v4100_v13 = vmul.f32 1.442695, %v4082_v2  ;;  %v4098_v29 = vmul.f32 1.442695, %v4081_v16 }
 0xcb8   : > { %v4055_v20 = vpop.xlane.xlu1 %4054  ;;  %v4057_v23 = vpop.xlane.xlu0 %4056 }
 0xcb9   : > { %6211 = vpow2.f32 %v4100_v13  ;;  %v4083_v18 = vsub.f32 %v4035_v45, %v4055_v20  ;;  %v4084_v48 = vsub.f32 %v4036_v44, %v4057_v23 }
 0xcba   : > { %6213 = vpow2.f32 %v4098_v29 }
 0xcbb   : > { %v4102_v47 = vmul.f32 1.442695, %v4083_v18  ;;  %v4104_v55 = vmul.f32 1.442695, %v4084_v48 }
 0xcbc   : > { %v4061_v40 = vpop.xlane.xlu0 %4060  ;;  %v4059_v61 = vpop.xlane.xlu1 %4058 }
 0xcbd   : > { %6215 = vpow2.f32 %v4102_v47  ;;  %v4086_v19 = vsub.f32 %v4038_v6, %v4061_v40  ;;  %v4085_v30 = vsub.f32 %v4037_v51, %v4059_v61 }
 0xcbe   : > { %6217 = vpow2.f32 %v4104_v55 }
 0xcbf   : > { %v4108_v60 = vmul.f32 1.442695, %v4086_v19  ;;  %v4106_v39 = vmul.f32 1.442695, %v4085_v30 }
 0xcc0   : > { %v4063_v11 = vpop.xlane.xlu1 %4062  ;;  %v4065_v46 = vpop.xlane.xlu0 %4064 }
 0xcc1   : > { %6219 = vpow2.f32 %v4108_v60  ;;  %v4087_v25 = vsub.f32 %v4039_v15, %v4063_v11  ;;  %v4088_v62 = vsub.f32 %v4040_v38, %v4065_v46 }
 0xcc2   : > { %v6210_v56 = vpop.eup %6209  ;;  %6221 = vpow2.f32 %v4106_v39 }
 0xcc3   : > { %v4110_v45 = vmul.f32 1.442695, %v4087_v25  ;;  %v4112_v44 = vmul.f32 1.442695, %v4088_v62  ;;  %4128 = vadd.xlane.f32.xlu0 %v6210_v56  ;;  %v5051_v62 = vld [vmem:[%s8088_s9 + $0xc] sm:$0xf] }
 0xcc4   : > { %v4069_v57 = vpop.xlane.xlu0 %4068  ;;  %v4067_v43 = vpop.xlane.xlu1 %4066  ;;  %5952 = vmatprep.subr.msk.bf16.mxu1 %vm2330_vm2, %v5051_v62 }
 0xcc5   : > { %6223 = vpow2.f32 %v4110_v45  ;;  %v4090_v32 = vsub.f32 %v4042_v37, %v4069_v57  ;;  %v4089_v0 = vsub.f32 %v4041_v8, %v4067_v43 }
 0xcc6   : > { %v6212_v6 = vpop.eup %6211  ;;  %6225 = vpow2.f32 %v4112_v44 }
 0xcc7   : > { %v6214_v51 = vpop.eup %6213  ;;  %v4116_v5 = vmul.f32 1.442695, %v4090_v32  ;;  %v4114_v54 = vmul.f32 1.442695, %v4089_v0  ;;  %4132 = vadd.xlane.f32.xlu0 %v6212_v6 }
 0xcc8   : > { %4130 = vadd.xlane.f32.xlu1 %v6214_v51  ;;  %v4071_v9 = vpop.xlane.xlu1 %4070  ;;  %v4073_v15 = vpop.xlane.xlu0 %4072  ;;  %v4160_v38 = vpack.c.bf16 %v6214_v51, %v6210_v56  ;;  %v4340_v56 = vsel %vm2330_vm2, %v5051_v62, 0 }
 0xcc9   : > { %6227 = vpow2.f32 %v4116_v5  ;;  %v4091_v36 = vsub.f32 %v7733_v49, %v4071_v9  ;;  %v4092_v24 = vsub.f32 %v7735_v33, %v4073_v15 }
 0xcca   : > { %v6216_v53 = vpop.eup %6215  ;;  %6229 = vpow2.f32 %v4114_v54  ;;  %5883 = vmatprep.mubr.bf16.mxu1 %v4160_v38 }
 0xccb   : > { %v6218_v37 = vpop.eup %6217  ;;  %v4161_v8 = vpack.c.bf16 %v6216_v53, %v6212_v6  ;;  %v4118_v52 = vmul.f32 1.442695, %v4091_v36  ;;  %v4120_v7 = vmul.f32 1.442695, %v4092_v24 }
 0xccc   : > { %4136 = vadd.xlane.f32.xlu0 %v6218_v37  ;;  %4134 = vadd.xlane.f32.xlu1 %v6216_v53  ;;  %v4077_v63 = vpop.xlane.xlu0 %4076  ;;  %v4075_v1 = vpop.xlane.xlu1 %4074 }
 0xccd   : > { %6231 = vpow2.f32 %v4118_v52  ;;  %v4094_v2 = vsub.f32 %v7739_v14, %v4077_v63  ;;  %v4093_v16 = vsub.f32 %v7741_v22, %v4075_v1  ;;  %5884 = vmatmul.mubr.bf16.vlgmr.msra.gmra.mxu1 %v4161_v8 }
 0xcce   : > { %v6220_v49 = vpop.eup %6219  ;;  %6233 = vpow2.f32 %v4120_v7  ;;  %5900 = vmatpush3.bf16.msra.mxu1 %v4340_v56 }
 0xccf   : > { %v6222_v33 = vpop.eup %6221  ;;  %v4124_v13 = vmul.f32 1.442695, %v4094_v2  ;;  %v4122_v29 = vmul.f32 1.442695, %v4093_v16 }
 0xcd0   : > { %4140 = vadd.xlane.f32.xlu0 %v6220_v49  ;;  %4138 = vadd.xlane.f32.xlu1 %v6222_v33  ;;  %v4079_v20 = vpop.xlane.xlu1 %4078  ;;  %v4162_v23 = vpack.c.bf16 %v6222_v33, %v6218_v37 }
 0xcd1   : > { %6235 = vpow2.f32 %v4124_v13  ;;  %v4095_v18 = vsub.f32 %v7745_v3, %v4079_v20 }
 0xcd2   : > { %v6224_v48 = vpop.eup %6223  ;;  %6237 = vpow2.f32 %v4122_v29  ;;  %5887 = vmatprep.mubr.bf16.mxu1 %v4162_v23 }
 0xcd3   : > { %v6226_v47 = vpop.eup %6225  ;;  %v4126_v14 = vmul.f32 1.442695, %v4095_v18  ;;  %v4163_v55 = vpack.c.bf16 %v6224_v48, %v6220_v49 }
 0xcd4   : > { %4144 = vadd.xlane.f32.xlu0 %v6226_v47  ;;  %4142 = vadd.xlane.f32.xlu1 %v6224_v48 }
 0xcd5   : > { %6239 = vpow2.f32 %v4126_v14  ;;  %5888 = vmatmul.mubr.bf16.gmra.mxu1 %v4163_v55 }
 0xcd6   : > { %v6228_v22 = vpop.eup %6227 }
 0xcd7   : > { %v6230_v40 = vpop.eup %6229 }
 0xcd8   : > { %4148 = vadd.xlane.f32.xlu0 %v6228_v22  ;;  %4146 = vadd.xlane.f32.xlu1 %v6230_v40  ;;  %v4164_v61 = vpack.c.bf16 %v6230_v40, %v6226_v47 }
 0xcda   : > { %v6232_v19 = vpop.eup %6231  ;;  %5891 = vmatprep.mubr.bf16.mxu1 %v4164_v61 }
 0xcdb   : > { %v6234_v30 = vpop.eup %6233  ;;  %v4165_v60 = vpack.c.bf16 %v6232_v19, %v6228_v22 }
 0xcdc   : > { %4152 = vadd.xlane.f32.xlu0 %v6234_v30  ;;  %4150 = vadd.xlane.f32.xlu1 %v6232_v19 }
 0xcdd   : > { %5892 = vmatmul.mubr.bf16.gmra.mxu1 %v4165_v60 }
 0xcde   : > { %v6236_v3 = vpop.eup %6235 }
 0xcdf   : > { %v6238_v39 = vpop.eup %6237 }
 0xce0   : > { %4156 = vadd.xlane.f32.xlu0 %v6236_v3  ;;  %4154 = vadd.xlane.f32.xlu1 %v6238_v39  ;;  %v4166_v11 = vpack.c.bf16 %v6238_v39, %v6234_v30 }
 0xce2   : > { %v6240_v46 = vpop.eup %6239  ;;  %5895 = vmatprep.mubr.bf16.mxu1 %v4166_v11 }
 0xce3   : > { %v4167_v25 = vpack.c.bf16 %v6240_v46, %v6236_v3 }
 0xce4   : > { %4158 = vadd.xlane.f32.xlu1 %v6240_v46 }
 0xce5   : > { %5896 = vmatmul.mubr.bf16.gmra.mxu1 %v4167_v25 }
 0xd4c   : > { %v4129_v44 = vpop.xlane.xlu0 %4128 }
 0xd4d   : > { %6241 = vrcp.f32 %v4129_v44 }
 0xd50   : > { %v4133_v43 = vpop.xlane.xlu0 %4132 }
 0xd51   : > { %v4131_v45 = vpop.xlane.xlu1 %4130 }
 0xd55   : > { %v4135_v57 = vpop.xlane.xlu1 %4134  ;;  %v4137_v0 = vpop.xlane.xlu0 %4136 }
 0xd56   : > { %6243 = vrcp.f32 %v4135_v57 }
 0xd57   : > { %6245 = vrcp.f32 %v4131_v45 }
 0xd58   : > { %6247 = vrcp.f32 %v4133_v43 }
 0xd59   : > { %v4139_v32 = vpop.xlane.xlu1 %4138  ;;  %v4141_v51 = vpop.xlane.xlu0 %4140  ;;  %6249 = vrcp.f32 %v4137_v0 }
 0xd5a   : > { %v6242_v24 = vpop.eup %6241 }
 0xd5d   : > { %v4143_v6 = vpop.xlane.xlu1 %4142  ;;  %v4145_v54 = vpop.xlane.xlu0 %4144 }
 0xd5e   : > { %6251 = vrcp.f32 %v4143_v6 }
 0xd5f   : > { %6253 = vrcp.f32 %v4139_v32 }
 0xd60   : > { %6255 = vrcp.f32 %v4141_v51 }
 0xd61   : > { %v4147_v5 = vpop.xlane.xlu1 %4146  ;;  %v4149_v36 = vpop.xlane.xlu0 %4148  ;;  %6257 = vrcp.f32 %v4145_v54 }
 0xd63   : > { %v6244_v37 = vpop.eup %6243 }
 0xd64   : > { %v6246_v8 = vpop.eup %6245 }
 0xd65   : > { %v4151_v15 = vpop.xlane.xlu1 %4150  ;;  %v6248_v63 = vpop.eup %6247 }
 0xd66   : > { %6259 = vrcp.f32 %v4151_v15  ;;  %v4153_v13 = vpop.xlane.xlu0 %4152  ;;  %v6250_v18 = vpop.eup %6249 }
 0xd67   : > { %6261 = vrcp.f32 %v4147_v5 }
 0xd68   : > { %6263 = vrcp.f32 %v4149_v36 }
 0xd69   : > { %v4155_v1 = vpop.xlane.xlu1 %4154  ;;  %6265 = vrcp.f32 %v4153_v13 }
 0xd6a   : > { %v4157_v19 = vpop.xlane.xlu0 %4156 }
 0xd6b   : > { %v6252_v47 = vpop.eup %6251 }
 0xd6c   : > { %v6254_v55 = vpop.eup %6253 }
 0xd6d   : > { %v4159_v14 = vpop.xlane.xlu1 %4158  ;;  %v6256_v61 = vpop.eup %6255 }
 0xd6e   : > { %6267 = vrcp.f32 %v4159_v14  ;;  %v6258_v62 = vpop.eup %6257  ;;  %v6305_v14 = vld [vmem:[%s6407_s22 + $0x10] sm:$0xff] }
 0xd6f   : > { %6269 = vrcp.f32 %v4155_v1 }
 0xd70   : > { %6271 = vrcp.f32 %v4157_v19  ;;  %v6306_v19 = vld [vmem:[%s6407_s22] sm:$0xff] }
 0xd73   : > { %v6260_v45 = vpop.eup %6259 }
 0xd74   : > { %v6262_v44 = vpop.eup %6261 }
 0xd75   : > { %v6264_v32 = vpop.eup %6263 }
 0xd8d   : > { %v5885_v9 = vpop.f32.mrf.mxu1 }
 0xd8e   : > { %v4291_v49 = vmul.f32 %v6248_v63, %v5885_v9 }
 0xd8f   : > { %v4210_v38 = vpop.f32.mrf.mxu1 }
 0xd90   : > { %v4289_v2 = vmul.f32 %v6242_v24, %v4210_v38  ;;  %v6266_v38 = vpop.eup %6265 }
 0xd91   : > { %v5886_v53 = vpop.f32.mrf.mxu1  ;;  %v6268_v24 = vpop.eup %6267 }
 0xd92   : > { %v4292_v52 = vmul.f32 %v6244_v37, %v5886_v53  ;;  %v6270_v53 = vpop.eup %6269 }
 0xd93   : > { %v4213_v7 = vpop.f32.mrf.mxu1 }
 0xd94   : > { %v4290_v16 = vmul.f32 %v6246_v8, %v4213_v7  ;;  %v4306_v20 = vpack.c.bf16 %v4292_v52, %v4291_v49  ;;  %v6272_v52 = vpop.eup %6271 }
 0xd95   : > { %v5889_v33 = vpop.f32.mrf.mxu1 }
 0xd96   : > { %v4305_v29 = vpack.c.bf16 %v4290_v16, %v4289_v2  ;;  %v4295_v3 = vmul.f32 %v6256_v61, %v5889_v33  ;;  %v7769_v33 = vld [vmem:[%s8089_s10] ss:$0 sm:$0xff] }
 0xd97   : > { %v4226_v23 = vpop.f32.mrf.mxu1 }
 0xd98   : > { %5901 = vmatprep.mubr.msk.bf16.mxu1 %vm1068_vm1, %v4305_v29  ;;  %v4293_v30 = vmul.f32 %v6250_v18, %v4226_v23 }
 0xd99   : > { %v5890_v48 = vpop.f32.mrf.mxu1  ;;  %5902 = vmatmul.mubr.msk.bf16.vlgmr.msra.gmra.mxu1 %vm1068_vm1, %v4306_v20 }
 0xd9a   : > { %v4296_v22 = vmul.f32 %v6252_v47, %v5890_v48 }
 0xd9b   : > { %v4229_v40 = vpop.f32.mrf.mxu1 }
 0xd9c   : > { %v4294_v60 = vmul.f32 %v6254_v55, %v4229_v40  ;;  %v4308_v46 = vpack.c.bf16 %v4296_v22, %v4295_v3  ;;  %v6307_v3 = vld [vmem:[%s6407_s22 + $0x18] sm:$0xff] }
 0xd9d   : > { %v5893_v39 = vpop.f32.mrf.mxu1 }
 0xd9e   : > { %v4307_v11 = vpack.c.bf16 %v4294_v60, %v4293_v30  ;;  %v4299_v51 = vmul.f32 %v6264_v32, %v5893_v39 }
 0xd9f   : > { %v4242_v25 = vpop.f32.mrf.mxu1 }
 0xda0   : > { %5905 = vmatprep.mubr.msk.bf16.mxu1 %vm1068_vm1, %v4307_v11  ;;  %v4297_v0 = vmul.f32 %v6258_v62, %v4242_v25 }
 0xda1   : > { %v5894_v56 = vpop.f32.mrf.mxu1  ;;  %5906 = vmatmul.mubr.msk.bf16.gmra.mxu1 %vm1068_vm1, %v4308_v46 }
 0xda2   : > { %v4300_v57 = vmul.f32 %v6260_v45, %v5894_v56  ;;  %v6308_v56 = vld [vmem:[%s6407_s22 + $0x8] sm:$0xff] }
 0xda3   : > { %v4245_v43 = vpop.f32.mrf.mxu1 }
 0xda4   : > { %v4298_v6 = vmul.f32 %v6262_v44, %v4245_v43  ;;  %v4310_v9 = vpack.c.bf16 %v4300_v57, %v4299_v51  ;;  %v6309_v43 = vld [vmem:[%s6407_s22 + $0x30] sm:$0xff] }
 0xda5   : > { %v5897_v5 = vpop.f32.mrf.mxu1 }
 0xda6   : > { %v4309_v54 = vpack.c.bf16 %v4298_v6, %v4297_v0  ;;  %v4303_v1 = vmul.f32 %v6272_v52, %v5897_v5 }
 0xda7   : > { %v4258_v15 = vpop.f32.mrf.mxu1 }
 0xda8   : > { %5909 = vmatprep.mubr.msk.bf16.mxu1 %vm1068_vm1, %v4309_v54  ;;  %v4301_v7 = vmul.f32 %v6266_v38, %v4258_v15  ;;  %v6310_v54 = vld [vmem:[%s6407_s22 + $0x20] sm:$0xff] }
 0xda9   : > { %v5898_v36 = vpop.f32.mrf.mxu1  ;;  %5910 = vmatmul.mubr.msk.bf16.gmra.mxu1 %vm1068_vm1, %v4310_v9 }
 0xdaa   : > { %v4304_v37 = vmul.f32 %v6268_v24, %v5898_v36  ;;  %v6311_v36 = vld [vmem:[%s6407_s22 + $0x38] sm:$0xff] }
 0xdab   : > { %v4261_v8 = vpop.f32.mrf.mxu1 }
 0xdac   : > { %v4302_v63 = vmul.f32 %v6270_v53, %v4261_v8  ;;  %v4312_v16 = vpack.c.bf16 %v4304_v37, %v4303_v1 }
 0xdae   : > { %v4311_v2 = vpack.c.bf16 %v4302_v63, %v4301_v7  ;;  %v6312_v7 = vld [vmem:[%s6407_s22 + $0x28] sm:$0xff] }
 0xdb0   : > { %5913 = vmatprep.mubr.msk.bf16.mxu1 %vm1068_vm1, %v4311_v2 }
 0xdb1   : > { %5914 = vmatmul.mubr.msk.bf16.gmra.mxu1 %vm1068_vm1, %v4312_v16  ;;  %v6313_v16 = vld [vmem:[%s6407_s22 + $0x50] sm:$0xff] }
 0xe59   : > { %v5903_v49 = vpop.f32.mrf.mxu1 }
 0xe5a   : > { %v4441_v13 = vadd.f32 %v5903_v49, %v7626_v4 }
 0xe5b   : > { %v4376_v29 = vpop.f32.mrf.mxu1 }
 0xe5c   : > { %v4464_v20 = vadd.f32 %v7769_v33, %v4441_v13  ;;  %v4439_v23 = vadd.f32 %v4376_v29, %v7630_v35 }
 0xe5d   : > { %v5904_v18 = vpop.f32.mrf.mxu1 }
 0xe5e   : > { %v4462_v48 = vadd.f32 %v7769_v33, %v4439_v23  ;;  %v4442_v47 = vadd.f32 %v5904_v18, %v7634_v58  ;;  %v7777_v55 = vadd.f32 %v6305_v14, %v4464_v20  ;;  %v6314_v18 = vld [vmem:[%s6407_s22 + $0x40] sm:$0xff] }
 0xe5f   : > { %v4379_v22 = vpop.f32.mrf.mxu1 }
 0xe60   : > { %v4465_v40 = vadd.f32 %v7769_v33, %v4442_v47  ;;  %v4440_v4 = vadd.f32 %v4379_v22, %v7638_v17  ;;  %v4500_v61 = vsel %vm406_vm0, %v7777_v55, 0.0  ;;  %v7784_v35 = vadd.f32 %v6306_v19, %v4462_v48  ;;  %v6315_v22 = vld [vmem:[%s6407_s22 + $0x58] sm:$0xff] }
 0xe61   : > { %4501 = vadd.xlane.f32.xlu0 %v4500_v61  ;;  %v5907_v30 = vpop.f32.mrf.mxu1 }
 0xe62   : > { %v4463_v60 = vadd.f32 %v7769_v33, %v4440_v4  ;;  %v4445_v58 = vadd.f32 %v5907_v30, %v7642_v31  ;;  %v7789_v39 = vadd.f32 %v6307_v3, %v4465_v40  ;;  %v4494_v17 = vsel %vm406_vm0, %v7784_v35, 0.0  ;;  %v6316_v30 = vld [vmem:[%s6407_s22 + $0x48] sm:$0xff] }
 0xe63   : > { %v4392_v11 = vpop.f32.mrf.mxu1 }
 0xe64   : > { %v4468_v46 = vadd.f32 %v7769_v33, %v4445_v58  ;;  %v4443_v25 = vadd.f32 %v4392_v11, %v7646_v41  ;;  %v4503_v62 = vsel %vm406_vm0, %v7789_v39, 0.0  ;;  %v7798_v45 = vadd.f32 %v6308_v56, %v4463_v60 }
 0xe65   : > { %4495 = vadd.xlane.f32.xlu0 %v4494_v17  ;;  %4504 = vadd.xlane.f32.xlu1 %v4503_v62  ;;  %v5908_v31 = vpop.f32.mrf.mxu1 }
 0xe66   : > { %v4466_v44 = vadd.f32 %v7769_v33, %v4443_v25  ;;  %v4446_v57 = vadd.f32 %v5908_v31, %v7650_v42  ;;  %v7803_v32 = vadd.f32 %v6309_v43, %v4468_v46  ;;  %v4497_v41 = vsel %vm406_vm0, %v7798_v45, 0.0  ;;  %v6317_v25 = vld [vmem:[%s6407_s22 + $0x60] sm:$0xff]  ;;  %v6319_v43 = vld [vmem:[%s6407_s22 + $0x68] sm:$0xff] }
 0xe67   : > { %v4395_v0 = vpop.f32.mrf.mxu1 }
 0xe68   : > { %v4469_v6 = vadd.f32 %v7769_v33, %v4446_v57  ;;  %v4444_v51 = vadd.f32 %v4395_v0, %v7654_v21  ;;  %v4512_v5 = vsel %vm406_vm0, %v7803_v32, 0.0  ;;  %v7812_v9 = vadd.f32 %v6310_v54, %v4466_v44  ;;  %v6318_v57 = vld [vmem:[%s6407_s22 + $0x70] sm:$0xff] }
 0xe69   : > { %4498 = vadd.xlane.f32.xlu1 %v4497_v41  ;;  %4513 = vadd.xlane.f32.xlu0 %v4512_v5  ;;  %v5911_v42 = vpop.f32.mrf.mxu1 }
 0xe6a   : > { %v4467_v15 = vadd.f32 %v7769_v33, %v4444_v51  ;;  %v4449_v38 = vadd.f32 %v5911_v42, %v7658_v59  ;;  %v7817_v24 = vadd.f32 %v6311_v36, %v4469_v6  ;;  %v4506_v21 = vsel %vm406_vm0, %v7812_v9, 0.0  ;;  %v6320_v6 = vld [vmem:[%s6407_s22 + $0x78] sm:$0xff] }
 0xe6b   : > { %v4408_v53 = vpop.f32.mrf.mxu1 }
 0xe6c   : > { %v4472_v37 = vadd.f32 %v7769_v33, %v4449_v38  ;;  %v4447_v8 = vadd.f32 %v4408_v53, %v7662_v28  ;;  %v4515_v52 = vsel %vm406_vm0, %v7817_v24, 0.0  ;;  %v7826_v63 = vadd.f32 %v6312_v7, %v4467_v15 }
 0xe6d   : > { %4507 = vadd.xlane.f32.xlu0 %v4506_v21  ;;  %4516 = vadd.xlane.f32.xlu1 %v4515_v52  ;;  %v5912_v59 = vpop.f32.mrf.mxu1 }
 0xe6e   : > { %v4470_v1 = vadd.f32 %v7769_v33, %v4447_v8  ;;  %v4450_v2 = vadd.f32 %v5912_v59, %v7666_v34  ;;  %v7831_v49 = vadd.f32 %v6313_v16, %v4472_v37  ;;  %v4509_v28 = vsel %vm406_vm0, %v7826_v63, 0.0 }
 0xe6f   : > { %v4411_v13 = vpop.f32.mrf.mxu1 }
 0xe70   : > { %v4473_v29 = vadd.f32 %v7769_v33, %v4450_v2  ;;  %v4448_v20 = vadd.f32 %v4411_v13, %v7670_v26  ;;  %v4524_v23 = vsel %vm406_vm0, %v7831_v49, 0.0  ;;  %v7840_v48 = vadd.f32 %v6314_v18, %v4470_v1 }
 0xe71   : > { %4510 = vadd.xlane.f32.xlu1 %v4509_v28  ;;  %4525 = vadd.xlane.f32.xlu0 %v4524_v23  ;;  %v5915_v34 = vpop.f32.mrf.mxu1 }
 0xe72   : > { %v4471_v47 = vadd.f32 %v7769_v33, %v4448_v20  ;;  %v4453_v14 = vadd.f32 %v5915_v34, %v7674_v50  ;;  %v7845_v40 = vadd.f32 %v6315_v22, %v4473_v29  ;;  %v4518_v61 = vsel %vm406_vm0, %v7840_v48, 0.0 }
 0xe73   : > { %v4424_v4 = vpop.f32.mrf.mxu1 }
 0xe74   : > { %v4451_v26 = vadd.f32 %v4424_v4, %v7678_v12  ;;  %v4527_v19 = vsel %vm406_vm0, %v7845_v40, 0.0  ;;  %v7853_v60 = vadd.f32 %v6316_v30, %v4471_v47  ;;  %v4476_v58 = vadd.f32 %v7769_v33, %v4453_v14 }
 0xe75   : > { %4519 = vadd.xlane.f32.xlu0 %v4518_v61  ;;  %4528 = vadd.xlane.f32.xlu1 %v4527_v19  ;;  %v5916_v50 = vpop.f32.mrf.mxu1 }
 0xe76   : > { %v4474_v3 = vadd.f32 %v7769_v33, %v4451_v26  ;;  %v4454_v12 = vadd.f32 %v5916_v50, %v7682_v27  ;;  %v4521_v46 = vsel %vm406_vm0, %v7853_v60, 0.0  ;;  %v7869_v27 = vadd.f32 %v6318_v57, %v4476_v58 }
 0xe77   : > { %v4427_v11 = vpop.f32.mrf.mxu1 }
 0xe78   : > { %v4452_v17 = vadd.f32 %v4427_v11, %v7684_v10  ;;  %v7862_v62 = vadd.f32 %v6317_v25, %v4474_v3  ;;  %v4477_v56 = vadd.f32 %v7769_v33, %v4454_v12  ;;  %v4536_v0 = vsel %vm406_vm0, %v7869_v27, 0.0 }
 0xe79   : > { %4522 = vadd.xlane.f32.xlu1 %v4521_v46 }
 0xe7a   : > { %v4475_v31 = vadd.f32 %v7769_v33, %v4452_v17  ;;  %v4530_v44 = vsel %vm406_vm0, %v7862_v62, 0.0  ;;  %v7879_v51 = vadd.f32 %v6320_v6, %v4477_v56 }
 0xe7b   : > { %4531 = vadd.xlane.f32.xlu0 %v4530_v44 }
 0xe7c   : > { %v7872_v10 = vadd.f32 %v6319_v43, %v4475_v31  ;;  %v4539_v33 = vsel %vm406_vm0, %v7879_v51, 0.0 }
 0xe7e   : > { %v4533_v41 = vsel %vm406_vm0, %v7872_v10, 0.0 }
 0xe7f   : > { %4537 = vadd.xlane.f32.xlu0 %v4536_v0  ;;  %4534 = vadd.xlane.f32.xlu1 %v4533_v41 }
 0xe83   : > { %4540 = vadd.xlane.f32.xlu1 %v4539_v33 }
 0xeea   : > { %v4502_v5 = vpop.xlane.xlu0 %4501 }
 0xeeb   : > { %v4544_v54 = vmul.f32 0.03125, %v4502_v5 }
 0xeed   : > { %v7884_v42 = vsub.f32 %v7777_v55, %v4544_v54 }
 0xeee   : > { %v4496_v15 = vpop.xlane.xlu0 %4495  ;;  %v4505_v38 = vpop.xlane.xlu1 %4504 }
 0xeef   : > { %v4542_v36 = vmul.f32 0.03125, %v4496_v15  ;;  %v4545_v53 = vmul.f32 0.03125, %v4505_v38  ;;  %v4576_v21 = vmul.f32 %v7884_v42, %v7884_v42 }
 0xef1   : > { %v7889_v37 = vsub.f32 %v7784_v35, %v4542_v36  ;;  %v7892_v8 = vsub.f32 %v7789_v39, %v4545_v53  ;;  %v4596_v52 = vsel %vm406_vm0, %v4576_v21, 0.0 }
 0xef2   : > { %v4514_v7 = vpop.xlane.xlu0 %4513  ;;  %4597 = vadd.xlane.f32.xlu0 %v4596_v52  ;;  %v4499_v59 = vpop.xlane.xlu1 %4498 }
 0xef3   : > { %v4548_v55 = vmul.f32 0.03125, %v4514_v7  ;;  %v4543_v1 = vmul.f32 0.03125, %v4499_v59  ;;  %v4574_v2 = vmul.f32 %v7889_v37, %v7889_v37  ;;  %v4577_v16 = vmul.f32 %v7892_v8, %v7892_v8 }
 0xef5   : > { %v7900_v13 = vsub.f32 %v7803_v32, %v4548_v55  ;;  %v7903_v35 = vsub.f32 %v7798_v45, %v4543_v1  ;;  %v4590_v39 = vsel %vm406_vm0, %v4574_v2, 0.0  ;;  %v4599_v28 = vsel %vm406_vm0, %v4577_v16, 0.0 }
 0xef6   : > { %v4508_v29 = vpop.xlane.xlu0 %4507  ;;  %4591 = vadd.xlane.f32.xlu0 %v4590_v39  ;;  %v4517_v20 = vpop.xlane.xlu1 %4516  ;;  %4600 = vadd.xlane.f32.xlu1 %v4599_v28 }
 0xef7   : > { %v4546_v23 = vmul.f32 0.03125, %v4508_v29  ;;  %v4549_v18 = vmul.f32 0.03125, %v4517_v20  ;;  %v4580_v34 = vmul.f32 %v7900_v13, %v7900_v13  ;;  %v4575_v32 = vmul.f32 %v7903_v35, %v7903_v35 }
 0xef9   : > { %v7912_v47 = vsub.f32 %v7812_v9, %v4546_v23  ;;  %v7915_v45 = vsub.f32 %v7817_v24, %v4549_v18  ;;  %v4608_v14 = vsel %vm406_vm0, %v4580_v34, 0.0  ;;  %v4593_v22 = vsel %vm406_vm0, %v4575_v32, 0.0 }
 0xefa   : > { %v4526_v4 = vpop.xlane.xlu0 %4525  ;;  %4609 = vadd.xlane.f32.xlu0 %v4608_v14  ;;  %v4511_v26 = vpop.xlane.xlu1 %4510  ;;  %4594 = vadd.xlane.f32.xlu1 %v4593_v22 }
 0xefb   : > { %v4552_v61 = vmul.f32 0.03125, %v4526_v4  ;;  %v4547_v19 = vmul.f32 0.03125, %v4511_v26  ;;  %v4578_v30 = vmul.f32 %v7912_v47, %v7912_v47  ;;  %v4581_v9 = vmul.f32 %v7915_v45, %v7915_v45 }
 0xefd   : > { %v7924_v50 = vsub.f32 %v7831_v49, %v4552_v61  ;;  %v7927_v24 = vsub.f32 %v7826_v63, %v4547_v19  ;;  %v4602_v58 = vsel %vm406_vm0, %v4578_v30, 0.0  ;;  %v4611_v3 = vsel %vm406_vm0, %v4581_v9, 0.0 }
 0xefe   : > { %v4520_v12 = vpop.xlane.xlu0 %4519  ;;  %4603 = vadd.xlane.f32.xlu0 %v4602_v58  ;;  %v4529_v11 = vpop.xlane.xlu1 %4528  ;;  %4612 = vadd.xlane.f32.xlu1 %v4611_v3 }
 0xeff   : > { %v4550_v17 = vmul.f32 0.03125, %v4520_v12  ;;  %v4553_v46 = vmul.f32 0.03125, %v4529_v11  ;;  %v4584_v25 = vmul.f32 %v7924_v50, %v7924_v50  ;;  %v4579_v49 = vmul.f32 %v7927_v24, %v7927_v24 }
 0xf01   : > { %v7936_v56 = vsub.f32 %v7840_v48, %v4550_v17  ;;  %v7939_v63 = vsub.f32 %v7845_v40, %v4553_v46  ;;  %v4620_v31 = vsel %vm406_vm0, %v4584_v25, 0.0  ;;  %v4605_v44 = vsel %vm406_vm0, %v4579_v49, 0.0 }
 0xf02   : > { %4621 = vadd.xlane.f32.xlu0 %v4620_v31  ;;  %v4523_v57 = vpop.xlane.xlu1 %4522  ;;  %4606 = vadd.xlane.f32.xlu1 %v4605_v44 }
 0xf03   : > { %v4551_v43 = vmul.f32 0.03125, %v4523_v57  ;;  %v4582_v0 = vmul.f32 %v7936_v56, %v7936_v56  ;;  %v4585_v41 = vmul.f32 %v7939_v63, %v7939_v63 }
 0xf04   : > { %v4532_v6 = vpop.xlane.xlu0 %4531 }
 0xf05   : > { %v7948_v48 = vsub.f32 %v7853_v60, %v4551_v43  ;;  %v4554_v40 = vmul.f32 0.03125, %v4532_v6  ;;  %v4614_v33 = vsel %vm406_vm0, %v4582_v0, 0.0  ;;  %v4623_v5 = vsel %vm406_vm0, %v4585_v41, 0.0 }
 0xf06   : > { %4615 = vadd.xlane.f32.xlu0 %v4614_v33  ;;  %4624 = vadd.xlane.f32.xlu1 %v4623_v5  ;;  %v7983_v5 = vld [vmem:[%s8080_s1] ss:$0 sm:$0xff] }
 0xf07   : > { %v7953_v54 = vsub.f32 %v7862_v62, %v4554_v40  ;;  %v4583_v15 = vmul.f32 %v7948_v48, %v7948_v48 }
 0xf08   : > { %v4538_v38 = vpop.xlane.xlu0 %4537  ;;  %v4535_v36 = vpop.xlane.xlu1 %4534 }
 0xf09   : > { %v4556_v53 = vmul.f32 0.03125, %v4538_v38  ;;  %v4555_v21 = vmul.f32 0.03125, %v4535_v36  ;;  %v4617_v60 = vsel %vm406_vm0, %v4583_v15, 0.0  ;;  %v4586_v52 = vmul.f32 %v7953_v54, %v7953_v54 }
 0xf0a   : > { %4618 = vadd.xlane.f32.xlu1 %v4617_v60 }
 0xf0b   : > { %v7961_v7 = vsub.f32 %v7869_v27, %v4556_v53  ;;  %v7964_v59 = vsub.f32 %v7872_v10, %v4555_v21  ;;  %v4626_v62 = vsel %vm406_vm0, %v4586_v52, 0.0  ;;  %v7996_v21 = vld [vmem:[%s8081_s2] ss:$0 sm:$0xff] }
 0xf0c   : > { %4627 = vadd.xlane.f32.xlu0 %v4626_v62  ;;  %v4541_v55 = vpop.xlane.xlu1 %4540 }
 0xf0d   : > { %v4557_v1 = vmul.f32 0.03125, %v4541_v55  ;;  %v4588_v2 = vmul.f32 %v7961_v7, %v7961_v7  ;;  %v4587_v16 = vmul.f32 %v7964_v59, %v7964_v59 }
 0xf0f   : > { %v7972_v39 = vsub.f32 %v7879_v51, %v4557_v1  ;;  %v4632_v27 = vsel %vm406_vm0, %v4588_v2, 0.0  ;;  %v4629_v28 = vsel %vm406_vm0, %v4587_v16, 0.0 }
 0xf10   : > { %4633 = vadd.xlane.f32.xlu0 %v4632_v27  ;;  %4630 = vadd.xlane.f32.xlu1 %v4629_v28 }
 0xf11   : > { %v4589_v10 = vmul.f32 %v7972_v39, %v7972_v39 }
 0xf13   : > { %v4635_v29 = vsel %vm406_vm0, %v4589_v10, 0.0 }
 0xf14   : > { %4636 = vadd.xlane.f32.xlu1 %v4635_v29 }
 0xf7b   : > { %v4598_v20 = vpop.xlane.xlu0 %4597 }
 0xf7c   : > { %v4640_v23 = vmul.f32 0.03125, %v4598_v20 }
 0xf7e   : > { %v4656_v18 = vadd.f32 1e-05, %v4640_v23 }
 0xf7f   : > { %v4592_v34 = vpop.xlane.xlu0 %4591  ;;  %v4601_v32 = vpop.xlane.xlu1 %4600 }
 0xf80   : > { %6273 = vrsqrt.f32 %v4656_v18  ;;  %v4638_v51 = vmul.f32 0.03125, %v4592_v34  ;;  %v4641_v14 = vmul.f32 0.03125, %v4601_v32 }
 0xf82   : > { %v4654_v22 = vadd.f32 1e-05, %v4638_v51  ;;  %v4657_v4 = vadd.f32 1e-05, %v4641_v14 }
 0xf83   : > { %v4610_v26 = vpop.xlane.xlu0 %4609  ;;  %v4595_v61 = vpop.xlane.xlu1 %4594 }
 0xf84   : > { %6275 = vrsqrt.f32 %v4654_v22  ;;  %v4644_v19 = vmul.f32 0.03125, %v4610_v26  ;;  %v4639_v30 = vmul.f32 0.03125, %v4595_v61 }
 0xf85   : > { %6277 = vrsqrt.f32 %v4657_v4 }
 0xf86   : > { %v4660_v9 = vadd.f32 1e-05, %v4644_v19  ;;  %v4655_v58 = vadd.f32 1e-05, %v4639_v30 }
 0xf87   : > { %v4604_v3 = vpop.xlane.xlu0 %4603  ;;  %v4613_v12 = vpop.xlane.xlu1 %4612 }
 0xf88   : > { %6279 = vrsqrt.f32 %v4660_v9  ;;  %v4642_v11 = vmul.f32 0.03125, %v4604_v3  ;;  %v4645_v17 = vmul.f32 0.03125, %v4613_v12 }
 0xf89   : > { %6281 = vrsqrt.f32 %v4655_v58 }
 0xf8a   : > { %v4658_v46 = vadd.f32 1e-05, %v4642_v11  ;;  %v4661_v25 = vadd.f32 1e-05, %v4645_v17 }
 0xf8b   : > { %v4622_v49 = vpop.xlane.xlu0 %4621  ;;  %v4607_v31 = vpop.xlane.xlu1 %4606 }
 0xf8c   : > { %6283 = vrsqrt.f32 %v4658_v46  ;;  %v4648_v44 = vmul.f32 0.03125, %v4622_v49  ;;  %v4643_v57 = vmul.f32 0.03125, %v4607_v31 }
 0xf8d   : > { %v6274_v43 = vpop.eup %6273  ;;  %6285 = vrsqrt.f32 %v4661_v25 }
 0xf8e   : > { %v4688_v0 = vmul.f32 %v6274_v43, %v7884_v42  ;;  %v4664_v41 = vadd.f32 1e-05, %v4648_v44  ;;  %v4659_v6 = vadd.f32 1e-05, %v4643_v57 }
 0xf8f   : > { %v4616_v40 = vpop.xlane.xlu0 %4615  ;;  %v4625_v33 = vpop.xlane.xlu1 %4624 }
 0xf90   : > { %v4704_v15 = vmul.f32 %v7983_v5, %v4688_v0  ;;  %6287 = vrsqrt.f32 %v4664_v41  ;;  %v4646_v38 = vmul.f32 0.03125, %v4616_v40  ;;  %v4649_v36 = vmul.f32 0.03125, %v4625_v33 }
 0xf91   : > { %v6276_v53 = vpop.eup %6275  ;;  %6289 = vrsqrt.f32 %v4659_v6 }
 0xf92   : > { %v6278_v42 = vpop.eup %6277  ;;  %v4720_v60 = vadd.f32 %v7996_v21, %v4704_v15  ;;  %v4686_v52 = vmul.f32 %v6276_v53, %v7889_v37  ;;  %v4662_v62 = vadd.f32 1e-05, %v4646_v38  ;;  %v4665_v55 = vadd.f32 1e-05, %v4649_v36 }
 0xf93   : > { %v4689_v1 = vmul.f32 %v6278_v42, %v7892_v8  ;;  %v4619_v2 = vpop.xlane.xlu1 %4618 }
 0xf94   : > { %4736 = vst.msk [vmem:[%s7991_s21 + $0x10] sm:$0xff] %vm406_vm0, %v4720_v60  ;;  %v4702_v16 = vmul.f32 %v7983_v5, %v4686_v52  ;;  %6291 = vrsqrt.f32 %v4662_v62  ;;  %v4647_v27 = vmul.f32 0.03125, %v4619_v2 }
 0xf95   : > { %v6280_v28 = vpop.eup %6279  ;;  %v4705_v10 = vmul.f32 %v7983_v5, %v4689_v1  ;;  %6293 = vrsqrt.f32 %v4665_v55  ;;  %v4628_v29 = vpop.xlane.xlu0 %4627 }
 0xf96   : > { %v6282_v20 = vpop.eup %6281  ;;  %v4718_v37 = vadd.f32 %v7996_v21, %v4702_v16  ;;  %v4692_v23 = vmul.f32 %v6280_v28, %v7900_v13  ;;  %v4663_v8 = vadd.f32 1e-05, %v4647_v27  ;;  %v4650_v18 = vmul.f32 0.03125, %v4628_v29 }
 0xf97   : > { %v4721_v34 = vadd.f32 %v7996_v21, %v4705_v10  ;;  %v4687_v32 = vmul.f32 %v6282_v20, %v7903_v35 }
 0xf98   : > { %4734 = vst.msk [vmem:[%s7991_s21] sm:$0xff] %vm406_vm0, %v4718_v37  ;;  %v4708_v51 = vmul.f32 %v7983_v5, %v4692_v23  ;;  %6295 = vrsqrt.f32 %v4663_v8  ;;  %v4666_v14 = vadd.f32 1e-05, %v4650_v18 }
 0xf99   : > { %v6284_v22 = vpop.eup %6283  ;;  %4737 = vst.msk [vmem:[%s7991_s21 + $0x18] sm:$0xff] %vm406_vm0, %v4721_v34  ;;  %v4703_v4 = vmul.f32 %v7983_v5, %v4687_v32  ;;  %v4634_v13 = vpop.xlane.xlu0 %4633 }
 0xf9a   : > { %v4631_v26 = vpop.xlane.xlu1 %4630  ;;  %v6286_v61 = vpop.eup %6285  ;;  %v4724_v19 = vadd.f32 %v7996_v21, %v4708_v51  ;;  %v4690_v35 = vmul.f32 %v6284_v22, %v7912_v47  ;;  %6297 = vrsqrt.f32 %v4666_v14  ;;  %v4652_v30 = vmul.f32 0.03125, %v4634_v13 }
 0xf9b   : > { %v4719_v9 = vadd.f32 %v7996_v21, %v4703_v4  ;;  %v4693_v58 = vmul.f32 %v6286_v61, %v7915_v45  ;;  %v4651_v3 = vmul.f32 0.03125, %v4631_v26 }
 0xf9c   : > { %4740 = vst.msk [vmem:[%s7991_s21 + $0x30] sm:$0xff] %vm406_vm0, %v4724_v19  ;;  %v4706_v12 = vmul.f32 %v7983_v5, %v4690_v35  ;;  %v4668_v11 = vadd.f32 1e-05, %v4652_v30 }
 0xf9d   : > { %v6288_v17 = vpop.eup %6287  ;;  %4735 = vst.msk [vmem:[%s7991_s21 + $0x8] sm:$0xff] %vm406_vm0, %v4719_v9  ;;  %v4709_v46 = vmul.f32 %v7983_v5, %v4693_v58  ;;  %v4667_v47 = vadd.f32 1e-05, %v4651_v3 }
 0xf9e   : > { %v4637_v25 = vpop.xlane.xlu1 %4636  ;;  %v6290_v49 = vpop.eup %6289  ;;  %v4722_v31 = vadd.f32 %v7996_v21, %v4706_v12  ;;  %v4696_v45 = vmul.f32 %v6288_v17, %v7924_v50  ;;  %6299 = vrsqrt.f32 %v4668_v11 }
 0xf9f   : > { %v4653_v44 = vmul.f32 0.03125, %v4637_v25  ;;  %v4725_v57 = vadd.f32 %v7996_v21, %v4709_v46  ;;  %v4691_v43 = vmul.f32 %v6290_v49, %v7927_v24  ;;  %6301 = vrsqrt.f32 %v4667_v47 }
 0xfa0   : > { %4738 = vst.msk [vmem:[%s7991_s21 + $0x20] sm:$0xff] %vm406_vm0, %v4722_v31  ;;  %v4712_v0 = vmul.f32 %v7983_v5, %v4696_v45 }
 0xfa1   : > { %v4669_v41 = vadd.f32 1e-05, %v4653_v44  ;;  %v6292_v6 = vpop.eup %6291  ;;  %4741 = vst.msk [vmem:[%s7991_s21 + $0x38] sm:$0xff] %vm406_vm0, %v4725_v57  ;;  %v4707_v40 = vmul.f32 %v7983_v5, %v4691_v43 }
 0xfa2   : > { %v6294_v50 = vpop.eup %6293  ;;  %v4728_v33 = vadd.f32 %v7996_v21, %v4712_v0  ;;  %v4694_v15 = vmul.f32 %v6292_v6, %v7936_v56 }
 0xfa3   : > { %6303 = vrsqrt.f32 %v4669_v41  ;;  %v4723_v24 = vadd.f32 %v7996_v21, %v4707_v40  ;;  %v4697_v38 = vmul.f32 %v6294_v50, %v7939_v63 }
 0xfa4   : > { %4744 = vst.msk [vmem:[%s7991_s21 + $0x50] sm:$0xff] %vm406_vm0, %v4728_v33  ;;  %v4710_v36 = vmul.f32 %v7983_v5, %v4694_v15 }
 0xfa5   : > { %v6296_v53 = vpop.eup %6295  ;;  %4739 = vst.msk [vmem:[%s7991_s21 + $0x28] sm:$0xff] %vm406_vm0, %v4723_v24  ;;  %v4713_v42 = vmul.f32 %v7983_v5, %v4697_v38 }
 0xfa6   : > { %v4726_v60 = vadd.f32 %v7996_v21, %v4710_v36  ;;  %v4695_v56 = vmul.f32 %v6296_v53, %v7948_v48 }
 0xfa7   : > { %v6298_v52 = vpop.eup %6297  ;;  %v4729_v62 = vadd.f32 %v7996_v21, %v4713_v42 }
 0xfa8   : > { %4742 = vst.msk [vmem:[%s7991_s21 + $0x40] sm:$0xff] %vm406_vm0, %v4726_v60  ;;  %v4711_v63 = vmul.f32 %v7983_v5, %v4695_v56  ;;  %v4698_v55 = vmul.f32 %v6298_v52, %v7953_v54 }
 0xfa9   : > { %4745 = vst.msk [vmem:[%s7991_s21 + $0x58] sm:$0xff] %vm406_vm0, %v4729_v62 }
 0xfaa   : > { %v4727_v1 = vadd.f32 %v7996_v21, %v4711_v63  ;;  %v4714_v2 = vmul.f32 %v7983_v5, %v4698_v55 }
 0xfab   : > { %v6300_v16 = vpop.eup %6299 }
 0xfac   : > { %v6302_v27 = vpop.eup %6301  ;;  %4743 = vst.msk [vmem:[%s7991_s21 + $0x48] sm:$0xff] %vm406_vm0, %v4727_v1  ;;  %v4730_v48 = vadd.f32 %v7996_v21, %v4714_v2  ;;  %v4700_v28 = vmul.f32 %v6300_v16, %v7961_v7 }
 0xfad   : > { %v4699_v10 = vmul.f32 %v6302_v27, %v7964_v59 }
 0xfae   : > { %4746 = vst.msk [vmem:[%s7991_s21 + $0x60] sm:$0xff] %vm406_vm0, %v4730_v48  ;;  %v4716_v54 = vmul.f32 %v7983_v5, %v4700_v28 }
 0xfaf   : > { %v4715_v20 = vmul.f32 %v7983_v5, %v4699_v10 }
 0xfb0   : > { %v6304_v29 = vpop.eup %6303  ;;  %v4732_v37 = vadd.f32 %v7996_v21, %v4716_v54 }
 0xfb1   : > { %v4701_v23 = vmul.f32 %v6304_v29, %v7972_v39  ;;  %v4731_v8 = vadd.f32 %v7996_v21, %v4715_v20 }
 0xfb2   : > { %4748 = vst.msk [vmem:[%s7991_s21 + $0x70] sm:$0xff] %vm406_vm0, %v4732_v37 }
 0xfb3   : > { %v4717_v18 = vmul.f32 %v7983_v5, %v4701_v23  ;;  %4747 = vst.msk [vmem:[%s7991_s21 + $0x68] sm:$0xff] %vm406_vm0, %v4731_v8 }
 0xfb5   : > { %v4733_v7 = vadd.f32 %v7996_v21, %v4717_v18 }
 0xfb7   : > { %4749 = vst.msk [vmem:[%s7991_s21 + $0x78] sm:$0xff] %vm406_vm0, %v4733_v7 }
 0xfb8 PF: > { %s21_s17 = sadd.s32 1, %s6329_s17  }
 0xfb9   : > { %p18_p4 = scmp.ge.s32.totalorder %s21_s17, 4  }
 0xfbb   :  { %20 = sbr.rel (!%p18_p4) target bundleno = 1 (0x1), region = 115 }

</bundles_post_ra>
